<compile_context>
chip_gen: v5e
topology: v5e:2x2
jax: 0.10.0
libtpu: 0.0.40
codegen_flags: <defaults>
</compile_context>

<pallas_src>
import jax
import jax.numpy as jnp
from jax import lax
from jax.experimental import pallas as pl
from jax.experimental.pallas import tpu as pltpu

EPS = 1e-5
NEG_SLOPE = 0.01
VMEM_LIMIT = 48 * 1024 * 1024   # deliberate scoped-VMEM budget; fits v7x's 64 MiB


# ----------------------------- Pallas kernels ------------------------------

def _conv_bn_lrelu_kernel(w_ref, p_ref, g_ref, beta_ref, o_ref):
    # w: (C_out, K) bf16, p: (K, M) bf16, g/beta: (C_out, 1) f32, o: (C_out, M) bf16
    y = jnp.dot(w_ref[...], p_ref[...], preferred_element_type=jnp.float32)
    # BatchNorm2d (training mode): per-channel stats over the batch*spatial lanes.
    mean = jnp.mean(y, axis=1, keepdims=True)
    cen = y - mean
    var = jnp.mean(cen * cen, axis=1, keepdims=True)          # biased variance
    scale = g_ref[...] * lax.rsqrt(var + EPS)                  # (C_out, 1)
    shift = beta_ref[...] - mean * scale                       # (C_out, 1)
    yb = y * scale + shift                                     # single FMA pass
    out = jnp.where(yb >= 0, yb, NEG_SLOPE * yb)               # LeakyReLU(0.01)
    o_ref[...] = out.astype(o_ref.dtype)                       # bf16 writeback


def _conv_bias_kernel(w_ref, p_ref, b_ref, o_ref):
    # Final conv: no BN / activation, bias kept, f32 output (feeds the head).
    o_ref[...] = (
        jnp.dot(w_ref[...], p_ref[...], preferred_element_type=jnp.float32)
        + b_ref[...])


def _vae_head_kernel(z_ref, w_ref, b_ref, eps_ref, z_out_ref, mu_ref, lv_ref):
    # z: (B, hidden) f32, w: (hidden, 2L) f32, b: (1, 2L) f32, eps: (B, L) f32.
    ml = jnp.dot(z_ref[...], w_ref[...],
                 preferred_element_type=jnp.float32) + b_ref[...]   # (B, 2L)
    L = mu_ref.shape[1]
    mu = ml[:, :L]
    lv = ml[:, L:]
    mu_ref[...] = mu
    lv_ref[...] = lv
    z_out_ref[...] = mu + eps_ref[...] * jnp.exp(0.5 * lv)     # reparameterize


# ---------------------------- pallas_call glue ------------------------------

def _full_specs(*shapes):
    return [pl.BlockSpec(s, lambda i, _n=len(s): (0,) * _n) for s in shapes]


def _compiler_params():
    return pltpu.CompilerParams(dimension_semantics=("arbitrary",),
                                vmem_limit_bytes=VMEM_LIMIT)


def conv_bn_lrelu_pallas(w2d, patchesT, gamma, beta):
    N, _ = w2d.shape
    M = patchesT.shape[1]
    return pl.pallas_call(
        _conv_bn_lrelu_kernel,
        out_shape=jax.ShapeDtypeStruct((N, M), jnp.bfloat16),
        grid=(1,),
        in_specs=_full_specs(w2d.shape, patchesT.shape, gamma.shape, beta.shape),
        out_specs=pl.BlockSpec((N, M), lambda i: (0, 0)),
        compiler_params=_compiler_params(),
    )(w2d, patchesT, gamma, beta)


def conv_bias_pallas(w2d, patchesT, bias_col):
    N, _ = w2d.shape
    M = patchesT.shape[1]
    return pl.pallas_call(
        _conv_bias_kernel,
        out_shape=jax.ShapeDtypeStruct((N, M), jnp.float32),
        grid=(1,),
        in_specs=_full_specs(w2d.shape, patchesT.shape, bias_col.shape),
        out_specs=pl.BlockSpec((N, M), lambda i: (0, 0)),
        compiler_params=_compiler_params(),
    )(w2d, patchesT, bias_col)


def vae_head_pallas(z_enc, w_ml, b_ml, eps):
    B, L = eps.shape
    return pl.pallas_call(
        _vae_head_kernel,
        out_shape=(jax.ShapeDtypeStruct((B, L), jnp.float32),) * 3,
        grid=(1,),
        in_specs=_full_specs(z_enc.shape, w_ml.shape, b_ml.shape, eps.shape),
        out_specs=tuple(pl.BlockSpec((B, L), lambda i: (0, 0)) for _ in range(3)),
        compiler_params=_compiler_params(),
    )(z_enc, w_ml, b_ml, eps)


def extract_patches_T(h, k=3, stride=2):
    """h: (C, B, H, W) -> patchesT (C*k*k, B*OH*OW); K ordered (c, kh, kw)."""
    C, B, H, W = h.shape
    OH = (H - k) // stride + 1
    OW = (W - k) // stride + 1
    taps = []
    for i in range(k):
        for j in range(k):
            taps.append(lax.slice(
                h, (0, 0, i, j),
                (C, B, i + stride * (OH - 1) + 1, j + stride * (OW - 1) + 1),
                (1, 1, stride, stride)))                       # (C, B, OH, OW)
    p = jnp.stack(taps, axis=1)                                # (C, 9, B, OH, OW)
    return p.reshape(C * k * k, B * OH * OW), OH, OW


# ------------------------------- parameters ---------------------------------

def init_params(key, in_channels, latent_dim):
    """Deterministic params matching the PyTorch module's shapes / default init."""
    channel_plan = [(in_channels, 32), (32, 32), (32, 64), (64, 64)]
    convs = []
    for cin, cout in channel_plan:
        key, kw, kb = jax.random.split(key, 3)
        fan_in, fan_out = cin * 9, cout * 9
        bw = (6.0 / (fan_in + fan_out)) ** 0.5                 # xavier_uniform_
        w4 = jax.random.uniform(kw, (cout, cin, 3, 3), jnp.float32, -bw, bw)
        bb = 1.0 / (fan_in ** 0.5)                             # conv bias default
        b = jax.random.uniform(kb, (cout,), jnp.float32, -bb, bb)
        convs.append(dict(
            w4=w4,                                             # reference path only
            w2=w4.reshape(cout, cin * 9).astype(jnp.bfloat16),  # kernel matmul lhs
            b=b,
            b_col=b.reshape(cout, 1),
            gamma=jnp.ones((cout, 1), jnp.float32),            # BatchNorm2d defaults
            beta=jnp.zeros((cout, 1), jnp.float32)))
    hidden = 64 * 4 * 4                                        # CNNEncoder @ 84x84
    heads = {}
    for name in ("mu", "logvar"):
        key, kw, kb = jax.random.split(key, 3)
        bd = 1.0 / (hidden ** 0.5)                             # nn.Linear default
        heads[name] = dict(
            w=jax.random.uniform(kw, (hidden, latent_dim), jnp.float32, -bd, bd),
            b=jax.random.uniform(kb, (1, latent_dim), jnp.float32, -bd, bd))
    # Concatenated head weights -> one lane-dense (hidden, 2L) MXU op in-kernel.
    heads["w_ml"] = jnp.concatenate([heads["mu"]["w"], heads["logvar"]["w"]], axis=1)
    heads["b_ml"] = jnp.concatenate([heads["mu"]["b"], heads["logvar"]["b"]], axis=1)
    return dict(convs=convs, head=heads)


# -------------------------------- forward -----------------------------------

@jax.jit
def vae_forward(obs, eps, params):
    """VAEBackbone.forward(obs, training=True) -> (z, mu, logvar)."""
    B = obs.shape[0]
    # bf16 activation path from the start (same values as casting the patches).
    h = jnp.transpose(obs, (1, 0, 2, 3)).astype(jnp.bfloat16)  # (C, B, H, W)
    convs = params["convs"]
    for li, lp in enumerate(convs):
        patchesT, OH, OW = extract_patches_T(h)                # bf16 (K, M)
        if li < len(convs) - 1:
            y = conv_bn_lrelu_pallas(lp["w2"], patchesT, lp["gamma"], lp["beta"])
        else:
            y = conv_bias_pallas(lp["w2"], patchesT, lp["b_col"])   # f32
        h = y.reshape(lp["w2"].shape[0], B, OH, OW)            # (C_out, B, OH, OW)
    z_enc = (jnp.transpose(h, (1, 0, 2, 3))                    # x.view(B, -1)
             .reshape(B, -1).astype(jnp.float32))
    hd = params["head"]
    z, mu, logvar = vae_head_pallas(z_enc, hd["w_ml"], hd["b_ml"], eps)
    # TODO(synk): decoder is an injected nn.Module with no definition in the spec;
    # recon_obs = decoder(z) is not computed here.
    return z, mu, logvar


# --------------------------- pure-JAX reference ------------------------------

def ref_forward(obs, eps, params):
    h = obs.astype(jnp.float32)
    convs = params["convs"]
    for li, lp in enumerate(convs):
        h = lax.conv_general_dilated(
            h, lp["w4"], window_strides=(2, 2), padding="VALID",
            dimension_numbers=("NCHW", "OIHW", "NCHW"))
        h = h + lp["b"].reshape(1, -1, 1, 1)
        if li < len(convs) - 1:
            mean = jnp.mean(h, axis=(0, 2, 3), keepdims=True)
            var = jnp.mean((h - mean) ** 2, axis=(0, 2, 3), keepdims=True)
            h = (h - mean) * lax.rsqrt(var + EPS)
            h = h * lp["gamma"].reshape(1, -1, 1, 1) + lp["beta"].reshape(1, -1, 1, 1)
            h = jnp.where(h >= 0, h, NEG_SLOPE * h)
    z_enc = h.reshape(h.shape[0], -1)
    hd = params["head"]
    mu = z_enc @ hd["mu"]["w"] + hd["mu"]["b"]
    logvar = z_enc @ hd["logvar"]["w"] + hd["logvar"]["b"]
    z = mu + eps * jnp.exp(0.5 * logvar)
    return z, mu, logvar


# ---------------------------------- main -------------------------------------

if __name__ == "__main__":
    key = jax.random.PRNGKey(0)
    k_params, k_x, k_eps = jax.random.split(key, 3)

    B, C_IN, H, W = 2, 4, 84, 84       # CNNEncoder expects 84x84 -> hidden = 64*4*4
    LATENT = 64
    params = init_params(k_params, C_IN, LATENT)
    obs = jax.random.normal(k_x, (B, C_IN, H, W), jnp.float32)
    eps = jax.random.normal(k_eps, (B, LATENT), jnp.float32)

    z, mu, logvar = jax.block_until_ready(vae_forward(obs, eps, params))
    assert z.shape == (B, LATENT), z.shape
    assert mu.shape == (B, LATENT) and logvar.shape == (B, LATENT)

    z_r, mu_r, lv_r = jax.block_until_ready(ref_forward(obs, eps, params))
    for got, want, name in ((z, z_r, "z"), (mu, mu_r, "mu"), (logvar, lv_r, "logvar")):
        err = float(jnp.max(jnp.abs(got - want)))
        assert jnp.allclose(got, want, rtol=3e-2, atol=3e-2), (name, err)

    print("KERNEL_OK")
</pallas_src>

<mosaic_0001>
module attributes {stable_mosaic.version = 11 : i64} {
  func.func @_conv_bn_lrelu_kernel(%arg0: i32, %arg1: memref<32x36xbf16, #tpu.memory_space<vmem>>, %arg2: memref<36x3362xbf16, #tpu.memory_space<vmem>>, %arg3: memref<32x1xf32, #tpu.memory_space<vmem>>, %arg4: memref<32x1xf32, #tpu.memory_space<vmem>>, %arg5: memref<32x3362xbf16, #tpu.memory_space<vmem>>) attributes {dimension_semantics = [#tpu.dimension_semantics<arbitrary>], iteration_bounds = array<i64: 1>, scalar_prefetch = 0 : i64, scratch_operands = 0 : i64, tpu.core_type = #tpu.core_type<tc>, window_params = [{pipeline_mode = #tpu.pipeline_mode<synchronous>, transform_indices = @transform_0, window_bounds = array<i64: 32, 36>}, {pipeline_mode = #tpu.pipeline_mode<synchronous>, transform_indices = @transform_1, window_bounds = array<i64: 36, 3362>}, {pipeline_mode = #tpu.pipeline_mode<synchronous>, transform_indices = @transform_2, window_bounds = array<i64: 32, 1>}, {pipeline_mode = #tpu.pipeline_mode<synchronous>, transform_indices = @transform_3, window_bounds = array<i64: 32, 1>}, {pipeline_mode = #tpu.pipeline_mode<synchronous>, transform_indices = @transform_4, window_bounds = array<i64: 32, 3362>}]} {
    %c0 = arith.constant 0 : index
    %c0_0 = arith.constant 0 : index
    %0 = vector.load %arg1[%c0, %c0_0] : memref<32x36xbf16, #tpu.memory_space<vmem>>, vector<32x36xbf16>
    %c0_1 = arith.constant 0 : index
    %c0_2 = arith.constant 0 : index
    %1 = vector.load %arg2[%c0_1, %c0_2] : memref<36x3362xbf16, #tpu.memory_space<vmem>>, vector<36x3362xbf16>
    %cst = arith.constant dense<0.000000e+00> : vector<32x3362xf32>
    %2 = tpu.matmul %0, %1, %cst {dimension_numbers = #tpu.dot_dimension_numbers<[1], [0], [0], [1], [0, 0, 1, 1], [], []>} : vector<32x36xbf16>, vector<36x3362xbf16>, vector<32x3362xf32> -> vector<32x3362xf32>
    %cst_3 = arith.constant dense<0.000000e+00> : vector<32xf32>
    %3 = vector.multi_reduction <add>, %2, %cst_3 [1] : vector<32x3362xf32> to vector<32xf32>
    %4 = vector.shape_cast %3 : vector<32xf32> to vector<32x1xf32>
    %cst_4 = arith.constant 3.362000e+03 : f32
    %5 = vector.broadcast %cst_4 : f32 to vector<32x1xf32>
    %6 = arith.divf %4, %5 : vector<32x1xf32>
    %7 = vector.broadcast %6 : vector<32x1xf32> to vector<32x3362xf32>
    %8 = arith.subf %2, %7 : vector<32x3362xf32>
    %9 = arith.mulf %8, %8 : vector<32x3362xf32>
    %cst_5 = arith.constant dense<0.000000e+00> : vector<32xf32>
    %10 = vector.multi_reduction <add>, %9, %cst_5 [1] : vector<32x3362xf32> to vector<32xf32>
    %11 = vector.shape_cast %10 : vector<32xf32> to vector<32x1xf32>
    %cst_6 = arith.constant 3.362000e+03 : f32
    %12 = vector.broadcast %cst_6 : f32 to vector<32x1xf32>
    %13 = arith.divf %11, %12 : vector<32x1xf32>
    %c0_7 = arith.constant 0 : index
    %c0_8 = arith.constant 0 : index
    %14 = vector.load %arg3[%c0_7, %c0_8] : memref<32x1xf32, #tpu.memory_space<vmem>>, vector<32x1xf32>
    %cst_9 = arith.constant 9.99999974E-6 : f32
    %15 = vector.broadcast %cst_9 : f32 to vector<32x1xf32>
    %16 = arith.addf %13, %15 : vector<32x1xf32>
    %17 = math.rsqrt %16 : vector<32x1xf32>
    %18 = arith.mulf %14, %17 : vector<32x1xf32>
    %c0_10 = arith.constant 0 : index
    %c0_11 = arith.constant 0 : index
    %19 = vector.load %arg4[%c0_10, %c0_11] : memref<32x1xf32, #tpu.memory_space<vmem>>, vector<32x1xf32>
    %20 = arith.mulf %6, %18 : vector<32x1xf32>
    %21 = arith.subf %19, %20 : vector<32x1xf32>
    %22 = vector.broadcast %18 : vector<32x1xf32> to vector<32x3362xf32>
    %23 = arith.mulf %2, %22 : vector<32x3362xf32>
    %24 = vector.broadcast %21 : vector<32x1xf32> to vector<32x3362xf32>
    %25 = arith.addf %23, %24 : vector<32x3362xf32>
    %cst_12 = arith.constant 0.000000e+00 : f32
    %26 = vector.broadcast %cst_12 : f32 to vector<32x3362xf32>
    %27 = arith.cmpf oge, %25, %26 : vector<32x3362xf32>
    %cst_13 = arith.constant 0.00999999977 : f32
    %28 = vector.broadcast %cst_13 : f32 to vector<32x3362xf32>
    %29 = arith.mulf %28, %25 : vector<32x3362xf32>
    %30 = arith.select %27, %25, %29 : vector<32x3362xi1>, vector<32x3362xf32>
    %31 = arith.truncf %30 : vector<32x3362xf32> to vector<32x3362xbf16>
    %c0_14 = arith.constant 0 : index
    %c0_15 = arith.constant 0 : index
    %32 = vector.load %arg5[%c0_14, %c0_15] : memref<32x3362xbf16, #tpu.memory_space<vmem>>, vector<32x3362xbf16>
    tpu.vector_store %arg5[%c0_14, %c0_15], %31 {strides = array<i32>} : memref<32x3362xbf16, #tpu.memory_space<vmem>>, vector<32x3362xbf16>,
    return
  }
  func.func @transform_0(%arg0: i32) -> (i32, i32) {
    %c0_i32 = arith.constant 0 : i32
    %c0_i32_0 = arith.constant 0 : i32
    %c0_i32_1 = arith.constant 0 : i32
    return %c0_i32, %c0_i32_0 : i32, i32
  }
  func.func @transform_1(%arg0: i32) -> (i32, i32) {
    %c0_i32 = arith.constant 0 : i32
    %c0_i32_0 = arith.constant 0 : i32
    %c0_i32_1 = arith.constant 0 : i32
    return %c0_i32, %c0_i32_0 : i32, i32
  }
  func.func @transform_2(%arg0: i32) -> (i32, i32) {
    %c0_i32 = arith.constant 0 : i32
    %c0_i32_0 = arith.constant 0 : i32
    %c0_i32_1 = arith.constant 0 : i32
    return %c0_i32, %c0_i32_0 : i32, i32
  }
  func.func @transform_3(%arg0: i32) -> (i32, i32) {
    %c0_i32 = arith.constant 0 : i32
    %c0_i32_0 = arith.constant 0 : i32
    %c0_i32_1 = arith.constant 0 : i32
    return %c0_i32, %c0_i32_0 : i32, i32
  }
  func.func @transform_4(%arg0: i32) -> (i32, i32) {
    %c0_i32 = arith.constant 0 : i32
    %c0_i32_0 = arith.constant 0 : i32
    %c0_i32_1 = arith.constant 0 : i32
    return %c0_i32, %c0_i32_0 : i32, i32
  }
}

module attributes {stable_mosaic.version = 11 : i64} {
  func.func @_conv_bn_lrelu_kernel(%arg0: i32, %arg1: memref<32x288xbf16, #tpu.memory_space<vmem>>, %arg2: memref<288x800xbf16, #tpu.memory_space<vmem>>, %arg3: memref<32x1xf32, #tpu.memory_space<vmem>>, %arg4: memref<32x1xf32, #tpu.memory_space<vmem>>, %arg5: memref<32x800xbf16, #tpu.memory_space<vmem>>) attributes {dimension_semantics = [#tpu.dimension_semantics<arbitrary>], iteration_bounds = array<i64: 1>, scalar_prefetch = 0 : i64, scratch_operands = 0 : i64, tpu.core_type = #tpu.core_type<tc>, window_params = [{pipeline_mode = #tpu.pipeline_mode<synchronous>, transform_indices = @transform_0, window_bounds = array<i64: 32, 288>}, {pipeline_mode = #tpu.pipeline_mode<synchronous>, transform_indices = @transform_1, window_bounds = array<i64: 288, 800>}, {pipeline_mode = #tpu.pipeline_mode<synchronous>, transform_indices = @transform_2, window_bounds = array<i64: 32, 1>}, {pipeline_mode = #tpu.pipeline_mode<synchronous>, transform_indices = @transform_3, window_bounds = array<i64: 32, 1>}, {pipeline_mode = #tpu.pipeline_mode<synchronous>, transform_indices = @transform_4, window_bounds = array<i64: 32, 800>}]} {
    %c0 = arith.constant 0 : index
    %c0_0 = arith.constant 0 : index
    %0 = vector.load %arg1[%c0, %c0_0] : memref<32x288xbf16, #tpu.memory_space<vmem>>, vector<32x288xbf16>
    %c0_1 = arith.constant 0 : index
    %c0_2 = arith.constant 0 : index
    %1 = vector.load %arg2[%c0_1, %c0_2] : memref<288x800xbf16, #tpu.memory_space<vmem>>, vector<288x800xbf16>
    %cst = arith.constant dense<0.000000e+00> : vector<32x800xf32>
    %2 = tpu.matmul %0, %1, %cst {dimension_numbers = #tpu.dot_dimension_numbers<[1], [0], [0], [1], [0, 0, 1, 1], [], []>} : vector<32x288xbf16>, vector<288x800xbf16>, vector<32x800xf32> -> vector<32x800xf32>
    %cst_3 = arith.constant dense<0.000000e+00> : vector<32xf32>
    %3 = vector.multi_reduction <add>, %2, %cst_3 [1] : vector<32x800xf32> to vector<32xf32>
    %4 = vector.shape_cast %3 : vector<32xf32> to vector<32x1xf32>
    %cst_4 = arith.constant 8.000000e+02 : f32
    %5 = vector.broadcast %cst_4 : f32 to vector<32x1xf32>
    %6 = arith.divf %4, %5 : vector<32x1xf32>
    %7 = vector.broadcast %6 : vector<32x1xf32> to vector<32x800xf32>
    %8 = arith.subf %2, %7 : vector<32x800xf32>
    %9 = arith.mulf %8, %8 : vector<32x800xf32>
    %cst_5 = arith.constant dense<0.000000e+00> : vector<32xf32>
    %10 = vector.multi_reduction <add>, %9, %cst_5 [1] : vector<32x800xf32> to vector<32xf32>
    %11 = vector.shape_cast %10 : vector<32xf32> to vector<32x1xf32>
    %cst_6 = arith.constant 8.000000e+02 : f32
    %12 = vector.broadcast %cst_6 : f32 to vector<32x1xf32>
    %13 = arith.divf %11, %12 : vector<32x1xf32>
    %c0_7 = arith.constant 0 : index
    %c0_8 = arith.constant 0 : index
    %14 = vector.load %arg3[%c0_7, %c0_8] : memref<32x1xf32, #tpu.memory_space<vmem>>, vector<32x1xf32>
    %cst_9 = arith.constant 9.99999974E-6 : f32
    %15 = vector.broadcast %cst_9 : f32 to vector<32x1xf32>
    %16 = arith.addf %13, %15 : vector<32x1xf32>
    %17 = math.rsqrt %16 : vector<32x1xf32>
    %18 = arith.mulf %14, %17 : vector<32x1xf32>
    %c0_10 = arith.constant 0 : index
    %c0_11 = arith.constant 0 : index
    %19 = vector.load %arg4[%c0_10, %c0_11] : memref<32x1xf32, #tpu.memory_space<vmem>>, vector<32x1xf32>
    %20 = arith.mulf %6, %18 : vector<32x1xf32>
    %21 = arith.subf %19, %20 : vector<32x1xf32>
    %22 = vector.broadcast %18 : vector<32x1xf32> to vector<32x800xf32>
    %23 = arith.mulf %2, %22 : vector<32x800xf32>
    %24 = vector.broadcast %21 : vector<32x1xf32> to vector<32x800xf32>
    %25 = arith.addf %23, %24 : vector<32x800xf32>
    %cst_12 = arith.constant 0.000000e+00 : f32
    %26 = vector.broadcast %cst_12 : f32 to vector<32x800xf32>
    %27 = arith.cmpf oge, %25, %26 : vector<32x800xf32>
    %cst_13 = arith.constant 0.00999999977 : f32
    %28 = vector.broadcast %cst_13 : f32 to vector<32x800xf32>
    %29 = arith.mulf %28, %25 : vector<32x800xf32>
    %30 = arith.select %27, %25, %29 : vector<32x800xi1>, vector<32x800xf32>
    %31 = arith.truncf %30 : vector<32x800xf32> to vector<32x800xbf16>
    %c0_14 = arith.constant 0 : index
    %c0_15 = arith.constant 0 : index
    %32 = vector.load %arg5[%c0_14, %c0_15] : memref<32x800xbf16, #tpu.memory_space<vmem>>, vector<32x800xbf16>
    tpu.vector_store %arg5[%c0_14, %c0_15], %31 {strides = array<i32>} : memref<32x800xbf16, #tpu.memory_space<vmem>>, vector<32x800xbf16>,
    return
  }
  func.func @transform_0(%arg0: i32) -> (i32, i32) {
    %c0_i32 = arith.constant 0 : i32
    %c0_i32_0 = arith.constant 0 : i32
    %c0_i32_1 = arith.constant 0 : i32
    return %c0_i32, %c0_i32_0 : i32, i32
  }
  func.func @transform_1(%arg0: i32) -> (i32, i32) {
    %c0_i32 = arith.constant 0 : i32
    %c0_i32_0 = arith.constant 0 : i32
    %c0_i32_1 = arith.constant 0 : i32
    return %c0_i32, %c0_i32_0 : i32, i32
  }
  func.func @transform_2(%arg0: i32) -> (i32, i32) {
    %c0_i32 = arith.constant 0 : i32
    %c0_i32_0 = arith.constant 0 : i32
    %c0_i32_1 = arith.constant 0 : i32
    return %c0_i32, %c0_i32_0 : i32, i32
  }
  func.func @transform_3(%arg0: i32) -> (i32, i32) {
    %c0_i32 = arith.constant 0 : i32
    %c0_i32_0 = arith.constant 0 : i32
    %c0_i32_1 = arith.constant 0 : i32
    return %c0_i32, %c0_i32_0 : i32, i32
  }
  func.func @transform_4(%arg0: i32) -> (i32, i32) {
    %c0_i32 = arith.constant 0 : i32
    %c0_i32_0 = arith.constant 0 : i32
    %c0_i32_1 = arith.constant 0 : i32
    return %c0_i32, %c0_i32_0 : i32, i32
  }
}

module attributes {stable_mosaic.version = 11 : i64} {
  func.func @_conv_bn_lrelu_kernel(%arg0: i32, %arg1: memref<64x288xbf16, #tpu.memory_space<vmem>>, %arg2: memref<288x162xbf16, #tpu.memory_space<vmem>>, %arg3: memref<64x1xf32, #tpu.memory_space<vmem>>, %arg4: memref<64x1xf32, #tpu.memory_space<vmem>>, %arg5: memref<64x162xbf16, #tpu.memory_space<vmem>>) attributes {dimension_semantics = [#tpu.dimension_semantics<arbitrary>], iteration_bounds = array<i64: 1>, scalar_prefetch = 0 : i64, scratch_operands = 0 : i64, tpu.core_type = #tpu.core_type<tc>, window_params = [{pipeline_mode = #tpu.pipeline_mode<synchronous>, transform_indices = @transform_0, window_bounds = array<i64: 64, 288>}, {pipeline_mode = #tpu.pipeline_mode<synchronous>, transform_indices = @transform_1, window_bounds = array<i64: 288, 162>}, {pipeline_mode = #tpu.pipeline_mode<synchronous>, transform_indices = @transform_2, window_bounds = array<i64: 64, 1>}, {pipeline_mode = #tpu.pipeline_mode<synchronous>, transform_indices = @transform_3, window_bounds = array<i64: 64, 1>}, {pipeline_mode = #tpu.pipeline_mode<synchronous>, transform_indices = @transform_4, window_bounds = array<i64: 64, 162>}]} {
    %c0 = arith.constant 0 : index
    %c0_0 = arith.constant 0 : index
    %0 = vector.load %arg1[%c0, %c0_0] : memref<64x288xbf16, #tpu.memory_space<vmem>>, vector<64x288xbf16>
    %c0_1 = arith.constant 0 : index
    %c0_2 = arith.constant 0 : index
    %1 = vector.load %arg2[%c0_1, %c0_2] : memref<288x162xbf16, #tpu.memory_space<vmem>>, vector<288x162xbf16>
    %cst = arith.constant dense<0.000000e+00> : vector<64x162xf32>
    %2 = tpu.matmul %0, %1, %cst {dimension_numbers = #tpu.dot_dimension_numbers<[1], [0], [0], [1], [0, 0, 1, 1], [], []>} : vector<64x288xbf16>, vector<288x162xbf16>, vector<64x162xf32> -> vector<64x162xf32>
    %cst_3 = arith.constant dense<0.000000e+00> : vector<64xf32>
    %3 = vector.multi_reduction <add>, %2, %cst_3 [1] : vector<64x162xf32> to vector<64xf32>
    %4 = vector.shape_cast %3 : vector<64xf32> to vector<64x1xf32>
    %cst_4 = arith.constant 1.620000e+02 : f32
    %5 = vector.broadcast %cst_4 : f32 to vector<64x1xf32>
    %6 = arith.divf %4, %5 : vector<64x1xf32>
    %7 = vector.broadcast %6 : vector<64x1xf32> to vector<64x162xf32>
    %8 = arith.subf %2, %7 : vector<64x162xf32>
    %9 = arith.mulf %8, %8 : vector<64x162xf32>
    %cst_5 = arith.constant dense<0.000000e+00> : vector<64xf32>
    %10 = vector.multi_reduction <add>, %9, %cst_5 [1] : vector<64x162xf32> to vector<64xf32>
    %11 = vector.shape_cast %10 : vector<64xf32> to vector<64x1xf32>
    %cst_6 = arith.constant 1.620000e+02 : f32
    %12 = vector.broadcast %cst_6 : f32 to vector<64x1xf32>
    %13 = arith.divf %11, %12 : vector<64x1xf32>
    %c0_7 = arith.constant 0 : index
    %c0_8 = arith.constant 0 : index
    %14 = vector.load %arg3[%c0_7, %c0_8] : memref<64x1xf32, #tpu.memory_space<vmem>>, vector<64x1xf32>
    %cst_9 = arith.constant 9.99999974E-6 : f32
    %15 = vector.broadcast %cst_9 : f32 to vector<64x1xf32>
    %16 = arith.addf %13, %15 : vector<64x1xf32>
    %17 = math.rsqrt %16 : vector<64x1xf32>
    %18 = arith.mulf %14, %17 : vector<64x1xf32>
    %c0_10 = arith.constant 0 : index
    %c0_11 = arith.constant 0 : index
    %19 = vector.load %arg4[%c0_10, %c0_11] : memref<64x1xf32, #tpu.memory_space<vmem>>, vector<64x1xf32>
    %20 = arith.mulf %6, %18 : vector<64x1xf32>
    %21 = arith.subf %19, %20 : vector<64x1xf32>
    %22 = vector.broadcast %18 : vector<64x1xf32> to vector<64x162xf32>
    %23 = arith.mulf %2, %22 : vector<64x162xf32>
    %24 = vector.broadcast %21 : vector<64x1xf32> to vector<64x162xf32>
    %25 = arith.addf %23, %24 : vector<64x162xf32>
    %cst_12 = arith.constant 0.000000e+00 : f32
    %26 = vector.broadcast %cst_12 : f32 to vector<64x162xf32>
    %27 = arith.cmpf oge, %25, %26 : vector<64x162xf32>
    %cst_13 = arith.constant 0.00999999977 : f32
    %28 = vector.broadcast %cst_13 : f32 to vector<64x162xf32>
    %29 = arith.mulf %28, %25 : vector<64x162xf32>
    %30 = arith.select %27, %25, %29 : vector<64x162xi1>, vector<64x162xf32>
    %31 = arith.truncf %30 : vector<64x162xf32> to vector<64x162xbf16>
    %c0_14 = arith.constant 0 : index
    %c0_15 = arith.constant 0 : index
    %32 = vector.load %arg5[%c0_14, %c0_15] : memref<64x162xbf16, #tpu.memory_space<vmem>>, vector<64x162xbf16>
    tpu.vector_store %arg5[%c0_14, %c0_15], %31 {strides = array<i32>} : memref<64x162xbf16, #tpu.memory_space<vmem>>, vector<64x162xbf16>,
    return
  }
  func.func @transform_0(%arg0: i32) -> (i32, i32) {
    %c0_i32 = arith.constant 0 : i32
    %c0_i32_0 = arith.constant 0 : i32
    %c0_i32_1 = arith.constant 0 : i32
    return %c0_i32, %c0_i32_0 : i32, i32
  }
  func.func @transform_1(%arg0: i32) -> (i32, i32) {
    %c0_i32 = arith.constant 0 : i32
    %c0_i32_0 = arith.constant 0 : i32
    %c0_i32_1 = arith.constant 0 : i32
    return %c0_i32, %c0_i32_0 : i32, i32
  }
  func.func @transform_2(%arg0: i32) -> (i32, i32) {
    %c0_i32 = arith.constant 0 : i32
    %c0_i32_0 = arith.constant 0 : i32
    %c0_i32_1 = arith.constant 0 : i32
    return %c0_i32, %c0_i32_0 : i32, i32
  }
  func.func @transform_3(%arg0: i32) -> (i32, i32) {
    %c0_i32 = arith.constant 0 : i32
    %c0_i32_0 = arith.constant 0 : i32
    %c0_i32_1 = arith.constant 0 : i32
    return %c0_i32, %c0_i32_0 : i32, i32
  }
  func.func @transform_4(%arg0: i32) -> (i32, i32) {
    %c0_i32 = arith.constant 0 : i32
    %c0_i32_0 = arith.constant 0 : i32
    %c0_i32_1 = arith.constant 0 : i32
    return %c0_i32, %c0_i32_0 : i32, i32
  }
}

module attributes {stable_mosaic.version = 11 : i64} {
  func.func @_conv_bias_kernel(%arg0: i32, %arg1: memref<64x576xbf16, #tpu.memory_space<vmem>>, %arg2: memref<576x32xbf16, #tpu.memory_space<vmem>>, %arg3: memref<64x1xf32, #tpu.memory_space<vmem>>, %arg4: memref<64x32xf32, #tpu.memory_space<vmem>>) attributes {dimension_semantics = [#tpu.dimension_semantics<arbitrary>], iteration_bounds = array<i64: 1>, scalar_prefetch = 0 : i64, scratch_operands = 0 : i64, tpu.core_type = #tpu.core_type<tc>, window_params = [{pipeline_mode = #tpu.pipeline_mode<synchronous>, transform_indices = @transform_0, window_bounds = array<i64: 64, 576>}, {pipeline_mode = #tpu.pipeline_mode<synchronous>, transform_indices = @transform_1, window_bounds = array<i64: 576, 32>}, {pipeline_mode = #tpu.pipeline_mode<synchronous>, transform_indices = @transform_2, window_bounds = array<i64: 64, 1>}, {pipeline_mode = #tpu.pipeline_mode<synchronous>, transform_indices = @transform_3, window_bounds = array<i64: 64, 32>}]} {
    %c0 = arith.constant 0 : index
    %c0_0 = arith.constant 0 : index
    %0 = vector.load %arg1[%c0, %c0_0] : memref<64x576xbf16, #tpu.memory_space<vmem>>, vector<64x576xbf16>
    %c0_1 = arith.constant 0 : index
    %c0_2 = arith.constant 0 : index
    %1 = vector.load %arg2[%c0_1, %c0_2] : memref<576x32xbf16, #tpu.memory_space<vmem>>, vector<576x32xbf16>
    %cst = arith.constant dense<0.000000e+00> : vector<64x32xf32>
    %2 = tpu.matmul %0, %1, %cst {dimension_numbers = #tpu.dot_dimension_numbers<[1], [0], [0], [1], [0, 0, 1, 1], [], []>} : vector<64x576xbf16>, vector<576x32xbf16>, vector<64x32xf32> -> vector<64x32xf32>
    %c0_3 = arith.constant 0 : index
    %c0_4 = arith.constant 0 : index
    %3 = vector.load %arg3[%c0_3, %c0_4] : memref<64x1xf32, #tpu.memory_space<vmem>>, vector<64x1xf32>
    %4 = vector.broadcast %3 : vector<64x1xf32> to vector<64x32xf32>
    %5 = arith.addf %2, %4 : vector<64x32xf32>
    %c0_5 = arith.constant 0 : index
    %c0_6 = arith.constant 0 : index
    %6 = vector.load %arg4[%c0_5, %c0_6] : memref<64x32xf32, #tpu.memory_space<vmem>>, vector<64x32xf32>
    tpu.vector_store %arg4[%c0_5, %c0_6], %5 {strides = array<i32>} : memref<64x32xf32, #tpu.memory_space<vmem>>, vector<64x32xf32>,
    return
  }
  func.func @transform_0(%arg0: i32) -> (i32, i32) {
    %c0_i32 = arith.constant 0 : i32
    %c0_i32_0 = arith.constant 0 : i32
    %c0_i32_1 = arith.constant 0 : i32
    return %c0_i32, %c0_i32_0 : i32, i32
  }
  func.func @transform_1(%arg0: i32) -> (i32, i32) {
    %c0_i32 = arith.constant 0 : i32
    %c0_i32_0 = arith.constant 0 : i32
    %c0_i32_1 = arith.constant 0 : i32
    return %c0_i32, %c0_i32_0 : i32, i32
  }
  func.func @transform_2(%arg0: i32) -> (i32, i32) {
    %c0_i32 = arith.constant 0 : i32
    %c0_i32_0 = arith.constant 0 : i32
    %c0_i32_1 = arith.constant 0 : i32
    return %c0_i32, %c0_i32_0 : i32, i32
  }
  func.func @transform_3(%arg0: i32) -> (i32, i32) {
    %c0_i32 = arith.constant 0 : i32
    %c0_i32_0 = arith.constant 0 : i32
    %c0_i32_1 = arith.constant 0 : i32
    return %c0_i32, %c0_i32_0 : i32, i32
  }
}

module attributes {stable_mosaic.version = 11 : i64} {
  func.func @_vae_head_kernel(%arg0: i32, %arg1: memref<2x1024xf32, #tpu.memory_space<vmem>>, %arg2: memref<1024x128xf32, #tpu.memory_space<vmem>>, %arg3: memref<1x128xf32, #tpu.memory_space<vmem>>, %arg4: memref<2x64xf32, #tpu.memory_space<vmem>>, %arg5: memref<2x64xf32, #tpu.memory_space<vmem>>, %arg6: memref<2x64xf32, #tpu.memory_space<vmem>>, %arg7: memref<2x64xf32, #tpu.memory_space<vmem>>) attributes {dimension_semantics = [#tpu.dimension_semantics<arbitrary>], iteration_bounds = array<i64: 1>, scalar_prefetch = 0 : i64, scratch_operands = 0 : i64, tpu.core_type = #tpu.core_type<tc>, window_params = [{pipeline_mode = #tpu.pipeline_mode<synchronous>, transform_indices = @transform_0, window_bounds = array<i64: 2, 1024>}, {pipeline_mode = #tpu.pipeline_mode<synchronous>, transform_indices = @transform_1, window_bounds = array<i64: 1024, 128>}, {pipeline_mode = #tpu.pipeline_mode<synchronous>, transform_indices = @transform_2, window_bounds = array<i64: 1, 128>}, {pipeline_mode = #tpu.pipeline_mode<synchronous>, transform_indices = @transform_3, window_bounds = array<i64: 2, 64>}, {pipeline_mode = #tpu.pipeline_mode<synchronous>, transform_indices = @transform_4, window_bounds = array<i64: 2, 64>}, {pipeline_mode = #tpu.pipeline_mode<synchronous>, transform_indices = @transform_5, window_bounds = array<i64: 2, 64>}, {pipeline_mode = #tpu.pipeline_mode<synchronous>, transform_indices = @transform_6, window_bounds = array<i64: 2, 64>}]} {
    %c0 = arith.constant 0 : index
    %c0_0 = arith.constant 0 : index
    %0 = vector.load %arg1[%c0, %c0_0] : memref<2x1024xf32, #tpu.memory_space<vmem>>, vector<2x1024xf32>
    %c0_1 = arith.constant 0 : index
    %c0_2 = arith.constant 0 : index
    %1 = vector.load %arg2[%c0_1, %c0_2] : memref<1024x128xf32, #tpu.memory_space<vmem>>, vector<1024x128xf32>
    %cst = arith.constant dense<0.000000e+00> : vector<2x128xf32>
    %2 = tpu.matmul %0, %1, %cst {dimension_numbers = #tpu.dot_dimension_numbers<[1], [0], [0], [1], [0, 0, 1, 1], [], []>} : vector<2x1024xf32>, vector<1024x128xf32>, vector<2x128xf32> -> vector<2x128xf32>
    %c0_3 = arith.constant 0 : index
    %c0_4 = arith.constant 0 : index
    %3 = vector.load %arg3[%c0_3, %c0_4] : memref<1x128xf32, #tpu.memory_space<vmem>>, vector<1x128xf32>
    %4 = vector.broadcast %3 : vector<1x128xf32> to vector<2x128xf32>
    %5 = arith.addf %2, %4 : vector<2x128xf32>
    %6 = vector.extract_strided_slice %5 {offsets = [0, 0], sizes = [2, 64], strides = [1, 1]} : vector<2x128xf32> to vector<2x64xf32>
    %7 = vector.extract_strided_slice %5 {offsets = [0, 64], sizes = [2, 64], strides = [1, 1]} : vector<2x128xf32> to vector<2x64xf32>
    %c0_5 = arith.constant 0 : index
    %c0_6 = arith.constant 0 : index
    %8 = vector.load %arg6[%c0_5, %c0_6] : memref<2x64xf32, #tpu.memory_space<vmem>>, vector<2x64xf32>
    tpu.vector_store %arg6[%c0_5, %c0_6], %6 {strides = array<i32>} : memref<2x64xf32, #tpu.memory_space<vmem>>, vector<2x64xf32>,
    %c0_7 = arith.constant 0 : index
    %c0_8 = arith.constant 0 : index
    %9 = vector.load %arg7[%c0_7, %c0_8] : memref<2x64xf32, #tpu.memory_space<vmem>>, vector<2x64xf32>
    tpu.vector_store %arg7[%c0_7, %c0_8], %7 {strides = array<i32>} : memref<2x64xf32, #tpu.memory_space<vmem>>, vector<2x64xf32>,
    %c0_9 = arith.constant 0 : index
    %c0_10 = arith.constant 0 : index
    %10 = vector.load %arg4[%c0_9, %c0_10] : memref<2x64xf32, #tpu.memory_space<vmem>>, vector<2x64xf32>
    %cst_11 = arith.constant 5.000000e-01 : f32
    %11 = vector.broadcast %cst_11 : f32 to vector<2x64xf32>
    %12 = arith.mulf %11, %7 : vector<2x64xf32>
    %13 = math.exp %12 : vector<2x64xf32>
    %14 = arith.mulf %10, %13 : vector<2x64xf32>
    %15 = arith.addf %6, %14 : vector<2x64xf32>
    %c0_12 = arith.constant 0 : index
    %c0_13 = arith.constant 0 : index
    %16 = vector.load %arg5[%c0_12, %c0_13] : memref<2x64xf32, #tpu.memory_space<vmem>>, vector<2x64xf32>
    tpu.vector_store %arg5[%c0_12, %c0_13], %15 {strides = array<i32>} : memref<2x64xf32, #tpu.memory_space<vmem>>, vector<2x64xf32>,
    return
  }
  func.func @transform_0(%arg0: i32) -> (i32, i32) {
    %c0_i32 = arith.constant 0 : i32
    %c0_i32_0 = arith.constant 0 : i32
    %c0_i32_1 = arith.constant 0 : i32
    return %c0_i32, %c0_i32_0 : i32, i32
  }
  func.func @transform_1(%arg0: i32) -> (i32, i32) {
    %c0_i32 = arith.constant 0 : i32
    %c0_i32_0 = arith.constant 0 : i32
    %c0_i32_1 = arith.constant 0 : i32
    return %c0_i32, %c0_i32_0 : i32, i32
  }
  func.func @transform_2(%arg0: i32) -> (i32, i32) {
    %c0_i32 = arith.constant 0 : i32
    %c0_i32_0 = arith.constant 0 : i32
    %c0_i32_1 = arith.constant 0 : i32
    return %c0_i32, %c0_i32_0 : i32, i32
  }
  func.func @transform_3(%arg0: i32) -> (i32, i32) {
    %c0_i32 = arith.constant 0 : i32
    %c0_i32_0 = arith.constant 0 : i32
    %c0_i32_1 = arith.constant 0 : i32
    return %c0_i32, %c0_i32_0 : i32, i32
  }
  func.func @transform_4(%arg0: i32) -> (i32, i32) {
    %c0_i32 = arith.constant 0 : i32
    %c0_i32_0 = arith.constant 0 : i32
    %c0_i32_1 = arith.constant 0 : i32
    return %c0_i32, %c0_i32_0 : i32, i32
  }
  func.func @transform_5(%arg0: i32) -> (i32, i32) {
    %c0_i32 = arith.constant 0 : i32
    %c0_i32_0 = arith.constant 0 : i32
    %c0_i32_1 = arith.constant 0 : i32
    return %c0_i32, %c0_i32_0 : i32, i32
  }
  func.func @transform_6(%arg0: i32) -> (i32, i32) {
    %c0_i32 = arith.constant 0 : i32
    %c0_i32_0 = arith.constant 0 : i32
    %c0_i32_1 = arith.constant 0 : i32
    return %c0_i32, %c0_i32_0 : i32, i32
  }
}

</mosaic_0001>

<bundles_post_ra>
// kernel: vae_forward.5
= control target key start
LH: loop header
LB: loop body
LE: loop exit
PB: predicated region body
PF: predicated region fallthrough
CT: control target
= control target key end

     0   :  { %vm449_vm0 = vcmask 1041408   ;;  %vm442_vm1 = vcmask 293888   ;;  %vm1069_vm2 = vcmask 277504   ;;  %s4832_s1 = inlined_call_operand.vmem [shape: bf16[36,3362], index: 1, kind: input, shape index: {}]   ;;  %s4833_s0 = inlined_call_operand.vmem [shape: bf16[32,36], index: 0, kind: input, shape index: {}]   ;;  %s4834_s2 = inlined_call_operand.vmem [shape: f32[32,1], index: 2, kind: input, shape index: {}]   ;;  %s4835_s3 = inlined_call_operand.vmem [shape: f32[32,1], index: 3, kind: input, shape index: {}]   ;;  %s4836_s4 = inlined_call_operand.vmem [shape: bf16[32,3362], index: 4, kind: output, shape index: {}]  }
   0x1   :  { %v78_v0 = vld [vmem:[%s4832_s1 + $0x1b0] sm:$0x33]  ;;  %v79_v1 = vld [vmem:[%s4832_s1 + $0x1b8] sm:$0x33]  ;;  %v2589_v9 = vld [vmem:[%s4832_s1 + $0x140] sm:$0xf0] }
   0x2   :  { %v280_v2 = vunpack.c.l.b16 %v78_v0  ;;  %v281_v3 = vunpack.c.h.b16 %v78_v0  ;;  %v282_v4 = vunpack.c.l.b16 %v79_v1  ;;  %v2387_v8 = vld [vmem:[%s4832_s1 + $0xd8] sm:$0xf]  ;;  %v2576_v10 = vld [vmem:[%s4832_s1 + $0xdc] sm:$0xf]  ;;  %v2389_v11 = vld [vmem:[%s4832_s1 + $0x144] sm:$0xf0]  ;;  %v283_v18 = vunpack.c.h.b16 %v79_v1 }
   0x3   :  { %v2395_v12 = vld [vmem:[%s4832_s1 + $0xe0] sm:$0xf]  ;;  %v2590_v13 = vld [vmem:[%s4832_s1 + $0x148] sm:$0xf0]  ;;  %v2388_v19 = vor.u32 %v2589_v9, %v2387_v8  ;;  %v2392_v22 = vor.u32 %v2576_v10, %v2389_v11  ;;  %v2549_v26 = vld [vmem:[%s4832_s1 + $0x4] sm:$0xf] }
   0x4   :  { %v361_v5 = vpack.c.b16 %v280_v2, %v280_v2  ;;  %v362_v6 = vpack.c.b16 %v281_v3, %v281_v3  ;;  %v363_v7 = vpack.c.b16 %v282_v4, %v282_v4  ;;  %v81_v17 = vld [vmem:[%s4832_s1 + $0x1c8] sm:$0x33]  ;;  %v80_v21 = vld [vmem:[%s4832_s1 + $0x1c0] sm:$0x33]  ;;  %v2396_v23 = vor.u32 %v2590_v13, %v2395_v12  ;;  %v2281_v27 = vld [vmem:[%s4832_s1 + $0x6c] sm:$0xf0] }
   0x5   :  { %v286_v20 = vunpack.c.l.b16 %v81_v17  ;;  %v2279_v24 = vld [vmem:[%s4832_s1] sm:$0xf]  ;;  %v2562_v25 = vld [vmem:[%s4832_s1 + $0x68] sm:$0xf0]  ;;  %v2287_v28 = vld [vmem:[%s4832_s1 + $0x8] sm:$0xf]  ;;  %v285_v30 = vunpack.c.h.b16 %v80_v21  ;;  %v284_v31 = vunpack.c.l.b16 %v80_v21  ;;  %v364_v33 = vpack.c.b16 %v283_v18, %v283_v18 }
   0x6   :  { %v451_v14 = vsel %vm449_vm0, %v361_v5, 0  ;;  %v454_v15 = vsel %vm449_vm0, %v362_v6, 0  ;;  %v457_v16 = vsel %vm449_vm0, %v363_v7, 0  ;;  %v2563_v29 = vld [vmem:[%s4832_s1 + $0x70] sm:$0xf0]  ;;  %v2280_v34 = vor.u32 %v2562_v25, %v2279_v24  ;;  %v2702_v37 = vld [vmem:[%s4833_s0] sm:$0xff] }
   0x7   :  { %536 = vmatpush.bf16.msra.mxu0 %v451_v14  ;;  %2603 = vmatpush.bf16.msra.mxu3 %v451_v14  ;;  %v367_v32 = vpack.c.b16 %v286_v20, %v286_v20  ;;  %v2284_v35 = vor.u32 %v2549_v26, %v2281_v27  ;;  %v2288_v36 = vor.u32 %v2563_v29, %v2287_v28  ;;  %v2707_v38 = vld [vmem:[%s4833_s0 + $0x8] sm:$0xff]  ;;  %v2577_v40 = vld [vmem:[%s4832_s1 + $0xe4] sm:$0xf]  ;;  %v2397_v41 = vld [vmem:[%s4832_s1 + $0x14c] sm:$0xf0]  ;;  %v287_v43 = vunpack.c.h.b16 %v81_v17 }
   0x8   :  { %555 = vmatpush.bf16.msra.mxu1 %v454_v15  ;;  %574 = vmatpush.bf16.msra.mxu2 %v457_v16  ;;  %v366_v39 = vpack.c.b16 %v285_v30, %v285_v30  ;;  %v365_v42 = vpack.c.b16 %v284_v31, %v284_v31  ;;  %v460_v45 = vsel %vm449_vm0, %v364_v33, 0  ;;  %v2411_v46 = vld [vmem:[%s4832_s1 + $0xf0] sm:$0xf]  ;;  %v2592_v47 = vld [vmem:[%s4832_s1 + $0x158] sm:$0xf0]  ;;  %v2400_v52 = vor.u32 %v2577_v40, %v2397_v41 }
   0x9   :  { %v469_v44 = vsel %vm449_vm0, %v367_v32, 0  ;;  %v2550_v48 = vld [vmem:[%s4832_s1 + $0xc] sm:$0xf]  ;;  %v2405_v50 = vld [vmem:[%s4832_s1 + $0x154] sm:$0xf0]  ;;  %v2412_v53 = vor.u32 %v2592_v47, %v2411_v46  ;;  %v368_v60 = vpack.c.b16 %v287_v43, %v287_v43 }
   0xa   :  { %v2578_v49 = vld [vmem:[%s4832_s1 + $0xec] sm:$0xf]  ;;  %v466_v51 = vsel %vm449_vm0, %v366_v39, 0  ;;  %v463_v54 = vsel %vm449_vm0, %v365_v42, 0  ;;  %v2403_v55 = vld [vmem:[%s4832_s1 + $0xe8] sm:$0xf] }
   0xb   :  { %537 = vmatpush.bf16.msra.mxu0 %v2388_v19  ;;  %2604 = vmatpush.bf16.msra.mxu3 %v2388_v19  ;;  %v2591_v56 = vld [vmem:[%s4832_s1 + $0x150] sm:$0xf0]  ;;  %v2289_v57 = vld [vmem:[%s4832_s1 + $0x74] sm:$0xf0]  ;;  %v2565_v59 = vld [vmem:[%s4832_s1 + $0x80] sm:$0xf0]  ;;  %v2408_v61 = vor.u32 %v2578_v49, %v2405_v50 }
   0xc   :  { %556 = vmatpush.bf16.msra.mxu1 %v2392_v22  ;;  %575 = vmatpush.bf16.msra.mxu2 %v2396_v23  ;;  %v2303_v58 = vld [vmem:[%s4832_s1 + $0x18] sm:$0xf]  ;;  %v82_v63 = vld [vmem:[%s4832_s1 + $0x1d0] sm:$0x33]  ;;  %v2404_v0 = vor.u32 %v2591_v56, %v2403_v55  ;;  %v2292_v5 = vor.u32 %v2550_v48, %v2289_v57  ;;  %v2564_v6 = vld [vmem:[%s4832_s1 + $0x78] sm:$0xf0] }
   0xd   :  { %v2760_v62 = vld [vmem:[%s4832_s1 + $0x1d8] sm:$0x33]  ;;  %v2295_v1 = vld [vmem:[%s4832_s1 + $0x10] sm:$0xf]  ;;  %v288_v3 = vunpack.c.l.b16 %v82_v63  ;;  %v289_v4 = vunpack.c.h.b16 %v82_v63  ;;  %v2304_v7 = vor.u32 %v2565_v59, %v2303_v58  ;;  %v2551_v8 = vld [vmem:[%s4832_s1 + $0x14] sm:$0xf] }
   0xe   :  { %v290_v2 = vunpack.c.l.b16 %v2760_v62  ;;  %v2297_v9 = vld [vmem:[%s4832_s1 + $0x7c] sm:$0xf0]  ;;  %v472_v10 = vsel %vm449_vm0, %v368_v60, 0  ;;  %v2579_v14 = vld [vmem:[%s4832_s1 + $0xf4] sm:$0xf]  ;;  %v2296_v18 = vor.u32 %v2564_v6, %v2295_v1 }
   0xf   :  { %538 = vmatpush.bf16.msra.mxu0 %v2280_v34  ;;  %2605 = vmatpush.bf16.msra.mxu3 %v2280_v34  ;;  %v369_v12 = vpack.c.b16 %v288_v3, %v288_v3  ;;  %v370_v13 = vpack.c.b16 %v289_v4, %v289_v4  ;;  %v2413_v15 = vld [vmem:[%s4832_s1 + $0x15c] sm:$0xf0]  ;;  %v2594_v17 = vld [vmem:[%s4832_s1 + $0x168] sm:$0xf0]  ;;  %v2300_v19 = vor.u32 %v2551_v8, %v2297_v9  ;;  %v2419_v25 = vld [vmem:[%s4832_s1 + $0xf8] sm:$0xf]  ;;  %v291_v34 = vunpack.c.h.b16 %v2760_v62 }
  0x10   :  { %557 = vmatpush.bf16.msra.mxu1 %v2284_v35  ;;  %576 = vmatpush.bf16.msra.mxu2 %v2288_v36  ;;  %v371_v11 = vpack.c.b16 %v290_v2, %v290_v2  ;;  %v2427_v16 = vld [vmem:[%s4832_s1 + $0x100] sm:$0xf]  ;;  %v2416_v23 = vor.u32 %v2579_v14, %v2413_v15  ;;  %v2593_v26 = vld [vmem:[%s4832_s1 + $0x160] sm:$0xf0]  ;;  %v2552_v27 = vld [vmem:[%s4832_s1 + $0x1c] sm:$0xf] }
  0x11   :  { %v475_v21 = vsel %vm449_vm0, %v369_v12, 0  ;;  %v478_v22 = vsel %vm449_vm0, %v370_v13, 0  ;;  %v2428_v24 = vor.u32 %v2594_v17, %v2427_v16  ;;  %v2305_v28 = vld [vmem:[%s4832_s1 + $0x84] sm:$0xf0]  ;;  %v2420_v29 = vor.u32 %v2593_v26, %v2419_v25  ;;  %v2580_v31 = vld [vmem:[%s4832_s1 + $0xfc] sm:$0xf] }
  0x12   :  { %2493 = vmatmul.msk.bf16.vlgmr.msra.gmra.mxu0 %vm442_vm1, %v2702_v37  ;;  %2494 = vmatmul.msk.bf16.vlgmr.msra.gmra.mxu3 %vm442_vm1, %v2707_v38  ;;  %v481_v20 = vsel %vm449_vm0, %v371_v11, 0  ;;  %v2308_v30 = vor.u32 %v2552_v27, %v2305_v28  ;;  %v2421_v32 = vld [vmem:[%s4832_s1 + $0x164] sm:$0xf0]  ;;  %v2311_v33 = vld [vmem:[%s4832_s1 + $0x20] sm:$0xf] }
  0x13   :  { %593 = vmatpush.bf16.msrb.mxu3 %v460_v45  ;;  %2495 = vmatmul.msk.bf16.vlgmr.msra.gmra.mxu1 %vm442_vm1, %v2702_v37  ;;  %v2424_v35 = vor.u32 %v2580_v31, %v2421_v32  ;;  %v2566_v36 = vld [vmem:[%s4832_s1 + $0x88] sm:$0xf0]  ;;  %v2319_v39 = vld [vmem:[%s4832_s1 + $0x28] sm:$0xf]  ;;  %v2567_v40 = vld [vmem:[%s4832_s1 + $0x90] sm:$0xf0]  ;;  %v372_v45 = vpack.c.b16 %v291_v34, %v291_v34 }
  0x14   :  { %650 = vmatpush.bf16.msrb.mxu2 %v469_v44  ;;  %631 = vmatpush.bf16.msrb.mxu1 %v466_v51  ;;  %v2312_v41 = vor.u32 %v2566_v36, %v2311_v33  ;;  %v2320_v42 = vor.u32 %v2567_v40, %v2319_v39  ;;  %v2553_v43 = vld [vmem:[%s4832_s1 + $0x24] sm:$0xf]  ;;  %v2313_v44 = vld [vmem:[%s4832_s1 + $0x8c] sm:$0xf0]  ;;  %v85_v48 = vld [vmem:[%s4832_s1 + $0x1e8] sm:$0x33] }
  0x15   :  { %2497 = vmatmul.msk.bf16.vlgmr.msra.gmra.mxu2 %vm442_vm1, %v2702_v37  ;;  %612 = vmatpush.bf16.msrb.mxu0 %v463_v54  ;;  %v2316_v46 = vor.u32 %v2553_v43, %v2313_v44  ;;  %v484_v47 = vsel %vm449_vm0, %v372_v45, 0  ;;  %v84_v49 = vld [vmem:[%s4832_s1 + $0x1e0] sm:$0x33]  ;;  %v294_v51 = vunpack.c.l.b16 %v85_v48  ;;  %v2429_v54 = vld [vmem:[%s4832_s1 + $0x16c] sm:$0xf0] }
  0x16   :  { %v2581_v50 = vld [vmem:[%s4832_s1 + $0x104] sm:$0xf]  ;;  %v2443_v56 = vld [vmem:[%s4832_s1 + $0x110] sm:$0xf]  ;;  %v2554_v57 = vld [vmem:[%s4832_s1 + $0x2c] sm:$0xf] }
  0x17   :  { %594 = vmatpush.bf16.msrb.mxu3 %v2400_v52  ;;  %v292_v52 = vunpack.c.l.b16 %v84_v49  ;;  %v2432_v55 = vor.u32 %v2581_v50, %v2429_v54  ;;  %v2321_v58 = vld [vmem:[%s4832_s1 + $0x94] sm:$0xf0]  ;;  %v375_v59 = vpack.c.b16 %v294_v51, %v294_v51  ;;  %v2596_v62 = vld [vmem:[%s4832_s1 + $0x178] sm:$0xf0]  ;;  %v2435_v63 = vld [vmem:[%s4832_s1 + $0x108] sm:$0xf] }
  0x18   :  { %651 = vmatpush.bf16.msrb.mxu2 %v2412_v53  ;;  %632 = vmatpush.bf16.msrb.mxu1 %v2408_v61  ;;  %v293_v53 = vunpack.c.h.b16 %v84_v49  ;;  %v2324_v1 = vor.u32 %v2554_v57, %v2321_v58  ;;  %v2437_v8 = vld [vmem:[%s4832_s1 + $0x174] sm:$0xf0]  ;;  %v2327_v9 = vld [vmem:[%s4832_s1 + $0x30] sm:$0xf]  ;;  %v2568_v12 = vld [vmem:[%s4832_s1 + $0x98] sm:$0xf0] }
  0x19   :  { %613 = vmatpush.bf16.msrb.mxu0 %v2404_v0  ;;  %v373_v60 = vpack.c.b16 %v292_v52, %v292_v52  ;;  %v2595_v0 = vld [vmem:[%s4832_s1 + $0x170] sm:$0xf0]  ;;  %v493_v2 = vsel %vm449_vm0, %v375_v59, 0  ;;  %v2335_v13 = vld [vmem:[%s4832_s1 + $0x38] sm:$0xf]  ;;  %v2328_v15 = vor.u32 %v2568_v12, %v2327_v9 }
  0x1a   :  { %v374_v61 = vpack.c.b16 %v293_v53, %v293_v53  ;;  %v2436_v6 = vor.u32 %v2595_v0, %v2435_v63  ;;  %v2569_v14 = vld [vmem:[%s4832_s1 + $0xa0] sm:$0xf0]  ;;  %v2555_v17 = vld [vmem:[%s4832_s1 + $0x34] sm:$0xf]  ;;  %v2445_v28 = vld [vmem:[%s4832_s1 + $0x17c] sm:$0xf0] }
  0x1b   :  { %595 = vmatpush.bf16.msrb.mxu3 %v2292_v5  ;;  %v487_v3 = vsel %vm449_vm0, %v373_v60, 0  ;;  %v2444_v5 = vor.u32 %v2596_v62, %v2443_v56  ;;  %v2336_v16 = vor.u32 %v2569_v14, %v2335_v13  ;;  %v2556_v31 = vld [vmem:[%s4832_s1 + $0x3c] sm:$0xf]  ;;  %v2337_v32 = vld [vmem:[%s4832_s1 + $0xa4] sm:$0xf0] }
  0x1c   :  { %652 = vmatpush.bf16.msrb.mxu2 %v2304_v7  ;;  %633 = vmatpush.bf16.msrb.mxu1 %v2300_v19  ;;  %v490_v4 = vsel %vm449_vm0, %v374_v61, 0  ;;  %v2582_v7 = vld [vmem:[%s4832_s1 + $0x10c] sm:$0xf]  ;;  %v2451_v39 = vld [vmem:[%s4832_s1 + $0x118] sm:$0xf] }
  0x1d   :  { %614 = vmatpush.bf16.msrb.mxu0 %v2296_v18  ;;  %v2440_v11 = vor.u32 %v2582_v7, %v2437_v8  ;;  %v2329_v18 = vld [vmem:[%s4832_s1 + $0x9c] sm:$0xf0]  ;;  %v2598_v36 = vld [vmem:[%s4832_s1 + $0x188] sm:$0xf0]  ;;  %v2597_v40 = vld [vmem:[%s4832_s1 + $0x180] sm:$0xf0] }
  0x1e   :  { %v2343_v49 = vld [vmem:[%s4832_s1 + $0x40] sm:$0xf]  ;;  %v2570_v52 = vld [vmem:[%s4832_s1 + $0xa8] sm:$0xf0]  ;;  %v2351_v53 = vld [vmem:[%s4832_s1 + $0x48] sm:$0xf] }
  0x1f   :  { %669 = vmatpush.bf16.msra.mxu3 %v472_v10  ;;  %v295_v10 = vunpack.c.h.b16 %v85_v48  ;;  %v2453_v48 = vld [vmem:[%s4832_s1 + $0x184] sm:$0xf0]  ;;  %v2571_v54 = vld [vmem:[%s4832_s1 + $0xb0] sm:$0xf0]  ;;  %v2557_v57 = vld [vmem:[%s4832_s1 + $0x44] sm:$0xf] }
  0x20   :  { %726 = vmatpush.bf16.msra.mxu2 %v481_v20  ;;  %707 = vmatpush.bf16.msra.mxu1 %v478_v22  ;;  %v2332_v20 = vor.u32 %v2555_v17, %v2329_v18  ;;  %v87_v22 = vld [vmem:[%s4832_s1 + $0x1f8] sm:$0x33]  ;;  %v2352_v56 = vor.u32 %v2571_v54, %v2351_v53  ;;  %v2345_v58 = vld [vmem:[%s4832_s1 + $0xac] sm:$0xf0]  ;;  %v89_v62 = vld [vmem:[%s4832_s1 + $0x208] sm:$0x33] }
  0x21   :  { %688 = vmatpush.bf16.msra.mxu0 %v475_v21  ;;  %v376_v19 = vpack.c.b16 %v295_v10, %v295_v10  ;;  %v298_v25 = vunpack.c.l.b16 %v87_v22  ;;  %v299_v50 = vunpack.c.h.b16 %v87_v22  ;;  %v2348_v60 = vor.u32 %v2557_v57, %v2345_v58  ;;  %v2558_v12 = vld [vmem:[%s4832_s1 + $0x4c] sm:$0xf]  ;;  %v2353_v13 = vld [vmem:[%s4832_s1 + $0xb4] sm:$0xf0]  ;;  %v2475_v14 = vld [vmem:[%s4832_s1 + $0x130] sm:$0xf] }
  0x22   :  { %2499 = vmatmul.msk.bf16.vlgmr.msrb.gmra.mxu3 %vm442_vm1, %v2702_v37  ;;  %2501 = vmatmul.msk.bf16.vlgmr.msrb.gmra.mxu0 %vm442_vm1, %v2702_v37  ;;  %v302_v63 = vunpack.c.l.b16 %v89_v62  ;;  %v2467_v18 = vld [vmem:[%s4832_s1 + $0x128] sm:$0xf]  ;;  %v2469_v22 = vld [vmem:[%s4832_s1 + $0x194] sm:$0xf0] }
  0x23   :  { %670 = vmatpush.bf16.msra.mxu3 %v2416_v23  ;;  %2496 = vmatmul.msk.bf16.gmra.mxu1 %vm442_vm1, %v2707_v38  ;;  %v496_v21 = vsel %vm449_vm0, %v376_v19, 0  ;;  %v86_v23 = vld [vmem:[%s4832_s1 + $0x1f0] sm:$0x33]  ;;  %v379_v33 = vpack.c.b16 %v298_v25, %v298_v25  ;;  %v380_v59 = vpack.c.b16 %v299_v50, %v299_v50  ;;  %v2572_v25 = vld [vmem:[%s4832_s1 + $0xb8] sm:$0xf0] }
  0x24   :  { %727 = vmatpush.bf16.msra.mxu2 %v2428_v24  ;;  %708 = vmatpush.bf16.msra.mxu1 %v2424_v35  ;;  %v2583_v24 = vld [vmem:[%s4832_s1 + $0x114] sm:$0xf]  ;;  %v296_v26 = vunpack.c.l.b16 %v86_v23  ;;  %v297_v27 = vunpack.c.h.b16 %v86_v23  ;;  %v383_v0 = vpack.c.b16 %v302_v63, %v302_v63 }
  0x25   :  { %689 = vmatpush.bf16.msra.mxu0 %v2420_v29  ;;  %2498 = vmatmul.msk.bf16.gmra.mxu2 %vm442_vm1, %v2707_v38  ;;  %v2448_v29 = vor.u32 %v2583_v24, %v2445_v28  ;;  %v508_v61 = vsel %vm449_vm0, %v380_v59, 0  ;;  %v2599_v19 = vld [vmem:[%s4832_s1 + $0x190] sm:$0xf0]  ;;  %v2359_v24 = vld [vmem:[%s4832_s1 + $0x50] sm:$0xf] }
  0x26   :  { %v377_v34 = vpack.c.b16 %v296_v26, %v296_v26  ;;  %v378_v35 = vpack.c.b16 %v297_v27, %v297_v27  ;;  %v2360_v26 = vor.u32 %v2572_v25, %v2359_v24  ;;  %v2367_v27 = vld [vmem:[%s4832_s1 + $0x58] sm:$0xf]  ;;  %v2573_v28 = vld [vmem:[%s4832_s1 + $0xc0] sm:$0xf0]  ;;  %v2560_v59 = vld [vmem:[%s4832_s1 + $0x5c] sm:$0xf] }
  0x27   :  { %671 = vmatpush.bf16.msra.mxu3 %v2308_v30  ;;  %v2459_v30 = vld [vmem:[%s4832_s1 + $0x120] sm:$0xf] }
  0x28   :  { %728 = vmatpush.bf16.msra.mxu2 %v2320_v42  ;;  %709 = vmatpush.bf16.msra.mxu1 %v2316_v46  ;;  %v505_v42 = vsel %vm449_vm0, %v379_v33, 0  ;;  %v499_v43 = vsel %vm449_vm0, %v377_v34, 0  ;;  %v502_v44 = vsel %vm449_vm0, %v378_v35, 0  ;;  %v2460_v45 = vor.u32 %v2598_v36, %v2459_v30  ;;  %v2559_v30 = vld [vmem:[%s4832_s1 + $0x54] sm:$0xf] }
  0x29   :  { %690 = vmatpush.bf16.msra.mxu0 %v2312_v41  ;;  %v2340_v41 = vor.u32 %v2556_v31, %v2337_v32  ;;  %v2452_v46 = vor.u32 %v2597_v40, %v2451_v39  ;;  %v2361_v31 = vld [vmem:[%s4832_s1 + $0xbc] sm:$0xf0]  ;;  %v303_v33 = vunpack.c.h.b16 %v89_v62  ;;  %v91_v40 = vld [vmem:[%s4832_s1 + $0x218] sm:$0x3] }
  0x2a   :  { %v2364_v32 = vor.u32 %v2559_v30, %v2361_v31 }
  0x2b   :  { %745 = vmatpush.bf16.msrb.mxu3 %v484_v47  ;;  %v2584_v47 = vld [vmem:[%s4832_s1 + $0x11c] sm:$0xf]  ;;  %v384_v36 = vpack.c.b16 %v303_v33, %v303_v33 }
  0x2c   :  { %v2456_v51 = vor.u32 %v2584_v47, %v2453_v48 }
  0x2d   :  { %764 = vmatpush.bf16.msrb.mxu0 %v487_v3  ;;  %v520_v39 = vsel %vm449_vm0, %v384_v36, 0 }
  0x2f   :  { %746 = vmatpush.bf16.msrb.mxu3 %v2432_v55  ;;  %v2344_v55 = vor.u32 %v2570_v52, %v2343_v49  ;;  %v2477_v52 = vld [vmem:[%s4832_s1 + $0x19c] sm:$0xf0] }
  0x31   :  { %765 = vmatpush.bf16.msrb.mxu0 %v2436_v6  ;;  %v2461_v6 = vld [vmem:[%s4832_s1 + $0x18c] sm:$0xf0] }
  0x32   :  { %2500 = vmatmul.msk.bf16.gmra.mxu3 %vm442_vm1, %v2707_v38  ;;  %2502 = vmatmul.msk.bf16.gmra.mxu0 %vm442_vm1, %v2707_v38 }
  0x33   :  { %2503 = vmatmul.msk.bf16.vlgmr.msrb.gmra.mxu1 %vm442_vm1, %v2702_v37  ;;  %747 = vmatpush.bf16.msrb.mxu3 %v2324_v1  ;;  %v88_v1 = vld [vmem:[%s4832_s1 + $0x200] sm:$0x33] }
  0x34   :  { %783 = vmatpush.bf16.msrb.mxu1 %v490_v4  ;;  %v300_v3 = vunpack.c.l.b16 %v88_v1  ;;  %v301_v4 = vunpack.c.h.b16 %v88_v1  ;;  %v2602_v1 = vld [vmem:[%s4832_s1 + $0x1a8] sm:$0xf0] }
  0x35   :  { %2505 = vmatmul.msk.bf16.vlgmr.msrb.gmra.mxu2 %vm442_vm1, %v2702_v37  ;;  %766 = vmatpush.bf16.msrb.mxu0 %v2328_v15  ;;  %v2600_v15 = vld [vmem:[%s4832_s1 + $0x198] sm:$0xf0] }
  0x36   :  { %802 = vmatpush.bf16.msrb.mxu2 %v493_v2  ;;  %v517_v2 = vsel %vm449_vm0, %v383_v0, 0  ;;  %v381_v7 = vpack.c.b16 %v300_v3, %v300_v3  ;;  %v382_v9 = vpack.c.b16 %v301_v4, %v301_v4  ;;  %v2476_v17 = vor.u32 %v2600_v15, %v2475_v14  ;;  %v2491_v0 = vld [vmem:[%s4832_s1 + $0x140] sm:$0xf]  ;;  %v2483_v4 = vld [vmem:[%s4832_s1 + $0x138] sm:$0xf] }
  0x37   :  { %v2492_v3 = vor.u32 %v2602_v1, %v2491_v0 }
  0x38   :  { %784 = vmatpush.bf16.msrb.mxu1 %v2440_v11  ;;  %v511_v10 = vsel %vm449_vm0, %v381_v7, 0  ;;  %v514_v11 = vsel %vm449_vm0, %v382_v9, 0  ;;  %v2588_v7 = vld [vmem:[%s4832_s1 + $0x13c] sm:$0xf] }
  0x3a   :  { %803 = vmatpush.bf16.msrb.mxu2 %v2444_v5  ;;  %v2585_v5 = vld [vmem:[%s4832_s1 + $0x124] sm:$0xf] }
  0x3b   :  { %v2464_v8 = vor.u32 %v2585_v5, %v2461_v6  ;;  %v2601_v5 = vld [vmem:[%s4832_s1 + $0x1a0] sm:$0xf0] }
  0x3c   :  { %785 = vmatpush.bf16.msrb.mxu1 %v2332_v20  ;;  %v2468_v20 = vor.u32 %v2599_v19, %v2467_v18  ;;  %v2484_v6 = vor.u32 %v2601_v5, %v2483_v4  ;;  %v2575_v18 = vld [vmem:[%s4832_s1 + $0xd0] sm:$0xf0] }
  0x3e   :  { %804 = vmatpush.bf16.msrb.mxu2 %v2336_v16  ;;  %v2356_v16 = vor.u32 %v2558_v12, %v2353_v13  ;;  %v2574_v12 = vld [vmem:[%s4832_s1 + $0xc8] sm:$0xf0] }
  0x42   :  { %2507 = vmatmul.msk.bf16.vlgmr.msra.gmra.mxu3 %vm442_vm1, %v2702_v37  ;;  %2509 = vmatmul.msk.bf16.vlgmr.msra.gmra.mxu0 %vm442_vm1, %v2702_v37 }
  0x43   :  { %2504 = vmatmul.msk.bf16.gmra.mxu1 %vm442_vm1, %v2707_v38  ;;  %821 = vmatpush.bf16.msra.mxu3 %v496_v21  ;;  %v2586_v21 = vld [vmem:[%s4832_s1 + $0x12c] sm:$0xf] }
  0x44   :  { %840 = vmatpush.bf16.msra.mxu0 %v499_v43  ;;  %v2472_v23 = vor.u32 %v2586_v21, %v2469_v22  ;;  %v2561_v21 = vld [vmem:[%s4832_s1 + $0x64] sm:$0xf]  ;;  %v2377_v22 = vld [vmem:[%s4832_s1 + $0xcc] sm:$0xf0] }
  0x45   :  { %2506 = vmatmul.msk.bf16.gmra.mxu2 %vm442_vm1, %v2707_v38  ;;  %v2380_v24 = vor.u32 %v2561_v21, %v2377_v22 }
  0x47   :  { %822 = vmatpush.bf16.msra.mxu3 %v2448_v29  ;;  %v2368_v29 = vor.u32 %v2573_v28, %v2367_v27 }
  0x48   :  { %841 = vmatpush.bf16.msra.mxu0 %v2452_v46  ;;  %v90_v46 = vld [vmem:[%s4832_s1 + $0x210] sm:$0x33] }
  0x49   :  { %v304_v49 = vunpack.c.l.b16 %v90_v46  ;;  %v305_v50 = vunpack.c.h.b16 %v90_v46 }
  0x4b   :  { %823 = vmatpush.bf16.msra.mxu3 %v2340_v41  ;;  %v306_v41 = vunpack.c.l.b16 %v91_v40  ;;  %v385_v53 = vpack.c.b16 %v304_v49, %v304_v49 }
  0x4c   :  { %842 = vmatpush.bf16.msra.mxu0 %v2344_v55  ;;  %v386_v55 = vpack.c.b16 %v305_v50, %v305_v50 }
  0x4e   :  { %v526_v58 = vsel %vm449_vm0, %v386_v55, 0 }
  0x52   :  { %2508 = vmatmul.msk.bf16.gmra.mxu3 %vm442_vm1, %v2707_v38  ;;  %2510 = vmatmul.msk.bf16.gmra.mxu0 %vm442_vm1, %v2707_v38 }
  0x53   :  { %2511 = vmatmul.msk.bf16.vlgmr.msra.gmra.mxu1 %vm442_vm1, %v2702_v37 }
  0x54   :  { %859 = vmatpush.bf16.msra.mxu1 %v502_v44  ;;  %v387_v44 = vpack.c.b16 %v306_v41, %v306_v41 }
  0x55   :  { %2513 = vmatmul.msk.bf16.vlgmr.msra.gmra.mxu2 %vm442_vm1, %v2702_v37 }
  0x56   :  { %878 = vmatpush.bf16.msra.mxu2 %v505_v42  ;;  %v529_v48 = vsel %vm449_vm0, %v387_v44, 0 }
  0x58   :  { %860 = vmatpush.bf16.msra.mxu1 %v2456_v51  ;;  %v2587_v51 = vld [vmem:[%s4832_s1 + $0x134] sm:$0xf] }
  0x59   :  { %v2480_v54 = vor.u32 %v2587_v51, %v2477_v52 }
  0x5a   :  { %879 = vmatpush.bf16.msra.mxu2 %v2460_v45 }
  0x5c   :  { %861 = vmatpush.bf16.msra.mxu1 %v2348_v60  ;;  %v2369_v60 = vld [vmem:[%s4832_s1 + $0xc4] sm:$0xf0] }
  0x5d   :  { %v2372_v62 = vor.u32 %v2560_v59, %v2369_v60 }
  0x5e   :  { %880 = vmatpush.bf16.msra.mxu2 %v2352_v56  ;;  %v523_v56 = vsel %vm449_vm0, %v385_v53, 0 }
  0x62   :  { %2515 = vmatmul.msk.bf16.vlgmr.msrb.gmra.mxu3 %vm442_vm1, %v2702_v37  ;;  %2517 = vmatmul.msk.bf16.vlgmr.msrb.gmra.mxu0 %vm442_vm1, %v2702_v37 }
  0x63   :  { %2512 = vmatmul.msk.bf16.gmra.mxu1 %vm442_vm1, %v2707_v38  ;;  %897 = vmatpush.bf16.msrb.mxu3 %v508_v61 }
  0x64   :  { %916 = vmatpush.bf16.msrb.mxu0 %v511_v10 }
  0x65   :  { %2514 = vmatmul.msk.bf16.gmra.mxu2 %vm442_vm1, %v2707_v38 }
  0x67   :  { %898 = vmatpush.bf16.msrb.mxu3 %v2464_v8  ;;  %v2485_v8 = vld [vmem:[%s4832_s1 + $0x1a4] sm:$0xf0] }
  0x68   :  { %917 = vmatpush.bf16.msrb.mxu0 %v2468_v20  ;;  %v2488_v9 = vor.u32 %v2588_v7, %v2485_v8 }
  0x6b   :  { %899 = vmatpush.bf16.msrb.mxu3 %v2356_v16 }
  0x6c   :  { %918 = vmatpush.bf16.msrb.mxu0 %v2360_v26 }
  0x72   :  { %2516 = vmatmul.msk.bf16.gmra.mxu3 %vm442_vm1, %v2707_v38  ;;  %2518 = vmatmul.msk.bf16.gmra.mxu0 %vm442_vm1, %v2707_v38 }
  0x73   :  { %2519 = vmatmul.msk.bf16.vlgmr.msrb.gmra.mxu1 %vm442_vm1, %v2702_v37 }
  0x74   :  { %935 = vmatpush.bf16.msrb.mxu1 %v514_v11  ;;  %v2375_v11 = vld [vmem:[%s4832_s1 + $0x60] sm:$0xf] }
  0x75   :  { %2521 = vmatmul.msk.bf16.vlgmr.msrb.gmra.mxu2 %vm442_vm1, %v2702_v37  ;;  %v2376_v14 = vor.u32 %v2574_v12, %v2375_v11 }
  0x76   :  { %954 = vmatpush.bf16.msrb.mxu2 %v517_v2 }
  0x78   :  { %936 = vmatpush.bf16.msrb.mxu1 %v2472_v23 }
  0x7a   :  { %955 = vmatpush.bf16.msrb.mxu2 %v2476_v17  ;;  %v2383_v17 = vld [vmem:[%s4832_s1 + $0x68] sm:$0xf] }
  0x7b   :  { %v2384_v19 = vor.u32 %v2575_v18, %v2383_v17 }
  0x7c   :  { %937 = vmatpush.bf16.msrb.mxu1 %v2364_v32 }
  0x7e   :  { %956 = vmatpush.bf16.msrb.mxu2 %v2368_v29 }
  0x82   :  { %2523 = vmatmul.msk.bf16.vlgmr.msra.gmra.mxu3 %vm442_vm1, %v2702_v37  ;;  %2525 = vmatmul.msk.bf16.vlgmr.msra.gmra.mxu0 %vm442_vm1, %v2702_v37 }
  0x83   :  { %2520 = vmatmul.msk.bf16.gmra.mxu1 %vm442_vm1, %v2707_v38  ;;  %973 = vmatpush.bf16.msra.mxu3 %v520_v39 }
  0x84   :  { %992 = vmatpush.bf16.msra.mxu0 %v523_v56 }
  0x85   :  { %2522 = vmatmul.msk.bf16.gmra.mxu2 %vm442_vm1, %v2707_v38 }
  0x87   :  { %974 = vmatpush.bf16.msra.mxu3 %v2480_v54 }
  0x88   :  { %993 = vmatpush.bf16.msra.mxu0 %v2484_v6 }
  0x8b   :  { %975 = vmatpush.bf16.msra.mxu3 %v2372_v62 }
  0x8c   :  { %994 = vmatpush.bf16.msra.mxu0 %v2376_v14 }
  0x8f   :  { %v3061_v34 = vpop.f32.mrf.mxu0 }
  0x90   :  { %4979 = vst [vmem:[#allocation2_spill] sm:$0xff] %v3061_v34  ;;  %v3063_v35 = vpop.f32.mrf.mxu1 }
  0x91   :  { %4980 = vst [vmem:[#allocation3_spill] sm:$0xff] %v3063_v35 }
  0x92   :  { %2524 = vmatmul.msk.bf16.gmra.mxu3 %vm442_vm1, %v2707_v38  ;;  %2526 = vmatmul.msk.bf16.gmra.mxu0 %vm442_vm1, %v2707_v38 }
  0x93   :  { %2527 = vmatmul.msk.bf16.vlgmr.msra.gmra.mxu1 %vm442_vm1, %v2702_v37 }
  0x94   :  { %1011 = vmatpush.bf16.msra.mxu1 %v526_v58 }
  0x95   :  { %2529 = vmatmul.msk.bf16.vlgmr.msra.gmra.mxu2 %vm442_vm1, %v2702_v37  ;;  %v3077_v42 = vpop.f32.mrf.mxu3 }
  0x96   :  { %4981 = vst [vmem:[#allocation4_spill] sm:$0xff] %v3077_v42  ;;  %1030 = vmatpush.bf16.msra.mxu2 %v529_v48 }
  0x97   :  { %v3081_v45 = vpop.f32.mrf.mxu0 }
  0x98   :  { %v3079_v43 = vpop.f32.mrf.mxu2  ;;  %4983 = vst [vmem:[#allocation6_spill] sm:$0xff] %v3081_v45  ;;  %v3086_v47 = vpop.f32.mrf.mxu1  ;;  %1012 = vmatpush.bf16.msra.mxu1 %v2488_v9 }
  0x99   :  { %4982 = vst [vmem:[#allocation5_spill] sm:$0xff] %v3079_v43 }
  0x9a   :  { %4984 = vst [vmem:[#allocation7_spill] sm:$0xff] %v3086_v47  ;;  %1031 = vmatpush.bf16.msra.mxu2 %v2492_v3 }
  0x9c   :  { %1013 = vmatpush.bf16.msra.mxu1 %v2380_v24 }
  0x9d   :  { %v3096_v57 = vpop.f32.mrf.mxu3 }
  0x9e   :  { %4985 = vst [vmem:[#allocation8_spill] sm:$0xff] %v3096_v57  ;;  %1032 = vmatpush.bf16.msra.mxu2 %v2384_v19 }
  0x9f   :  { %v3107_v63 = vpop.f32.mrf.mxu0 }
  0xa0   :  { %v3105_v61 = vpop.f32.mrf.mxu2  ;;  %4987 = vst [vmem:[#allocation10_spill] sm:$0xff] %v3107_v63  ;;  %v3115_v2 = vpop.f32.mrf.mxu1 }
  0xa1   :  { %4986 = vst [vmem:[#allocation9_spill] sm:$0xff] %v3105_v61 }
  0xa2   :  { %4988 = vst [vmem:[#allocation11_spill] sm:$0xff] %v3115_v2  ;;  %2531 = vmatmul.msk.bf16.vlgmr.msrb.gmra.mxu3 %vm442_vm1, %v2702_v37  ;;  %2533 = vmatmul.msk.bf16.vlgmr.msrb.gmra.mxu0 %vm442_vm1, %v2702_v37 }
  0xa3   :  { %2528 = vmatmul.msk.bf16.gmra.mxu1 %vm442_vm1, %v2707_v38 }
  0xa5   :  { %2530 = vmatmul.msk.bf16.gmra.mxu2 %vm442_vm1, %v2707_v38  ;;  %v3137_v10 = vpop.f32.mrf.mxu3 }
  0xa6   :  { %4989 = vst [vmem:[#allocation12_spill] sm:$0xff] %v3137_v10 }
  0xa7   :  { %v3147_v15 = vpop.f32.mrf.mxu0 }
  0xa8   :  { %v3145_v13 = vpop.f32.mrf.mxu2  ;;  %4991 = vst [vmem:[#allocation14_spill] sm:$0xff] %v3147_v15  ;;  %v3149_v16 = vpop.f32.mrf.mxu1 }
  0xa9   :  { %4990 = vst [vmem:[#allocation13_spill] sm:$0xff] %v3145_v13 }
  0xaa   :  { %4992 = vst [vmem:[#allocation15_spill] sm:$0xff] %v3149_v16 }
  0xad   :  { %v3157_v20 = vpop.f32.mrf.mxu3 }
  0xae   :  { %4993 = vst [vmem:[#allocation16_spill] sm:$0xff] %v3157_v20 }
  0xaf   :  { %v3167_v25 = vpop.f32.mrf.mxu0 }
  0xb0   :  { %v3165_v23 = vpop.f32.mrf.mxu2  ;;  %4995 = vst [vmem:[#allocation18_spill] sm:$0xff] %v3167_v25  ;;  %v3169_v26 = vpop.f32.mrf.mxu1 }
  0xb1   :  { %4994 = vst [vmem:[#allocation17_spill] sm:$0xff] %v3165_v23 }
  0xb2   :  { %4996 = vst [vmem:[#allocation19_spill] sm:$0xff] %v3169_v26  ;;  %2532 = vmatmul.msk.bf16.gmra.mxu3 %vm442_vm1, %v2707_v38  ;;  %2534 = vmatmul.msk.bf16.gmra.mxu0 %vm442_vm1, %v2707_v38 }
  0xb3   :  { %2535 = vmatmul.msk.bf16.vlgmr.msrb.gmra.mxu1 %vm442_vm1, %v2702_v37 }
  0xb5   :  { %2537 = vmatmul.msk.bf16.vlgmr.msrb.gmra.mxu2 %vm442_vm1, %v2702_v37  ;;  %v3179_v27 = vpop.f32.mrf.mxu3 }
  0xb6   :  { %4997 = vst [vmem:[#allocation20_spill] sm:$0xff] %v3179_v27 }
  0xb7   :  { %v3183_v29 = vpop.f32.mrf.mxu0 }
  0xb8   :  { %v3181_v28 = vpop.f32.mrf.mxu2  ;;  %4998 = vst [vmem:[#allocation21_spill] sm:$0xff] %v3183_v29  ;;  %v3185_v30 = vpop.f32.mrf.mxu1 }
  0xb9   :  { %4999 = vst [vmem:[#allocation22_spill] sm:$0xff] %v3185_v30 }
  0xbd   :  { %v3187_v31 = vpop.f32.mrf.mxu3 }
  0xbe   :  { %5000 = vst [vmem:[#allocation23_spill] sm:$0xff] %v3187_v31 }
  0xbf   :  { %v3191_v33 = vpop.f32.mrf.mxu0 }
  0xc0   :  { %v3189_v32 = vpop.f32.mrf.mxu2  ;;  %5002 = vst [vmem:[#allocation25_spill] sm:$0xff] %v3191_v33  ;;  %v3193_v36 = vpop.f32.mrf.mxu1 }
  0xc1   :  { %5001 = vst [vmem:[#allocation24_spill] sm:$0xff] %v3189_v32 }
  0xc2   :  { %5003 = vst [vmem:[#allocation26_spill] sm:$0xff] %v3193_v36  ;;  %2539 = vmatmul.msk.bf16.vlgmr.msra.gmra.mxu3 %vm442_vm1, %v2702_v37  ;;  %2541 = vmatmul.msk.bf16.vlgmr.msra.gmra.mxu0 %vm442_vm1, %v2702_v37 }
  0xc3   :  { %2536 = vmatmul.msk.bf16.gmra.mxu1 %vm442_vm1, %v2707_v38 }
  0xc5   :  { %2538 = vmatmul.msk.bf16.gmra.mxu2 %vm442_vm1, %v2707_v38  ;;  %v3203_v39 = vpop.f32.mrf.mxu3 }
  0xc6   :  { %5004 = vst [vmem:[#allocation27_spill] sm:$0xff] %v3203_v39 }
  0xc7   :  { %v3207_v41 = vpop.f32.mrf.mxu0 }
  0xc8   :  { %v3205_v40 = vpop.f32.mrf.mxu2  ;;  %5006 = vst [vmem:[#allocation29_spill] sm:$0xff] %v3207_v41  ;;  %v3209_v44 = vpop.f32.mrf.mxu1 }
  0xc9   :  { %5005 = vst [vmem:[#allocation28_spill] sm:$0xff] %v3205_v40 }
  0xca   :  { %5007 = vst [vmem:[#allocation30_spill] sm:$0xff] %v3209_v44 }
  0xcd   :  { %v3211_v46 = vpop.f32.mrf.mxu3 }
  0xce   :  { %5008 = vst [vmem:[#allocation31_spill] sm:$0xff] %v3211_v46 }
  0xcf   :  { %v3215_v49 = vpop.f32.mrf.mxu0 }
  0xd0   :  { %v3213_v48 = vpop.f32.mrf.mxu2  ;;  %5010 = vst [vmem:[#allocation33_spill] sm:$0xff] %v3215_v49  ;;  %v3217_v50 = vpop.f32.mrf.mxu1 }
  0xd1   :  { %5009 = vst [vmem:[#allocation32_spill] sm:$0xff] %v3213_v48 }
  0xd2   :  { %5011 = vst [vmem:[#allocation34_spill] sm:$0xff] %v3217_v50  ;;  %2540 = vmatmul.msk.bf16.gmra.mxu3 %vm442_vm1, %v2707_v38  ;;  %2542 = vmatmul.msk.bf16.gmra.mxu0 %vm442_vm1, %v2707_v38 }
  0xd3   :  { %2543 = vmatmul.msk.bf16.vlgmr.msra.gmra.mxu1 %vm442_vm1, %v2702_v37 }
  0xd5   :  { %2545 = vmatmul.msk.bf16.vlgmr.msra.gmra.mxu2 %vm442_vm1, %v2702_v37  ;;  %v3227_v51 = vpop.f32.mrf.mxu3 }
  0xd6   :  { %5012 = vst [vmem:[#allocation35_spill] sm:$0xff] %v3227_v51 }
  0xd7   :  { %v3231_v53 = vpop.f32.mrf.mxu0 }
  0xd8   :  { %v3229_v52 = vpop.f32.mrf.mxu2  ;;  %5013 = vst [vmem:[#allocation36_spill] sm:$0xff] %v3231_v53  ;;  %v3233_v54 = vpop.f32.mrf.mxu1 }
  0xdd   :  { %v3235_v55 = vpop.f32.mrf.mxu3 }
  0xde   :  { %5014 = vst [vmem:[#allocation37_spill] sm:$0xff] %v3235_v55 }
  0xdf   :  { %v3239_v58 = vpop.f32.mrf.mxu0 }
  0xe0   :  { %v3237_v56 = vpop.f32.mrf.mxu2  ;;  %v3241_v59 = vpop.f32.mrf.mxu1 }
  0xe1   :  { %5015 = vst [vmem:[#allocation38_spill] sm:$0xff] %v3241_v59 }
  0xe3   :  { %2544 = vmatmul.msk.bf16.gmra.mxu1 %vm442_vm1, %v2707_v38 }
  0xe5   :  { %2546 = vmatmul.msk.bf16.gmra.mxu2 %vm442_vm1, %v2707_v38  ;;  %v3247_v37 = vpop.f32.mrf.mxu3 }
  0xe7   :  { %v3251_v62 = vpop.f32.mrf.mxu0 }
  0xe8   :  { %v3249_v60 = vpop.f32.mrf.mxu2  ;;  %v3253_v0 = vpop.f32.mrf.mxu1 }
  0xe9   :  { %5016 = vst [vmem:[#allocation39_spill] sm:$0xff] %v3249_v60 }
  0xea   :  { %5017 = vst [vmem:[#allocation40_spill] sm:$0xff] %v3253_v0 }
  0xed   :  { %v3255_v1 = vpop.f32.mrf.mxu3 }
  0xef   :  { %v3259_v4 = vpop.f32.mrf.mxu0 }
  0xf0   :  { %v3257_v3 = vpop.f32.mrf.mxu2  ;;  %5019 = vst [vmem:[#allocation42_spill] sm:$0xff] %v3259_v4  ;;  %v3261_v5 = vpop.f32.mrf.mxu1 }
  0xf1   :  { %5018 = vst [vmem:[#allocation41_spill] sm:$0xff] %v3257_v3 }
  0xf2   :  { %5020 = vst [vmem:[#allocation43_spill] sm:$0xff] %v3261_v5 }
  0xf5   :  { %v3263_v6 = vpop.f32.mrf.mxu3 }
  0xf6   :  { %5021 = vst [vmem:[#allocation44_spill] sm:$0xff] %v3263_v6 }
  0xf7   :  { %v3267_v38 = vpop.f32.mrf.mxu0 }
  0xf8   :  { %v3265_v7 = vpop.f32.mrf.mxu2  ;;  %5023 = vst [vmem:[#allocation46_spill] sm:$0xff] %v3267_v38  ;;  %v3269_v8 = vpop.f32.mrf.mxu1 }
  0xf9   :  { %5022 = vst [vmem:[#allocation45_spill] sm:$0xff] %v3265_v7 }
  0xfd   :  { %v3271_v9 = vpop.f32.mrf.mxu3 }
  0xfe   :  { %5024 = vst [vmem:[#allocation47_spill] sm:$0xff] %v3271_v9 }
  0xff   :  { %v3275_v12 = vpop.f32.mrf.mxu0 }
 0x100   :  { %v3273_v11 = vpop.f32.mrf.mxu2  ;;  %5026 = vst [vmem:[#allocation49_spill] sm:$0xff] %v3275_v12  ;;  %v3277_v14 = vpop.f32.mrf.mxu1 }
 0x101   :  { %5025 = vst [vmem:[#allocation48_spill] sm:$0xff] %v3273_v11 }
 0x102   :  { %5027 = vst [vmem:[#allocation50_spill] sm:$0xff] %v3277_v14  ;;  %v1044_v14 = vadd.f32 %v3063_v35, %v3061_v34 }
 0x105   :  { %v3279_v17 = vpop.f32.mrf.mxu3 }
 0x106   :  { %5028 = vst [vmem:[#allocation51_spill] sm:$0xff] %v3279_v17 }
 0x107   :  { %v3283_v19 = vpop.f32.mrf.mxu0 }
 0x108   :  { %v3281_v18 = vpop.f32.mrf.mxu2  ;;  %5030 = vst [vmem:[#allocation53_spill] sm:$0xff] %v3283_v19  ;;  %v3285_v21 = vpop.f32.mrf.mxu1 }
 0x109   :  { %5029 = vst [vmem:[#allocation52_spill] sm:$0xff] %v3281_v18 }
 0x10a   :  { %5031 = vst [vmem:[#allocation54_spill] sm:$0xff] %v3285_v21  ;;  %v1045_v21 = vadd.f32 %v1044_v14, %v3079_v43 }
 0x10d   :  { %v3287_v22 = vpop.f32.mrf.mxu3 }
 0x10e   :  { %5032 = vst [vmem:[#allocation55_spill] sm:$0xff] %v3287_v22 }
 0x10f   :  { %v3291_v38 = vpop.f32.mrf.mxu0 }
 0x110   :  { %v3289_v24 = vpop.f32.mrf.mxu2  ;;  %5034 = vst [vmem:[#allocation57_spill] sm:$0xff] %v3291_v38  ;;  %v3293_v9 = vpop.f32.mrf.mxu1 }
 0x111   :  { %5033 = vst [vmem:[#allocation56_spill] sm:$0xff] %v3289_v24  ;;  %v1046_v24 = vadd.f32 %v1045_v21, %v3137_v10 }
 0x115   :  { %v3295_v3 = vpop.f32.mrf.mxu3 }
 0x116   :  { %5035 = vst [vmem:[#allocation58_spill] sm:$0xff] %v3295_v3  ;;  %v1074_v3 = vadd.f32 %v3086_v47, %v3081_v45 }
 0x117   :  { %v3303_v19 = vpop.f32.mrf.mxu0 }
 0x118   :  { %v3297_v4 = vpop.f32.mrf.mxu2  ;;  %v3301_v18 = vpop.f32.mrf.mxu1  ;;  %5038 = vst [vmem:[#allocation61_spill] sm:$0xff] %v3303_v19  ;;  %v1075_v34 = vadd.f32 %v1074_v3, %v3105_v61 }
 0x119   :  { %5036 = vst [vmem:[#allocation59_spill] sm:$0xff] %v3297_v4  ;;  %v1047_v4 = vadd.f32 %v1046_v24, %v3107_v63  ;;  %v1103_v24 = vadd.f32 %v3115_v2, %v3077_v42 }
 0x11a   :  { %5037 = vst [vmem:[#allocation60_spill] sm:$0xff] %v3301_v18  ;;  %v1076_v43 = vadd.f32 %v1075_v34, %v3157_v20 }
 0x11b   :  { %v1048_v19 = vadd.f32 %v1047_v4, %v3169_v26  ;;  %v1104_v3 = vadd.f32 %v1103_v24, %v3145_v13 }
 0x11c   :  { %v1077_v47 = vadd.f32 %v1076_v43, %v3147_v15 }
 0x11d   :  { %v3306_v0 = vpop.f32.mrf.mxu3  ;;  %v1049_v21 = vadd.f32 %v1048_v19, %v3181_v28  ;;  %v1105_v20 = vadd.f32 %v1104_v3, %v3179_v27 }
 0x11e   :  { %5039 = vst [vmem:[#allocation62_spill] sm:$0xff] %v3306_v0  ;;  %v1078_v4 = vadd.f32 %v1077_v47, %v3185_v30  ;;  %v1132_v47 = vadd.f32 %v3149_v16, %v3096_v57 }
 0x11f   :  { %v3316_v35 = vpop.f32.mrf.mxu0  ;;  %v1050_v0 = vadd.f32 %v1049_v21, %v3203_v39 }
 0x120   :  { %v3309_v38 = vpop.f32.mrf.mxu2  ;;  %v3311_v22 = vpop.f32.mrf.mxu1  ;;  %5042 = vst [vmem:[#allocation65_spill] sm:$0xff] %v3316_v35  ;;  %v1079_v21 = vadd.f32 %v1078_v4, %v3189_v32  ;;  %v1133_v3 = vadd.f32 %v1132_v47, %v3165_v23 }
 0x121   :  { %5040 = vst [vmem:[#allocation63_spill] sm:$0xff] %v3309_v38  ;;  %v1051_v61 = vadd.f32 %v1050_v0, %v3191_v33  ;;  %v1106_v0 = vadd.f32 %v1105_v20, %v3167_v25 }
 0x122   :  { %5041 = vst [vmem:[#allocation64_spill] sm:$0xff] %v3311_v22  ;;  %v1080_v43 = vadd.f32 %v1079_v21, %v3211_v46  ;;  %v1134_v27 = vadd.f32 %v1133_v3, %v3187_v31 }
 0x123   :  { %v1052_v45 = vadd.f32 %v1051_v61, %v3217_v50  ;;  %v1107_v4 = vadd.f32 %v1106_v0, %v3193_v36  ;;  %v5060_v36 = vld [vmem:[#allocation41_spill] sm:$0xff] }
 0x124   :  { %v1081_v61 = vadd.f32 %v1080_v43, %v3207_v41  ;;  %v1135_v3 = vadd.f32 %v1134_v27, %v3183_v29  ;;  %v5057_v29 = vld [vmem:[#allocation40_spill] sm:$0xff] }
 0x125   :  { %v3320_v14 = vpop.f32.mrf.mxu3  ;;  %v1053_v24 = vadd.f32 %v1052_v45, %v3229_v52  ;;  %v1108_v45 = vadd.f32 %v1107_v4, %v3205_v40 }
 0x126   :  { %5043 = vst [vmem:[#allocation66_spill] sm:$0xff] %v3320_v14  ;;  %v1082_v42 = vadd.f32 %v1081_v61, %v3233_v54 }
 0x127   :  { %v3337_v19 = vpop.f32.mrf.mxu0  ;;  %v1054_v2 = vadd.f32 %v1053_v24, %v3247_v37  ;;  %v1109_v24 = vadd.f32 %v1108_v45, %v3227_v51 }
 0x128   :  { %v3324_v10 = vpop.f32.mrf.mxu2  ;;  %v3327_v22 = vpop.f32.mrf.mxu1  ;;  %v1083_v47 = vadd.f32 %v1082_v42, %v3237_v56 }
 0x129   :  { %5044 = vst [vmem:[#allocation67_spill] sm:$0xff] %v3324_v10  ;;  %v1055_v16 = vadd.f32 %v1054_v2, %v3239_v58  ;;  %v1136_v2 = vadd.f32 %v1135_v3, %v3209_v44  ;;  %v1110_v31 = vadd.f32 %v1109_v24, %v3215_v49  ;;  %v5055_v44 = vld [vmem:[#allocation55_spill] sm:$0xff] }
 0x12a   :  { %5045 = vst [vmem:[#allocation68_spill] sm:$0xff] %v3327_v22  ;;  %v1084_v4 = vadd.f32 %v1083_v47, %v3255_v1 }
 0x12b   :  { %v1056_v43 = vadd.f32 %v1055_v16, %v3261_v5  ;;  %v1137_v45 = vadd.f32 %v1136_v2, %v3213_v48  ;;  %v1111_v42 = vadd.f32 %v1110_v31, %v3241_v59 }
 0x12c   :  { %v1085_v16 = vadd.f32 %v1084_v4, %v3251_v62 }
 0x12d   :  { %v3335_v34 = vpop.f32.mrf.mxu3  ;;  %v1057_v61 = vadd.f32 %v1056_v43, %v3265_v7  ;;  %v1138_v27 = vadd.f32 %v1137_v45, %v3235_v55  ;;  %v1112_v47 = vadd.f32 %v1111_v42, %v3249_v60  ;;  %v5056_v55 = vld [vmem:[#allocation59_spill] sm:$0xff]  ;;  %v5058_v60 = vld [vmem:[#allocation42_spill] sm:$0xff] }
 0x12e   :  { %5046 = vst [vmem:[#allocation69_spill] sm:$0xff] %v3335_v34  ;;  %v1086_v43 = vadd.f32 %v1085_v16, %v3269_v8 }
 0x12f   :  { %v3363_v20 = vpop.f32.mrf.mxu0  ;;  %v1058_v23 = vadd.f32 %v1057_v61, %v3279_v17  ;;  %v1113_v2 = vadd.f32 %v1112_v47, %v3263_v6  ;;  %v1139_v48 = vadd.f32 %v1138_v27, %v3231_v53 }
 0x130   :  { %v3342_v39 = vpop.f32.mrf.mxu2  ;;  %v3346_v13 = vpop.f32.mrf.mxu1  ;;  %5051 = vst [vmem:[#allocation74_spill] sm:$0xff] %v3363_v20  ;;  %v1087_v31 = vadd.f32 %v1086_v43, %v3273_v11  ;;  %v5062_v43 = vld [vmem:[#allocation50_spill] sm:$0xff]  ;;  %v5063_v11 = vld [vmem:[#allocation53_spill] sm:$0xff] }
 0x131   :  { %5047 = vst [vmem:[#allocation70_spill] sm:$0xff] %v3342_v39  ;;  %v1059_v24 = vadd.f32 %v1058_v23, %v3275_v12  ;;  %v1140_v16 = vadd.f32 %v1139_v48, %v5057_v29  ;;  %v1114_v23 = vadd.f32 %v1113_v2, %v5058_v60  ;;  %v5068_v60 = vld [vmem:[#allocation58_spill] sm:$0xff] }
 0x132   :  { %5048 = vst [vmem:[#allocation71_spill] sm:$0xff] %v3346_v13  ;;  %v1088_v45 = vadd.f32 %v1087_v31, %v5055_v44  ;;  %v5065_v31 = vld [vmem:[#allocation47_spill] sm:$0xff]  ;;  %v5066_v44 = vld [vmem:[#allocation52_spill] sm:$0xff] }
 0x133   :  { %v1060_v4 = vadd.f32 %v1059_v24, %v3293_v9  ;;  %v1141_v47 = vadd.f32 %v1140_v16, %v5060_v36  ;;  %v1115_v24 = vadd.f32 %v1114_v23, %v5062_v43  ;;  %v5069_v43 = vld [vmem:[#allocation46_spill] sm:$0xff] }
 0x134   :  { %v1089_v27 = vadd.f32 %v1088_v45, %v5063_v11 }
 0x135   :  { %v3356_v21 = vpop.f32.mrf.mxu3  ;;  %v1061_v42 = vadd.f32 %v1060_v4, %v5056_v55  ;;  %v1142_v4 = vadd.f32 %v1141_v47, %v5065_v31  ;;  %v1116_v48 = vadd.f32 %v1115_v24, %v5066_v44  ;;  %v5071_v24 = vld [vmem:[#allocation54_spill] sm:$0xff]  ;;  %v5072_v44 = vld [vmem:[#allocation57_spill] sm:$0xff] }
 0x136   :  { %5049 = vst [vmem:[#allocation72_spill] sm:$0xff] %v3356_v21  ;;  %v1090_v2 = vadd.f32 %v1089_v27, %v3301_v18 }
 0x137   :  { %v3389_v61 = vpop.f32.mrf.mxu0  ;;  %v1062_v59 = vadd.f32 %v1061_v42, %v3320_v14  ;;  %v1117_v16 = vadd.f32 %v1116_v48, %v5068_v60  ;;  %v1143_v45 = vadd.f32 %v1142_v4, %v5069_v43  ;;  %v5074_v48 = vld [vmem:[#allocation56_spill] sm:$0xff]  ;;  %v5077_v43 = vld [vmem:[#allocation62_spill] sm:$0xff] }
 0x138   :  { %v3361_v57 = vpop.f32.mrf.mxu2  ;;  %v3368_v0 = vpop.f32.mrf.mxu1  ;;  %5054 = vst [vmem:[#allocation77_spill] sm:$0xff] %v3389_v61  ;;  %v1091_v36 = vadd.f32 %v1090_v2, %v3309_v38 }
 0x139   :  { %5050 = vst [vmem:[#allocation73_spill] sm:$0xff] %v3361_v57  ;;  %v1063_v42 = vadd.f32 %v1062_v59, %v3316_v35  ;;  %v1144_v27 = vadd.f32 %v1143_v45, %v5071_v24  ;;  %v1118_v59 = vadd.f32 %v1117_v16, %v5072_v44 }
 0x13a   :  { %v1092_v11 = vadd.f32 %v1091_v36, %v3335_v34 }
 0x13b   :  { %v1064_v23 = vadd.f32 %v1063_v42, %v3346_v13  ;;  %v1145_v2 = vadd.f32 %v1144_v27, %v5074_v48  ;;  %v5076_v42 = vld [vmem:[#allocation64_spill] sm:$0xff] }
 0x13c   :  { %v1119_v4 = vadd.f32 %v1118_v59, %v5076_v42  ;;  %v1093_v36 = vadd.f32 %v1092_v11, %v3337_v19 }
 0x13d   :  { %v3377_v51 = vpop.f32.mrf.mxu3  ;;  %v1065_v47 = vadd.f32 %v1064_v23, %v3361_v57  ;;  %v1146_v23 = vadd.f32 %v1145_v2, %v5077_v43  ;;  %v5078_v2 = vld [vmem:[#allocation61_spill] sm:$0xff] }
 0x13e   :  { %5052 = vst [vmem:[#allocation75_spill] sm:$0xff] %v3377_v51  ;;  %v1120_v34 = vadd.f32 %v1119_v4, %v3324_v10  ;;  %v1094_v45 = vadd.f32 %v1093_v36, %v3368_v0 }
 0x13f   :  { %v3413_v29 = vpop.f32.mrf.mxu0  ;;  %v1147_v4 = vadd.f32 %v1146_v23, %v5078_v2 }
 0x140   :  { %v3381_v40 = vpop.f32.mrf.mxu2  ;;  %v3387_v3 = vpop.f32.mrf.mxu1  ;;  %5067 = vst [vmem:[#allocation80_spill] sm:$0xff] %v3413_v29  ;;  %v1121_v24 = vadd.f32 %v1120_v34, %v3356_v21 }
 0x141   :  { %5053 = vst [vmem:[#allocation76_spill] sm:$0xff] %v3387_v3  ;;  %v1095_v27 = vadd.f32 %v1094_v45, %v3381_v40  ;;  %v1148_v10 = vadd.f32 %v1147_v4, %v3327_v22 }
 0x142   :  { %v1122_v34 = vadd.f32 %v1121_v24, %v3363_v20 }
 0x143   :  { %v1149_v21 = vadd.f32 %v1148_v10, %v3342_v39 }
 0x145   :  { %v3403_v6 = vpop.f32.mrf.mxu3  ;;  %v1150_v23 = vadd.f32 %v1149_v21, %v3377_v51 }
 0x146   :  { %5061 = vst [vmem:[#allocation78_spill] sm:$0xff] %v3403_v6  ;;  %v1066_v18 = vadd.f32 %v1065_v47, %v3403_v6 }
 0x147   :  { %v3437_v47 = vpop.f32.mrf.mxu0 }
 0x148   :  { %v3400_v49 = vpop.f32.mrf.mxu2  ;;  %v3407_v53 = vpop.f32.mrf.mxu1  ;;  %v1067_v16 = vadd.f32 %v1066_v18, %v3413_v29 }
 0x149   :  { %5059 = vst [vmem:[#allocation59_spill] sm:$0xff] %v3400_v49 }
 0x14a   :  { %5064 = vst [vmem:[#allocation79_spill] sm:$0xff] %v3407_v53 }
 0x14d   :  { %v3429_v60 = vpop.f32.mrf.mxu3 }
 0x14e   :  { %5075 = vst [vmem:[#allocation83_spill] sm:$0xff] %v3429_v60  ;;  %v1096_v36 = vadd.f32 %v1095_v27, %v3429_v60 }
 0x150   :  { %v3421_v31 = vpop.f32.mrf.mxu2  ;;  %v3426_v25 = vpop.f32.mrf.mxu1  ;;  %v1097_v42 = vadd.f32 %v1096_v36, %v3437_v47  ;;  %v1151_v36 = vadd.f32 %v1150_v23, %v3389_v61 }
 0x151   :  { %5070 = vst [vmem:[#allocation81_spill] sm:$0xff] %v3421_v31  ;;  %v1068_v59 = vadd.f32 %v1067_v16, %v3426_v25  ;;  %v1123_v16 = vadd.f32 %v1122_v34, %v3387_v3 }
 0x152   :  { %5073 = vst [vmem:[#allocation82_spill] sm:$0xff] %v3426_v25  ;;  %v1152_v21 = vadd.f32 %v1151_v36, %v3407_v53  ;;  %v2621_v53 = vmov 3362.0  }
 0x153   :  { %v1124_v27 = vadd.f32 %v1123_v16, %v3400_v49  ;;  %2611 = vrcp.f32 %v2621_v53  ;;  %v5090_v53 = vld [vmem:[#allocation5_spill] sm:$0xff] }
 0x155   :  { %v3452_v45 = vpop.f32.mrf.mxu3 }
 0x156   :  { %5079 = vst [vmem:[#allocation84_spill] sm:$0xff] %v3452_v45  ;;  %v1125_v4 = vadd.f32 %v1124_v27, %v3452_v45 }
 0x158   :  { %v3441_v48 = vpop.f32.mrf.mxu2  ;;  %v3448_v43 = vpop.f32.mrf.mxu1 }
 0x159   :  { %v1070_v11 = vsel %vm1069_vm2, %v3441_v48, 0.0 }
 0x15a   :  { %v1071_v18 = vadd.f32 %v1070_v11, %v1068_v59  ;;  %v1098_v59 = vadd.f32 %v1097_v42, %v3448_v43  ;;  %v3462_v11 = vpop.f32.mrf.mxu0  ;;  %v1153_v42 = vadd.f32 %v1152_v21, %v3421_v31 }
 0x15b   :  { %5081 = vst [vmem:[#allocation86_spill] sm:$0xff] %v3462_v11  ;;  %v1126_v34 = vadd.f32 %v1125_v4, %v3462_v11 }
 0x15c   :  { %1072 = vadd.xlane.f32.xlu0 %v1071_v18 }
 0x15d   :  { %v3472_v16 = vpop.f32.mrf.mxu3 }
 0x15e   :  { %5083 = vst [vmem:[#allocation88_spill] sm:$0xff] %v3472_v16 }
 0x160   :  { %v3459_v2 = vpop.f32.mrf.mxu2  ;;  %v3467_v18 = vpop.f32.mrf.mxu1 }
 0x161   :  { %5080 = vst [vmem:[#allocation85_spill] sm:$0xff] %v3459_v2  ;;  %v1099_v24 = vsel %vm1069_vm2, %v3459_v2, 0.0  ;;  %v1127_v39 = vadd.f32 %v1126_v34, %v3467_v18 }
 0x162   :  { %v1100_v10 = vadd.f32 %v1099_v24, %v1098_v59  ;;  %5082 = vst [vmem:[#allocation87_spill] sm:$0xff] %v3467_v18  ;;  %v1154_v59 = vadd.f32 %v1153_v42, %v3472_v16  ;;  %v3481_v23 = vpop.f32.mrf.mxu0  ;;  %v2612_v42 = vpop.eup %2611 }
 0x163   :  { %5085 = vst [vmem:[#allocation90_spill] sm:$0xff] %v3481_v23  ;;  %vm1166_vm3 = vweird.f32 %v2612_v42 }
 0x164   :  { %1101 = vadd.xlane.f32.xlu0 %v1100_v10  ;;  %v1155_v4 = vadd.f32 %v1154_v59, %v3481_v23 }
 0x168   :  { %v3475_v51 = vpop.f32.mrf.mxu2  ;;  %v3483_v10 = vpop.f32.mrf.mxu1 }
 0x169   :  { %5084 = vst [vmem:[#allocation89_spill] sm:$0xff] %v3475_v51  ;;  %v1128_v27 = vsel %vm1069_vm2, %v3475_v51, 0.0  ;;  %v1156_v36 = vadd.f32 %v1155_v4, %v3483_v10 }
 0x16a   :  { %v1129_v24 = vadd.f32 %v1128_v27, %v1127_v39  ;;  %5086 = vst [vmem:[#allocation91_spill] sm:$0xff] %v3483_v10  ;;  %v1162_v39 = vmul.f32 3362.0, %v2612_v42  ;;  %v5088_v10 = vld [vmem:[#allocation2_spill] sm:$0xff] }
 0x16c   :  { %1130 = vadd.xlane.f32.xlu1 %v1129_v24  ;;  %v1163_v27 = vsub.f32 1.0, %v1162_v39 }
 0x16e   :  { %v1164_v16 = vmul.f32 %v2612_v42, %v1163_v27 }
 0x170   :  { %v3487_v21 = vpop.f32.mrf.mxu2  ;;  %v1165_v24 = vadd.f32 %v2612_v42, %v1164_v16  ;;  %v5091_v16 = vld [vmem:[#allocation12_spill] sm:$0xff] }
 0x171   :  { %5087 = vst [vmem:[#allocation92_spill] sm:$0xff] %v3487_v21  ;;  %v1157_v34 = vsel %vm1069_vm2, %v3487_v21, 0.0 }
 0x172   :  { %v1158_v31 = vadd.f32 %v1157_v34, %v1156_v36  ;;  %v3491_v61 = vsel %vm1166_vm3, %v2612_v42, %v1165_v24  ;;  %v5089_v36 = vld [vmem:[#allocation3_spill] sm:$0xff] }
 0x174   :  { %1159 = vadd.xlane.f32.xlu1 %v1158_v31 }
 0x1cf   :  { %v1073_v59 = vpop.xlane.xlu0 %1072 }
 0x1d0   :  { %v3494_v4 = vmul.f32 %v3491_v61, %v1073_v59 }
 0x1d2   :  { %v1172_v23 = vsub.f32 %v5088_v10, %v3494_v4  ;;  %v1173_v31 = vsub.f32 %v5089_v36, %v3494_v4  ;;  %v1174_v34 = vsub.f32 %v5090_v53, %v3494_v4  ;;  %v1175_v27 = vsub.f32 %v5091_v16, %v3494_v4  ;;  %v5092_v16 = vld [vmem:[#allocation27_spill] sm:$0xff] }
 0x1d3   :  { %v1176_v42 = vsub.f32 %v3107_v63, %v3494_v4  ;;  %v1177_v10 = vsub.f32 %v3169_v26, %v3494_v4  ;;  %v1178_v36 = vsub.f32 %v3181_v28, %v3494_v4  ;;  %v1179_v11 = vsub.f32 %v5092_v16, %v3494_v4 }
 0x1d4   :  { %v1280_v21 = vmul.f32 %v1172_v23, %v1172_v23  ;;  %v1281_v39 = vmul.f32 %v1173_v31, %v1173_v31  ;;  %v1282_v24 = vmul.f32 %v1174_v34, %v1174_v34  ;;  %v1283_v18 = vmul.f32 %v1175_v27, %v1175_v27  ;;  %v5093_v27 = vld [vmem:[#allocation6_spill] sm:$0xff] }
 0x1d5   :  { %v1284_v53 = vmul.f32 %v1176_v42, %v1176_v42  ;;  %v1285_v63 = vmul.f32 %v1177_v10, %v1177_v10  ;;  %v1182_v10 = vsub.f32 %v3229_v52, %v3494_v4 }
 0x1d6   :  { %v1388_v59 = vadd.f32 %v1281_v39, %v1280_v21  ;;  %v1180_v21 = vsub.f32 %v3191_v33, %v3494_v4  ;;  %v1286_v39 = vmul.f32 %v1178_v36, %v1178_v36  ;;  %v5095_v33 = vld [vmem:[#allocation9_spill] sm:$0xff] }
 0x1d7   :  { %v1102_v22 = vpop.xlane.xlu0 %1101 }
 0x1d8   :  { %v1389_v51 = vadd.f32 %v1388_v59, %v1282_v24  ;;  %v3511_v31 = vmul.f32 %v3491_v61, %v1102_v22  ;;  %v5094_v59 = vld [vmem:[#allocation7_spill] sm:$0xff]  ;;  %v1287_v22 = vmul.f32 %v1179_v11, %v1179_v11  ;;  %v5096_v11 = vld [vmem:[#allocation16_spill] sm:$0xff] }
 0x1da   :  { %v1390_v23 = vadd.f32 %v1389_v51, %v1283_v18  ;;  %v1199_v24 = vsub.f32 %v5093_v27, %v3511_v31  ;;  %v1200_v42 = vsub.f32 %v5094_v59, %v3511_v31  ;;  %v1181_v51 = vsub.f32 %v3217_v50, %v3494_v4 }
 0x1db   :  { %v1201_v36 = vsub.f32 %v5095_v33, %v3511_v31  ;;  %v1183_v27 = vsub.f32 %v3247_v37, %v3494_v4  ;;  %v1184_v50 = vsub.f32 %v3239_v58, %v3494_v4  ;;  %v1189_v33 = vsub.f32 %v3293_v9, %v3494_v4 }
 0x1dc   :  { %v1391_v34 = vadd.f32 %v1390_v23, %v1284_v53  ;;  %v1288_v53 = vmul.f32 %v1180_v21, %v1180_v21  ;;  %v1289_v16 = vmul.f32 %v1181_v51, %v1181_v51  ;;  %v1202_v21 = vsub.f32 %v5096_v11, %v3511_v31 }
 0x1dd   :  { %v1188_v51 = vsub.f32 %v3275_v12, %v3494_v4  ;;  %v1190_v11 = vsub.f32 %v5056_v55, %v3494_v4 }
 0x1de   :  { %v1392_v26 = vadd.f32 %v1391_v34, %v1285_v63  ;;  %v1307_v63 = vmul.f32 %v1199_v24, %v1199_v24  ;;  %v1308_v34 = vmul.f32 %v1200_v42, %v1200_v42  ;;  %v1187_v24 = vsub.f32 %v3279_v17, %v3494_v4 }
 0x1df   :  { %v1290_v42 = vmul.f32 %v1182_v10, %v1182_v10  ;;  %v1191_v10 = vsub.f32 %v3320_v14, %v3494_v4  ;;  %v1131_v17 = vpop.xlane.xlu1 %1130 }
 0x1e0   :  { %v1393_v18 = vadd.f32 %v1392_v26, %v1286_v39  ;;  %v1185_v26 = vsub.f32 %v3261_v5, %v3494_v4  ;;  %v1186_v39 = vsub.f32 %v3265_v7, %v3494_v4  ;;  %v1291_v7 = vmul.f32 %v1183_v27, %v1183_v27 }
 0x1e1   :  { %v1194_v27 = vsub.f32 %v3361_v57, %v3494_v4 }
 0x1e2   :  { %v1394_v23 = vadd.f32 %v1393_v18, %v1287_v22  ;;  %v1203_v18 = vsub.f32 %v3147_v15, %v3511_v31 }
 0x1e4   :  { %v1395_v59 = vadd.f32 %v1394_v23, %v1288_v53  ;;  %v1309_v53 = vmul.f32 %v1201_v36, %v1201_v36  ;;  %v1417_v23 = vadd.f32 %v1308_v34, %v1307_v63  ;;  %v1192_v36 = vsub.f32 %v3316_v35, %v3494_v4 }
 0x1e5   :  { %v1193_v63 = vsub.f32 %v3346_v13, %v3494_v4  ;;  %v1292_v34 = vmul.f32 %v1184_v50, %v1184_v50  ;;  %v3564_v13 = vmul.f32 %v3491_v61, %v1131_v17  ;;  %v1206_v50 = vsub.f32 %v3211_v46, %v3511_v31  ;;  %v5097_v46 = vld [vmem:[#allocation4_spill] sm:$0xff] }
 0x1e6   :  { %v1396_v22 = vadd.f32 %v1395_v59, %v1289_v16  ;;  %v1204_v16 = vsub.f32 %v3185_v30, %v3511_v31  ;;  %v1310_v59 = vmul.f32 %v1202_v21, %v1202_v21  ;;  %v1418_v12 = vadd.f32 %v1417_v23, %v1309_v53 }
 0x1e7   :  { %v1195_v21 = vsub.f32 %v3403_v6, %v3494_v4  ;;  %v1196_v53 = vsub.f32 %v3413_v29, %v3494_v4  ;;  %v1293_v23 = vmul.f32 %v1185_v26, %v1185_v26  ;;  %v1295_v6 = vmul.f32 %v1187_v24, %v1187_v24 }
 0x1e8   :  { %v1397_v5 = vadd.f32 %v1396_v22, %v1290_v42  ;;  %v1205_v42 = vsub.f32 %v3189_v32, %v3511_v31  ;;  %v1311_v22 = vmul.f32 %v1203_v18, %v1203_v18  ;;  %v1419_v14 = vadd.f32 %v1418_v12, %v1310_v59 }
 0x1e9   :  { %v1197_v18 = vsub.f32 %v3426_v25, %v3494_v4  ;;  %v1198_v12 = vsub.f32 %v3441_v48, %v3494_v4  ;;  %v1294_v59 = vmul.f32 %v1186_v39, %v1186_v39  ;;  %v1297_v29 = vmul.f32 %v1189_v33, %v1189_v33  ;;  %v5098_v39 = vld [vmem:[#allocation11_spill] sm:$0xff] }
 0x1ea   :  { %v1398_v15 = vadd.f32 %v1397_v5, %v1291_v7  ;;  %v1312_v5 = vmul.f32 %v1204_v16, %v1204_v16  ;;  %v1420_v7 = vadd.f32 %v1419_v14, %v1311_v22  ;;  %v1313_v26 = vmul.f32 %v1205_v42, %v1205_v42 }
 0x1eb   :  { %v1208_v14 = vsub.f32 %v3233_v54, %v3511_v31  ;;  %v1314_v16 = vmul.f32 %v1206_v50, %v1206_v50  ;;  %v1226_v25 = vsub.f32 %v5097_v46, %v3564_v13  ;;  %v1298_v24 = vmul.f32 %v1190_v11, %v1190_v11 }
 0x1ec   :  { %v1399_v30 = vadd.f32 %v1398_v15, %v1292_v34  ;;  %v1207_v15 = vsub.f32 %v3207_v41, %v3511_v31  ;;  %v1421_v17 = vadd.f32 %v1420_v7, %v1312_v5  ;;  %v1296_v34 = vmul.f32 %v1188_v51, %v1188_v51 }
 0x1ed   :  { %v1300_v35 = vmul.f32 %v1192_v36, %v1192_v36  ;;  %v1301_v42 = vmul.f32 %v1193_v63, %v1193_v63  ;;  %v1209_v33 = vsub.f32 %v3237_v56, %v3511_v31  ;;  %v1302_v5 = vmul.f32 %v1194_v27, %v1194_v27 }
 0x1ee   :  { %v1400_v32 = vadd.f32 %v1399_v30, %v1293_v23  ;;  %v1422_v22 = vadd.f32 %v1421_v17, %v1313_v26  ;;  %v1227_v30 = vsub.f32 %v5098_v39, %v3564_v13  ;;  %v1299_v23 = vmul.f32 %v1191_v10, %v1191_v10  ;;  %v5099_v17 = vld [vmem:[#allocation13_spill] sm:$0xff] }
 0x1ef   :  { %v1210_v50 = vsub.f32 %v3255_v1, %v3511_v31  ;;  %v1228_v39 = vsub.f32 %v5099_v17, %v3564_v13  ;;  %v1334_v11 = vmul.f32 %v1226_v25, %v1226_v25  ;;  %v1303_v36 = vmul.f32 %v1195_v21, %v1195_v21  ;;  %v5101_v21 = vld [vmem:[#allocation18_spill] sm:$0xff] }
 0x1f0   :  { %v1401_v57 = vadd.f32 %v1400_v32, %v1294_v59  ;;  %v1315_v32 = vmul.f32 %v1207_v15, %v1207_v15  ;;  %v1423_v51 = vadd.f32 %v1422_v22, %v1314_v16  ;;  %v1316_v59 = vmul.f32 %v1208_v14, %v1208_v14 }
 0x1f1   :  { %v1335_v10 = vmul.f32 %v1227_v30, %v1227_v30  ;;  %v1211_v63 = vsub.f32 %v3251_v62, %v3511_v31  ;;  %v1304_v15 = vmul.f32 %v1196_v53, %v1196_v53  ;;  %v1317_v16 = vmul.f32 %v1209_v33, %v1209_v33  ;;  %v5102_v33 = vld [vmem:[#allocation48_spill] sm:$0xff] }
 0x1f2   :  { %v1402_v41 = vadd.f32 %v1401_v57, %v1295_v6  ;;  %v1424_v26 = vadd.f32 %v1423_v51, %v1315_v32  ;;  %v1306_v57 = vmul.f32 %v1198_v12, %v1198_v12  ;;  %v1305_v22 = vmul.f32 %v1197_v18, %v1197_v18  ;;  %v5103_v18 = vld [vmem:[#allocation26_spill] sm:$0xff] }
 0x1f3   :  { %v1212_v32 = vsub.f32 %v3269_v8, %v3511_v31  ;;  %v1318_v51 = vmul.f32 %v1210_v50, %v1210_v50  ;;  %v1230_v12 = vsub.f32 %v5101_v21, %v3564_v13  ;;  %v1446_v30 = vadd.f32 %v1335_v10, %v1334_v11 }
 0x1f4   :  { %v1403_v7 = vadd.f32 %v1402_v41, %v1296_v34  ;;  %v1425_v27 = vadd.f32 %v1424_v26, %v1316_v59  ;;  %v5100_v41 = vld [vmem:[#allocation20_spill] sm:$0xff]  ;;  %v1413_v53 = vsel %vm1069_vm2, %v1306_v57, 0.0  ;;  %v1213_v59 = vsub.f32 %v5102_v33, %v3511_v31 }
 0x1f5   :  { %v1229_v34 = vsub.f32 %v5100_v41, %v3564_v13  ;;  %v1319_v26 = vmul.f32 %v1211_v63, %v1211_v63  ;;  %v5106_v57 = vld [vmem:[#allocation28_spill] sm:$0xff]  ;;  %v1338_v21 = vmul.f32 %v1230_v12, %v1230_v12 }
 0x1f6   :  { %v1404_v6 = vadd.f32 %v1403_v7, %v1297_v29  ;;  %v1426_v25 = vadd.f32 %v1425_v27, %v1317_v16  ;;  %v1336_v29 = vmul.f32 %v1228_v39, %v1228_v39  ;;  %v5104_v16 = vld [vmem:[#allocation55_spill] sm:$0xff]  ;;  %v5105_v39 = vld [vmem:[#allocation53_spill] sm:$0xff] }
 0x1f7   :  { %v1214_v27 = vsub.f32 %v5104_v16, %v3511_v31  ;;  %v1215_v11 = vsub.f32 %v5105_v39, %v3511_v31 }
 0x1f8   :  { %v1405_v14 = vadd.f32 %v1404_v6, %v1298_v24  ;;  %v1427_v41 = vadd.f32 %v1426_v25, %v1318_v51  ;;  %v1231_v24 = vsub.f32 %v5103_v18, %v3564_v13  ;;  %v1337_v6 = vmul.f32 %v1229_v34, %v1229_v34  ;;  %v5107_v25 = vld [vmem:[#allocation60_spill] sm:$0xff] }
 0x1f9   :  { %v1447_v17 = vadd.f32 %v1446_v30, %v1336_v29  ;;  %v1216_v18 = vsub.f32 %v5107_v25, %v3511_v31  ;;  %v1321_v34 = vmul.f32 %v1213_v59, %v1213_v59  ;;  %v1160_v29 = vpop.xlane.xlu1 %1159 }
 0x1fa   :  { %v1406_v7 = vadd.f32 %v1405_v14, %v1299_v23  ;;  %v1320_v23 = vmul.f32 %v1212_v32, %v1212_v32  ;;  %v1428_v10 = vadd.f32 %v1427_v41, %v1319_v26  ;;  %v1232_v14 = vsub.f32 %v5106_v57, %v3564_v13  ;;  %v5109_v57 = vld [vmem:[#allocation69_spill] sm:$0xff] }
 0x1fb   :  { %v1448_v63 = vadd.f32 %v1447_v17, %v1337_v6  ;;  %v1339_v32 = vmul.f32 %v1231_v24, %v1231_v24  ;;  %v1218_v12 = vsub.f32 %v5109_v57, %v3511_v31  ;;  %v1322_v17 = vmul.f32 %v1214_v27, %v1214_v27 }
 0x1fc   :  { %v1407_v50 = vadd.f32 %v1406_v7, %v1300_v35  ;;  %v1217_v35 = vsub.f32 %v3309_v38, %v3511_v31  ;;  %v1429_v30 = vadd.f32 %v1428_v10, %v1320_v23  ;;  %v5108_v7 = vld [vmem:[#allocation35_spill] sm:$0xff]  ;;  %v1340_v59 = vmul.f32 %v1232_v14, %v1232_v14 }
 0x1fd   :  { %v1233_v46 = vsub.f32 %v5108_v7, %v3564_v13  ;;  %v1449_v41 = vadd.f32 %v1448_v63, %v1338_v21  ;;  %v3618_v23 = vmul.f32 %v3491_v61, %v1160_v29  ;;  %v1323_v21 = vmul.f32 %v1215_v11, %v1215_v11  ;;  %v5111_v63 = vld [vmem:[#allocation38_spill] sm:$0xff] }
 0x1fe   :  { %v1408_v51 = vadd.f32 %v1407_v50, %v1301_v42  ;;  %v1219_v42 = vsub.f32 %v3337_v19, %v3511_v31  ;;  %v1430_v6 = vadd.f32 %v1429_v30, %v1321_v34  ;;  %v5110_v50 = vld [vmem:[#allocation33_spill] sm:$0xff]  ;;  %v1221_v30 = vsub.f32 %v3381_v40, %v3511_v31 }
 0x1ff   :  { %v1234_v38 = vsub.f32 %v5110_v50, %v3564_v13  ;;  %v1450_v25 = vadd.f32 %v1449_v41, %v1339_v32  ;;  %v1341_v7 = vmul.f32 %v1233_v46, %v1233_v46  ;;  %v1222_v14 = vsub.f32 %v3429_v60, %v3511_v31 }
 0x200   :  { %v1409_v26 = vadd.f32 %v1408_v51, %v1302_v5  ;;  %v1220_v5 = vsub.f32 %v3368_v0, %v3511_v31  ;;  %v1431_v24 = vadd.f32 %v1430_v6, %v1322_v17  ;;  %v1235_v51 = vsub.f32 %v5111_v63, %v3564_v13  ;;  %v5113_v63 = vld [vmem:[#allocation8_spill] sm:$0xff] }
 0x201   :  { %v1451_v27 = vadd.f32 %v1450_v25, %v1340_v59  ;;  %v1324_v29 = vmul.f32 %v1216_v18, %v1216_v18  ;;  %v1325_v6 = vmul.f32 %v1217_v35, %v1217_v35  ;;  %v1253_v46 = vsub.f32 %v5113_v63, %v3618_v23 }
 0x202   :  { %v1410_v10 = vadd.f32 %v1409_v26, %v1303_v36  ;;  %v1432_v32 = vadd.f32 %v1431_v24, %v1323_v21  ;;  %v5112_v36 = vld [vmem:[#allocation39_spill] sm:$0xff]  ;;  %v1342_v26 = vmul.f32 %v1234_v38, %v1234_v38  ;;  %v1343_v60 = vmul.f32 %v1235_v51, %v1235_v51 }
 0x203   :  { %v1236_v41 = vsub.f32 %v5112_v36, %v3564_v13  ;;  %v1452_v11 = vadd.f32 %v1451_v27, %v1341_v7  ;;  %v1223_v24 = vsub.f32 %v3437_v47, %v3511_v31  ;;  %v1224_v38 = vsub.f32 %v3448_v43, %v3511_v31  ;;  %v5116_v7 = vld [vmem:[#allocation42_spill] sm:$0xff] }
 0x204   :  { %v1411_v34 = vadd.f32 %v1410_v10, %v1304_v15  ;;  %v5114_v15 = vld [vmem:[#allocation15_spill] sm:$0xff]  ;;  %v1433_v59 = vadd.f32 %v1432_v32, %v1324_v29  ;;  %v5115_v10 = vld [vmem:[#allocation44_spill] sm:$0xff]  ;;  %v1238_v27 = vsub.f32 %v5116_v7, %v3564_v13  ;;  %v1327_v29 = vmul.f32 %v1219_v42, %v1219_v42  ;;  %v5117_v32 = vld [vmem:[#allocation17_spill] sm:$0xff] }
 0x205   :  { %v1254_v25 = vsub.f32 %v5114_v15, %v3618_v23  ;;  %v1237_v50 = vsub.f32 %v5115_v10, %v3564_v13  ;;  %v1453_v18 = vadd.f32 %v1452_v11, %v1342_v26  ;;  %v1255_v51 = vsub.f32 %v5117_v32, %v3618_v23 }
 0x206   :  { %v1412_v17 = vadd.f32 %v1411_v34, %v1305_v22  ;;  %v1326_v22 = vmul.f32 %v1218_v12, %v1218_v12  ;;  %v1434_v35 = vadd.f32 %v1433_v59, %v1325_v6  ;;  %v1344_v34 = vmul.f32 %v1236_v41, %v1236_v41 }
 0x207   :  { %v1454_v15 = vadd.f32 %v1453_v18, %v1343_v60  ;;  %v1361_v26 = vmul.f32 %v1253_v46, %v1253_v46  ;;  %v1345_v10 = vmul.f32 %v1237_v50, %v1237_v50  ;;  %v1225_v12 = vsub.f32 %v3459_v2, %v3511_v31  ;;  %v5119_v60 = vld [vmem:[#allocation23_spill] sm:$0xff]  ;;  %v5120_v18 = vld [vmem:[#allocation52_spill] sm:$0xff] }
 0x208   :  { %v1414_v21 = vadd.f32 %v1413_v53, %v1412_v17  ;;  %v1362_v53 = vmul.f32 %v1254_v25, %v1254_v25  ;;  %v1435_v11 = vadd.f32 %v1434_v35, %v1326_v22  ;;  %v5118_v17 = vld [vmem:[#allocation50_spill] sm:$0xff]  ;;  %v1328_v6 = vmul.f32 %v1220_v5, %v1220_v5  ;;  %v5121_v35 = vld [vmem:[#allocation21_spill] sm:$0xff] }
 0x209   :  { %v1239_v63 = vsub.f32 %v5118_v17, %v3564_v13  ;;  %v1455_v36 = vadd.f32 %v1454_v15, %v1344_v34  ;;  %v1329_v59 = vmul.f32 %v1221_v30, %v1221_v30  ;;  %v1256_v41 = vsub.f32 %v5119_v60, %v3618_v23  ;;  %v5122_v17 = vld [vmem:[#allocation58_spill] sm:$0xff] }
 0x20a   :  { %1415 = vadd.xlane.f32.xlu2 %v1414_v21  ;;  %v1436_v42 = vadd.f32 %v1435_v11, %v1327_v29  ;;  %v1240_v21 = vsub.f32 %v5120_v18, %v3564_v13  ;;  %v1346_v46 = vmul.f32 %v1238_v27, %v1238_v27  ;;  %v1330_v22 = vmul.f32 %v1222_v14, %v1222_v14  ;;  %v5123_v29 = vld [vmem:[#allocation30_spill] sm:$0xff] }
 0x20b   :  { %v1456_v25 = vadd.f32 %v1455_v36, %v1345_v10  ;;  %v1257_v32 = vsub.f32 %v5121_v35, %v3618_v23  ;;  %v1363_v50 = vmul.f32 %v1255_v51, %v1255_v51  ;;  %v1475_v15 = vadd.f32 %v1362_v53, %v1361_v26  ;;  %v5124_v26 = vld [vmem:[#allocation32_spill] sm:$0xff] }
 0x20c   :  { %v1437_v34 = vadd.f32 %v1436_v42, %v1328_v6  ;;  %v1241_v5 = vsub.f32 %v5122_v17, %v3564_v13  ;;  %v1347_v30 = vmul.f32 %v1239_v63, %v1239_v63  ;;  %v1331_v2 = vmul.f32 %v1223_v24, %v1223_v24  ;;  %v5125_v24 = vld [vmem:[#allocation64_spill] sm:$0xff] }
 0x20d   :  { %v1457_v7 = vadd.f32 %v1456_v25, %v1346_v46  ;;  %v1258_v11 = vsub.f32 %v5123_v29, %v3618_v23  ;;  %v1364_v60 = vmul.f32 %v1256_v41, %v1256_v41  ;;  %v1476_v18 = vadd.f32 %v1475_v15, %v1363_v50 }
 0x20e   :  { %v1438_v27 = vadd.f32 %v1437_v34, %v1329_v59  ;;  %v1242_v14 = vsub.f32 %v5072_v44, %v3564_v13  ;;  %v1348_v36 = vmul.f32 %v1240_v21, %v1240_v21  ;;  %v1332_v51 = vmul.f32 %v1224_v38, %v1224_v38  ;;  %v5126_v59 = vld [vmem:[#allocation37_spill] sm:$0xff]  ;;  %v5127_v38 = vld [vmem:[#allocation67_spill] sm:$0xff] }
 0x20f   :  { %v1458_v10 = vadd.f32 %v1457_v7, %v1347_v30  ;;  %v1259_v53 = vsub.f32 %v5124_v26, %v3618_v23  ;;  %v1365_v6 = vmul.f32 %v1257_v32, %v1257_v32  ;;  %v1477_v42 = vadd.f32 %v1476_v18, %v1364_v60  ;;  %v5128_v32 = vld [vmem:[#allocation36_spill] sm:$0xff] }
 0x210   :  { %v1439_v63 = vadd.f32 %v1438_v27, %v1330_v22  ;;  %v1243_v46 = vsub.f32 %v5125_v24, %v3564_v13  ;;  %v1349_v25 = vmul.f32 %v1241_v5, %v1241_v5  ;;  %v1333_v41 = vmul.f32 %v1225_v12, %v1225_v12  ;;  %v5129_v5 = vld [vmem:[#allocation72_spill] sm:$0xff] }
 0x211   :  { %v1459_v29 = vadd.f32 %v1458_v10, %v1348_v36  ;;  %v1260_v50 = vsub.f32 %v5126_v59, %v3618_v23  ;;  %v1366_v15 = vmul.f32 %v1258_v11, %v1258_v11  ;;  %v1478_v34 = vadd.f32 %v1477_v42, %v1365_v6 }
 0x212   :  { %v1440_v21 = vadd.f32 %v1439_v63, %v1331_v2  ;;  %v1244_v7 = vsub.f32 %v5127_v38, %v3564_v13  ;;  %v1350_v30 = vmul.f32 %v1242_v14, %v1242_v14  ;;  %v1261_v60 = vsub.f32 %v5128_v32, %v3618_v23  ;;  %v5130_v2 = vld [vmem:[#allocation40_spill] sm:$0xff]  ;;  %v5140_v32 = vld [vmem:[#allocation61_spill] sm:$0xff] }
 0x213   :  { %v1460_v26 = vadd.f32 %v1459_v29, %v1349_v25  ;;  %v1367_v18 = vmul.f32 %v1259_v53, %v1259_v53  ;;  %v1479_v22 = vadd.f32 %v1478_v34, %v1366_v15  ;;  %v1245_v12 = vsub.f32 %v5129_v5, %v3564_v13 }
 0x214   :  { %v1441_v27 = vadd.f32 %v1440_v21, %v1332_v51  ;;  %v1351_v36 = vmul.f32 %v1243_v46, %v1243_v46  ;;  %v1442_v11 = vsel %vm1069_vm2, %v1333_v41, 0.0  ;;  %v1262_v6 = vsub.f32 %v5130_v2, %v3618_v23  ;;  %v5131_v51 = vld [vmem:[#allocation41_spill] sm:$0xff] }
 0x215   :  { %v1461_v10 = vadd.f32 %v1460_v26, %v1350_v30  ;;  %v1368_v42 = vmul.f32 %v1260_v50, %v1260_v50  ;;  %v1480_v63 = vadd.f32 %v1479_v22, %v1367_v18  ;;  %v1246_v29 = vsub.f32 %v3363_v20, %v3564_v13  ;;  %v5132_v50 = vld [vmem:[#allocation47_spill] sm:$0xff] }
 0x216   :  { %v1443_v14 = vadd.f32 %v1442_v11, %v1441_v27  ;;  %v1352_v25 = vmul.f32 %v1244_v7, %v1244_v7  ;;  %v1263_v15 = vsub.f32 %v5131_v51, %v3618_v23  ;;  %v1369_v34 = vmul.f32 %v1261_v60, %v1261_v60 }
 0x217   :  { %v1462_v53 = vadd.f32 %v1461_v10, %v1351_v36  ;;  %v1481_v21 = vadd.f32 %v1480_v63, %v1368_v42  ;;  %v1247_v26 = vsub.f32 %v3387_v3, %v3564_v13  ;;  %v1353_v46 = vmul.f32 %v1245_v12, %v1245_v12  ;;  %v5133_v10 = vld [vmem:[#allocation46_spill] sm:$0xff] }
 0x218   :  { %1444 = vadd.xlane.f32.xlu2 %v1443_v14  ;;  %v1264_v30 = vsub.f32 %v5132_v50, %v3618_v23  ;;  %v1370_v18 = vmul.f32 %v1262_v6, %v1262_v6  ;;  %v1248_v7 = vsub.f32 %v3400_v49, %v3564_v13  ;;  %v1354_v27 = vmul.f32 %v1246_v29, %v1246_v29 }
 0x219   :  { %v1463_v41 = vadd.f32 %v1462_v53, %v1352_v25  ;;  %v1482_v22 = vadd.f32 %v1481_v21, %v1369_v34  ;;  %v1265_v60 = vsub.f32 %v5133_v10, %v3618_v23  ;;  %v1371_v11 = vmul.f32 %v1263_v15, %v1263_v15  ;;  %v5134_v25 = vld [vmem:[#allocation54_spill] sm:$0xff]  ;;  %v5137_v15 = vld [vmem:[#allocation56_spill] sm:$0xff] }
 0x21a   :  { %v1249_v63 = vsub.f32 %v3452_v45, %v3564_v13  ;;  %v1355_v12 = vmul.f32 %v1247_v26, %v1247_v26  ;;  %v1266_v53 = vsub.f32 %v5134_v25, %v3618_v23  ;;  %v1372_v6 = vmul.f32 %v1264_v30, %v1264_v30  ;;  %v5135_v21 = vld [vmem:[#allocation86_spill] sm:$0xff]  ;;  %v5138_v26 = vld [vmem:[#allocation87_spill] sm:$0xff] }
 0x21b   :  { %v1464_v36 = vadd.f32 %v1463_v41, %v1353_v46  ;;  %v1483_v42 = vadd.f32 %v1482_v22, %v1370_v18  ;;  %v1250_v50 = vsub.f32 %v5135_v21, %v3564_v13  ;;  %v1356_v29 = vmul.f32 %v1248_v7, %v1248_v7  ;;  %v5136_v41 = vld [vmem:[#allocation89_spill] sm:$0xff]  ;;  %v5139_v30 = vld [vmem:[#allocation62_spill] sm:$0xff] }
 0x21c   :  { %v1252_v10 = vsub.f32 %v5136_v41, %v3564_v13  ;;  %v1267_v18 = vsub.f32 %v5137_v15, %v3618_v23  ;;  %v1373_v22 = vmul.f32 %v1265_v60, %v1265_v60  ;;  %v1269_v59 = vsub.f32 %v5140_v32, %v3618_v23  ;;  %v5170_v32 = vld [vmem:[#allocation82_spill] sm:$0xff] }
 0x21d   :  { %v1465_v14 = vadd.f32 %v1464_v36, %v1354_v27  ;;  %v1484_v34 = vadd.f32 %v1483_v42, %v1371_v11  ;;  %v1251_v27 = vsub.f32 %v5138_v26, %v3564_v13  ;;  %v1357_v36 = vmul.f32 %v1249_v63, %v1249_v63 }
 0x21e   :  { %v1268_v11 = vsub.f32 %v5139_v30, %v3618_v23  ;;  %v1374_v42 = vmul.f32 %v1266_v53, %v1266_v53  ;;  %v1358_v7 = vmul.f32 %v1250_v50, %v1250_v50  ;;  %v1375_v35 = vmul.f32 %v1267_v18, %v1267_v18 }
 0x21f   :  { %v1466_v46 = vadd.f32 %v1465_v14, %v1355_v12  ;;  %v1485_v51 = vadd.f32 %v1484_v34, %v1372_v6  ;;  %v1360_v14 = vmul.f32 %v1252_v10, %v1252_v10  ;;  %v1359_v60 = vmul.f32 %v1251_v27, %v1251_v27  ;;  %v5141_v34 = vld [vmem:[#allocation68_spill] sm:$0xff] }
 0x220   :  { %v1270_v41 = vsub.f32 %v5141_v34, %v3618_v23  ;;  %v1376_v63 = vmul.f32 %v1268_v11, %v1268_v11  ;;  %v5169_v34 = vld [vmem:[#allocation80_spill] sm:$0xff] }
 0x221   :  { %v1467_v25 = vadd.f32 %v1466_v46, %v1356_v29  ;;  %v1486_v2 = vadd.f32 %v1485_v51, %v1373_v22  ;;  %v1471_v30 = vsel %vm1069_vm2, %v1360_v14, 0.0  ;;  %v5142_v51 = vld [vmem:[#allocation70_spill] sm:$0xff]  ;;  %v5143_v22 = vld [vmem:[#allocation75_spill] sm:$0xff] }
 0x222   :  { %v1271_v50 = vsub.f32 %v5142_v51, %v3618_v23  ;;  %v1272_v18 = vsub.f32 %v5143_v22, %v3618_v23  ;;  %v5168_v51 = vld [vmem:[#allocation78_spill] sm:$0xff] }
 0x223   :  { %v1468_v12 = vadd.f32 %v1467_v25, %v1357_v36  ;;  %v1487_v15 = vadd.f32 %v1486_v2, %v1374_v42  ;;  %v1377_v25 = vmul.f32 %v1269_v59, %v1269_v59  ;;  %v1378_v2 = vmul.f32 %v1270_v41, %v1270_v41  ;;  %v5144_v36 = vld [vmem:[#allocation77_spill] sm:$0xff] }
 0x224   :  { %v1273_v42 = vsub.f32 %v5144_v36, %v3618_v23  ;;  %v1379_v11 = vmul.f32 %v1271_v50, %v1271_v50  ;;  %v5146_v59 = vld [vmem:[#allocation81_spill] sm:$0xff]  ;;  %v5166_v36 = vld [vmem:[#allocation71_spill] sm:$0xff] }
 0x225   :  { %v1469_v6 = vadd.f32 %v1468_v12, %v1358_v7  ;;  %v1488_v29 = vadd.f32 %v1487_v15, %v1375_v35  ;;  %v5145_v15 = vld [vmem:[#allocation79_spill] sm:$0xff]  ;;  %v1380_v12 = vmul.f32 %v1272_v18, %v1272_v18 }
 0x226   :  { %v1274_v7 = vsub.f32 %v5145_v15, %v3618_v23  ;;  %v5150_v18 = vld [vmem:[#allocation91_spill] sm:$0xff] }
 0x227   :  { %v1470_v46 = vadd.f32 %v1469_v6, %v1359_v60  ;;  %v1489_v10 = vadd.f32 %v1488_v29, %v1376_v63  ;;  %v1275_v60 = vsub.f32 %v5146_v59, %v3618_v23  ;;  %v5147_v63 = vld [vmem:[#allocation88_spill] sm:$0xff] }
 0x228   :  { %v1276_v41 = vsub.f32 %v5147_v63, %v3618_v23  ;;  %v1382_v29 = vmul.f32 %v1274_v7, %v1274_v7 }
 0x229   :  { %v1472_v53 = vadd.f32 %v1471_v30, %v1470_v46  ;;  %v1490_v27 = vadd.f32 %v1489_v10, %v1377_v25  ;;  %v1381_v30 = vmul.f32 %v1273_v42, %v1273_v42  ;;  %v5148_v25 = vld [vmem:[#allocation90_spill] sm:$0xff]  ;;  %v1383_v50 = vmul.f32 %v1275_v60, %v1275_v60 }
 0x22a   :  { %v1277_v10 = vsub.f32 %v5148_v25, %v3618_v23 }
 0x22b   :  { %1473 = vadd.xlane.f32.xlu0 %v1472_v53  ;;  %v1491_v35 = vadd.f32 %v1490_v27, %v1378_v2  ;;  %v5149_v2 = vld [vmem:[#allocation92_spill] sm:$0xff] }
 0x22c   :  { %v1279_v27 = vsub.f32 %v5149_v2, %v3618_v23  ;;  %v1385_v42 = vmul.f32 %v1277_v10, %v1277_v10 }
 0x22d   :  { %v1492_v14 = vadd.f32 %v1491_v35, %v1379_v11  ;;  %v1278_v11 = vsub.f32 %v5150_v18, %v3618_v23  ;;  %v1384_v35 = vmul.f32 %v1276_v41, %v1276_v41 }
 0x22f   :  { %v1493_v6 = vadd.f32 %v1492_v14, %v1380_v12  ;;  %v1387_v14 = vmul.f32 %v1279_v27, %v1279_v27  ;;  %v1386_v15 = vmul.f32 %v1278_v11, %v1278_v11  ;;  %v1508_v27 = vld [vmem:[%s4834_s2] sm:$0xff] }
 0x231   :  { %v1494_v46 = vadd.f32 %v1493_v6, %v1381_v30  ;;  %v1500_v30 = vsel %vm1069_vm2, %v1387_v14, 0.0 }
 0x233   :  { %v1495_v53 = vadd.f32 %v1494_v46, %v1382_v29 }
 0x235   :  { %v1496_v59 = vadd.f32 %v1495_v53, %v1383_v50 }
 0x237   :  { %v1497_v12 = vadd.f32 %v1496_v59, %v1384_v35 }
 0x239   :  { %v1498_v63 = vadd.f32 %v1497_v12, %v1385_v42  ;;  %v1560_v12 = vld [vmem:[%s4835_s3] sm:$0xff] }
 0x23b   :  { %v1499_v7 = vadd.f32 %v1498_v63, %v1386_v15  ;;  %v2622_v15 = vmov 0  }
 0x23c   :  { %2608 = vset.pattern.permute.xlu2 %v2622_v15  ;;  %2609 = vset.pattern.permute.xlu0 %v2622_v15 }
 0x23d   :  { %v1501_v6 = vadd.f32 %v1500_v30, %v1499_v7  ;;  %2610 = vset.pattern.permute.xlu1 %v2622_v15 }
 0x23f   :  { %1502 = vadd.xlane.f32.xlu1 %v1501_v6 }
 0x27d   :  { %v1416_v60 = vpop.xlane.xlu2 %1415 }
 0x27e   :  { %v1504_v29 = vmul.f32 %v1416_v60, %v3491_v61 }
 0x280   :  { %v1512_v46 = vadd.f32 1e-05, %v1504_v29 }
 0x282   :  { %2613 = vrsqrt.f32 %v1512_v46  ;;  %vm1522_vm5 = vweird.f32 %v1512_v46 }
 0x288   :  { %v2614_v2 = vpop.eup %2613 }
 0x289   :  { %v1517_v25 = vmul.f32 %v2614_v2, %v1512_v46  ;;  %vm1523_vm4 = vweird.f32 %v2614_v2 }
 0x28a   :  { %vm1524_vm6 = vmor %vm1522_vm5, %vm1523_vm4 }
 0x28b   :  { %v1518_v18 = vmul.f32 %v2614_v2, %v1517_v25  ;;  %v1445_v50 = vpop.xlane.xlu2 %1444 }
 0x28c   :  { %v1505_v59 = vmul.f32 %v1445_v50, %v3491_v61 }
 0x28d   :  { %v1519_v41 = vmul.f32 0.5, %v1518_v18 }
 0x28e   :  { %v1513_v53 = vadd.f32 1e-05, %v1505_v59 }
 0x28f   :  { %v1520_v10 = vsub.f32 1.5, %v1519_v41 }
 0x290   :  { %2615 = vrsqrt.f32 %v1513_v53  ;;  %vm1532_vm8 = vweird.f32 %v1513_v53 }
 0x291   :  { %v1521_v63 = vmul.f32 %v2614_v2, %v1520_v10  ;;  %v1561_v10 = vld [vmem:[%s4835_s3 + $0x8] sm:$0xff] }
 0x293   :  { %v1525_v25 = vsel %vm1524_vm6, %v2614_v2, %v1521_v63  ;;  %v1509_v2 = vld [vmem:[%s4834_s2 + $0x8] sm:$0xff] }
 0x294   :  { %v1556_v18 = vmul.f32 %v1525_v25, %v1508_v27 }
 0x296   :  { %1574 = vperm.xlu2 %2608, %v1556_v18   ;;  %v2616_v11 = vpop.eup %2615  ;;  %v1564_v42 = vmul.f32 %v1556_v18, %v3494_v4 }
 0x297   :  { %v1527_v35 = vmul.f32 %v2616_v11, %v1513_v53  ;;  %vm1533_vm7 = vweird.f32 %v2616_v11 }
 0x298   :  { %v1568_v30 = vsub.f32 %v1560_v12, %v1564_v42  ;;  %vm1534_vm9 = vmor %vm1532_vm8, %vm1533_vm7 }
 0x299   :  { %v1528_v14 = vmul.f32 %v2616_v11, %v1527_v35 }
 0x29b   :  { %v1529_v7 = vmul.f32 0.5, %v1528_v14 }
 0x29d   :  { %v1530_v6 = vsub.f32 1.5, %v1529_v7 }
 0x29e   :  { %v1474_v60 = vpop.xlane.xlu0 %1473  ;;  %1702 = vperm.xlu2 %2608, %v1568_v30  }
 0x29f   :  { %v1506_v29 = vmul.f32 %v1474_v60, %v3491_v61  ;;  %v1531_v46 = vmul.f32 %v2616_v11, %v1530_v6 }
 0x2a1   :  { %v1514_v4 = vadd.f32 1e-05, %v1506_v29  ;;  %v1535_v41 = vsel %vm1534_vm9, %v2616_v11, %v1531_v46  ;;  %v1510_v11 = vld [vmem:[%s4834_s2 + $0x10] sm:$0xff]  ;;  %v1511_v46 = vld [vmem:[%s4834_s2 + $0x18] sm:$0xff] }
 0x2a2   :  { %v1557_v50 = vmul.f32 %v1535_v41, %v1509_v2 }
 0x2a3   :  { %2617 = vrsqrt.f32 %v1514_v4  ;;  %vm1542_vm11 = vweird.f32 %v1514_v4 }
 0x2a4   :  { %1579 = vperm.xlu0 %2609, %v1557_v50   ;;  %v1565_v59 = vmul.f32 %v1557_v50, %v3511_v31  ;;  %v1563_v50 = vld [vmem:[%s4835_s3 + $0x18] sm:$0xff] }
 0x2a6   :  { %v1569_v15 = vsub.f32 %v1561_v10, %v1565_v59 }
 0x2a8   :  { %1707 = vperm.xlu1 %2610, %v1569_v15  }
 0x2a9   :  { %v2618_v63 = vpop.eup %2617 }
 0x2aa   :  { %v1537_v53 = vmul.f32 %v2618_v63, %v1514_v4  ;;  %vm1543_vm10 = vweird.f32 %v2618_v63 }
 0x2ab   :  { %vm1544_vm12 = vmor %vm1542_vm11, %vm1543_vm10 }
 0x2ac   :  { %v1538_v27 = vmul.f32 %v2618_v63, %v1537_v53 }
 0x2ae   :  { %v1539_v25 = vmul.f32 0.5, %v1538_v27 }
 0x2b0   :  { %v1540_v18 = vsub.f32 1.5, %v1539_v25  ;;  %v5151_v25 = vld [vmem:[#allocation2_spill] sm:$0xff] }
 0x2b2   :  { %v1541_v35 = vmul.f32 %v2618_v63, %v1540_v18  ;;  %v1503_v42 = vpop.xlane.xlu1 %1502 }
 0x2b3   :  { %v1507_v12 = vmul.f32 %v1503_v42, %v3491_v61  ;;  %v5153_v42 = vld [vmem:[#allocation5_spill] sm:$0xff] }
 0x2b4   :  { %v1545_v14 = vsel %vm1544_vm12, %v2618_v63, %v1541_v35  ;;  %v1562_v63 = vld [vmem:[%s4835_s3 + $0x10] sm:$0xff] }
 0x2b5   :  { %v1558_v31 = vmul.f32 %v1545_v14, %v1510_v11  ;;  %v1515_v7 = vadd.f32 1e-05, %v1507_v12  ;;  %v5152_v11 = vld [vmem:[#allocation3_spill] sm:$0xff]  ;;  %v5154_v14 = vld [vmem:[#allocation12_spill] sm:$0xff] }
 0x2b7   :  { %1584 = vperm.xlu1 %2610, %v1558_v31   ;;  %2619 = vrsqrt.f32 %v1515_v7  ;;  %vm1552_vm14 = vweird.f32 %v1515_v7  ;;  %v1566_v15 = vmul.f32 %v1558_v31, %v3564_v13 }
 0x2b9   :  { %v1570_v53 = vsub.f32 %v1562_v63, %v1566_v15  ;;  %v5160_v15 = vld [vmem:[#allocation43_spill] sm:$0xff] }
 0x2bd   :  { %v2620_v30 = vpop.eup %2619 }
 0x2be   :  { %v1547_v6 = vmul.f32 %v2620_v30, %v1515_v7  ;;  %vm1553_vm13 = vweird.f32 %v2620_v30 }
 0x2bf   :  { %vm1554_vm15 = vmor %vm1552_vm14, %vm1553_vm13 }
 0x2c0   :  { %v1548_v60 = vmul.f32 %v2620_v30, %v1547_v6  ;;  %v5156_v6 = vld [vmem:[#allocation19_spill] sm:$0xff] }
 0x2c2   :  { %v1549_v29 = vmul.f32 0.5, %v1548_v60  ;;  %v5157_v60 = vld [vmem:[#allocation27_spill] sm:$0xff] }
 0x2c4   :  { %v1550_v2 = vsub.f32 1.5, %v1549_v29 }
 0x2c6   :  { %v1551_v4 = vmul.f32 %v2620_v30, %v1550_v2  ;;  %v5158_v2 = vld [vmem:[#allocation25_spill] sm:$0xff] }
 0x2c8   :  { %v1555_v41 = vsel %vm1554_vm15, %v2620_v30, %v1551_v4  ;;  %v5159_v4 = vld [vmem:[#allocation34_spill] sm:$0xff] }
 0x2c9   :  { %v1559_v61 = vmul.f32 %v1555_v41, %v1511_v46 }
 0x2cb   :  { %1589 = vperm.xlu2 %2608, %v1559_v61   ;;  %v1567_v10 = vmul.f32 %v1559_v61, %v3618_v23  ;;  %v5155_v23 = vld [vmem:[#allocation10_spill] sm:$0xff] }
 0x2cd   :  { %v1571_v59 = vsub.f32 %v1563_v50, %v1567_v10 }
 0x2cf   :  { %1717 = vperm.xlu1 %2610, %v1571_v59  }
 0x2d3   :  { %1712 = vperm.xlu2 %2608, %v1570_v53   ;;  %v5161_v53 = vld [vmem:[#allocation45_spill] sm:$0xff] }
 0x2f0   :  { %v1575_v27 = vpop.permute.xlu2 %1574 }
 0x2f1   :  { %v1592_v18 = vmul.f32 %v1575_v27, %v5151_v25  ;;  %v1593_v35 = vmul.f32 %v1575_v27, %v5152_v11  ;;  %v1594_v12 = vmul.f32 %v1575_v27, %v5153_v42  ;;  %v1595_v7 = vmul.f32 %v1575_v27, %v5154_v14  ;;  %v5163_v14 = vld [vmem:[#allocation49_spill] sm:$0xff] }
 0x2f2   :  { %v1596_v30 = vmul.f32 %v1575_v27, %v5155_v23  ;;  %v1597_v13 = vmul.f32 %v1575_v27, %v5156_v6  ;;  %v1598_v31 = vmul.f32 %v1575_v27, %v3181_v28  ;;  %v1599_v29 = vmul.f32 %v1575_v27, %v5157_v60  ;;  %v5162_v28 = vld [vmem:[#allocation51_spill] sm:$0xff] }
 0x2f3   :  { %v1600_v46 = vmul.f32 %v1575_v27, %v5158_v2  ;;  %v1601_v41 = vmul.f32 %v1575_v27, %v5159_v4  ;;  %v1602_v61 = vmul.f32 %v1575_v27, %v3229_v52  ;;  %v1603_v50 = vmul.f32 %v1575_v27, %v3247_v37  ;;  %v5164_v52 = vld [vmem:[#allocation66_spill] sm:$0xff]  ;;  %v5165_v37 = vld [vmem:[#allocation65_spill] sm:$0xff] }
 0x2f4   :  { %v1604_v59 = vmul.f32 %v1575_v27, %v3239_v58  ;;  %v1605_v63 = vmul.f32 %v1575_v27, %v5160_v15  ;;  %v1606_v25 = vmul.f32 %v1575_v27, %v5161_v53  ;;  %v1618_v11 = vmul.f32 %v1575_v27, %v3441_v48  ;;  %v5167_v15 = vld [vmem:[#allocation73_spill] sm:$0xff] }
 0x2f5   :  { %v1607_v42 = vmul.f32 %v1575_v27, %v5162_v28  ;;  %v1608_v23 = vmul.f32 %v1575_v27, %v5163_v14  ;;  %v1609_v6 = vmul.f32 %v1575_v27, %v3293_v9  ;;  %v1610_v60 = vmul.f32 %v1575_v27, %v5056_v55 }
 0x2f6   :  { %v1611_v2 = vmul.f32 %v1575_v27, %v5164_v52  ;;  %v1612_v4 = vmul.f32 %v1575_v27, %v5165_v37  ;;  %v1613_v58 = vmul.f32 %v1575_v27, %v5166_v36  ;;  %v1614_v53 = vmul.f32 %v1575_v27, %v5167_v15 }
 0x2f7   :  { %v1615_v48 = vmul.f32 %v1575_v27, %v5168_v51  ;;  %v1616_v28 = vmul.f32 %v1575_v27, %v5169_v34  ;;  %v1617_v14 = vmul.f32 %v1575_v27, %v5170_v32 }
 0x2f8   :  { %v1703_v10 = vpop.permute.xlu2 %1702 }
 0x2f9   :  { %v3780_v22 = vadd.f32 %v1703_v10, %v1618_v11  ;;  %v1720_v26 = vadd.f32 %v1703_v10, %v1592_v18  ;;  %v1721_v9 = vadd.f32 %v1703_v10, %v1593_v35  ;;  %v3786_v21 = vadd.f32 %v1703_v10, %v1594_v12 }
 0x2fa   :  { %v3788_v55 = vadd.f32 %v1703_v10, %v1595_v7  ;;  %v3790_v52 = vadd.f32 %v1703_v10, %v1596_v30  ;;  %v3792_v37 = vadd.f32 %v1703_v10, %v1597_v13  ;;  %v3794_v36 = vadd.f32 %v1703_v10, %v1598_v31 }
 0x2fb   :  { %v3796_v11 = vadd.f32 %v1703_v10, %v1599_v29  ;;  %v3798_v15 = vadd.f32 %v1703_v10, %v1600_v46  ;;  %v3800_v51 = vadd.f32 %v1703_v10, %v1601_v41  ;;  %v3802_v34 = vadd.f32 %v1703_v10, %v1602_v61 }
 0x2fc   :  { %v3804_v32 = vadd.f32 %v1703_v10, %v1603_v50  ;;  %v3806_v27 = vadd.f32 %v1703_v10, %v1604_v59  ;;  %v3808_v18 = vadd.f32 %v1703_v10, %v1605_v63  ;;  %v3810_v35 = vadd.f32 %v1703_v10, %v1606_v25 }
 0x2fd   :  { %v3812_v12 = vadd.f32 %v1703_v10, %v1607_v42  ;;  %v3814_v7 = vadd.f32 %v1703_v10, %v1608_v23  ;;  %v3816_v30 = vadd.f32 %v1703_v10, %v1609_v6  ;;  %v3818_v13 = vadd.f32 %v1703_v10, %v1610_v60 }
 0x2fe   :  { %v3820_v31 = vadd.f32 %v1703_v10, %v1611_v2  ;;  %v3822_v29 = vadd.f32 %v1703_v10, %v1612_v4  ;;  %v3824_v46 = vadd.f32 %v1703_v10, %v1613_v58  ;;  %v3826_v41 = vadd.f32 %v1703_v10, %v1614_v53 }
 0x2ff   :  { %v3828_v61 = vadd.f32 %v1703_v10, %v1615_v48  ;;  %v3830_v50 = vadd.f32 %v1703_v10, %v1616_v28  ;;  %vm1828_vm0 = vcmp.ge.f32.partialorder %v1720_v26, 0.0  ;;  %vm1829_vm1 = vcmp.ge.f32.partialorder %v1721_v9, 0.0 }
 0x300   :  { %vm1830_vm2 = vcmp.ge.f32.partialorder %v3786_v21, 0.0  ;;  %vm1831_vm3 = vcmp.ge.f32.partialorder %v3788_v55, 0.0  ;;  %vm1832_vm4 = vcmp.ge.f32.partialorder %v3790_v52, 0.0  ;;  %vm1833_vm5 = vcmp.ge.f32.partialorder %v3792_v37, 0.0 }
 0x301   :  { %vm1834_vm6 = vcmp.ge.f32.partialorder %v3794_v36, 0.0  ;;  %vm1835_vm7 = vcmp.ge.f32.partialorder %v3796_v11, 0.0  ;;  %v1936_v59 = vmul.f32 0.01, %v1720_v26  ;;  %vm1838_vm10 = vcmp.ge.f32.partialorder %v3802_v34, 0.0 }
 0x302   :  { %vm1839_vm11 = vcmp.ge.f32.partialorder %v3804_v32, 0.0  ;;  %vm1840_vm12 = vcmp.ge.f32.partialorder %v3806_v27, 0.0  ;;  %v1937_v63 = vmul.f32 0.01, %v1721_v9  ;;  %vm1843_vm15 = vcmp.ge.f32.partialorder %v3812_v12, 0.0 }
 0x303   :  { %v1938_v25 = vmul.f32 0.01, %v3786_v21  ;;  %v3847_v42 = vadd.f32 %v1703_v10, %v1617_v14  ;;  %v1939_v23 = vmul.f32 0.01, %v3788_v55  ;;  %v1940_v6 = vmul.f32 0.01, %v3790_v52 }
 0x304   :  { %v1941_v60 = vmul.f32 0.01, %v3792_v37  ;;  %v1942_v2 = vmul.f32 0.01, %v3794_v36  ;;  %v1943_v4 = vmul.f32 0.01, %v3796_v11  ;;  %v2044_v58 = vsel %vm1828_vm0, %v1720_v26, %v1936_v59 }
 0x305   :  { %v1944_v10 = vmul.f32 0.01, %v3798_v15  ;;  %vm1848_vm8 = vcmp.ge.f32.partialorder %v3822_v29, 0.0  ;;  %vm1849_vm9 = vcmp.ge.f32.partialorder %v3824_v46, 0.0  ;;  %v1945_v53 = vmul.f32 0.01, %v3800_v51 }
 0x306   :  { %v1946_v48 = vmul.f32 0.01, %v3802_v34  ;;  %v1947_v28 = vmul.f32 0.01, %v3804_v32  ;;  %v2045_v14 = vsel %vm1829_vm1, %v1721_v9, %v1937_v63  ;;  %vm1850_vm14 = vcmp.ge.f32.partialorder %v3826_v41, 0.0 }
 0x307   :  { %vm1851_vm13 = vcmp.ge.f32.partialorder %v3828_v61, 0.0  ;;  %v1948_v45 = vmul.f32 0.01, %v3806_v27  ;;  %v1949_v26 = vmul.f32 0.01, %v3808_v18  ;;  %v2046_v49 = vsel %vm1830_vm2, %v3786_v21, %v1938_v25 }
 0x308   :  { %v1950_v59 = vmul.f32 0.01, %v3810_v35  ;;  %vm1852_vm0 = vcmp.ge.f32.partialorder %v3830_v50, 0.0  ;;  %v1951_v3 = vmul.f32 0.01, %v3812_v12  ;;  %v2047_v20 = vsel %vm1831_vm3, %v3788_v55, %v1939_v23 }
 0x309   :  { %v1952_v9 = vmul.f32 0.01, %v3814_v7  ;;  %v1953_v63 = vmul.f32 0.01, %v3816_v30  ;;  %v1954_v5 = vmul.f32 0.01, %v3818_v13  ;;  %v2048_v21 = vsel %vm1832_vm4, %v3790_v52, %v1940_v6 }
 0x30a   :  { %v1955_v38 = vmul.f32 0.01, %v3820_v31  ;;  %v2049_v25 = vsel %vm1833_vm5, %v3792_v37, %v1941_v60  ;;  %v1956_v24 = vmul.f32 0.01, %v3822_v29  ;;  %v1957_v44 = vmul.f32 0.01, %v3824_v46 }
 0x30b   :  { %v2050_v55 = vsel %vm1834_vm6, %v3794_v36, %v1942_v2  ;;  %v2051_v23 = vsel %vm1835_vm7, %v3796_v11, %v1943_v4  ;;  %v1958_v17 = vmul.f32 0.01, %v3826_v41  ;;  %vm5171_vm1 = vcmp.ge.f32.partialorder %v3798_v15, 0.0 }
 0x30c   :  { %v2052_v52 = vsel %vm5171_vm1, %v3798_v15, %v1944_v10  ;;  %vm5172_vm2 = vcmp.ge.f32.partialorder %v3800_v51, 0.0  ;;  %v2054_v6 = vsel %vm1838_vm10, %v3802_v34, %v1946_v48  ;;  %v2055_v36 = vsel %vm1839_vm11, %v3804_v32, %v1947_v28  ;;  %v5181_v28 = vld [vmem:[#allocation9_spill] sm:$0xff] }
 0x30d   :  { %v2053_v37 = vsel %vm5172_vm2, %v3800_v51, %v1945_v53  ;;  %v2152_v60 = vpack.c.bf16 %v2045_v14, %v2044_v58  ;;  %v2153_v11 = vpack.c.bf16 %v2047_v20, %v2046_v49  ;;  %v2154_v2 = vpack.c.bf16 %v2049_v25, %v2048_v21  ;;  %v5184_v21 = vld [vmem:[#allocation22_spill] sm:$0xff] }
 0x30e   :  { %v1959_v4 = vmul.f32 0.01, %v3828_v61  ;;  %v2056_v15 = vsel %vm1840_vm12, %v3806_v27, %v1948_v45  ;;  %vm5173_vm3 = vcmp.ge.f32.partialorder %v3808_v18, 0.0  ;;  %v2155_v10 = vpack.c.bf16 %v2051_v23, %v2050_v55  ;;  %v5185_v55 = vld [vmem:[#allocation24_spill] sm:$0xff] }
 0x30f   :  { %v2057_v51 = vsel %vm5173_vm3, %v3808_v18, %v1949_v26  ;;  %v1960_v34 = vmul.f32 0.01, %v3830_v50  ;;  %vm5174_vm4 = vcmp.ge.f32.partialorder %v3810_v35, 0.0  ;;  %v2059_v49 = vsel %vm1843_vm15, %v3812_v12, %v1951_v3  ;;  %2208 = vst [vmem:[%s4836_s4] sm:$0xff] %v2152_v60  ;;  %v5182_v26 = vld [vmem:[#allocation16_spill] sm:$0xff] }
 0x310   :  { %v2058_v32 = vsel %vm5174_vm4, %v3810_v35, %v1950_v59  ;;  %v2156_v20 = vpack.c.bf16 %v2053_v37, %v2052_v52  ;;  %v1961_v45 = vmul.f32 0.01, %v3847_v42  ;;  %vm5175_vm5 = vcmp.ge.f32.partialorder %v3814_v7, 0.0  ;;  %2209 = vst [vmem:[%s4836_s4 + $0x8] sm:$0xff] %v2153_v11  ;;  %v5186_v52 = vld [vmem:[#allocation31_spill] sm:$0xff] }
 0x311   :  { %v2060_v27 = vsel %vm5175_vm5, %v3814_v7, %v1952_v9  ;;  %vm5176_vm6 = vcmp.ge.f32.partialorder %v3816_v30, 0.0  ;;  %v2157_v35 = vpack.c.bf16 %v2055_v36, %v2054_v6  ;;  %vm1853_vm7 = vcmp.ge.f32.partialorder %v3847_v42, 0.0  ;;  %2210 = vst [vmem:[%s4836_s4 + $0x10] sm:$0xff] %v2154_v2  ;;  %v5183_v9 = vld [vmem:[#allocation14_spill] sm:$0xff]  ;;  %v5187_v6 = vld [vmem:[#allocation29_spill] sm:$0xff] }
 0x312   :  { %v2061_v18 = vsel %vm5176_vm6, %v3816_v30, %v1953_v63  ;;  %vm5177_vm10 = vcmp.ge.f32.partialorder %v3818_v13, 0.0  ;;  %vm5178_vm11 = vcmp.ge.f32.partialorder %v3820_v31, 0.0  ;;  %v2158_v7 = vpack.c.bf16 %v2057_v51, %v2056_v15  ;;  %2211 = vst [vmem:[%s4836_s4 + $0x18] sm:$0xff] %v2155_v10 }
 0x313   :  { %v2062_v3 = vsel %vm5177_vm10, %v3818_v13, %v1954_v5  ;;  %v2063_v12 = vsel %vm5178_vm11, %v3820_v31, %v1955_v38  ;;  %v2064_v30 = vsel %vm1848_vm8, %v3822_v29, %v1956_v24  ;;  %v2065_v58 = vsel %vm1849_vm9, %v3824_v46, %v1957_v44  ;;  %2212 = vst [vmem:[%s4836_s4 + $0x20] sm:$0xff] %v2156_v20 }
 0x314   :  { %v2159_v53 = vpack.c.bf16 %v2059_v49, %v2058_v32  ;;  %v2066_v38 = vsel %vm1850_vm14, %v3826_v41, %v1958_v17  ;;  %v2067_v5 = vsel %vm1851_vm13, %v3828_v61, %v1959_v4  ;;  %v2160_v13 = vpack.c.bf16 %v2061_v18, %v2060_v27  ;;  %2213 = vst [vmem:[%s4836_s4 + $0x28] sm:$0xff] %v2157_v35  ;;  %v5179_v61 = vld [vmem:[#allocation6_spill] sm:$0xff]  ;;  %v5190_v49 = vld [vmem:[#allocation83_spill] sm:$0xff] }
 0x315   :  { %v2068_v44 = vsel %vm1852_vm0, %v3830_v50, %v1960_v34  ;;  %v2069_v24 = vsel %vm1853_vm7, %v3847_v42, %v1961_v45  ;;  %v2161_v31 = vpack.c.bf16 %v2063_v12, %v2062_v3  ;;  %v2162_v17 = vpack.c.bf16 %v2065_v58, %v2064_v30  ;;  %2214 = vst [vmem:[%s4836_s4 + $0x30] sm:$0xff] %v2158_v7  ;;  %v5180_v42 = vld [vmem:[#allocation7_spill] sm:$0xff]  ;;  %v5188_v34 = vld [vmem:[#allocation60_spill] sm:$0xff] }
 0x316   :  { %v2163_v29 = vpack.c.bf16 %v2067_v5, %v2066_v38  ;;  %2215 = vst [vmem:[%s4836_s4 + $0x38] sm:$0xff] %v2159_v53  ;;  %v3978_v46 = vpop.permute.xlu0 %1579  ;;  %v2164_v41 = vpack.c.bf16 %v2069_v24, %v2068_v44 }
 0x317   :  { %2216 = vst [vmem:[%s4836_s4 + $0x40] sm:$0xff] %v2160_v13  ;;  %v1619_v50 = vmul.f32 %v3978_v46, %v5179_v61  ;;  %v1620_v48 = vmul.f32 %v3978_v46, %v5180_v42  ;;  %v1621_v14 = vmul.f32 %v3978_v46, %v5181_v28  ;;  %v1622_v59 = vmul.f32 %v3978_v46, %v5182_v26 }
 0x318   :  { %2217 = vst [vmem:[%s4836_s4 + $0x48] sm:$0xff] %v2161_v31  ;;  %v1623_v63 = vmul.f32 %v3978_v46, %v5183_v9  ;;  %v1624_v25 = vmul.f32 %v3978_v46, %v5184_v21  ;;  %v1625_v23 = vmul.f32 %v3978_v46, %v5185_v55  ;;  %v1626_v37 = vmul.f32 %v3978_v46, %v5186_v52 }
 0x319   :  { %2218 = vst [vmem:[%s4836_s4 + $0x50] sm:$0xff] %v2162_v17  ;;  %v1627_v36 = vmul.f32 %v3978_v46, %v5187_v6  ;;  %v1628_v60 = vmul.f32 %v3978_v46, %v3233_v54  ;;  %v1629_v11 = vmul.f32 %v3978_v46, %v3237_v56  ;;  %v1630_v2 = vmul.f32 %v3978_v46, %v3255_v1  ;;  %v5189_v1 = vld [vmem:[#allocation63_spill] sm:$0xff] }
 0x31a   :  { %2219 = vst [vmem:[%s4836_s4 + $0x58] sm:$0xff] %v2163_v29  ;;  %v1631_v4 = vmul.f32 %v3978_v46, %v3251_v62  ;;  %v1632_v15 = vmul.f32 %v3978_v46, %v3269_v8  ;;  %v1633_v51 = vmul.f32 %v3978_v46, %v5102_v33  ;;  %v1634_v10 = vmul.f32 %v3978_v46, %v5104_v16  ;;  %v4031_v32 = vpop.permute.xlu1 %1707 }
 0x31b   :  { %2220 = vst [vmem:[%s4836_s4 + $0x60] sm:$0xff] %v2164_v41  ;;  %v1635_v54 = vmul.f32 %v3978_v46, %v5105_v39  ;;  %v1636_v56 = vmul.f32 %v3978_v46, %v5188_v34  ;;  %v1637_v62 = vmul.f32 %v3978_v46, %v5189_v1  ;;  %v1638_v8 = vmul.f32 %v3978_v46, %v5109_v57 }
 0x31c   :  { %v1639_v33 = vmul.f32 %v3978_v46, %v3337_v19  ;;  %v1640_v16 = vmul.f32 %v3978_v46, %v3368_v0  ;;  %v1641_v39 = vmul.f32 %v3978_v46, %v3381_v40  ;;  %v1642_v20 = vmul.f32 %v3978_v46, %v5190_v49 }
 0x31d   :  { %v1643_v45 = vmul.f32 %v3978_v46, %v3437_v47  ;;  %v1644_v27 = vmul.f32 %v3978_v46, %v3448_v43  ;;  %v1747_v57 = vadd.f32 %v4031_v32, %v1619_v50  ;;  %v1748_v18 = vadd.f32 %v4031_v32, %v1620_v48 }
 0x31e   :  { %v4052_v19 = vadd.f32 %v4031_v32, %v1621_v14  ;;  %v4055_v0 = vadd.f32 %v4031_v32, %v1622_v59  ;;  %v4058_v40 = vadd.f32 %v4031_v32, %v1623_v63  ;;  %v4061_v35 = vadd.f32 %v4031_v32, %v1624_v25 }
 0x31f   :  { %v4064_v47 = vadd.f32 %v4031_v32, %v1625_v23  ;;  %v4067_v43 = vadd.f32 %v4031_v32, %v1626_v37  ;;  %v4070_v3 = vadd.f32 %v4031_v32, %v1627_v36  ;;  %v4073_v12 = vadd.f32 %v4031_v32, %v1628_v60 }
 0x320   :  { %v4076_v7 = vadd.f32 %v4031_v32, %v1629_v11  ;;  %v4079_v30 = vadd.f32 %v4031_v32, %v1630_v2  ;;  %v4082_v58 = vadd.f32 %v4031_v32, %v1631_v4  ;;  %v4085_v53 = vadd.f32 %v4031_v32, %v1632_v15 }
 0x321   :  { %v4088_v38 = vadd.f32 %v4031_v32, %v1633_v51  ;;  %v4091_v5 = vadd.f32 %v4031_v32, %v1634_v10  ;;  %v4094_v13 = vadd.f32 %v4031_v32, %v1635_v54  ;;  %v4097_v44 = vadd.f32 %v4031_v32, %v1636_v56 }
 0x322   :  { %v4100_v24 = vadd.f32 %v4031_v32, %v1637_v62  ;;  %v4103_v31 = vadd.f32 %v4031_v32, %v1638_v8  ;;  %v4106_v17 = vadd.f32 %v4031_v32, %v1639_v33  ;;  %v4109_v29 = vadd.f32 %v4031_v32, %v1640_v16 }
 0x323   :  { %v4112_v41 = vadd.f32 %v4031_v32, %v1641_v39  ;;  %v4115_v61 = vadd.f32 %v4031_v32, %v1642_v20  ;;  %v4118_v50 = vadd.f32 %v4031_v32, %v1643_v45  ;;  %vm1855_vm8 = vcmp.ge.f32.partialorder %v1747_v57, 0.0 }
 0x324   :  { %vm1856_vm9 = vcmp.ge.f32.partialorder %v1748_v18, 0.0  ;;  %vm1857_vm12 = vcmp.ge.f32.partialorder %v4052_v19, 0.0  ;;  %vm1858_vm13 = vcmp.ge.f32.partialorder %v4055_v0, 0.0  ;;  %vm1859_vm14 = vcmp.ge.f32.partialorder %v4058_v40, 0.0 }
 0x325   :  { %vm1860_vm15 = vcmp.ge.f32.partialorder %v4061_v35, 0.0  ;;  %vm1861_vm0 = vcmp.ge.f32.partialorder %v4064_v47, 0.0  ;;  %vm1862_vm1 = vcmp.ge.f32.partialorder %v4067_v43, 0.0  ;;  %vm1863_vm2 = vcmp.ge.f32.partialorder %v4070_v3, 0.0 }
 0x326   :  { %v1963_v42 = vmul.f32 0.01, %v1747_v57  ;;  %vm1866_vm5 = vcmp.ge.f32.partialorder %v4079_v30, 0.0  ;;  %vm1867_vm6 = vcmp.ge.f32.partialorder %v4082_v58, 0.0  ;;  %v1964_v48 = vmul.f32 0.01, %v1748_v18 }
 0x327   :  { %vm1870_vm11 = vcmp.ge.f32.partialorder %v4091_v5, 0.0  ;;  %v1965_v28 = vmul.f32 0.01, %v4052_v19  ;;  %v4136_v14 = vadd.f32 %v4031_v32, %v1644_v27  ;;  %v1966_v26 = vmul.f32 0.01, %v4055_v0 }
 0x328   :  { %v1967_v59 = vmul.f32 0.01, %v4058_v40  ;;  %v1968_v9 = vmul.f32 0.01, %v4061_v35  ;;  %v1969_v63 = vmul.f32 0.01, %v4064_v47  ;;  %v2071_v55 = vsel %vm1855_vm8, %v1747_v57, %v1963_v42 }
 0x329   :  { %v1970_v21 = vmul.f32 0.01, %v4067_v43  ;;  %v1971_v25 = vmul.f32 0.01, %v4070_v3  ;;  %vm1875_vm4 = vcmp.ge.f32.partialorder %v4106_v17, 0.0  ;;  %vm1876_vm3 = vcmp.ge.f32.partialorder %v4109_v29, 0.0 }
 0x32a   :  { %v1972_v23 = vmul.f32 0.01, %v4073_v12  ;;  %v1973_v52 = vmul.f32 0.01, %v4076_v7  ;;  %v1974_v37 = vmul.f32 0.01, %v4079_v30  ;;  %v2072_v6 = vsel %vm1856_vm9, %v1748_v18, %v1964_v48 }
 0x32b   :  { %vm1877_vm10 = vcmp.ge.f32.partialorder %v4112_v41, 0.0  ;;  %vm1878_vm7 = vcmp.ge.f32.partialorder %v4115_v61, 0.0  ;;  %v1975_v36 = vmul.f32 0.01, %v4082_v58  ;;  %v1976_v60 = vmul.f32 0.01, %v4085_v53 }
 0x32c   :  { %v1977_v11 = vmul.f32 0.01, %v4088_v38  ;;  %v2073_v2 = vsel %vm1857_vm12, %v4052_v19, %v1965_v28  ;;  %vm1879_vm8 = vcmp.ge.f32.partialorder %v4118_v50, 0.0  ;;  %v1978_v4 = vmul.f32 0.01, %v4091_v5 }
 0x32d   :  { %v1979_v15 = vmul.f32 0.01, %v4094_v13  ;;  %v1980_v51 = vmul.f32 0.01, %v4097_v44  ;;  %v2074_v10 = vsel %vm1858_vm13, %v4055_v0, %v1966_v26  ;;  %v1981_v54 = vmul.f32 0.01, %v4100_v24 }
 0x32e   :  { %v1982_v34 = vmul.f32 0.01, %v4103_v31  ;;  %v2075_v56 = vsel %vm1859_vm14, %v4058_v40, %v1967_v59  ;;  %v2076_v1 = vsel %vm1860_vm15, %v4061_v35, %v1968_v9  ;;  %v1983_v62 = vmul.f32 0.01, %v4106_v17 }
 0x32f   :  { %v1984_v8 = vmul.f32 0.01, %v4109_v29  ;;  %v2077_v33 = vsel %vm1861_vm0, %v4064_v47, %v1969_v63  ;;  %v2078_v16 = vsel %vm1862_vm1, %v4067_v43, %v1970_v21  ;;  %v1985_v39 = vmul.f32 0.01, %v4112_v41 }
 0x330   :  { %v2079_v49 = vsel %vm1863_vm2, %v4070_v3, %v1971_v25  ;;  %vm5191_vm9 = vcmp.ge.f32.partialorder %v4073_v12, 0.0  ;;  %vm5192_vm12 = vcmp.ge.f32.partialorder %v4076_v7, 0.0  ;;  %v2082_v27 = vsel %vm1866_vm5, %v4079_v30, %v1974_v37  ;;  %v5200_v25 = vld [vmem:[#allocation4_spill] sm:$0xff] }
 0x331   :  { %v2080_v20 = vsel %vm5191_vm9, %v4073_v12, %v1972_v23  ;;  %v2081_v45 = vsel %vm5192_vm12, %v4076_v7, %v1973_v52  ;;  %v2166_v57 = vpack.c.bf16 %v2072_v6, %v2071_v55  ;;  %v2167_v18 = vpack.c.bf16 %v2074_v10, %v2073_v2  ;;  %v5201_v52 = vld [vmem:[#allocation11_spill] sm:$0xff]  ;;  %v5202_v6 = vld [vmem:[#allocation13_spill] sm:$0xff]  ;;  %v5204_v2 = vld [vmem:[#allocation18_spill] sm:$0xff] }
 0x332   :  { %v2168_v19 = vpack.c.bf16 %v2076_v1, %v2075_v56  ;;  %v1986_v0 = vmul.f32 0.01, %v4115_v61  ;;  %v2083_v40 = vsel %vm1867_vm6, %v4082_v58, %v1975_v36  ;;  %vm5193_vm13 = vcmp.ge.f32.partialorder %v4085_v53, 0.0  ;;  %v5206_v10 = vld [vmem:[#allocation28_spill] sm:$0xff]  ;;  %v5208_v1 = vld [vmem:[#allocation33_spill] sm:$0xff] }
 0x333   :  { %v2084_v35 = vsel %vm5193_vm13, %v4085_v53, %v1976_v60  ;;  %v2169_v47 = vpack.c.bf16 %v2078_v16, %v2077_v33  ;;  %v1987_v43 = vmul.f32 0.01, %v4118_v50  ;;  %vm5194_vm14 = vcmp.ge.f32.partialorder %v4088_v38, 0.0  ;;  %2223 = vst [vmem:[%s4836_s4 + $0x6c] sm:$0xff] %v2166_v57  ;;  %v5203_v60 = vld [vmem:[#allocation20_spill] sm:$0xff]  ;;  %v5210_v16 = vld [vmem:[#allocation39_spill] sm:$0xff] }
 0x334   :  { %v2085_v3 = vsel %vm5194_vm14, %v4088_v38, %v1977_v11  ;;  %v2086_v12 = vsel %vm1870_vm11, %v4091_v5, %v1978_v4  ;;  %v2170_v7 = vpack.c.bf16 %v2080_v20, %v2079_v49  ;;  %v1988_v30 = vmul.f32 0.01, %v4136_v14  ;;  %2224 = vst [vmem:[%s4836_s4 + $0x74] sm:$0xff] %v2167_v18  ;;  %v5211_v49 = vld [vmem:[#allocation44_spill] sm:$0xff]  ;;  %v5213_v57 = vld [vmem:[#allocation50_spill] sm:$0xff] }
 0x335   :  { %vm5195_vm15 = vcmp.ge.f32.partialorder %v4094_v13, 0.0  ;;  %vm5196_vm0 = vcmp.ge.f32.partialorder %v4097_v44, 0.0  ;;  %v2171_v38 = vpack.c.bf16 %v2082_v27, %v2081_v45  ;;  %vm1880_vm1 = vcmp.ge.f32.partialorder %v4136_v14, 0.0  ;;  %2225 = vst [vmem:[%s4836_s4 + $0x7c] sm:$0xff] %v2168_v19  ;;  %v5212_v45 = vld [vmem:[#allocation42_spill] sm:$0xff]  ;;  %v5214_v19 = vld [vmem:[#allocation52_spill] sm:$0xff] }
 0x336   :  { %v2087_v58 = vsel %vm5195_vm15, %v4094_v13, %v1979_v15  ;;  %v2088_v53 = vsel %vm5196_vm0, %v4097_v44, %v1980_v51  ;;  %vm5197_vm2 = vcmp.ge.f32.partialorder %v4100_v24, 0.0  ;;  %vm5198_vm5 = vcmp.ge.f32.partialorder %v4103_v31, 0.0  ;;  %v5199_v44 = vld [vmem:[#allocation85_spill] sm:$0xff]  ;;  %2226 = vst [vmem:[%s4836_s4 + $0x84] sm:$0xff] %v2169_v47  ;;  %v5205_v15 = vld [vmem:[#allocation26_spill] sm:$0xff] }
 0x337   :  { %v2089_v5 = vsel %vm5197_vm2, %v4100_v24, %v1981_v54  ;;  %v2090_v42 = vsel %vm5198_vm5, %v4103_v31, %v1982_v34  ;;  %v2172_v13 = vpack.c.bf16 %v2084_v35, %v2083_v40  ;;  %v1645_v48 = vmul.f32 %v3978_v46, %v5199_v44  ;;  %v4247_v31 = vpop.permute.xlu2 %1589  ;;  %2227 = vst [vmem:[%s4836_s4 + $0x8c] sm:$0xff] %v2170_v7  ;;  %v5207_v34 = vld [vmem:[#allocation35_spill] sm:$0xff]  ;;  %v5215_v40 = vld [vmem:[#allocation58_spill] sm:$0xff]  ;;  %v5216_v47 = vld [vmem:[#allocation57_spill] sm:$0xff] }
 0x338   :  { %v2091_v28 = vsel %vm1875_vm4, %v4106_v17, %v1983_v62  ;;  %v2092_v24 = vsel %vm1876_vm3, %v4109_v29, %v1984_v8  ;;  %v2173_v26 = vpack.c.bf16 %v2086_v12, %v2085_v3  ;;  %v2093_v59 = vsel %vm1877_vm10, %v4112_v41, %v1985_v39  ;;  %2228 = vst [vmem:[%s4836_s4 + $0x94] sm:$0xff] %v2171_v38  ;;  %v5209_v8 = vld [vmem:[#allocation38_spill] sm:$0xff]  ;;  %v5217_v3 = vld [vmem:[#allocation64_spill] sm:$0xff]  ;;  %v5218_v7 = vld [vmem:[#allocation67_spill] sm:$0xff] }
 0x339   :  { %v2094_v46 = vsel %vm1878_vm7, %v4115_v61, %v1986_v0  ;;  %v2174_v17 = vpack.c.bf16 %v2088_v53, %v2087_v58  ;;  %v4259_v29 = vadd.f32 %v4031_v32, %v1645_v48  ;;  %v2095_v9 = vsel %vm1879_vm8, %v4118_v50, %v1987_v43  ;;  %v1585_v61 = vpop.permute.xlu1 %1584  ;;  %2229 = vst [vmem:[%s4836_s4 + $0x9c] sm:$0xff] %v2172_v13  ;;  %v5219_v58 = vld [vmem:[#allocation72_spill] sm:$0xff]  ;;  %v5222_v48 = vld [vmem:[#allocation59_spill] sm:$0xff] }
 0x33a   :  { %v2096_v41 = vsel %vm1880_vm1, %v4136_v14, %v1988_v30  ;;  %v2175_v63 = vpack.c.bf16 %v2090_v42, %v2089_v5  ;;  %v2176_v21 = vpack.c.bf16 %v2092_v24, %v2091_v28  ;;  %v2177_v32 = vpack.c.bf16 %v2094_v46, %v2093_v59  ;;  %2230 = vst [vmem:[%s4836_s4 + $0xa4] sm:$0xff] %v2173_v26  ;;  %v5220_v5 = vld [vmem:[#allocation74_spill] sm:$0xff]  ;;  %v5221_v13 = vld [vmem:[#allocation76_spill] sm:$0xff] }
 0x33b   :  { %v4277_v50 = vmul.f32 0.01, %v3780_v22  ;;  %v2178_v14 = vpack.c.bf16 %v2096_v41, %v2095_v9  ;;  %2231 = vst [vmem:[%s4836_s4 + $0xac] sm:$0xff] %v2174_v17  ;;  %v1646_v55 = vmul.f32 %v1585_v61, %v5200_v25  ;;  %v4284_v23 = vmul.f32 0.01, %v4259_v29  ;;  %v5223_v24 = vld [vmem:[#allocation84_spill] sm:$0xff] }
 0x33c   :  { %2232 = vst [vmem:[%s4836_s4 + $0xb4] sm:$0xff] %v2175_v63  ;;  %v1647_v37 = vmul.f32 %v1585_v61, %v5201_v52  ;;  %v1648_v36 = vmul.f32 %v1585_v61, %v5202_v6  ;;  %v1649_v11 = vmul.f32 %v1585_v61, %v5203_v60  ;;  %v1650_v4 = vmul.f32 %v1585_v61, %v5204_v2  ;;  %v5224_v59 = vld [vmem:[#allocation86_spill] sm:$0xff]  ;;  %v5225_v17 = vld [vmem:[#allocation87_spill] sm:$0xff]  ;;  %v5226_v41 = vld [vmem:[#allocation89_spill] sm:$0xff] }
 0x33d   :  { %2233 = vst [vmem:[%s4836_s4 + $0xbc] sm:$0xff] %v2176_v21  ;;  %v1651_v51 = vmul.f32 %v1585_v61, %v5205_v15  ;;  %v1652_v54 = vmul.f32 %v1585_v61, %v5206_v10  ;;  %v1653_v56 = vmul.f32 %v1585_v61, %v5207_v34  ;;  %v1654_v62 = vmul.f32 %v1585_v61, %v5208_v1 }
 0x33e   :  { %2234 = vst [vmem:[%s4836_s4 + $0xc4] sm:$0xff] %v2177_v32  ;;  %v1655_v33 = vmul.f32 %v1585_v61, %v5209_v8  ;;  %v1656_v39 = vmul.f32 %v1585_v61, %v5210_v16  ;;  %v1657_v20 = vmul.f32 %v1585_v61, %v5211_v49  ;;  %v1658_v27 = vmul.f32 %v1585_v61, %v5212_v45 }
 0x33f   :  { %2235 = vst [vmem:[%s4836_s4 + $0xcc] sm:$0xff] %v2178_v14  ;;  %v1659_v18 = vmul.f32 %v1585_v61, %v5213_v57  ;;  %v1660_v0 = vmul.f32 %v1585_v61, %v5214_v19  ;;  %v1661_v35 = vmul.f32 %v1585_v61, %v5215_v40  ;;  %v1662_v43 = vmul.f32 %v1585_v61, %v5216_v47  ;;  %v1713_v38 = vpop.permute.xlu2 %1712 }
 0x340   :  { %v1663_v12 = vmul.f32 %v1585_v61, %v5217_v3  ;;  %v1664_v30 = vmul.f32 %v1585_v61, %v5218_v7  ;;  %v1665_v53 = vmul.f32 %v1585_v61, %v5219_v58  ;;  %v1666_v42 = vmul.f32 %v1585_v61, %v5220_v5 }
 0x341   :  { %v1667_v44 = vmul.f32 %v1585_v61, %v5221_v13  ;;  %v1668_v28 = vmul.f32 %v1585_v61, %v5222_v48  ;;  %v1669_v26 = vmul.f32 %v1585_v61, %v5223_v24  ;;  %v1670_v46 = vmul.f32 %v1585_v61, %v5224_v59 }
 0x342   :  { %v1671_v9 = vmul.f32 %v1585_v61, %v5225_v17  ;;  %v1672_v63 = vmul.f32 %v1585_v61, %v5226_v41  ;;  %v1774_v21 = vadd.f32 %v1713_v38, %v1646_v55  ;;  %v1775_v32 = vadd.f32 %v1713_v38, %v1647_v37 }
 0x343   :  { %v4324_v14 = vadd.f32 %v1713_v38, %v1648_v36  ;;  %v4326_v25 = vadd.f32 %v1713_v38, %v1649_v11  ;;  %v4328_v52 = vadd.f32 %v1713_v38, %v1650_v4  ;;  %v4330_v6 = vadd.f32 %v1713_v38, %v1651_v51 }
 0x344   :  { %v4332_v60 = vadd.f32 %v1713_v38, %v1652_v54  ;;  %v4334_v2 = vadd.f32 %v1713_v38, %v1653_v56  ;;  %v4336_v15 = vadd.f32 %v1713_v38, %v1654_v62  ;;  %v4338_v10 = vadd.f32 %v1713_v38, %v1655_v33 }
 0x345   :  { %v4340_v34 = vadd.f32 %v1713_v38, %v1656_v39  ;;  %v4342_v61 = vadd.f32 %v1713_v38, %v1657_v20  ;;  %v4344_v55 = vadd.f32 %v1713_v38, %v1658_v27  ;;  %v4346_v37 = vadd.f32 %v1713_v38, %v1659_v18 }
 0x346   :  { %v4348_v36 = vadd.f32 %v1713_v38, %v1660_v0  ;;  %v4350_v11 = vadd.f32 %v1713_v38, %v1661_v35  ;;  %v4352_v4 = vadd.f32 %v1713_v38, %v1662_v43  ;;  %v4354_v51 = vadd.f32 %v1713_v38, %v1663_v12 }
 0x347   :  { %v4356_v54 = vadd.f32 %v1713_v38, %v1664_v30  ;;  %v4358_v56 = vadd.f32 %v1713_v38, %v1665_v53  ;;  %v4360_v1 = vadd.f32 %v1713_v38, %v1666_v42  ;;  %v4362_v62 = vadd.f32 %v1713_v38, %v1667_v44 }
 0x348   :  { %v4364_v8 = vadd.f32 %v1713_v38, %v1668_v28  ;;  %v4366_v33 = vadd.f32 %v1713_v38, %v1669_v26  ;;  %v4368_v16 = vadd.f32 %v1713_v38, %v1670_v46  ;;  %v4370_v39 = vadd.f32 %v1713_v38, %v1671_v9 }
 0x349   :  { %vm1882_vm3 = vcmp.ge.f32.partialorder %v1774_v21, 0.0  ;;  %vm1883_vm4 = vcmp.ge.f32.partialorder %v1775_v32, 0.0  ;;  %vm1884_vm6 = vcmp.ge.f32.partialorder %v4324_v14, 0.0  ;;  %vm1885_vm7 = vcmp.ge.f32.partialorder %v4326_v25, 0.0 }
 0x34a   :  { %vm1886_vm10 = vcmp.ge.f32.partialorder %v4328_v52, 0.0  ;;  %vm1887_vm11 = vcmp.ge.f32.partialorder %v4330_v6, 0.0  ;;  %vm1888_vm8 = vcmp.ge.f32.partialorder %v4332_v60, 0.0  ;;  %vm1889_vm9 = vcmp.ge.f32.partialorder %v4334_v2, 0.0 }
 0x34b   :  { %v1990_v49 = vmul.f32 0.01, %v1774_v21  ;;  %vm1892_vm14 = vcmp.ge.f32.partialorder %v4340_v34, 0.0  ;;  %vm1893_vm15 = vcmp.ge.f32.partialorder %v4342_v61, 0.0  ;;  %vm1894_vm0 = vcmp.ge.f32.partialorder %v4344_v55, 0.0 }
 0x34c   :  { %v1991_v20 = vmul.f32 0.01, %v1775_v32  ;;  %vm1897_vm5 = vcmp.ge.f32.partialorder %v4350_v11, 0.0  ;;  %v1992_v45 = vmul.f32 0.01, %v4324_v14  ;;  %v4387_v27 = vadd.f32 %v1713_v38, %v1672_v63 }
 0x34d   :  { %v1993_v57 = vmul.f32 0.01, %v4326_v25  ;;  %v1994_v18 = vmul.f32 0.01, %v4328_v52  ;;  %v1995_v19 = vmul.f32 0.01, %v4330_v6  ;;  %v2098_v47 = vsel %vm1882_vm3, %v1774_v21, %v1990_v49 }
 0x34e   :  { %v1996_v0 = vmul.f32 0.01, %v4332_v60  ;;  %v1997_v40 = vmul.f32 0.01, %v4334_v2  ;;  %v1998_v35 = vmul.f32 0.01, %v4336_v15  ;;  %v2099_v7 = vsel %vm1883_vm4, %v1775_v32, %v1991_v20 }
 0x34f   :  { %vm1902_vm12 = vcmp.ge.f32.partialorder %v4360_v1, 0.0  ;;  %v1999_v43 = vmul.f32 0.01, %v4338_v10  ;;  %v2000_v3 = vmul.f32 0.01, %v4340_v34  ;;  %vm1904_vm2 = vcmp.ge.f32.partialorder %v4364_v8, 0.0 }
 0x350   :  { %v2001_v12 = vmul.f32 0.01, %v4342_v61  ;;  %v2002_v30 = vmul.f32 0.01, %v4344_v55  ;;  %v2003_v58 = vmul.f32 0.01, %v4346_v37  ;;  %v2100_v38 = vsel %vm1884_vm6, %v4324_v14, %v1992_v45 }
 0x351   :  { %v2004_v53 = vmul.f32 0.01, %v4348_v36  ;;  %vm1906_vm3 = vcmp.ge.f32.partialorder %v4368_v16, 0.0  ;;  %vm1907_vm13 = vcmp.ge.f32.partialorder %v4370_v39, 0.0  ;;  %v2005_v5 = vmul.f32 0.01, %v4350_v11 }
 0x352   :  { %v2006_v42 = vmul.f32 0.01, %v4352_v4  ;;  %v2007_v13 = vmul.f32 0.01, %v4354_v51  ;;  %v2101_v44 = vsel %vm1885_vm7, %v4326_v25, %v1993_v57  ;;  %vm1854_vm4 = vcmp.ge.f32.partialorder %v3780_v22, 0.0 }
 0x353   :  { %vm1881_vm1 = vcmp.ge.f32.partialorder %v4259_v29, 0.0  ;;  %v2008_v48 = vmul.f32 0.01, %v4356_v54  ;;  %v2009_v28 = vmul.f32 0.01, %v4358_v56  ;;  %v2102_v24 = vsel %vm1886_vm10, %v4328_v52, %v1994_v18 }
 0x354   :  { %v2103_v26 = vsel %vm1887_vm11, %v4330_v6, %v1995_v19  ;;  %v2010_v59 = vmul.f32 0.01, %v4360_v1  ;;  %v2011_v46 = vmul.f32 0.01, %v4362_v62  ;;  %v2104_v17 = vsel %vm1888_vm8, %v4332_v60, %v1996_v0 }
 0x355   :  { %v2105_v9 = vsel %vm1889_vm9, %v4334_v2, %v1997_v40  ;;  %v2012_v41 = vmul.f32 0.01, %v4364_v8  ;;  %vm5227_vm6 = vcmp.ge.f32.partialorder %v4336_v15, 0.0  ;;  %vm5228_vm7 = vcmp.ge.f32.partialorder %v4338_v10, 0.0 }
 0x356   :  { %v2106_v63 = vsel %vm5227_vm6, %v4336_v15, %v1998_v35  ;;  %v2107_v21 = vsel %vm5228_vm7, %v4338_v10, %v1999_v43  ;;  %v2108_v32 = vsel %vm1892_vm14, %v4340_v34, %v2000_v3  ;;  %v2109_v14 = vsel %vm1893_vm15, %v4342_v61, %v2001_v12  ;;  %v5238_v3 = vld [vmem:[#allocation15_spill] sm:$0xff] }
 0x357   :  { %v2180_v25 = vpack.c.bf16 %v2099_v7, %v2098_v47  ;;  %v2181_v52 = vpack.c.bf16 %v2101_v44, %v2100_v38  ;;  %v2182_v6 = vpack.c.bf16 %v2103_v26, %v2102_v24  ;;  %v2013_v60 = vmul.f32 0.01, %v4366_v33  ;;  %v5239_v7 = vld [vmem:[#allocation17_spill] sm:$0xff]  ;;  %v5243_v44 = vld [vmem:[#allocation32_spill] sm:$0xff] }
 0x358   :  { %v2110_v2 = vsel %vm1894_vm0, %v4344_v55, %v2002_v30  ;;  %vm5229_vm10 = vcmp.ge.f32.partialorder %v4346_v37, 0.0  ;;  %v2183_v10 = vpack.c.bf16 %v2105_v9, %v2104_v17  ;;  %v2014_v34 = vmul.f32 0.01, %v4368_v16  ;;  %v5241_v38 = vld [vmem:[#allocation21_spill] sm:$0xff]  ;;  %v5245_v26 = vld [vmem:[#allocation36_spill] sm:$0xff] }
 0x359   :  { %v2111_v15 = vsel %vm5229_vm10, %v4346_v37, %v2003_v58  ;;  %vm5230_vm11 = vcmp.ge.f32.partialorder %v4348_v36, 0.0  ;;  %v2113_v49 = vsel %vm1897_vm5, %v4350_v11, %v2005_v5  ;;  %v2184_v20 = vpack.c.bf16 %v2107_v21, %v2106_v63  ;;  %2237 = vst [vmem:[%s4836_s4 + $0xd8] sm:$0xff] %v2180_v25  ;;  %v5240_v58 = vld [vmem:[#allocation23_spill] sm:$0xff]  ;;  %v5247_v9 = vld [vmem:[#allocation41_spill] sm:$0xff]  ;;  %v5250_v25 = vld [vmem:[#allocation54_spill] sm:$0xff] }
 0x35a   :  { %v2112_v61 = vsel %vm5230_vm11, %v4348_v36, %v2004_v53  ;;  %v2015_v55 = vmul.f32 0.01, %v4370_v39  ;;  %vm5231_vm8 = vcmp.ge.f32.partialorder %v4352_v4, 0.0  ;;  %vm5232_vm9 = vcmp.ge.f32.partialorder %v4354_v51, 0.0  ;;  %2238 = vst [vmem:[%s4836_s4 + $0xe0] sm:$0xff] %v2181_v52  ;;  %v5248_v63 = vld [vmem:[#allocation47_spill] sm:$0xff] }
 0x35b   :  { %v2114_v37 = vsel %vm5231_vm8, %v4352_v4, %v2006_v42  ;;  %v2115_v45 = vsel %vm5232_vm9, %v4354_v51, %v2007_v13  ;;  %v2185_v36 = vpack.c.bf16 %v2109_v14, %v2108_v32  ;;  %v2016_v11 = vmul.f32 0.01, %v4387_v27  ;;  %2239 = vst [vmem:[%s4836_s4 + $0xe8] sm:$0xff] %v2182_v6  ;;  %v5242_v42 = vld [vmem:[#allocation30_spill] sm:$0xff]  ;;  %v5251_v6 = vld [vmem:[#allocation56_spill] sm:$0xff] }
 0x35c   :  { %vm5233_vm14 = vcmp.ge.f32.partialorder %v4356_v54, 0.0  ;;  %vm5234_vm15 = vcmp.ge.f32.partialorder %v4358_v56, 0.0  ;;  %v2186_v4 = vpack.c.bf16 %v2111_v15, %v2110_v2  ;;  %vm1908_vm0 = vcmp.ge.f32.partialorder %v4387_v27, 0.0  ;;  %2240 = vst [vmem:[%s4836_s4 + $0xf0] sm:$0xff] %v2183_v10  ;;  %v5249_v32 = vld [vmem:[#allocation46_spill] sm:$0xff]  ;;  %v1718_v10 = vpop.permute.xlu1 %1717 }
 0x35d   :  { %v2116_v57 = vsel %vm5233_vm14, %v4356_v54, %v2008_v48  ;;  %v2117_v18 = vsel %vm5234_vm15, %v4358_v56, %v2009_v28  ;;  %v2118_v51 = vsel %vm1902_vm12, %v4360_v1, %v2010_v59  ;;  %vm5235_vm5 = vcmp.ge.f32.partialorder %v4362_v62, 0.0  ;;  %2241 = vst [vmem:[%s4836_s4 + $0xf8] sm:$0xff] %v2184_v20  ;;  %v5244_v28 = vld [vmem:[#allocation37_spill] sm:$0xff]  ;;  %v5252_v2 = vld [vmem:[#allocation62_spill] sm:$0xff] }
 0x35e   :  { %v2119_v19 = vsel %vm5235_vm5, %v4362_v62, %v2011_v46  ;;  %v2187_v54 = vpack.c.bf16 %v2113_v49, %v2112_v61  ;;  %v2120_v56 = vsel %vm1904_vm2, %v4364_v8, %v2012_v41  ;;  %vm5236_vm6 = vcmp.ge.f32.partialorder %v4366_v33, 0.0  ;;  %2242 = vst [vmem:[%s4836_s4 + $0x100] sm:$0xff] %v2185_v36  ;;  %v5246_v46 = vld [vmem:[#allocation40_spill] sm:$0xff] }
 0x35f   :  { %v2121_v0 = vsel %vm5236_vm6, %v4366_v33, %v2013_v60  ;;  %v2188_v40 = vpack.c.bf16 %v2115_v45, %v2114_v37  ;;  %v2122_v1 = vsel %vm1906_vm3, %v4368_v16, %v2014_v34  ;;  %v2123_v62 = vsel %vm1907_vm13, %v4370_v39, %v2015_v55  ;;  %2243 = vst [vmem:[%s4836_s4 + $0x108] sm:$0xff] %v2186_v4  ;;  %v5253_v34 = vld [vmem:[#allocation61_spill] sm:$0xff]  ;;  %v5254_v49 = vld [vmem:[#allocation68_spill] sm:$0xff]  ;;  %v5255_v55 = vld [vmem:[#allocation70_spill] sm:$0xff] }
 0x360   :  { %v2189_v35 = vpack.c.bf16 %v2117_v18, %v2116_v57  ;;  %v2070_v8 = vsel %vm1854_vm4, %v3780_v22, %v4277_v50  ;;  %v2097_v33 = vsel %vm1881_vm1, %v4259_v29, %v4284_v23  ;;  %v2124_v16 = vsel %vm1908_vm0, %v4387_v27, %v2016_v11  ;;  %2244 = vst [vmem:[%s4836_s4 + $0x110] sm:$0xff] %v2187_v54  ;;  %v5237_v23 = vld [vmem:[#allocation8_spill] sm:$0xff]  ;;  %v5256_v45 = vld [vmem:[#allocation75_spill] sm:$0xff]  ;;  %v5257_v11 = vld [vmem:[#allocation77_spill] sm:$0xff] }
 0x361   :  { %v2190_v47 = vpack.c.bf16 %v2119_v19, %v2118_v51  ;;  %v2191_v39 = vpack.c.bf16 %v2121_v0, %v2120_v56  ;;  %v2192_v43 = vpack.c.bf16 %v2123_v62, %v2122_v1  ;;  %2245 = vst [vmem:[%s4836_s4 + $0x118] sm:$0xff] %v2188_v40  ;;  %v2165_v22 = vpack.c.bf16 %v2070_v8, %v2070_v8  ;;  %v5258_v18 = vld [vmem:[#allocation79_spill] sm:$0xff]  ;;  %v5259_v51 = vld [vmem:[#allocation81_spill] sm:$0xff]  ;;  %v5260_v54 = vld [vmem:[#allocation88_spill] sm:$0xff] }
 0x362   :  { %v2179_v50 = vpack.c.bf16 %v2097_v33, %v2097_v33  ;;  %v2193_v29 = vpack.c.bf16 %v2124_v16, %v2124_v16  ;;  %2246 = vst [vmem:[%s4836_s4 + $0x120] sm:$0xff] %v2189_v35  ;;  %v1673_v27 = vmul.f32 %v4247_v31, %v5237_v23  ;;  %v1674_v12 = vmul.f32 %v4247_v31, %v5238_v3  ;;  %v5261_v0 = vld [vmem:[#allocation90_spill] sm:$0xff]  ;;  %v5262_v1 = vld [vmem:[#allocation91_spill] sm:$0xff]  ;;  %v5263_v35 = vld [vmem:[#allocation92_spill] sm:$0xff] }
 0x363   :  { %2247 = vst [vmem:[%s4836_s4 + $0x128] sm:$0xff] %v2190_v47  ;;  %v1675_v30 = vmul.f32 %v4247_v31, %v5239_v7  ;;  %v1676_v53 = vmul.f32 %v4247_v31, %v5240_v58  ;;  %vm4978_vm12 = vcmask 273408   ;;  %v1677_v5 = vmul.f32 %v4247_v31, %v5241_v38 }
 0x364   :  { %2248 = vst [vmem:[%s4836_s4 + $0x130] sm:$0xff] %v2191_v39  ;;  %v1678_v13 = vmul.f32 %v4247_v31, %v5242_v42  ;;  %v1679_v48 = vmul.f32 %v4247_v31, %v5243_v44  ;;  %v1680_v24 = vmul.f32 %v4247_v31, %v5244_v28  ;;  %v1681_v59 = vmul.f32 %v4247_v31, %v5245_v26 }
 0x365   :  { %2249 = vst [vmem:[%s4836_s4 + $0x138] sm:$0xff] %v2192_v43  ;;  %v1682_v17 = vmul.f32 %v4247_v31, %v5246_v46  ;;  %v1683_v41 = vmul.f32 %v4247_v31, %v5247_v9  ;;  %v1684_v21 = vmul.f32 %v4247_v31, %v5248_v63  ;;  %v1685_v14 = vmul.f32 %v4247_v31, %v5249_v32 }
 0x366   :  { %v1686_v52 = vmul.f32 %v4247_v31, %v5250_v25  ;;  %v1687_v60 = vmul.f32 %v4247_v31, %v5251_v6  ;;  %v1688_v15 = vmul.f32 %v4247_v31, %v5252_v2  ;;  %2222 = vst.msk [vmem:[%s4836_s4 + $0x68] sm:$0xf] %vm4978_vm12, %v2165_v22  ;;  %v1689_v61 = vmul.f32 %v4247_v31, %v5253_v34 }
 0x367   :  { %v1690_v20 = vmul.f32 %v4247_v31, %v5254_v49  ;;  %v1691_v37 = vmul.f32 %v4247_v31, %v5255_v55  ;;  %v1692_v36 = vmul.f32 %v4247_v31, %v5256_v45  ;;  %2236 = vst.msk [vmem:[%s4836_s4 + $0xd4] sm:$0xf] %vm4978_vm12, %v2179_v50  ;;  %v1693_v57 = vmul.f32 %v4247_v31, %v5257_v11 }
 0x368   :  { %v1694_v4 = vmul.f32 %v4247_v31, %v5258_v18  ;;  %v1695_v19 = vmul.f32 %v4247_v31, %v5259_v51  ;;  %v1696_v56 = vmul.f32 %v4247_v31, %v5260_v54  ;;  %2250 = vst.msk [vmem:[%s4836_s4 + $0x140] sm:$0xf] %vm4978_vm12, %v2193_v29  ;;  %v1697_v40 = vmul.f32 %v4247_v31, %v5261_v0 }
 0x369   :  { %v1698_v62 = vmul.f32 %v4247_v31, %v5262_v1  ;;  %v1699_v8 = vmul.f32 %v4247_v31, %v5263_v35  ;;  %v1801_v33 = vadd.f32 %v1718_v10, %v1673_v27  ;;  %v1802_v16 = vadd.f32 %v1718_v10, %v1674_v12 }
 0x36a   :  { %v4614_v47 = vadd.f32 %v1718_v10, %v1675_v30  ;;  %v4616_v39 = vadd.f32 %v1718_v10, %v1676_v53  ;;  %v4618_v43 = vadd.f32 %v1718_v10, %v1677_v5  ;;  %v4620_v22 = vadd.f32 %v1718_v10, %v1678_v13 }
 0x36b   :  { %v4622_v50 = vadd.f32 %v1718_v10, %v1679_v48  ;;  %v4624_v29 = vadd.f32 %v1718_v10, %v1680_v24  ;;  %v4626_v23 = vadd.f32 %v1718_v10, %v1681_v59  ;;  %v4628_v3 = vadd.f32 %v1718_v10, %v1682_v17 }
 0x36c   :  { %v4630_v7 = vadd.f32 %v1718_v10, %v1683_v41  ;;  %v4632_v31 = vadd.f32 %v1718_v10, %v1684_v21  ;;  %v4634_v27 = vadd.f32 %v1718_v10, %v1685_v14  ;;  %v4636_v12 = vadd.f32 %v1718_v10, %v1686_v52 }
 0x36d   :  { %v4638_v30 = vadd.f32 %v1718_v10, %v1687_v60  ;;  %v4640_v58 = vadd.f32 %v1718_v10, %v1688_v15  ;;  %v4642_v53 = vadd.f32 %v1718_v10, %v1689_v61  ;;  %v4644_v38 = vadd.f32 %v1718_v10, %v1690_v20 }
 0x36e   :  { %v4646_v5 = vadd.f32 %v1718_v10, %v1691_v37  ;;  %v4648_v42 = vadd.f32 %v1718_v10, %v1692_v36  ;;  %v4650_v13 = vadd.f32 %v1718_v10, %v1693_v57  ;;  %v4652_v44 = vadd.f32 %v1718_v10, %v1694_v4 }
 0x36f   :  { %v4654_v48 = vadd.f32 %v1718_v10, %v1695_v19  ;;  %v4656_v28 = vadd.f32 %v1718_v10, %v1696_v56  ;;  %v4658_v24 = vadd.f32 %v1718_v10, %v1697_v40  ;;  %v4660_v26 = vadd.f32 %v1718_v10, %v1698_v62 }
 0x370   :  { %vm1909_vm13 = vcmp.ge.f32.partialorder %v1801_v33, 0.0  ;;  %vm1910_vm1 = vcmp.ge.f32.partialorder %v1802_v16, 0.0  ;;  %vm1911_vm2 = vcmp.ge.f32.partialorder %v4614_v47, 0.0  ;;  %vm1912_vm3 = vcmp.ge.f32.partialorder %v4616_v39, 0.0 }
 0x371   :  { %vm1913_vm4 = vcmp.ge.f32.partialorder %v4618_v43, 0.0  ;;  %vm1914_vm7 = vcmp.ge.f32.partialorder %v4620_v22, 0.0  ;;  %vm1915_vm10 = vcmp.ge.f32.partialorder %v4622_v50, 0.0  ;;  %vm1916_vm11 = vcmp.ge.f32.partialorder %v4624_v29, 0.0 }
 0x372   :  { %v2017_v59 = vmul.f32 0.01, %v1801_v33  ;;  %vm1919_vm14 = vcmp.ge.f32.partialorder %v4630_v7, 0.0  ;;  %vm1920_vm15 = vcmp.ge.f32.partialorder %v4632_v31, 0.0  ;;  %vm1921_vm0 = vcmp.ge.f32.partialorder %v4634_v27, 0.0 }
 0x373   :  { %v2018_v46 = vmul.f32 0.01, %v1802_v16  ;;  %vm1924_vm12 = vcmp.ge.f32.partialorder %v4640_v58, 0.0  ;;  %v2019_v17 = vmul.f32 0.01, %v4614_v47  ;;  %v4677_v9 = vadd.f32 %v1718_v10, %v1699_v8 }
 0x374   :  { %v2020_v41 = vmul.f32 0.01, %v4616_v39  ;;  %v2021_v63 = vmul.f32 0.01, %v4618_v43  ;;  %v2022_v21 = vmul.f32 0.01, %v4620_v22  ;;  %v2125_v52 = vsel %vm1909_vm13, %v1801_v33, %v2017_v59 }
 0x375   :  { %v2023_v32 = vmul.f32 0.01, %v4622_v50  ;;  %v2024_v14 = vmul.f32 0.01, %v4624_v29  ;;  %v2025_v25 = vmul.f32 0.01, %v4626_v23  ;;  %v2126_v15 = vsel %vm1910_vm1, %v1802_v16, %v2018_v46 }
 0x376   :  { %vm1929_vm8 = vcmp.ge.f32.partialorder %v4650_v13, 0.0  ;;  %v2026_v6 = vmul.f32 0.01, %v4628_v3  ;;  %v2027_v60 = vmul.f32 0.01, %v4630_v7  ;;  %vm1931_vm6 = vcmp.ge.f32.partialorder %v4654_v48, 0.0 }
 0x377   :  { %v2028_v2 = vmul.f32 0.01, %v4632_v31  ;;  %vm1932_vm5 = vcmp.ge.f32.partialorder %v4656_v28, 0.0  ;;  %v2029_v10 = vmul.f32 0.01, %v4634_v27  ;;  %v2127_v49 = vsel %vm1911_vm2, %v4614_v47, %v2019_v17 }
 0x378   :  { %v2030_v34 = vmul.f32 0.01, %v4636_v12  ;;  %v2031_v61 = vmul.f32 0.01, %v4638_v30  ;;  %vm1933_vm13 = vcmp.ge.f32.partialorder %v4658_v24, 0.0  ;;  %vm1934_vm9 = vcmp.ge.f32.partialorder %v4660_v26, 0.0 }
 0x379   :  { %v2032_v20 = vmul.f32 0.01, %v4640_v58  ;;  %v2033_v55 = vmul.f32 0.01, %v4642_v53  ;;  %v2034_v37 = vmul.f32 0.01, %v4644_v38  ;;  %v2128_v45 = vsel %vm1912_vm3, %v4616_v39, %v2020_v41 }
 0x37a   :  { %v2035_v36 = vmul.f32 0.01, %v4646_v5  ;;  %v2036_v11 = vmul.f32 0.01, %v4648_v42  ;;  %v2129_v57 = vsel %vm1913_vm4, %v4618_v43, %v2021_v63  ;;  %v2130_v18 = vsel %vm1914_vm7, %v4620_v22, %v2022_v21 }
 0x37b   :  { %v2037_v4 = vmul.f32 0.01, %v4650_v13  ;;  %v2038_v51 = vmul.f32 0.01, %v4652_v44  ;;  %v2131_v19 = vsel %vm1915_vm10, %v4622_v50, %v2023_v32  ;;  %v2132_v54 = vsel %vm1916_vm11, %v4624_v29, %v2024_v14 }
 0x37c   :  { %v2039_v56 = vmul.f32 0.01, %v4654_v48  ;;  %vm5264_vm1 = vcmp.ge.f32.partialorder %v4626_v23, 0.0  ;;  %vm5265_vm2 = vcmp.ge.f32.partialorder %v4628_v3, 0.0  ;;  %v2135_v1 = vsel %vm1919_vm14, %v4630_v7, %v2027_v60 }
 0x37d   :  { %v2133_v0 = vsel %vm5264_vm1, %v4626_v23, %v2025_v25  ;;  %v2134_v40 = vsel %vm5265_vm2, %v4628_v3, %v2026_v6  ;;  %v2136_v62 = vsel %vm1920_vm15, %v4632_v31, %v2028_v2  ;;  %v2194_v35 = vpack.c.bf16 %v2126_v15, %v2125_v52 }
 0x37e   :  { %v2195_v8 = vpack.c.bf16 %v2128_v45, %v2127_v49  ;;  %v2196_v33 = vpack.c.bf16 %v2130_v18, %v2129_v57  ;;  %v2040_v16 = vmul.f32 0.01, %v4656_v28  ;;  %v2137_v47 = vsel %vm1921_vm0, %v4634_v27, %v2029_v10 }
 0x37f   :  { %vm5266_vm3 = vcmp.ge.f32.partialorder %v4636_v12, 0.0  ;;  %v2197_v43 = vpack.c.bf16 %v2132_v54, %v2131_v19  ;;  %v2041_v22 = vmul.f32 0.01, %v4658_v24  ;;  %vm5267_vm4 = vcmp.ge.f32.partialorder %v4638_v30, 0.0  ;;  %2251 = vst [vmem:[%s4836_s4 + $0x144] sm:$0xff] %v2194_v35 }
 0x380   :  { %v2138_v39 = vsel %vm5266_vm3, %v4636_v12, %v2030_v34  ;;  %v2139_v50 = vsel %vm5267_vm4, %v4638_v30, %v2031_v61  ;;  %v2140_v29 = vsel %vm1924_vm12, %v4640_v58, %v2032_v20  ;;  %v2198_v23 = vpack.c.bf16 %v2134_v40, %v2133_v0  ;;  %2252 = vst [vmem:[%s4836_s4 + $0x14c] sm:$0xff] %v2195_v8 }
 0x381   :  { %v2042_v3 = vmul.f32 0.01, %v4660_v26  ;;  %vm5268_vm7 = vcmp.ge.f32.partialorder %v4642_v53, 0.0  ;;  %vm5269_vm10 = vcmp.ge.f32.partialorder %v4644_v38, 0.0  ;;  %v2199_v27 = vpack.c.bf16 %v2136_v62, %v2135_v1  ;;  %2253 = vst [vmem:[%s4836_s4 + $0x154] sm:$0xff] %v2196_v33 }
 0x382   :  { %v2141_v7 = vsel %vm5268_vm7, %v4642_v53, %v2033_v55  ;;  %v2142_v31 = vsel %vm5269_vm10, %v4644_v38, %v2034_v37  ;;  %v2043_v12 = vmul.f32 0.01, %v4677_v9  ;;  %vm5270_vm12 = vcmp.ge.f32.partialorder %v4646_v5, 0.0  ;;  %2254 = vst [vmem:[%s4836_s4 + $0x15c] sm:$0xff] %v2197_v43 }
 0x383   :  { %v2143_v30 = vsel %vm5270_vm12, %v4646_v5, %v2035_v36  ;;  %vm5271_vm11 = vcmp.ge.f32.partialorder %v4648_v42, 0.0  ;;  %v2200_v53 = vpack.c.bf16 %v2138_v39, %v2137_v47  ;;  %vm1935_vm14 = vcmp.ge.f32.partialorder %v4677_v9, 0.0  ;;  %2255 = vst [vmem:[%s4836_s4 + $0x164] sm:$0xff] %v2198_v23 }
 0x384   :  { %v2144_v58 = vsel %vm5271_vm11, %v4648_v42, %v2036_v11  ;;  %v2145_v38 = vsel %vm1929_vm8, %v4650_v13, %v2037_v4  ;;  %vm5272_vm15 = vcmp.ge.f32.partialorder %v4652_v44, 0.0  ;;  %v2201_v5 = vpack.c.bf16 %v2140_v29, %v2139_v50  ;;  %2256 = vst [vmem:[%s4836_s4 + $0x16c] sm:$0xff] %v2199_v27 }
 0x385   :  { %v2146_v59 = vsel %vm5272_vm15, %v4652_v44, %v2038_v51  ;;  %v2147_v42 = vsel %vm1931_vm6, %v4654_v48, %v2039_v56  ;;  %v2148_v46 = vsel %vm1932_vm5, %v4656_v28, %v2040_v16  ;;  %v2202_v17 = vpack.c.bf16 %v2142_v31, %v2141_v7  ;;  %2257 = vst [vmem:[%s4836_s4 + $0x174] sm:$0xff] %v2200_v53 }
 0x386   :  { %v2149_v13 = vsel %vm1933_vm13, %v4658_v24, %v2041_v22  ;;  %v2150_v44 = vsel %vm1934_vm9, %v4660_v26, %v2042_v3  ;;  %v2203_v41 = vpack.c.bf16 %v2144_v58, %v2143_v30  ;;  %v2151_v48 = vsel %vm1935_vm14, %v4677_v9, %v2043_v12  ;;  %2258 = vst [vmem:[%s4836_s4 + $0x17c] sm:$0xff] %v2201_v5 }
 0x387   :  { %v2204_v28 = vpack.c.bf16 %v2146_v59, %v2145_v38  ;;  %v2205_v63 = vpack.c.bf16 %v2148_v46, %v2147_v42  ;;  %v2206_v24 = vpack.c.bf16 %v2150_v44, %v2149_v13  ;;  %2259 = vst [vmem:[%s4836_s4 + $0x184] sm:$0xff] %v2202_v17  ;;  %v2207_v26 = vpack.c.bf16 %v2151_v48, %v2151_v48 }
 0x388   :  { %2260 = vst [vmem:[%s4836_s4 + $0x18c] sm:$0xff] %v2203_v41  ;;  %vm5273_vm8 = vcmask 273408  }
 0x389   :  { %2261 = vst [vmem:[%s4836_s4 + $0x194] sm:$0xff] %v2204_v28 }
 0x38a   :  { %2262 = vst [vmem:[%s4836_s4 + $0x19c] sm:$0xff] %v2205_v63 }
 0x38b   :  { %2263 = vst [vmem:[%s4836_s4 + $0x1a4] sm:$0xff] %v2206_v24 }
 0x38c   :  { %2264 = vst.msk [vmem:[%s4836_s4 + $0x1ac] sm:$0xf] %vm5273_vm8, %v2207_v26 }

// kernel: vae_forward.6
= control target key start
LH: loop header
LB: loop body
LE: loop exit
PB: predicated region body
PF: predicated region fallthrough
CT: control target
= control target key end

     0   :  { %vm848_vm0 = vcmask 261120   ;;  %s3566_s1 = inlined_call_operand.vmem [shape: bf16[288,800], index: 1, kind: input, shape index: {}]   ;;  %s3567_s0 = inlined_call_operand.vmem [shape: bf16[32,288], index: 0, kind: input, shape index: {}]   ;;  %s3568_s2 = inlined_call_operand.vmem [shape: f32[32,1], index: 2, kind: input, shape index: {}]   ;;  %s3569_s3 = inlined_call_operand.vmem [shape: f32[32,1], index: 3, kind: input, shape index: {}]   ;;  %s3570_s4 = inlined_call_operand.vmem [shape: bf16[32,800], index: 4, kind: output, shape index: {}]  }
   0x1   :  { %v1900_v0 = vld [vmem:[%s3566_s1 + $0x188] sm:$0xf]  ;;  %v2278_v1 = vld [vmem:[%s3566_s1 + $0x1a0] sm:$0xf0]  ;;  %v2180_v5 = vld [vmem:[%s3566_s1 + $0x3b8] sm:$0xf] }
   0x2   :  { %v2124_v2 = vld [vmem:[%s3566_s1 + $0x348] sm:$0xf]  ;;  %v1901_v3 = vor.u32 %v2278_v1, %v1900_v0  ;;  %v2334_v4 = vld [vmem:[%s3566_s1 + $0x360] sm:$0xf0]  ;;  %v2348_v6 = vld [vmem:[%s3566_s1 + $0x3d0] sm:$0xf0] }
   0x3   :  { %v2125_v7 = vor.u32 %v2334_v4, %v2124_v2  ;;  %v2181_v8 = vor.u32 %v2348_v6, %v2180_v5  ;;  %v2275_v9 = vld [vmem:[%s3566_s1 + $0x18c] sm:$0xf]  ;;  %v1902_v10 = vld [vmem:[%s3566_s1 + $0x1a4] sm:$0xf0]  ;;  %v1872_v11 = vld [vmem:[%s3566_s1 + $0x150] sm:$0xf] }
   0x4   :  { %855 = vmatpush.bf16.msra.mxu0 %v1901_v3  ;;  %v1905_v12 = vor.u32 %v2275_v9, %v1902_v10  ;;  %v2271_v13 = vld [vmem:[%s3566_s1 + $0x168] sm:$0xf0]  ;;  %v2096_v14 = vld [vmem:[%s3566_s1 + $0x310] sm:$0xf]  ;;  %v2152_v18 = vld [vmem:[%s3566_s1 + $0x380] sm:$0xf] }
   0x5   :  { %v2327_v15 = vld [vmem:[%s3566_s1 + $0x328] sm:$0xf0]  ;;  %874 = vmatpush.bf16.msra.mxu1 %v2125_v7  ;;  %899 = vmatpush.bf16.msra.mxu2 %v2181_v8  ;;  %v1873_v16 = vor.u32 %v2271_v13, %v1872_v11  ;;  %v2341_v19 = vld [vmem:[%s3566_s1 + $0x398] sm:$0xf0]  ;;  %v2268_v20 = vld [vmem:[%s3566_s1 + $0x154] sm:$0xf] }
   0x6   :  { %v2097_v17 = vor.u32 %v2327_v15, %v2096_v14  ;;  %912 = vmatpush.bf16.msra.mxu3 %v1905_v12  ;;  %v2153_v21 = vor.u32 %v2341_v19, %v2152_v18  ;;  %v1874_v22 = vld [vmem:[%s3566_s1 + $0x16c] sm:$0xf0]  ;;  %v1688_v23 = vld [vmem:[%s3567_s0 + $0x8] sm:$0xf]  ;;  %v2222_v24 = vld [vmem:[%s3567_s0 + $0x10] sm:$0xf0] }
   0x7   :  { %v1877_v25 = vor.u32 %v2268_v20, %v1874_v22  ;;  %v2331_v26 = vld [vmem:[%s3566_s1 + $0x34c] sm:$0xf]  ;;  %v2126_v27 = vld [vmem:[%s3566_s1 + $0x364] sm:$0xf0]  ;;  %v1844_v28 = vld [vmem:[%s3566_s1 + $0x118] sm:$0xf]  ;;  %v2457_v29 = vor.u32 %v2222_v24, %v1688_v23 }
   0x8   :  { %856 = vmatpush.bf16.msra.mxu0 %v1873_v16  ;;  %v2129_v30 = vor.u32 %v2331_v26, %v2126_v27  ;;  %v2264_v31 = vld [vmem:[%s3566_s1 + $0x130] sm:$0xf0]  ;;  %v2068_v32 = vld [vmem:[%s3566_s1 + $0x2d8] sm:$0xf]  ;;  %v2261_v36 = vld [vmem:[%s3566_s1 + $0x11c] sm:$0xf] }
   0x9   :  { %v2320_v33 = vld [vmem:[%s3566_s1 + $0x2f0] sm:$0xf0]  ;;  %875 = vmatpush.bf16.msra.mxu1 %v2097_v17  ;;  %900 = vmatpush.bf16.msra.mxu2 %v2153_v21  ;;  %v1845_v34 = vor.u32 %v2264_v31, %v1844_v28  ;;  %v1846_v37 = vld [vmem:[%s3566_s1 + $0x134] sm:$0xf0]  ;;  %v2098_v40 = vld [vmem:[%s3566_s1 + $0x32c] sm:$0xf0] }
   0xa   :  { %v2069_v35 = vor.u32 %v2320_v33, %v2068_v32  ;;  %v2324_v38 = vld [vmem:[%s3566_s1 + $0x314] sm:$0xf]  ;;  %913 = vmatpush.bf16.msra.mxu3 %v1877_v25  ;;  %v1849_v39 = vor.u32 %v2261_v36, %v1846_v37  ;;  %v1816_v41 = vld [vmem:[%s3566_s1 + $0xe0] sm:$0xf]  ;;  %v2257_v42 = vld [vmem:[%s3566_s1 + $0xf8] sm:$0xf0] }
   0xb   :  { %v2101_v43 = vor.u32 %v2324_v38, %v2098_v40  ;;  %v2040_v44 = vld [vmem:[%s3566_s1 + $0x2a0] sm:$0xf]  ;;  %v2313_v45 = vld [vmem:[%s3566_s1 + $0x2b8] sm:$0xf0]  ;;  %v2254_v46 = vld [vmem:[%s3566_s1 + $0xe4] sm:$0xf]  ;;  %v1817_v47 = vor.u32 %v2257_v42, %v1816_v41 }
   0xc   :  { %2206 = vmatmul.msk.bf16.vlgmr.msra.gmra.mxu2 %vm848_vm0, %v2457_v29  ;;  %857 = vmatpush.bf16.msra.mxu0 %v1845_v34  ;;  %v1818_v48 = vld [vmem:[%s3566_s1 + $0xfc] sm:$0xf0]  ;;  %v2317_v49 = vld [vmem:[%s3566_s1 + $0x2dc] sm:$0xf]  ;;  %v2070_v50 = vld [vmem:[%s3566_s1 + $0x2f4] sm:$0xf0]  ;;  %v2041_v51 = vor.u32 %v2313_v45, %v2040_v44 }
   0xd   :  { %931 = vmatpush.bf16.msrb.mxu2 %v2129_v30  ;;  %876 = vmatpush.bf16.msra.mxu1 %v2069_v35  ;;  %v1788_v52 = vld [vmem:[%s3566_s1 + $0xa8] sm:$0xf]  ;;  %v2250_v53 = vld [vmem:[%s3566_s1 + $0xc0] sm:$0xf0]  ;;  %v1821_v54 = vor.u32 %v2254_v46, %v1818_v48  ;;  %v2073_v55 = vor.u32 %v2317_v49, %v2070_v50  ;;  %v2247_v58 = vld [vmem:[%s3566_s1 + $0xac] sm:$0xf] }
   0xe   :  { %914 = vmatpush.bf16.msra.mxu3 %v1849_v39  ;;  %v2012_v56 = vld [vmem:[%s3566_s1 + $0x268] sm:$0xf]  ;;  %v2306_v57 = vld [vmem:[%s3566_s1 + $0x280] sm:$0xf0]  ;;  %v2042_v61 = vld [vmem:[%s3566_s1 + $0x2bc] sm:$0xf0]  ;;  %v1789_v62 = vor.u32 %v2250_v53, %v1788_v52 }
   0xf   :  { %v1790_v59 = vld [vmem:[%s3566_s1 + $0xc4] sm:$0xf0]  ;;  %v2310_v60 = vld [vmem:[%s3566_s1 + $0x2a4] sm:$0xf]  ;;  %v2013_v63 = vor.u32 %v2306_v57, %v2012_v56  ;;  %v1760_v0 = vld [vmem:[%s3566_s1 + $0x70] sm:$0xf] }
  0x10   :  { %858 = vmatpush.bf16.msra.mxu0 %v1817_v47  ;;  %v2243_v1 = vld [vmem:[%s3566_s1 + $0x88] sm:$0xf0]  ;;  %v1793_v2 = vor.u32 %v2247_v58, %v1790_v59  ;;  %v2045_v3 = vor.u32 %v2310_v60, %v2042_v61  ;;  %v1984_v4 = vld [vmem:[%s3566_s1 + $0x230] sm:$0xf]  ;;  %v2240_v6 = vld [vmem:[%s3566_s1 + $0x74] sm:$0xf] }
  0x11   :  { %932 = vmatpush.bf16.msrb.mxu2 %v2101_v43  ;;  %877 = vmatpush.bf16.msra.mxu1 %v2041_v51  ;;  %v2299_v5 = vld [vmem:[%s3566_s1 + $0x248] sm:$0xf0]  ;;  %v1762_v7 = vld [vmem:[%s3566_s1 + $0x8c] sm:$0xf0]  ;;  %v2014_v9 = vld [vmem:[%s3566_s1 + $0x284] sm:$0xf0]  ;;  %v1761_v10 = vor.u32 %v2243_v1, %v1760_v0 }
  0x12   :  { %915 = vmatpush.bf16.msra.mxu3 %v1821_v54  ;;  %v2303_v8 = vld [vmem:[%s3566_s1 + $0x26c] sm:$0xf]  ;;  %v1700_v11 = vld [vmem:[%s3567_s0 + $0x20] sm:$0xf]  ;;  %v1985_v12 = vor.u32 %v2299_v5, %v1984_v4  ;;  %v1732_v14 = vld [vmem:[%s3566_s1 + $0x38] sm:$0xf]  ;;  %v1765_v16 = vor.u32 %v2240_v6, %v1762_v7 }
  0x13   :  { %v2225_v13 = vld [vmem:[%s3567_s0 + $0x28] sm:$0xf0]  ;;  %v2236_v15 = vld [vmem:[%s3566_s1 + $0x50] sm:$0xf0]  ;;  %v2017_v17 = vor.u32 %v2303_v8, %v2014_v9  ;;  %v1956_v18 = vld [vmem:[%s3566_s1 + $0x1f8] sm:$0xf] }
  0x14   :  { %859 = vmatpush.bf16.msra.mxu0 %v1789_v62  ;;  %v2292_v19 = vld [vmem:[%s3566_s1 + $0x210] sm:$0xf0]  ;;  %v2233_v20 = vld [vmem:[%s3566_s1 + $0x3c] sm:$0xf]  ;;  %v1734_v21 = vld [vmem:[%s3566_s1 + $0x54] sm:$0xf0]  ;;  %v2584_v24 = vor.u32 %v2225_v13, %v1700_v11  ;;  %v1733_v25 = vor.u32 %v2236_v15, %v1732_v14 }
  0x15   :  { %933 = vmatpush.bf16.msrb.mxu2 %v2073_v55  ;;  %878 = vmatpush.bf16.msra.mxu1 %v2013_v63  ;;  %v2296_v22 = vld [vmem:[%s3566_s1 + $0x234] sm:$0xf]  ;;  %v1986_v23 = vld [vmem:[%s3566_s1 + $0x24c] sm:$0xf0]  ;;  %v1957_v26 = vor.u32 %v2292_v19, %v1956_v18  ;;  %v1704_v27 = vld [vmem:[%s3566_s1] sm:$0xf]  ;;  %v1737_v31 = vor.u32 %v2233_v20, %v1734_v21 }
  0x16   :  { %916 = vmatpush.bf16.msra.mxu3 %v1793_v2  ;;  %v2229_v28 = vld [vmem:[%s3566_s1 + $0x18] sm:$0xf0]  ;;  %v1928_v30 = vld [vmem:[%s3566_s1 + $0x1c0] sm:$0xf]  ;;  %v1989_v32 = vor.u32 %v2296_v22, %v1986_v23  ;;  %v2226_v34 = vld [vmem:[%s3566_s1 + $0x4] sm:$0xf] }
  0x17   :  { %v2285_v33 = vld [vmem:[%s3566_s1 + $0x1d8] sm:$0xf0]  ;;  %v1706_v35 = vld [vmem:[%s3566_s1 + $0x1c] sm:$0xf0]  ;;  %v1958_v38 = vld [vmem:[%s3566_s1 + $0x214] sm:$0xf0]  ;;  %v1705_v39 = vor.u32 %v2229_v28, %v1704_v27 }
  0x18   :  { %860 = vmatpush.bf16.msra.mxu0 %v1761_v10  ;;  %v1680_v36 = vld [vmem:[%s3567_s0] sm:$0xf]  ;;  %v2289_v37 = vld [vmem:[%s3566_s1 + $0x1fc] sm:$0xf]  ;;  %v2221_v40 = vld [vmem:[%s3567_s0 + $0x8] sm:$0xf0]  ;;  %v1929_v43 = vor.u32 %v2285_v33, %v1928_v30  ;;  %v1709_v47 = vor.u32 %v2226_v34, %v1706_v35 }
  0x19   :  { %934 = vmatpush.bf16.msrb.mxu2 %v2045_v3  ;;  %879 = vmatpush.bf16.msra.mxu1 %v1985_v12  ;;  %v2132_v41 = vld [vmem:[%s3566_s1 + $0x350] sm:$0xf]  ;;  %v2335_v42 = vld [vmem:[%s3566_s1 + $0x368] sm:$0xf0]  ;;  %v2220_v44 = vld [vmem:[%s3567_s0 + $0x4] sm:$0xf]  ;;  %v1961_v48 = vor.u32 %v2289_v37, %v1958_v38  ;;  %v2642_v52 = vor.u32 %v2221_v40, %v1680_v36 }
  0x1a   :  { %917 = vmatpush.bf16.msra.mxu3 %v1765_v16  ;;  %v1682_v45 = vld [vmem:[%s3567_s0 + $0xc] sm:$0xf0]  ;;  %v2279_v49 = vld [vmem:[%s3566_s1 + $0x1a8] sm:$0xf0]  ;;  %v2282_v50 = vld [vmem:[%s3566_s1 + $0x1c4] sm:$0xf]  ;;  %v2133_v53 = vor.u32 %v2335_v42, %v2132_v41 }
  0x1b   :  { %v1908_v46 = vld [vmem:[%s3566_s1 + $0x190] sm:$0xf]  ;;  %v1930_v51 = vld [vmem:[%s3566_s1 + $0x1dc] sm:$0xf0]  ;;  %v2104_v54 = vld [vmem:[%s3566_s1 + $0x318] sm:$0xf]  ;;  %v2653_v57 = vor.u32 %v2220_v44, %v1682_v45 }
  0x1c   :  { %2207 = vmatmul.msk.bf16.gmra.mxu2 %vm848_vm0, %v2584_v24  ;;  %861 = vmatpush.bf16.msra.mxu0 %v1733_v25  ;;  %v2345_v55 = vld [vmem:[%s3566_s1 + $0x3bc] sm:$0xf]  ;;  %v2182_v56 = vld [vmem:[%s3566_s1 + $0x3d4] sm:$0xf0]  ;;  %v2328_v58 = vld [vmem:[%s3566_s1 + $0x330] sm:$0xf0]  ;;  %v1909_v62 = vor.u32 %v2279_v49, %v1908_v46  ;;  %v1933_v63 = vor.u32 %v2282_v50, %v1930_v51 }
  0x1d   :  { %935 = vmatpush.bf16.msrb.mxu2 %v2017_v17  ;;  %880 = vmatpush.bf16.msra.mxu1 %v1957_v26  ;;  %v2188_v59 = vld [vmem:[%s3566_s1 + $0x3c0] sm:$0xf]  ;;  %v2349_v60 = vld [vmem:[%s3566_s1 + $0x3d8] sm:$0xf0]  ;;  %v2185_v61 = vor.u32 %v2345_v55, %v2182_v56  ;;  %v1880_v0 = vld [vmem:[%s3566_s1 + $0x158] sm:$0xf]  ;;  %v2105_v2 = vor.u32 %v2328_v58, %v2104_v54 }
  0x1e   :  { %918 = vmatpush.bf16.msra.mxu3 %v1737_v31  ;;  %v2272_v1 = vld [vmem:[%s3566_s1 + $0x170] sm:$0xf0]  ;;  %v2189_v3 = vor.u32 %v2349_v60, %v2188_v59  ;;  %v2076_v4 = vld [vmem:[%s3566_s1 + $0x2e0] sm:$0xf]  ;;  %v2321_v5 = vld [vmem:[%s3566_s1 + $0x2f8] sm:$0xf0] }
  0x1f   :  { %v1881_v6 = vor.u32 %v2272_v1, %v1880_v0  ;;  %v2160_v7 = vld [vmem:[%s3566_s1 + $0x388] sm:$0xf]  ;;  %v2342_v8 = vld [vmem:[%s3566_s1 + $0x3a0] sm:$0xf0]  ;;  %v1852_v9 = vld [vmem:[%s3566_s1 + $0x120] sm:$0xf]  ;;  %v2077_v11 = vor.u32 %v2321_v5, %v2076_v4 }
  0x20   :  { %862 = vmatpush.bf16.msra.mxu0 %v1705_v39  ;;  %v2265_v10 = vld [vmem:[%s3566_s1 + $0x138] sm:$0xf0]  ;;  %v2161_v12 = vor.u32 %v2342_v8, %v2160_v7  ;;  %v2338_v13 = vld [vmem:[%s3566_s1 + $0x384] sm:$0xf]  ;;  %v2154_v14 = vld [vmem:[%s3566_s1 + $0x39c] sm:$0xf0] }
  0x21   :  { %936 = vmatpush.bf16.msrb.mxu2 %v1989_v32  ;;  %881 = vmatpush.bf16.msra.mxu1 %v1929_v43  ;;  %v2048_v15 = vld [vmem:[%s3566_s1 + $0x2a8] sm:$0xf]  ;;  %v2314_v16 = vld [vmem:[%s3566_s1 + $0x2c0] sm:$0xf0]  ;;  %v2157_v18 = vor.u32 %v2338_v13, %v2154_v14  ;;  %v1853_v19 = vor.u32 %v2265_v10, %v1852_v9  ;;  %v2276_v21 = vld [vmem:[%s3566_s1 + $0x194] sm:$0xf] }
  0x22   :  { %919 = vmatpush.bf16.msra.mxu3 %v1709_v47  ;;  %v1824_v17 = vld [vmem:[%s3566_s1 + $0xe8] sm:$0xf]  ;;  %v2258_v20 = vld [vmem:[%s3566_s1 + $0x100] sm:$0xf0]  ;;  %v1910_v22 = vld [vmem:[%s3566_s1 + $0x1ac] sm:$0xf0]  ;;  %v2049_v28 = vor.u32 %v2314_v16, %v2048_v15 }
  0x23   :  { %863 = vmatmul.bf16.vlgmr.msra.gmra.mxu0 %v2642_v52  ;;  %v1692_v23 = vld [vmem:[%s3567_s0 + $0x18] sm:$0xf]  ;;  %v1913_v25 = vor.u32 %v2276_v21, %v1910_v22  ;;  %v2269_v26 = vld [vmem:[%s3566_s1 + $0x15c] sm:$0xf]  ;;  %v2224_v30 = vld [vmem:[%s3567_s0 + $0x20] sm:$0xf0]  ;;  %v1825_v37 = vor.u32 %v2258_v20, %v1824_v17 }
  0x24   :  { %882 = vmatmul.bf16.vlgmr.msra.gmra.mxu1 %v2653_v57  ;;  %956 = vmatpush.bf16.msrb.mxu0 %v2185_v61  ;;  %v1882_v27 = vld [vmem:[%s3566_s1 + $0x174] sm:$0xf0]  ;;  %v2223_v31 = vld [vmem:[%s3567_s0 + $0x1c] sm:$0xf]  ;;  %v2020_v32 = vld [vmem:[%s3566_s1 + $0x270] sm:$0xf]  ;;  %v2758_v44 = vor.u32 %v2224_v30, %v1692_v23 }
  0x25   :  { %937 = vmatpush.bf16.msrb.mxu2 %v1961_v48  ;;  %920 = vmatmul.bf16.vlgmr.msra.gmra.mxu3 %v2642_v52  ;;  %v2307_v33 = vld [vmem:[%s3566_s1 + $0x288] sm:$0xf0]  ;;  %v1885_v34 = vor.u32 %v2269_v26, %v1882_v27  ;;  %v1916_v35 = vld [vmem:[%s3566_s1 + $0x198] sm:$0xf]  ;;  %v2280_v36 = vld [vmem:[%s3566_s1 + $0x1b0] sm:$0xf0] }
  0x26   :  { %988 = vmatpush.bf16.msrb.mxu3 %v2133_v53  ;;  %969 = vmatpush.bf16.msrb.mxu1 %v1909_v62  ;;  %v1694_v38 = vld [vmem:[%s3567_s0 + $0x24] sm:$0xf0]  ;;  %v1917_v39 = vor.u32 %v2280_v36, %v1916_v35  ;;  %v2262_v40 = vld [vmem:[%s3566_s1 + $0x124] sm:$0xf]  ;;  %v1854_v41 = vld [vmem:[%s3566_s1 + $0x13c] sm:$0xf0]  ;;  %v2021_v45 = vor.u32 %v2307_v33, %v2020_v32 }
  0x27   :  { %v1796_v42 = vld [vmem:[%s3566_s1 + $0xb0] sm:$0xf]  ;;  %v2251_v43 = vld [vmem:[%s3566_s1 + $0xc8] sm:$0xf0]  ;;  %v1888_v46 = vld [vmem:[%s3566_s1 + $0x160] sm:$0xf]  ;;  %v2766_v48 = vor.u32 %v2223_v31, %v1694_v38  ;;  %v1857_v51 = vor.u32 %v2262_v40, %v1854_v41 }
  0x28   :  { %957 = vmatpush.bf16.msrb.mxu0 %v2157_v18  ;;  %v2273_v47 = vld [vmem:[%s3566_s1 + $0x178] sm:$0xf0]  ;;  %v1992_v49 = vld [vmem:[%s3566_s1 + $0x238] sm:$0xf]  ;;  %v2300_v50 = vld [vmem:[%s3566_s1 + $0x250] sm:$0xf0]  ;;  %v1797_v53 = vor.u32 %v2251_v43, %v1796_v42 }
  0x29   :  { %938 = vmatpush.bf16.msrb.mxu2 %v1933_v63  ;;  %v2255_v54 = vld [vmem:[%s3566_s1 + $0xec] sm:$0xf]  ;;  %v1826_v55 = vld [vmem:[%s3566_s1 + $0x104] sm:$0xf0]  ;;  %v1768_v56 = vld [vmem:[%s3566_s1 + $0x78] sm:$0xf]  ;;  %v1889_v59 = vor.u32 %v2273_v47, %v1888_v46  ;;  %v1993_v60 = vor.u32 %v2300_v50, %v1992_v49 }
  0x2a   :  { %989 = vmatpush.bf16.msrb.mxu3 %v2105_v2  ;;  %970 = vmatpush.bf16.msrb.mxu1 %v1881_v6  ;;  %v2244_v58 = vld [vmem:[%s3566_s1 + $0x90] sm:$0xf0]  ;;  %v1860_v61 = vld [vmem:[%s3566_s1 + $0x128] sm:$0xf]  ;;  %v2266_v62 = vld [vmem:[%s3566_s1 + $0x140] sm:$0xf0]  ;;  %v1829_v1 = vor.u32 %v2255_v54, %v1826_v55 }
  0x2b   :  { %v1964_v63 = vld [vmem:[%s3566_s1 + $0x200] sm:$0xf]  ;;  %v2293_v0 = vld [vmem:[%s3566_s1 + $0x218] sm:$0xf0]  ;;  %v1769_v2 = vor.u32 %v2244_v58, %v1768_v56  ;;  %v1798_v4 = vld [vmem:[%s3566_s1 + $0xcc] sm:$0xf0]  ;;  %v1861_v7 = vor.u32 %v2266_v62, %v1860_v61 }
  0x2c   :  { %939 = vmatmul.bf16.vlgmr.msrb.gmra.mxu2 %v2653_v57  ;;  %1026 = vmatpush.bf16.msra.mxu0 %v1913_v25  ;;  %v1740_v5 = vld [vmem:[%s3566_s1 + $0x40] sm:$0xf]  ;;  %v2237_v6 = vld [vmem:[%s3566_s1 + $0x58] sm:$0xf0]  ;;  %v1965_v8 = vor.u32 %v2293_v0, %v1964_v63  ;;  %v1832_v9 = vld [vmem:[%s3566_s1 + $0xf0] sm:$0xf] }
  0x2d   :  { %1013 = vmatpush.bf16.msra.mxu2 %v2189_v3  ;;  %v2248_v3 = vld [vmem:[%s3566_s1 + $0xb4] sm:$0xf]  ;;  %v2259_v10 = vld [vmem:[%s3566_s1 + $0x108] sm:$0xf0]  ;;  %v2346_v13 = vld [vmem:[%s3566_s1 + $0x3c4] sm:$0xf]  ;;  %v1741_v15 = vor.u32 %v2237_v6, %v1740_v5 }
  0x2e   :  { %990 = vmatpush.bf16.msrb.mxu3 %v2077_v11  ;;  %971 = vmatpush.bf16.msrb.mxu1 %v1853_v19  ;;  %v1936_v11 = vld [vmem:[%s3566_s1 + $0x1c8] sm:$0xf]  ;;  %v1801_v14 = vor.u32 %v2248_v3, %v1798_v4  ;;  %v2190_v16 = vld [vmem:[%s3566_s1 + $0x3dc] sm:$0xf0]  ;;  %v2241_v17 = vld [vmem:[%s3566_s1 + $0x7c] sm:$0xf]  ;;  %v1833_v22 = vor.u32 %v2259_v10, %v1832_v9 }
  0x2f   :  { %v1770_v18 = vld [vmem:[%s3566_s1 + $0x94] sm:$0xf0]  ;;  %v1712_v19 = vld [vmem:[%s3566_s1 + $0x8] sm:$0xf]  ;;  %v2230_v20 = vld [vmem:[%s3566_s1 + $0x20] sm:$0xf0] }
  0x30   :  { %1027 = vmatpush.bf16.msra.mxu0 %v1885_v34  ;;  %v2332_v21 = vld [vmem:[%s3566_s1 + $0x354] sm:$0xf]  ;;  %v2134_v25 = vld [vmem:[%s3566_s1 + $0x36c] sm:$0xf0]  ;;  %v1804_v26 = vld [vmem:[%s3566_s1 + $0xb8] sm:$0xf]  ;;  %v1773_v30 = vor.u32 %v2241_v17, %v1770_v18  ;;  %v1713_v31 = vor.u32 %v2230_v20, %v1712_v19 }
  0x31   :  { %1014 = vmatpush.bf16.msra.mxu2 %v2161_v12  ;;  %v2286_v12 = vld [vmem:[%s3566_s1 + $0x1e0] sm:$0xf0]  ;;  %v2252_v27 = vld [vmem:[%s3566_s1 + $0xd0] sm:$0xf0]  ;;  %v2339_v32 = vld [vmem:[%s3566_s1 + $0x38c] sm:$0xf]  ;;  %v2137_v34 = vor.u32 %v2332_v21, %v2134_v25 }
  0x32   :  { %991 = vmatpush.bf16.msrb.mxu3 %v2049_v28  ;;  %972 = vmatpush.bf16.msrb.mxu1 %v1825_v37  ;;  %v1937_v23 = vor.u32 %v2286_v12, %v1936_v11  ;;  %v2193_v28 = vor.u32 %v2346_v13, %v2190_v16  ;;  %v2162_v33 = vld [vmem:[%s3566_s1 + $0x3a4] sm:$0xf0]  ;;  %v2325_v35 = vld [vmem:[%s3566_s1 + $0x31c] sm:$0xf]  ;;  %v1805_v36 = vor.u32 %v2252_v27, %v1804_v26  ;;  %v2234_v37 = vld [vmem:[%s3566_s1 + $0x44] sm:$0xf] }
  0x33   :  { %868 = vmatmul.bf16.gmra.mxu0 %v2758_v44  ;;  %v1742_v38 = vld [vmem:[%s3566_s1 + $0x5c] sm:$0xf0]  ;;  %v2245_v41 = vld [vmem:[%s3566_s1 + $0x98] sm:$0xf0]  ;;  %v2165_v42 = vor.u32 %v2339_v32, %v2162_v33  ;;  %v2318_v43 = vld [vmem:[%s3566_s1 + $0x2e4] sm:$0xf] }
  0x34   :  { %887 = vmatmul.bf16.gmra.mxu1 %v2766_v48  ;;  %1028 = vmatpush.bf16.msra.mxu0 %v1857_v51  ;;  %v1776_v40 = vld [vmem:[%s3566_s1 + $0x80] sm:$0xf]  ;;  %v2227_v50 = vld [vmem:[%s3566_s1 + $0xc] sm:$0xf]  ;;  %v1714_v51 = vld [vmem:[%s3566_s1 + $0x24] sm:$0xf0] }
  0x35   :  { %1083 = vmatpush.bf16.msrb.mxu2 %v1917_v39  ;;  %925 = vmatmul.bf16.gmra.mxu3 %v2758_v44  ;;  %v2106_v39 = vld [vmem:[%s3566_s1 + $0x334] sm:$0xf0]  ;;  %v2078_v47 = vld [vmem:[%s3566_s1 + $0x2fc] sm:$0xf0]  ;;  %v1777_v49 = vor.u32 %v2245_v41, %v1776_v40  ;;  %v2238_v54 = vld [vmem:[%s3566_s1 + $0x60] sm:$0xf0] }
  0x36   :  { %992 = vmatpush.bf16.msrb.mxu3 %v2021_v45  ;;  %973 = vmatpush.bf16.msrb.mxu1 %v1797_v53  ;;  %v1745_v45 = vor.u32 %v2234_v37, %v1742_v38  ;;  %v2109_v46 = vor.u32 %v2325_v35, %v2106_v39  ;;  %v1748_v53 = vld [vmem:[%s3566_s1 + $0x48] sm:$0xf]  ;;  %v2140_v55 = vld [vmem:[%s3566_s1 + $0x358] sm:$0xf]  ;;  %v2336_v56 = vld [vmem:[%s3566_s1 + $0x370] sm:$0xf0]  ;;  %v2081_v62 = vor.u32 %v2318_v43, %v2078_v47 }
  0x37   :  { %v2277_v58 = vld [vmem:[%s3566_s1 + $0x19c] sm:$0xf]  ;;  %v2311_v63 = vld [vmem:[%s3566_s1 + $0x2ac] sm:$0xf]  ;;  %v1749_v0 = vor.u32 %v2238_v54, %v1748_v53  ;;  %v2050_v3 = vld [vmem:[%s3566_s1 + $0x2c4] sm:$0xf0]  ;;  %v2141_v4 = vor.u32 %v2336_v56, %v2140_v55 }
  0x38   :  { %1029 = vmatpush.bf16.msra.mxu0 %v1829_v1  ;;  %v2270_v1 = vld [vmem:[%s3566_s1 + $0x164] sm:$0xf]  ;;  %v1720_v5 = vld [vmem:[%s3566_s1 + $0x10] sm:$0xf]  ;;  %v2231_v6 = vld [vmem:[%s3566_s1 + $0x28] sm:$0xf0]  ;;  %v2053_v10 = vor.u32 %v2311_v63, %v2050_v3 }
  0x39   :  { %1084 = vmatpush.bf16.msrb.mxu2 %v1889_v59  ;;  %v1918_v59 = vld [vmem:[%s3566_s1 + $0x1b4] sm:$0xf0]  ;;  %v2329_v9 = vld [vmem:[%s3566_s1 + $0x338] sm:$0xf0]  ;;  %v2304_v11 = vld [vmem:[%s3566_s1 + $0x274] sm:$0xf]  ;;  %v1721_v12 = vor.u32 %v2231_v6, %v1720_v5 }
  0x3a   :  { %993 = vmatpush.bf16.msrb.mxu3 %v1993_v60  ;;  %974 = vmatpush.bf16.msrb.mxu1 %v1769_v2  ;;  %v1717_v60 = vor.u32 %v2227_v50, %v1714_v51  ;;  %v1921_v61 = vor.u32 %v2277_v58, %v1918_v59  ;;  %v1890_v2 = vld [vmem:[%s3566_s1 + $0x17c] sm:$0xf0]  ;;  %v2022_v13 = vld [vmem:[%s3566_s1 + $0x28c] sm:$0xf0]  ;;  %v2142_v16 = vld [vmem:[%s3566_s1 + $0x374] sm:$0xf0] }
  0x3b   :  { %v2263_v18 = vld [vmem:[%s3566_s1 + $0x12c] sm:$0xf]  ;;  %v1862_v19 = vld [vmem:[%s3566_s1 + $0x144] sm:$0xf0]  ;;  %v2322_v21 = vld [vmem:[%s3566_s1 + $0x300] sm:$0xf0]  ;;  %v2025_v25 = vor.u32 %v2304_v11, %v2022_v13 }
  0x3c   :  { %944 = vmatmul.bf16.gmra.mxu2 %v2766_v48  ;;  %1030 = vmatpush.bf16.msra.mxu0 %v1801_v14  ;;  %v2084_v20 = vld [vmem:[%s3566_s1 + $0x2e8] sm:$0xf]  ;;  %v2297_v26 = vld [vmem:[%s3566_s1 + $0x23c] sm:$0xf]  ;;  %v2114_v27 = vld [vmem:[%s3566_s1 + $0x33c] sm:$0xf0] }
  0x3d   :  { %1085 = vmatpush.bf16.msrb.mxu2 %v1861_v7  ;;  %v1893_v7 = vor.u32 %v2270_v1, %v1890_v2  ;;  %v1834_v32 = vld [vmem:[%s3566_s1 + $0x10c] sm:$0xf0]  ;;  %v2085_v33 = vor.u32 %v2322_v21, %v2084_v20  ;;  %v2315_v35 = vld [vmem:[%s3566_s1 + $0x2c8] sm:$0xf0]  ;;  %v2290_v37 = vld [vmem:[%s3566_s1 + $0x204] sm:$0xf] }
  0x3e   :  { %994 = vmatpush.bf16.msrb.mxu3 %v1965_v8  ;;  %975 = vmatpush.bf16.msrb.mxu1 %v1741_v15  ;;  %v2112_v8 = vld [vmem:[%s3566_s1 + $0x320] sm:$0xf]  ;;  %v2333_v15 = vld [vmem:[%s3566_s1 + $0x35c] sm:$0xf]  ;;  %v2319_v40 = vld [vmem:[%s3566_s1 + $0x2ec] sm:$0xf] }
  0x3f   :  { %v2113_v14 = vor.u32 %v2329_v9, %v2112_v8  ;;  %v2145_v17 = vor.u32 %v2333_v15, %v2142_v16  ;;  %v1966_v39 = vld [vmem:[%s3566_s1 + $0x21c] sm:$0xf0]  ;;  %v2086_v41 = vld [vmem:[%s3566_s1 + $0x304] sm:$0xf0]  ;;  %v1806_v47 = vld [vmem:[%s3566_s1 + $0xd4] sm:$0xf0] }
  0x40   :  { %1031 = vmatpush.bf16.msra.mxu0 %v1773_v30  ;;  %v2089_v43 = vor.u32 %v2319_v40, %v2086_v41  ;;  %v2312_v50 = vld [vmem:[%s3566_s1 + $0x2b4] sm:$0xf]  ;;  %v2058_v51 = vld [vmem:[%s3566_s1 + $0x2cc] sm:$0xf0]  ;;  %v1969_v53 = vor.u32 %v2290_v37, %v1966_v39  ;;  %v2283_v54 = vld [vmem:[%s3566_s1 + $0x1cc] sm:$0xf] }
  0x41   :  { %1086 = vmatpush.bf16.msrb.mxu2 %v1833_v22  ;;  %v1865_v22 = vor.u32 %v2263_v18, %v1862_v19  ;;  %v1938_v56 = vld [vmem:[%s3566_s1 + $0x1e4] sm:$0xf0]  ;;  %v2061_v58 = vor.u32 %v2312_v50, %v2058_v51  ;;  %v2242_v59 = vld [vmem:[%s3566_s1 + $0x84] sm:$0xf]  ;;  %v2301_v1 = vld [vmem:[%s3566_s1 + $0x258] sm:$0xf0] }
  0x42   :  { %995 = vmatpush.bf16.msrb.mxu3 %v1937_v23  ;;  %976 = vmatpush.bf16.msrb.mxu1 %v1713_v31  ;;  %v2326_v23 = vld [vmem:[%s3566_s1 + $0x324] sm:$0xf]  ;;  %v2256_v31 = vld [vmem:[%s3566_s1 + $0xf4] sm:$0xf]  ;;  %v1941_v2 = vor.u32 %v2283_v54, %v1938_v56  ;;  %v2305_v5 = vld [vmem:[%s3566_s1 + $0x27c] sm:$0xf] }
  0x43   :  { %2208 = vmatmul.msk.bf16.vlgmr.msrb.gmra.mxu0 %vm848_vm0, %v2457_v29  ;;  %v2117_v30 = vor.u32 %v2326_v23, %v2114_v27  ;;  %v1837_v38 = vor.u32 %v2256_v31, %v1834_v32  ;;  %v2030_v6 = vld [vmem:[%s3566_s1 + $0x294] sm:$0xf0]  ;;  %v1972_v9 = vld [vmem:[%s3566_s1 + $0x208] sm:$0xf]  ;;  %v2168_v13 = vld [vmem:[%s3566_s1 + $0x390] sm:$0xf] }
  0x44   :  { %1032 = vmatpush.bf16.msra.mxu0 %v1745_v45  ;;  %v2028_v45 = vld [vmem:[%s3566_s1 + $0x278] sm:$0xf]  ;;  %v2033_v8 = vor.u32 %v2305_v5, %v2030_v6  ;;  %v1750_v11 = vld [vmem:[%s3566_s1 + $0x64] sm:$0xf0]  ;;  %v2298_v16 = vld [vmem:[%s3566_s1 + $0x244] sm:$0xf] }
  0x45   :  { %1087 = vmatpush.bf16.msrb.mxu2 %v1805_v36  ;;  %977 = vmatmul.bf16.vlgmr.msrb.gmra.mxu1 %v2642_v52  ;;  %v2228_v19 = vld [vmem:[%s3566_s1 + $0x14] sm:$0xf]  ;;  %v1722_v20 = vld [vmem:[%s3566_s1 + $0x2c] sm:$0xf0]  ;;  %v2291_v27 = vld [vmem:[%s3566_s1 + $0x20c] sm:$0xf] }
  0x46   :  { %1070 = vmatpush.bf16.msra.mxu3 %v2193_v28  ;;  %1045 = vmatpush.bf16.msra.mxu1 %v2137_v34  ;;  %v1994_v28 = vld [vmem:[%s3566_s1 + $0x254] sm:$0xf0]  ;;  %v2056_v34 = vld [vmem:[%s3566_s1 + $0x2b0] sm:$0xf]  ;;  %v2337_v32 = vld [vmem:[%s3566_s1 + $0x378] sm:$0xf0] }
  0x47   :  { %996 = vmatmul.bf16.vlgmr.msrb.gmra.mxu3 %v2653_v57  ;;  %v1997_v36 = vor.u32 %v2297_v26, %v1994_v28  ;;  %v1944_v23 = vld [vmem:[%s3566_s1 + $0x1d0] sm:$0xf]  ;;  %v1725_v26 = vor.u32 %v2228_v19, %v1722_v20  ;;  %v1974_v28 = vld [vmem:[%s3566_s1 + $0x224] sm:$0xf0]  ;;  %v1924_v37 = vld [vmem:[%s3566_s1 + $0x1a0] sm:$0xf] }
  0x48   :  { %1033 = vmatpush.bf16.msra.mxu0 %v1717_v60  ;;  %v1778_v60 = vld [vmem:[%s3566_s1 + $0x9c] sm:$0xf0]  ;;  %v2120_v39 = vld [vmem:[%s3566_s1 + $0x328] sm:$0xf]  ;;  %v2330_v40 = vld [vmem:[%s3566_s1 + $0x340] sm:$0xf0] }
  0x49   :  { %1088 = vmatpush.bf16.msrb.mxu2 %v1777_v49  ;;  %v2308_v49 = vld [vmem:[%s3566_s1 + $0x290] sm:$0xf0]  ;;  %v1781_v3 = vor.u32 %v2242_v59, %v1778_v60  ;;  %v2351_v50 = vld [vmem:[%s3566_s1 + $0x3e8] sm:$0xf0]  ;;  %v1868_v59 = vld [vmem:[%s3566_s1 + $0x130] sm:$0xf] }
  0x4a   :  { %1071 = vmatpush.bf16.msra.mxu3 %v2165_v42  ;;  %1046 = vmatpush.bf16.msra.mxu1 %v2109_v46  ;;  %v2057_v42 = vor.u32 %v2315_v35, %v2056_v34  ;;  %v2249_v46 = vld [vmem:[%s3566_s1 + $0xbc] sm:$0xf]  ;;  %v2029_v63 = vor.u32 %v2308_v49, %v2028_v45  ;;  %v2284_v35 = vld [vmem:[%s3566_s1 + $0x1d4] sm:$0xf]  ;;  %v1896_v45 = vld [vmem:[%s3566_s1 + $0x168] sm:$0xf] }
  0x4b   :  { %v1809_v55 = vor.u32 %v2249_v46, %v1806_v47  ;;  %v2274_v46 = vld [vmem:[%s3566_s1 + $0x180] sm:$0xf0]  ;;  %v2092_v47 = vld [vmem:[%s3566_s1 + $0x2f0] sm:$0xf]  ;;  %v2347_v56 = vld [vmem:[%s3566_s1 + $0x3cc] sm:$0xf] }
  0x4c   :  { %1102 = vmatpush.bf16.msrb.mxu0 %v2141_v4  ;;  %2210 = vmatmul.msk.bf16.vlgmr.msra.gmra.mxu2 %vm848_vm0, %v2457_v29  ;;  %v2204_v49 = vld [vmem:[%s3566_s1 + $0x3d0] sm:$0xf]  ;;  %v1897_v51 = vor.u32 %v2274_v46, %v1896_v45  ;;  %v2309_v6 = vld [vmem:[%s3566_s1 + $0x298] sm:$0xf0]  ;;  %v2295_v20 = vld [vmem:[%s3566_s1 + $0x228] sm:$0xf0] }
  0x4d   :  { %1089 = vmatpush.bf16.msrb.mxu2 %v1749_v0  ;;  %v2000_v0 = vld [vmem:[%s3566_s1 + $0x240] sm:$0xf]  ;;  %v2205_v54 = vor.u32 %v2351_v50, %v2204_v49 }
  0x4e   :  { %1140 = vmatpush.bf16.msrb.mxu3 %v1921_v61  ;;  %1047 = vmatpush.bf16.msra.mxu1 %v2081_v62  ;;  %v2196_v61 = vld [vmem:[%s3566_s1 + $0x3c8] sm:$0xf]  ;;  %v2350_v62 = vld [vmem:[%s3566_s1 + $0x3e0] sm:$0xf0] }
  0x4f   :  { %v2197_v4 = vor.u32 %v2350_v62, %v2196_v61  ;;  %v2267_v61 = vld [vmem:[%s3566_s1 + $0x148] sm:$0xf0]  ;;  %v2064_v62 = vld [vmem:[%s3566_s1 + $0x2b8] sm:$0xf] }
  0x50   :  { %1103 = vmatpush.bf16.msrb.mxu0 %v2113_v14  ;;  %v2343_v14 = vld [vmem:[%s3566_s1 + $0x3a8] sm:$0xf0] }
  0x51   :  { %1090 = vmatpush.bf16.msrb.mxu2 %v1721_v12  ;;  %v2294_v12 = vld [vmem:[%s3566_s1 + $0x220] sm:$0xf0]  ;;  %v2169_v18 = vor.u32 %v2343_v14, %v2168_v13  ;;  %v1784_v14 = vld [vmem:[%s3566_s1 + $0x88] sm:$0xf] }
  0x52   :  { %1141 = vmatpush.bf16.msrb.mxu3 %v1893_v7  ;;  %1048 = vmatpush.bf16.msra.mxu1 %v2053_v10  ;;  %v2001_v7 = vor.u32 %v2301_v1, %v2000_v0  ;;  %v2235_v10 = vld [vmem:[%s3566_s1 + $0x4c] sm:$0xf]  ;;  %v1973_v21 = vor.u32 %v2294_v12, %v1972_v9  ;;  %v1869_v0 = vor.u32 %v2267_v61, %v1868_v59  ;;  %v2253_v9 = vld [vmem:[%s3566_s1 + $0xd8] sm:$0xf0]  ;;  %v2302_v12 = vld [vmem:[%s3566_s1 + $0x260] sm:$0xf0] }
  0x53   :  { %2209 = vmatmul.msk.bf16.gmra.mxu0 %vm848_vm0, %v2584_v24  ;;  %v1753_v15 = vor.u32 %v2235_v10, %v1750_v11  ;;  %v2008_v10 = vld [vmem:[%s3566_s1 + $0x248] sm:$0xf] }
  0x54   :  { %1104 = vmatpush.bf16.msrb.mxu0 %v2085_v33  ;;  %v1977_v33 = vor.u32 %v2291_v27, %v1974_v28  ;;  %v2009_v13 = vor.u32 %v2302_v12, %v2008_v10  ;;  %v2239_v28 = vld [vmem:[%s3566_s1 + $0x68] sm:$0xf0] }
  0x55   :  { %1159 = vmatpush.bf16.msra.mxu2 %v2145_v17  ;;  %982 = vmatmul.bf16.gmra.mxu1 %v2758_v44  ;;  %v2002_v17 = vld [vmem:[%s3566_s1 + $0x25c] sm:$0xf0] }
  0x56   :  { %1142 = vmatpush.bf16.msrb.mxu3 %v1865_v22  ;;  %1049 = vmatpush.bf16.msra.mxu1 %v2025_v25  ;;  %v2005_v22 = vor.u32 %v2298_v16, %v2002_v17  ;;  %v2287_v25 = vld [vmem:[%s3566_s1 + $0x1e8] sm:$0xf0]  ;;  %v1980_v16 = vld [vmem:[%s3566_s1 + $0x210] sm:$0xf]  ;;  %v2176_v17 = vld [vmem:[%s3566_s1 + $0x398] sm:$0xf] }
  0x57   :  { %1001 = vmatmul.bf16.gmra.mxu3 %v2766_v48  ;;  %v1945_v31 = vor.u32 %v2287_v25, %v1944_v23  ;;  %v2340_v23 = vld [vmem:[%s3566_s1 + $0x394] sm:$0xf]  ;;  %v2170_v25 = vld [vmem:[%s3566_s1 + $0x3ac] sm:$0xf0] }
  0x58   :  { %1105 = vmatpush.bf16.msrb.mxu0 %v2057_v42  ;;  %v2121_v42 = vor.u32 %v2330_v40, %v2120_v39  ;;  %v2173_v27 = vor.u32 %v2340_v23, %v2170_v25 }
  0x59   :  { %1160 = vmatpush.bf16.msra.mxu2 %v2117_v30  ;;  %v2148_v30 = vld [vmem:[%s3566_s1 + $0x360] sm:$0xf] }
  0x5a   :  { %1050 = vmatpush.bf16.msra.mxu1 %v1997_v36  ;;  %1143 = vmatpush.bf16.msrb.mxu3 %v1837_v38  ;;  %v2149_v34 = vor.u32 %v2337_v32, %v2148_v30  ;;  %v1946_v36 = vld [vmem:[%s3566_s1 + $0x1ec] sm:$0xf0]  ;;  %v2281_v38 = vld [vmem:[%s3566_s1 + $0x1b8] sm:$0xf0]  ;;  %v1952_v30 = vld [vmem:[%s3566_s1 + $0x1d8] sm:$0xf] }
  0x5b   :  { %v1925_v41 = vor.u32 %v2281_v38, %v1924_v37 }
  0x5c   :  { %2211 = vmatmul.msk.bf16.gmra.mxu2 %vm848_vm0, %v2584_v24  ;;  %1106 = vmatpush.bf16.msrb.mxu0 %v2029_v63  ;;  %v2316_v63 = vld [vmem:[%s3566_s1 + $0x2d0] sm:$0xf0] }
  0x5d   :  { %1161 = vmatpush.bf16.msra.mxu2 %v2089_v43  ;;  %v1949_v43 = vor.u32 %v2284_v35, %v1946_v36  ;;  %v2065_v1 = vor.u32 %v2316_v63, %v2064_v62  ;;  %v2232_v35 = vld [vmem:[%s3566_s1 + $0x30] sm:$0xf0] }
  0x5e   :  { %1051 = vmatpush.bf16.msra.mxu1 %v1969_v53  ;;  %1144 = vmatpush.bf16.msrb.mxu3 %v1809_v55  ;;  %v2323_v53 = vld [vmem:[%s3566_s1 + $0x308] sm:$0xf0] }
  0x5f   :  { %v2093_v55 = vor.u32 %v2323_v53, %v2092_v47 }
  0x60   :  { %1107 = vmatpush.bf16.msrb.mxu0 %v2001_v7 }
  0x61   :  { %1162 = vmatpush.bf16.msra.mxu2 %v2061_v58  ;;  %v2198_v58 = vld [vmem:[%s3566_s1 + $0x3e4] sm:$0xf0] }
  0x62   :  { %1052 = vmatpush.bf16.msra.mxu1 %v1941_v2  ;;  %1145 = vmatpush.bf16.msrb.mxu3 %v1781_v3  ;;  %v2201_v60 = vor.u32 %v2347_v56, %v2198_v58  ;;  %v1840_v2 = vld [vmem:[%s3566_s1 + $0xf8] sm:$0xf]  ;;  %v2260_v3 = vld [vmem:[%s3566_s1 + $0x110] sm:$0xf0] }
  0x63   :  { %1034 = vmatmul.bf16.vlgmr.msra.gmra.mxu0 %v2642_v52  ;;  %v1841_v5 = vor.u32 %v2260_v3, %v1840_v2 }
  0x64   :  { %1108 = vmatpush.bf16.msrb.mxu0 %v1973_v21 }
  0x65   :  { %1163 = vmatpush.bf16.msra.mxu2 %v2033_v8  ;;  %1053 = vmatmul.bf16.vlgmr.msra.gmra.mxu1 %v2653_v57  ;;  %v1812_v8 = vld [vmem:[%s3566_s1 + $0xc0] sm:$0xf] }
  0x66   :  { %1127 = vmatpush.bf16.msrb.mxu1 %v2197_v4  ;;  %1146 = vmatpush.bf16.msrb.mxu3 %v1753_v15  ;;  %v2036_v4 = vld [vmem:[%s3566_s1 + $0x280] sm:$0xf]  ;;  %v1813_v11 = vor.u32 %v2253_v9, %v1812_v8  ;;  %v2246_v15 = vld [vmem:[%s3566_s1 + $0xa0] sm:$0xf0] }
  0x67   :  { %2212 = vmatmul.msk.bf16.vlgmr.msra.gmra.mxu3 %vm848_vm0, %v2457_v29  ;;  %v2037_v7 = vor.u32 %v2309_v6, %v2036_v4  ;;  %v1785_v19 = vor.u32 %v2246_v15, %v1784_v14 }
  0x68   :  { %1109 = vmatpush.bf16.msrb.mxu0 %v1945_v31  ;;  %v2288_v31 = vld [vmem:[%s3566_s1 + $0x1f0] sm:$0xf0] }
  0x69   :  { %1164 = vmatpush.bf16.msra.mxu2 %v2005_v22  ;;  %v1981_v22 = vor.u32 %v2295_v20, %v1980_v16 }
  0x6a   :  { %1128 = vmatpush.bf16.msrb.mxu1 %v2169_v18  ;;  %1147 = vmatpush.bf16.msrb.mxu3 %v1725_v26  ;;  %v2344_v18 = vld [vmem:[%s3566_s1 + $0x3b0] sm:$0xf0]  ;;  %v1756_v26 = vld [vmem:[%s3566_s1 + $0x50] sm:$0xf] }
  0x6b   :  { %v2177_v21 = vor.u32 %v2344_v18, %v2176_v17  ;;  %v1757_v32 = vor.u32 %v2239_v28, %v1756_v26 }
  0x6c   :  { %1091 = vmatmul.bf16.vlgmr.msrb.gmra.mxu2 %v2642_v52  ;;  %1184 = vmatpush.bf16.msra.mxu0 %v2201_v60 }
  0x6d   :  { %1165 = vmatpush.bf16.msra.mxu2 %v1977_v33  ;;  %v1953_v33 = vor.u32 %v2288_v31, %v1952_v30 }
  0x6e   :  { %1216 = vmatpush.bf16.msra.mxu3 %v2149_v34  ;;  %1197 = vmatpush.bf16.msra.mxu1 %v1925_v41  ;;  %v1728_v34 = vld [vmem:[%s3566_s1 + $0x18] sm:$0xf] }
  0x6f   :  { %v1729_v36 = vor.u32 %v2232_v35, %v1728_v34 }
  0x70   :  { %1185 = vmatpush.bf16.msra.mxu0 %v2173_v27 }
  0x71   :  { %1166 = vmatpush.bf16.msra.mxu2 %v1949_v43 }
  0x72   :  { %1217 = vmatpush.bf16.msra.mxu3 %v2121_v42  ;;  %1198 = vmatpush.bf16.msra.mxu1 %v1897_v51 }
  0x73   :  { %1039 = vmatmul.bf16.gmra.mxu0 %v2758_v44 }
  0x75   :  { %1241 = vmatpush.bf16.msrb.mxu2 %v2205_v54  ;;  %1058 = vmatmul.bf16.gmra.mxu1 %v2766_v48 }
  0x76   :  { %1218 = vmatpush.bf16.msra.mxu3 %v2093_v55  ;;  %1199 = vmatpush.bf16.msra.mxu1 %v1869_v0 }
  0x77   :  { %2213 = vmatmul.msk.bf16.gmra.mxu3 %vm848_vm0, %v2584_v24 }
  0x79   :  { %1242 = vmatpush.bf16.msrb.mxu2 %v2177_v21 }
  0x7a   :  { %1219 = vmatpush.bf16.msra.mxu3 %v2065_v1  ;;  %1200 = vmatpush.bf16.msra.mxu1 %v1841_v5 }
  0x7c   :  { %1096 = vmatmul.bf16.gmra.mxu2 %v2758_v44 }
  0x7e   :  { %1220 = vmatpush.bf16.msra.mxu3 %v2037_v7  ;;  %1201 = vmatpush.bf16.msra.mxu1 %v1813_v11 }
  0x82   :  { %1221 = vmatpush.bf16.msra.mxu3 %v2009_v13  ;;  %1202 = vmatpush.bf16.msra.mxu1 %v1785_v19 }
  0x83   :  { %1110 = vmatmul.bf16.vlgmr.msrb.gmra.mxu0 %v2653_v57 }
  0x85   :  { %2214 = vmatmul.msk.bf16.vlgmr.msrb.gmra.mxu1 %vm848_vm0, %v2457_v29 }
  0x86   :  { %1222 = vmatpush.bf16.msra.mxu3 %v1981_v22  ;;  %1203 = vmatpush.bf16.msra.mxu1 %v1757_v32 }
  0x87   :  { %1148 = vmatmul.bf16.vlgmr.msrb.gmra.mxu3 %v2642_v52 }
  0x8a   :  { %1223 = vmatpush.bf16.msra.mxu3 %v1953_v33  ;;  %1204 = vmatpush.bf16.msra.mxu1 %v1729_v36 }
  0x8c   :  { %1167 = vmatmul.bf16.vlgmr.msra.gmra.mxu2 %v2653_v57 }
  0x8f   :  { %v902_v37 = vpop.f32.mrf.mxu2 }
  0x93   :  { %1115 = vmatmul.bf16.gmra.mxu0 %v2766_v48 }
  0x95   :  { %2215 = vmatmul.msk.bf16.gmra.mxu1 %vm848_vm0, %v2584_v24 }
  0x97   :  { %1153 = vmatmul.bf16.gmra.mxu3 %v2758_v44  ;;  %v904_v38 = vpop.f32.mrf.mxu2 }
  0x9c   :  { %1172 = vmatmul.bf16.gmra.mxu2 %v2766_v48 }
  0x9f   :  { %v907_v39 = vpop.f32.mrf.mxu2 }
  0xa0   :  { %v864_v40 = vpop.f32.mrf.mxu0 }
  0xa1   :  { %v883_v41 = vpop.f32.mrf.mxu1 }
  0xa2   :  { %v884_v42 = vadd.f32 %v883_v41, %v864_v40 }
  0xa3   :  { %2216 = vmatmul.msk.bf16.vlgmr.msra.gmra.mxu0 %vm848_vm0, %v2457_v29 }
  0xa4   :  { %v3244_v43 = vadd.f32 %v902_v37, %v884_v42 }
  0xa5   :  { %1205 = vmatmul.bf16.vlgmr.msra.gmra.mxu1 %v2642_v52 }
  0xa7   :  { %1224 = vmatmul.bf16.vlgmr.msra.gmra.mxu3 %v2653_v57  ;;  %v909_v45 = vpop.f32.mrf.mxu2 }
  0xa8   :  { %v921_v46 = vpop.f32.mrf.mxu3  ;;  %v866_v47 = vpop.f32.mrf.mxu0 }
  0xa9   :  { %v885_v49 = vpop.f32.mrf.mxu1 }
  0xaa   :  { %v886_v50 = vadd.f32 %v885_v49, %v866_v47 }
  0xac   :  { %v3248_v51 = vadd.f32 %v904_v38, %v886_v50  ;;  %2218 = vmatmul.msk.bf16.vlgmr.msrb.gmra.mxu2 %vm848_vm0, %v2457_v29 }
  0xaf   :  { %v940_v53 = vpop.f32.mrf.mxu2 }
  0xb0   :  { %v923_v54 = vpop.f32.mrf.mxu3  ;;  %v941_v55 = vadd.f32 %v940_v53, %v921_v46  ;;  %v869_v56 = vpop.f32.mrf.mxu0 }
  0xb1   :  { %v888_v58 = vpop.f32.mrf.mxu1 }
  0xb2   :  { %v889_v59 = vadd.f32 %v888_v58, %v869_v56 }
  0xb3   :  { %2217 = vmatmul.msk.bf16.gmra.mxu0 %vm848_vm0, %v2584_v24 }
  0xb4   :  { %v3254_v52 = vadd.f32 %v907_v39, %v889_v59 }
  0xb5   :  { %1210 = vmatmul.bf16.gmra.mxu1 %v2758_v44 }
  0xb7   :  { %1229 = vmatmul.bf16.gmra.mxu3 %v2766_v48  ;;  %v942_v57 = vpop.f32.mrf.mxu2 }
  0xb8   :  { %v926_v60 = vpop.f32.mrf.mxu3  ;;  %v943_v61 = vadd.f32 %v942_v57, %v923_v54  ;;  %v871_v62 = vpop.f32.mrf.mxu0 }
  0xb9   :  { %v890_v29 = vpop.f32.mrf.mxu1 }
  0xba   :  { %v891_v63 = vadd.f32 %v890_v29, %v871_v62 }
  0xbc   :  { %v3258_v0 = vadd.f32 %v909_v45, %v891_v63  ;;  %2219 = vmatmul.msk.bf16.gmra.mxu2 %vm848_vm0, %v2584_v24 }
  0xbf   :  { %v945_v1 = vpop.f32.mrf.mxu2 }
  0xc0   :  { %v928_v2 = vpop.f32.mrf.mxu3  ;;  %v946_v3 = vadd.f32 %v945_v1, %v926_v60  ;;  %v959_v4 = vpop.f32.mrf.mxu0 }
  0xc1   :  { %v3262_v5 = vadd.f32 %v959_v4, %v941_v55 }
  0xc2   :  { %v978_v44 = vpop.f32.mrf.mxu1 }
  0xc7   :  { %v947_v6 = vpop.f32.mrf.mxu2 }
  0xc8   :  { %v948_v48 = vadd.f32 %v947_v6, %v928_v2  ;;  %v961_v8 = vpop.f32.mrf.mxu0 }
  0xc9   :  { %v3264_v10 = vadd.f32 %v961_v8, %v943_v61 }
  0xca   :  { %v997_v7 = vpop.f32.mrf.mxu3  ;;  %v980_v11 = vpop.f32.mrf.mxu1 }
  0xcb   :  { %v998_v9 = vadd.f32 %v997_v7, %v978_v44 }
  0xcf   :  { %v1016_v12 = vpop.f32.mrf.mxu2 }
  0xd0   :  { %v3266_v14 = vadd.f32 %v1016_v12, %v998_v9  ;;  %v964_v24 = vpop.f32.mrf.mxu0 }
  0xd1   :  { %v3268_v16 = vadd.f32 %v964_v24, %v946_v3 }
  0xd2   :  { %v999_v13 = vpop.f32.mrf.mxu3  ;;  %v983_v17 = vpop.f32.mrf.mxu1 }
  0xd3   :  { %v1000_v15 = vadd.f32 %v999_v13, %v980_v11  ;;  %v1254_v11 = vadd.f32 %v3262_v5, %v3244_v43 }
  0xd5   :  { %v1255_v13 = vadd.f32 %v1254_v11, %v3266_v14 }
  0xd7   :  { %v1018_v18 = vpop.f32.mrf.mxu2 }
  0xd8   :  { %v3270_v20 = vadd.f32 %v1018_v18, %v1000_v15  ;;  %v966_v21 = vpop.f32.mrf.mxu0 }
  0xd9   :  { %v3272_v23 = vadd.f32 %v966_v21, %v948_v48 }
  0xda   :  { %v1002_v19 = vpop.f32.mrf.mxu3  ;;  %v985_v25 = vpop.f32.mrf.mxu1 }
  0xdb   :  { %v1003_v22 = vadd.f32 %v1002_v19, %v983_v17 }
  0xdf   :  { %v1021_v26 = vpop.f32.mrf.mxu2 }
  0xe0   :  { %v3274_v28 = vadd.f32 %v1021_v26, %v1003_v22  ;;  %v1035_v30 = vpop.f32.mrf.mxu0 }
  0xe2   :  { %v1004_v27 = vpop.f32.mrf.mxu3  ;;  %v1054_v32 = vpop.f32.mrf.mxu1 }
  0xe3   :  { %v1005_v31 = vadd.f32 %v1004_v27, %v985_v25  ;;  %v1055_v6 = vadd.f32 %v1054_v32, %v1035_v30  ;;  %v1263_v32 = vadd.f32 %v3264_v10, %v3248_v51 }
  0xe7   :  { %v1023_v33 = vpop.f32.mrf.mxu2 }
  0xe8   :  { %v3276_v34 = vadd.f32 %v1023_v33, %v1005_v31  ;;  %v1037_v36 = vpop.f32.mrf.mxu0 }
  0xea   :  { %v1073_v35 = vpop.f32.mrf.mxu3  ;;  %v1056_v37 = vpop.f32.mrf.mxu1 }
  0xeb   :  { %v3292_v12 = vadd.f32 %v1073_v35, %v1055_v6  ;;  %v1057_v19 = vadd.f32 %v1056_v37, %v1037_v36  ;;  %v1264_v37 = vadd.f32 %v1263_v32, %v3270_v20 }
  0xed   :  { %v1256_v18 = vadd.f32 %v1255_v13, %v3292_v12 }
  0xef   :  { %v1092_v38 = vpop.f32.mrf.mxu2 }
  0xf0   :  { %v1040_v40 = vpop.f32.mrf.mxu0 }
  0xf2   :  { %v1075_v39 = vpop.f32.mrf.mxu3  ;;  %v1059_v41 = vpop.f32.mrf.mxu1 }
  0xf3   :  { %v3305_v33 = vadd.f32 %v1075_v39, %v1057_v19 }
  0xf7   :  { %v1094_v42 = vpop.f32.mrf.mxu2 }
  0xf8   :  { %v3278_v46 = vpop.f32.mrf.mxu0 }
  0xfa   :  { %v1078_v45 = vpop.f32.mrf.mxu3  ;;  %v3280_v47 = vpop.f32.mrf.mxu1 }
  0xff   :  { %v1097_v49 = vpop.f32.mrf.mxu2 }
 0x100   :  { %v1111_v53 = vpop.f32.mrf.mxu0 }
 0x101   :  { %v1112_v48 = vadd.f32 %v1111_v53, %v1092_v38 }
 0x102   :  { %v3282_v50 = vpop.f32.mrf.mxu3  ;;  %v1130_v54 = vpop.f32.mrf.mxu1 }
 0x103   :  { %v3295_v24 = vadd.f32 %v1130_v54, %v1112_v48 }
 0x105   :  { %v1257_v27 = vadd.f32 %v1256_v18, %v3295_v24 }
 0x107   :  { %v3284_v55 = vpop.f32.mrf.mxu2 }
 0x108   :  { %v1113_v58 = vpop.f32.mrf.mxu0 }
 0x109   :  { %v1114_v25 = vadd.f32 %v1113_v58, %v1094_v42  ;;  %v1060_v58 = vadd.f32 %v1059_v41, %v1040_v40 }
 0x10a   :  { %v1149_v56 = vpop.f32.mrf.mxu3  ;;  %v1132_v59 = vpop.f32.mrf.mxu1 }
 0x10b   :  { %v3311_v42 = vadd.f32 %v1132_v59, %v1114_v25  ;;  %v1272_v59 = vadd.f32 %v3268_v16, %v3254_v52  ;;  %v3321_v11 = vadd.f32 %v1078_v45, %v1060_v58  ;;  %v1062_v45 = vadd.f32 %v3280_v47, %v3278_v46 }
 0x10d   :  { %v1273_v41 = vadd.f32 %v1272_v59, %v3274_v28 }
 0x10f   :  { %v1168_v57 = vpop.f32.mrf.mxu2  ;;  %v1274_v18 = vadd.f32 %v1273_v41, %v3321_v11 }
 0x110   :  { %v1116_v61 = vpop.f32.mrf.mxu0  ;;  %v1169_v15 = vadd.f32 %v1168_v57, %v1149_v56  ;;  %v1265_v56 = vadd.f32 %v1264_v37, %v3305_v33 }
 0x111   :  { %v1117_v6 = vadd.f32 %v1116_v61, %v1097_v49 }
 0x112   :  { %v1151_v60 = vpop.f32.mrf.mxu3  ;;  %v1135_v62 = vpop.f32.mrf.mxu1 }
 0x113   :  { %v3327_v13 = vadd.f32 %v1135_v62, %v1117_v6  ;;  %v1281_v62 = vadd.f32 %v3272_v23, %v3258_v0 }
 0x115   :  { %v1282_v47 = vadd.f32 %v1281_v62, %v3276_v34 }
 0x117   :  { %v1170_v29 = vpop.f32.mrf.mxu2 }
 0x118   :  { %v1118_v1 = vpop.f32.mrf.mxu0  ;;  %v1171_v53 = vadd.f32 %v1170_v29, %v1151_v60 }
 0x11a   :  { %v1154_v63 = vpop.f32.mrf.mxu3  ;;  %v3286_v2 = vpop.f32.mrf.mxu1 }
 0x11f   :  { %v1173_v3 = vpop.f32.mrf.mxu2 }
 0x120   :  { %v1187_v44 = vpop.f32.mrf.mxu0  ;;  %v1174_v49 = vadd.f32 %v1173_v3, %v1154_v63  ;;  %v3341_v63 = vadd.f32 %v3282_v50, %v1062_v45 }
 0x121   :  { %v3298_v21 = vadd.f32 %v1187_v44, %v1169_v15  ;;  %v1266_v44 = vadd.f32 %v1265_v56, %v3311_v42 }
 0x122   :  { %v3288_v4 = vpop.f32.mrf.mxu3  ;;  %v1206_v7 = vpop.f32.mrf.mxu1 }
 0x123   :  { %v1258_v38 = vadd.f32 %v1257_v27, %v3298_v21 }
 0x127   :  { %v1175_v8 = vpop.f32.mrf.mxu2 }
 0x128   :  { %v1189_v22 = vpop.f32.mrf.mxu0 }
 0x129   :  { %v3314_v57 = vadd.f32 %v1189_v22, %v1171_v53  ;;  %v1119_v22 = vadd.f32 %v1118_v1, %v3284_v55  ;;  %v1176_v1 = vadd.f32 %v1175_v8, %v3288_v4  ;;  %v2367_v8 = vmov 800.0  }
 0x12a   :  { %v1225_v9 = vpop.f32.mrf.mxu3  ;;  %v1208_v35 = vpop.f32.mrf.mxu1  ;;  %2357 = vrcp.f32 %v2367_v8 }
 0x12b   :  { %v1226_v17 = vadd.f32 %v1225_v9, %v1206_v7  ;;  %v1267_v29 = vadd.f32 %v1266_v44, %v3314_v57  ;;  %v3348_v55 = vadd.f32 %v3286_v2, %v1119_v22 }
 0x12f   :  { %v1244_v26 = vpop.f32.mrf.mxu2 }
 0x130   :  { %v3301_v31 = vadd.f32 %v1244_v26, %v1226_v17  ;;  %v1192_v7 = vpop.f32.mrf.mxu0  ;;  %v1275_v26 = vadd.f32 %v1274_v18, %v3327_v13 }
 0x131   :  { %v3332_v19 = vadd.f32 %v1192_v7, %v1174_v49 }
 0x132   :  { %v1227_v30 = vpop.f32.mrf.mxu3  ;;  %v1259_v36 = vsel %vm848_vm0, %v3301_v31, 0.0  ;;  %v1211_v61 = vpop.f32.mrf.mxu1 }
 0x133   :  { %v1260_v54 = vadd.f32 %v1259_v36, %v1258_v38  ;;  %v1228_v39 = vadd.f32 %v1227_v30, %v1208_v35  ;;  %v1276_v3 = vadd.f32 %v1275_v26, %v3332_v19  ;;  %v1283_v38 = vadd.f32 %v1282_v47, %v3341_v63 }
 0x135   :  { %1261 = vadd.xlane.f32.xlu0 %v1260_v54  ;;  %v1284_v53 = vadd.f32 %v1283_v38, %v3348_v55 }
 0x137   :  { %v1246_v48 = vpop.f32.mrf.mxu2 }
 0x138   :  { %v3317_v9 = vadd.f32 %v1246_v48, %v1228_v39  ;;  %v1194_v30 = vpop.f32.mrf.mxu0  ;;  %v2358_v39 = vpop.eup %2357 }
 0x139   :  { %v3352_v36 = vadd.f32 %v1194_v30, %v1176_v1  ;;  %v1291_v44 = vmul.f32 800.0, %v2358_v39  ;;  %vm1295_vm1 = vweird.f32 %v2358_v39 }
 0x13a   :  { %v1230_v60 = vpop.f32.mrf.mxu3  ;;  %v1268_v40 = vsel %vm848_vm0, %v3317_v9, 0.0  ;;  %v1213_v50 = vpop.f32.mrf.mxu1 }
 0x13b   :  { %v1269_v15 = vadd.f32 %v1268_v40, %v1267_v29  ;;  %v1231_v17 = vadd.f32 %v1230_v60, %v1211_v61  ;;  %v1285_v58 = vadd.f32 %v1284_v53, %v3352_v36  ;;  %v1292_v6 = vsub.f32 1.0, %v1291_v44 }
 0x13d   :  { %1270 = vadd.xlane.f32.xlu0 %v1269_v15  ;;  %v1293_v48 = vmul.f32 %v2358_v39, %v1292_v6 }
 0x13f   :  { %v1249_v25 = vpop.f32.mrf.mxu2  ;;  %v1294_v7 = vadd.f32 %v2358_v39, %v1293_v48 }
 0x140   :  { %v3336_v27 = vadd.f32 %v1249_v25, %v1231_v17 }
 0x141   :  { %v3360_v59 = vsel %vm1295_vm1, %v2358_v39, %v1294_v7 }
 0x142   :  { %v1277_v46 = vsel %vm848_vm0, %v3336_v27, 0.0  ;;  %v1232_v32 = vpop.f32.mrf.mxu3 }
 0x143   :  { %v1278_v35 = vadd.f32 %v1277_v46, %v1276_v3  ;;  %v1233_v37 = vadd.f32 %v1232_v32, %v1213_v50 }
 0x145   :  { %1279 = vadd.xlane.f32.xlu1 %v1278_v35 }
 0x147   :  { %v1251_v54 = vpop.f32.mrf.mxu2 }
 0x148   :  { %v3355_v56 = vadd.f32 %v1251_v54, %v1233_v37 }
 0x14a   :  { %v1286_v2 = vsel %vm848_vm0, %v3355_v56, 0.0 }
 0x14b   :  { %v1287_v4 = vadd.f32 %v1286_v2, %v1285_v58 }
 0x14d   :  { %1288 = vadd.xlane.f32.xlu1 %v1287_v4 }
 0x1a8   :  { %v1262_v60 = vpop.xlane.xlu0 %1261 }
 0x1a9   :  { %v3363_v29 = vmul.f32 %v3360_v59, %v1262_v60 }
 0x1ab   :  { %v1301_v40 = vsub.f32 %v3244_v43, %v3363_v29  ;;  %v1302_v41 = vsub.f32 %v3262_v5, %v3363_v29  ;;  %v1303_v49 = vsub.f32 %v3266_v14, %v3363_v29  ;;  %v1304_v61 = vsub.f32 %v3292_v12, %v3363_v29 }
 0x1ac   :  { %v1305_v18 = vsub.f32 %v3295_v24, %v3363_v29  ;;  %v1306_v26 = vsub.f32 %v3298_v21, %v3363_v29  ;;  %v1307_v62 = vsub.f32 %v3301_v31, %v3363_v29 }
 0x1ad   :  { %v1329_v15 = vmul.f32 %v1301_v40, %v1301_v40  ;;  %v1330_v17 = vmul.f32 %v1302_v41, %v1302_v41  ;;  %v1331_v45 = vmul.f32 %v1303_v49, %v1303_v49  ;;  %v1332_v30 = vmul.f32 %v1304_v61, %v1304_v61 }
 0x1ae   :  { %v1333_v47 = vmul.f32 %v1305_v18, %v1305_v18  ;;  %v1334_v50 = vmul.f32 %v1306_v26, %v1306_v26  ;;  %v1335_v37 = vmul.f32 %v1307_v62, %v1307_v62 }
 0x1af   :  { %v1357_v22 = vadd.f32 %v1330_v17, %v1329_v15 }
 0x1b0   :  { %v1271_v25 = vpop.xlane.xlu0 %1270  ;;  %v1362_v48 = vsel %vm848_vm0, %v1335_v37, 0.0 }
 0x1b1   :  { %v3380_v3 = vmul.f32 %v3360_v59, %v1271_v25  ;;  %v1358_v46 = vadd.f32 %v1357_v22, %v1331_v45 }
 0x1b3   :  { %v1359_v1 = vadd.f32 %v1358_v46, %v1332_v30  ;;  %v1308_v32 = vsub.f32 %v3248_v51, %v3380_v3  ;;  %v1309_v35 = vsub.f32 %v3264_v10, %v3380_v3  ;;  %v1310_v38 = vsub.f32 %v3270_v20, %v3380_v3 }
 0x1b4   :  { %v1311_v54 = vsub.f32 %v3305_v33, %v3380_v3  ;;  %v1312_v4 = vsub.f32 %v3311_v42, %v3380_v3  ;;  %v1313_v7 = vsub.f32 %v3314_v57, %v3380_v3  ;;  %v1314_v60 = vsub.f32 %v3317_v9, %v3380_v3 }
 0x1b5   :  { %v1360_v53 = vadd.f32 %v1359_v1, %v1333_v47  ;;  %v1336_v58 = vmul.f32 %v1308_v32, %v1308_v32  ;;  %v1337_v2 = vmul.f32 %v1309_v35, %v1309_v35  ;;  %v1338_v39 = vmul.f32 %v1310_v38, %v1310_v38 }
 0x1b6   :  { %v1339_v49 = vmul.f32 %v1311_v54, %v1311_v54  ;;  %v1340_v15 = vmul.f32 %v1312_v4, %v1312_v4  ;;  %v1341_v25 = vmul.f32 %v1313_v7, %v1313_v7  ;;  %v1342_v26 = vmul.f32 %v1314_v60, %v1314_v60 }
 0x1b7   :  { %v1361_v8 = vadd.f32 %v1360_v53, %v1334_v50  ;;  %v1366_v44 = vadd.f32 %v1337_v2, %v1336_v58 }
 0x1b8   :  { %v1280_v6 = vpop.xlane.xlu1 %1279  ;;  %v1371_v37 = vsel %vm848_vm0, %v1342_v26, 0.0 }
 0x1b9   :  { %v3398_v40 = vmul.f32 %v3360_v59, %v1280_v6  ;;  %v1363_v41 = vadd.f32 %v1362_v48, %v1361_v8  ;;  %v1367_v61 = vadd.f32 %v1366_v44, %v1338_v39 }
 0x1bb   :  { %1364 = vadd.xlane.f32.xlu2 %v1363_v41  ;;  %v1368_v17 = vadd.f32 %v1367_v61, %v1339_v49  ;;  %v1315_v18 = vsub.f32 %v3254_v52, %v3398_v40  ;;  %v1316_v45 = vsub.f32 %v3268_v16, %v3398_v40  ;;  %v1317_v22 = vsub.f32 %v3274_v28, %v3398_v40 }
 0x1bc   :  { %v1318_v30 = vsub.f32 %v3321_v11, %v3398_v40  ;;  %v1319_v1 = vsub.f32 %v3327_v13, %v3398_v40  ;;  %v1320_v53 = vsub.f32 %v3332_v19, %v3398_v40  ;;  %v1321_v54 = vsub.f32 %v3336_v27, %v3398_v40 }
 0x1bd   :  { %v1369_v62 = vadd.f32 %v1368_v17, %v1340_v15  ;;  %v1343_v46 = vmul.f32 %v1315_v18, %v1315_v18  ;;  %v1344_v47 = vmul.f32 %v1316_v45, %v1316_v45  ;;  %v1345_v35 = vmul.f32 %v1317_v22, %v1317_v22 }
 0x1be   :  { %v1346_v4 = vmul.f32 %v1318_v30, %v1318_v30  ;;  %v1347_v39 = vmul.f32 %v1319_v1, %v1319_v1  ;;  %v1348_v60 = vmul.f32 %v1320_v53, %v1320_v53  ;;  %v1349_v41 = vmul.f32 %v1321_v54, %v1321_v54 }
 0x1bf   :  { %v1370_v32 = vadd.f32 %v1369_v62, %v1341_v25  ;;  %v1375_v38 = vadd.f32 %v1344_v47, %v1343_v46 }
 0x1c0   :  { %v1289_v50 = vpop.xlane.xlu1 %1288  ;;  %v1380_v26 = vsel %vm848_vm0, %v1349_v41, 0.0 }
 0x1c1   :  { %v3416_v58 = vmul.f32 %v3360_v59, %v1289_v50  ;;  %v1372_v2 = vadd.f32 %v1371_v37, %v1370_v32  ;;  %v1376_v8 = vadd.f32 %v1375_v38, %v1345_v35 }
 0x1c3   :  { %1373 = vadd.xlane.f32.xlu2 %v1372_v2  ;;  %v1377_v44 = vadd.f32 %v1376_v8, %v1346_v4  ;;  %v1322_v6 = vsub.f32 %v3258_v0, %v3416_v58  ;;  %v1323_v48 = vsub.f32 %v3272_v23, %v3416_v58  ;;  %v1324_v7 = vsub.f32 %v3276_v34, %v3416_v58 }
 0x1c4   :  { %v1325_v61 = vsub.f32 %v3341_v63, %v3416_v58  ;;  %v1326_v45 = vsub.f32 %v3348_v55, %v3416_v58  ;;  %v1328_v62 = vsub.f32 %v3355_v56, %v3416_v58  ;;  %v1327_v46 = vsub.f32 %v3352_v36, %v3416_v58 }
 0x1c5   :  { %v1378_v49 = vadd.f32 %v1377_v44, %v1347_v39  ;;  %v1350_v15 = vmul.f32 %v1322_v6, %v1322_v6  ;;  %v1351_v17 = vmul.f32 %v1323_v48, %v1323_v48  ;;  %v1352_v22 = vmul.f32 %v1324_v7, %v1324_v7 }
 0x1c6   :  { %v1353_v47 = vmul.f32 %v1325_v61, %v1325_v61  ;;  %v1354_v32 = vmul.f32 %v1326_v45, %v1326_v45  ;;  %v1356_v38 = vmul.f32 %v1328_v62, %v1328_v62  ;;  %v1355_v50 = vmul.f32 %v1327_v46, %v1327_v46 }
 0x1c7   :  { %v1379_v18 = vadd.f32 %v1378_v49, %v1348_v60  ;;  %v1384_v25 = vadd.f32 %v1351_v17, %v1350_v15  ;;  %v2368_v4 = vmov 0  }
 0x1c8   :  { %v1389_v54 = vsel %vm848_vm0, %v1356_v38, 0.0  ;;  %2354 = vset.pattern.permute.xlu2 %v2368_v4  ;;  %2355 = vset.pattern.permute.xlu0 %v2368_v4 }
 0x1c9   :  { %v1381_v30 = vadd.f32 %v1380_v26, %v1379_v18  ;;  %v1385_v1 = vadd.f32 %v1384_v25, %v1352_v22  ;;  %2356 = vset.pattern.permute.xlu1 %v2368_v4  ;;  %v1397_v26 = vld [vmem:[%s3568_s2] sm:$0xff]  ;;  %v1398_v4 = vld [vmem:[%s3568_s2 + $0x8] sm:$0xff] }
 0x1cb   :  { %1382 = vadd.xlane.f32.xlu0 %v1381_v30  ;;  %v1386_v35 = vadd.f32 %v1385_v1, %v1353_v47 }
 0x1cd   :  { %v1387_v37 = vadd.f32 %v1386_v35, %v1354_v32 }
 0x1cf   :  { %v1388_v53 = vadd.f32 %v1387_v37, %v1355_v50 }
 0x1d1   :  { %v1390_v2 = vadd.f32 %v1389_v54, %v1388_v53 }
 0x1d3   :  { %1391 = vadd.xlane.f32.xlu1 %v1390_v2  ;;  %v1449_v2 = vld [vmem:[%s3569_s3] sm:$0xff] }
 0x22e   :  { %v1365_v8 = vpop.xlane.xlu2 %1364 }
 0x22f   :  { %v1393_v39 = vmul.f32 %v1365_v8, %v3360_v59 }
 0x231   :  { %v1401_v44 = vadd.f32 1e-05, %v1393_v39 }
 0x233   :  { %2359 = vrsqrt.f32 %v1401_v44  ;;  %vm1411_vm3 = vweird.f32 %v1401_v44 }
 0x236   :  { %v1374_v6 = vpop.xlane.xlu2 %1373 }
 0x237   :  { %v1394_v48 = vmul.f32 %v1374_v6, %v3360_v59 }
 0x239   :  { %v2360_v7 = vpop.eup %2359  ;;  %v1402_v60 = vadd.f32 1e-05, %v1394_v48 }
 0x23a   :  { %v1406_v41 = vmul.f32 %v2360_v7, %v1401_v44  ;;  %vm1412_vm2 = vweird.f32 %v2360_v7 }
 0x23b   :  { %2361 = vrsqrt.f32 %v1402_v60  ;;  %vm1413_vm4 = vmor %vm1411_vm3, %vm1412_vm2  ;;  %vm1421_vm6 = vweird.f32 %v1402_v60 }
 0x23c   :  { %v1407_v49 = vmul.f32 %v2360_v7, %v1406_v41 }
 0x23e   :  { %v1408_v61 = vmul.f32 0.5, %v1407_v49  ;;  %v1383_v15 = vpop.xlane.xlu0 %1382 }
 0x23f   :  { %v1395_v17 = vmul.f32 %v1383_v15, %v3360_v59 }
 0x240   :  { %v1409_v18 = vsub.f32 1.5, %v1408_v61 }
 0x241   :  { %v2362_v45 = vpop.eup %2361  ;;  %v1403_v22 = vadd.f32 1e-05, %v1395_v17 }
 0x242   :  { %v1416_v25 = vmul.f32 %v2362_v45, %v1402_v60  ;;  %v1410_v62 = vmul.f32 %v2360_v7, %v1409_v18  ;;  %vm1422_vm5 = vweird.f32 %v2362_v45 }
 0x243   :  { %2363 = vrsqrt.f32 %v1403_v22  ;;  %vm1423_vm7 = vmor %vm1421_vm6, %vm1422_vm5  ;;  %vm1431_vm9 = vweird.f32 %v1403_v22  ;;  %vm1660_vm5 = vcmask 257024  }
 0x244   :  { %v1417_v30 = vmul.f32 %v2362_v45, %v1416_v25  ;;  %v1414_v46 = vsel %vm1413_vm4, %v2360_v7, %v1410_v62 }
 0x245   :  { %v1445_v47 = vmul.f32 %v1414_v46, %v1397_v26 }
 0x246   :  { %v1418_v1 = vmul.f32 0.5, %v1417_v30  ;;  %v1392_v32 = vpop.xlane.xlu1 %1391 }
 0x247   :  { %v1396_v35 = vmul.f32 %v1392_v32, %v3360_v59  ;;  %1463 = vperm.xlu2 %2354, %v1445_v47   ;;  %v1453_v53 = vmul.f32 %v1445_v47, %v3363_v29  ;;  %v1450_v29 = vld [vmem:[%s3569_s3 + $0x8] sm:$0xff]  ;;  %v1452_v47 = vld [vmem:[%s3569_s3 + $0x18] sm:$0xff] }
 0x248   :  { %v1419_v38 = vsub.f32 1.5, %v1418_v1 }
 0x249   :  { %v2364_v50 = vpop.eup %2363  ;;  %v1404_v37 = vadd.f32 1e-05, %v1396_v35  ;;  %v1457_v44 = vsub.f32 %v1449_v2, %v1453_v53 }
 0x24a   :  { %v1426_v54 = vmul.f32 %v2364_v50, %v1403_v22  ;;  %v1420_v8 = vmul.f32 %v2362_v45, %v1419_v38  ;;  %vm1432_vm8 = vweird.f32 %v2364_v50  ;;  %v1451_v38 = vld [vmem:[%s3569_s3 + $0x10] sm:$0xff] }
 0x24b   :  { %2365 = vrsqrt.f32 %v1404_v37  ;;  %vm1433_vm10 = vmor %vm1431_vm9, %vm1432_vm8  ;;  %vm1441_vm12 = vweird.f32 %v1404_v37 }
 0x24c   :  { %v1427_v59 = vmul.f32 %v2364_v50, %v1426_v54  ;;  %v1424_v39 = vsel %vm1423_vm7, %v2362_v45, %v1420_v8  ;;  %v1399_v45 = vld [vmem:[%s3568_s2 + $0x10] sm:$0xff] }
 0x24d   :  { %v1446_v6 = vmul.f32 %v1424_v39, %v1398_v4 }
 0x24e   :  { %v1428_v48 = vmul.f32 0.5, %v1427_v59 }
 0x24f   :  { %1511 = vperm.xlu2 %2354, %v1457_v44   ;;  %1468 = vperm.xlu0 %2355, %v1446_v6   ;;  %v1454_v7 = vmul.f32 %v1446_v6, %v3380_v3  ;;  %v1400_v3 = vld [vmem:[%s3568_s2 + $0x18] sm:$0xff] }
 0x250   :  { %v1429_v60 = vsub.f32 1.5, %v1428_v48 }
 0x251   :  { %v2366_v41 = vpop.eup %2365  ;;  %v1458_v49 = vsub.f32 %v1450_v29, %v1454_v7 }
 0x252   :  { %v1436_v61 = vmul.f32 %v2366_v41, %v1404_v37  ;;  %v1430_v15 = vmul.f32 %v2364_v50, %v1429_v60  ;;  %vm1442_vm11 = vweird.f32 %v2366_v41 }
 0x253   :  { %1516 = vperm.xlu1 %2356, %v1458_v49   ;;  %vm1443_vm13 = vmor %vm1441_vm12, %vm1442_vm11 }
 0x254   :  { %v1437_v17 = vmul.f32 %v2366_v41, %v1436_v61  ;;  %v1434_v25 = vsel %vm1433_vm10, %v2364_v50, %v1430_v15 }
 0x255   :  { %v1447_v62 = vmul.f32 %v1434_v25, %v1399_v45 }
 0x256   :  { %v1438_v18 = vmul.f32 0.5, %v1437_v17 }
 0x257   :  { %v1455_v35 = vmul.f32 %v1447_v62, %v3398_v40 }
 0x258   :  { %v1439_v26 = vsub.f32 1.5, %v1438_v18 }
 0x259   :  { %v1459_v50 = vsub.f32 %v1451_v38, %v1455_v35 }
 0x25a   :  { %v1440_v30 = vmul.f32 %v2366_v41, %v1439_v26 }
 0x25b   :  { %1473 = vperm.xlu1 %2356, %v1447_v62  }
 0x25c   :  { %v1444_v22 = vsel %vm1443_vm13, %v2366_v41, %v1440_v30 }
 0x25d   :  { %v1448_v46 = vmul.f32 %v1444_v22, %v1400_v3 }
 0x25f   :  { %1478 = vperm.xlu2 %2354, %v1448_v46   ;;  %v1456_v1 = vmul.f32 %v1448_v46, %v3416_v58 }
 0x261   :  { %v1460_v32 = vsub.f32 %v1452_v47, %v1456_v1 }
 0x263   :  { %1526 = vperm.xlu1 %2356, %v1460_v32  }
 0x267   :  { %1521 = vperm.xlu2 %2354, %v1459_v50  }
 0x2a1   :  { %v1464_v37 = vpop.permute.xlu2 %1463 }
 0x2a2   :  { %v1481_v53 = vmul.f32 %v1464_v37, %v3244_v43  ;;  %v1482_v54 = vmul.f32 %v1464_v37, %v3262_v5  ;;  %v1483_v2 = vmul.f32 %v1464_v37, %v3266_v14  ;;  %v1484_v4 = vmul.f32 %v1464_v37, %v3292_v12 }
 0x2a3   :  { %v1485_v58 = vmul.f32 %v1464_v37, %v3295_v24  ;;  %v1486_v40 = vmul.f32 %v1464_v37, %v3298_v21  ;;  %v1487_v8 = vmul.f32 %v1464_v37, %v3301_v31 }
 0x2a9   :  { %v1512_v59 = vpop.permute.xlu2 %1511 }
 0x2aa   :  { %v1529_v39 = vadd.f32 %v1512_v59, %v1481_v53  ;;  %v1530_v44 = vadd.f32 %v1512_v59, %v1482_v54  ;;  %v1531_v6 = vadd.f32 %v1512_v59, %v1483_v2  ;;  %v1532_v48 = vadd.f32 %v1512_v59, %v1484_v4 }
 0x2ab   :  { %v1533_v29 = vadd.f32 %v1512_v59, %v1485_v58  ;;  %v1534_v7 = vadd.f32 %v1512_v59, %v1486_v40  ;;  %v1535_v43 = vadd.f32 %v1512_v59, %v1487_v8 }
 0x2ac   :  { %vm1557_vm14 = vcmp.ge.f32.partialorder %v1529_v39, 0.0  ;;  %vm1558_vm15 = vcmp.ge.f32.partialorder %v1530_v44, 0.0  ;;  %vm1559_vm0 = vcmp.ge.f32.partialorder %v1531_v6, 0.0  ;;  %vm1560_vm1 = vcmp.ge.f32.partialorder %v1532_v48, 0.0 }
 0x2ad   :  { %vm1561_vm2 = vcmp.ge.f32.partialorder %v1533_v29, 0.0  ;;  %vm1562_vm3 = vcmp.ge.f32.partialorder %v1534_v7, 0.0  ;;  %vm1563_vm4 = vcmp.ge.f32.partialorder %v1535_v43, 0.0  ;;  %v1585_v5 = vmul.f32 0.01, %v1529_v39 }
 0x2ae   :  { %v1586_v14 = vmul.f32 0.01, %v1530_v44  ;;  %v1587_v12 = vmul.f32 0.01, %v1531_v6  ;;  %v1588_v24 = vmul.f32 0.01, %v1532_v48 }
 0x2af   :  { %v1589_v21 = vmul.f32 0.01, %v1533_v29  ;;  %v1590_v31 = vmul.f32 0.01, %v1534_v7  ;;  %v1591_v60 = vmul.f32 0.01, %v1535_v43  ;;  %v1613_v41 = vsel %vm1557_vm14, %v1529_v39, %v1585_v5 }
 0x2b0   :  { %v1614_v49 = vsel %vm1558_vm15, %v1530_v44, %v1586_v14  ;;  %v1615_v61 = vsel %vm1559_vm0, %v1531_v6, %v1587_v12  ;;  %v1616_v15 = vsel %vm1560_vm1, %v1532_v48, %v1588_v24 }
 0x2b1   :  { %v1617_v17 = vsel %vm1561_vm2, %v1533_v29, %v1589_v21  ;;  %v1618_v18 = vsel %vm1562_vm3, %v1534_v7, %v1590_v31  ;;  %v1619_v45 = vsel %vm1563_vm4, %v1535_v43, %v1591_v60  ;;  %v1641_v25 = vpack.c.bf16 %v1614_v49, %v1613_v41 }
 0x2b2   :  { %v1642_v26 = vpack.c.bf16 %v1616_v15, %v1615_v61  ;;  %v1643_v62 = vpack.c.bf16 %v1618_v18, %v1617_v17  ;;  %v1644_v3 = vpack.c.bf16 %v1619_v45, %v1619_v45 }
 0x2b3   :  { %1657 = vst [vmem:[%s3570_s4] sm:$0xff] %v1641_v25 }
 0x2b4   :  { %1658 = vst [vmem:[%s3570_s4 + $0x8] sm:$0xff] %v1642_v26 }
 0x2b5   :  { %1659 = vst [vmem:[%s3570_s4 + $0x10] sm:$0xff] %v1643_v62 }
 0x2b6   :  { %1661 = vst.msk [vmem:[%s3570_s4 + $0x18] sm:$0xf] %vm1660_vm5, %v1644_v3 }
 0x2b9   :  { %v1479_v30 = vpop.permute.xlu2 %1478 }
 0x2ba   :  { %v3487_v46 = vmul.f32 %v1479_v30, %v3258_v0  ;;  %v3490_v47 = vmul.f32 %v1479_v30, %v3272_v23  ;;  %v3500_v0 = vmul.f32 %v1479_v30, %v3276_v34  ;;  %v1507_v29 = vmul.f32 %v1479_v30, %v3352_v36 }
 0x2bb   :  { %v1508_v18 = vmul.f32 %v1479_v30, %v3355_v56 }
 0x2c1   :  { %v1469_v22 = vpop.permute.xlu0 %1468  ;;  %v1522_v60 = vpop.permute.xlu2 %1521 }
 0x2c2   :  { %v1488_v1 = vmul.f32 %v1469_v22, %v3248_v51  ;;  %v1489_v32 = vmul.f32 %v1469_v22, %v3264_v10  ;;  %v1490_v35 = vmul.f32 %v1469_v22, %v3270_v20  ;;  %v1491_v38 = vmul.f32 %v1469_v22, %v3305_v33 }
 0x2c3   :  { %v1492_v50 = vmul.f32 %v1469_v22, %v3311_v42  ;;  %v1493_v37 = vmul.f32 %v1469_v22, %v3314_v57  ;;  %v1494_v53 = vmul.f32 %v1469_v22, %v3317_v9  ;;  %v3503_v20 = vmul.f32 %v1479_v30, %v3341_v63 }
 0x2c4   :  { %v3506_v9 = vmul.f32 %v1479_v30, %v3348_v55 }
 0x2c5   :  { %v1517_v54 = vpop.permute.xlu1 %1516 }
 0x2c6   :  { %v1536_v23 = vadd.f32 %v1517_v54, %v1488_v1  ;;  %v1537_v2 = vadd.f32 %v1517_v54, %v1489_v32  ;;  %v1538_v4 = vadd.f32 %v1517_v54, %v1490_v35  ;;  %v1539_v51 = vadd.f32 %v1517_v54, %v1491_v38 }
 0x2c7   :  { %v1540_v58 = vadd.f32 %v1517_v54, %v1492_v50  ;;  %v1541_v10 = vadd.f32 %v1517_v54, %v1493_v37  ;;  %v1542_v40 = vadd.f32 %v1517_v54, %v1494_v53 }
 0x2c8   :  { %vm1564_vm6 = vcmp.ge.f32.partialorder %v1536_v23, 0.0  ;;  %vm1565_vm7 = vcmp.ge.f32.partialorder %v1537_v2, 0.0  ;;  %vm1566_vm8 = vcmp.ge.f32.partialorder %v1538_v4, 0.0  ;;  %vm1567_vm9 = vcmp.ge.f32.partialorder %v1539_v51, 0.0 }
 0x2c9   :  { %vm1568_vm10 = vcmp.ge.f32.partialorder %v1540_v58, 0.0  ;;  %vm1569_vm11 = vcmp.ge.f32.partialorder %v1541_v10, 0.0  ;;  %vm1570_vm12 = vcmp.ge.f32.partialorder %v1542_v40, 0.0  ;;  %v1592_v33 = vmul.f32 0.01, %v1536_v23 }
 0x2ca   :  { %v1593_v34 = vmul.f32 0.01, %v1537_v2  ;;  %v1594_v42 = vmul.f32 0.01, %v1538_v4  ;;  %v1595_v57 = vmul.f32 0.01, %v1539_v51 }
 0x2cb   :  { %v1596_v8 = vmul.f32 0.01, %v1540_v58  ;;  %v1597_v59 = vmul.f32 0.01, %v1541_v10  ;;  %v1598_v39 = vmul.f32 0.01, %v1542_v40  ;;  %v1620_v44 = vsel %vm1564_vm6, %v1536_v23, %v1592_v33 }
 0x2cc   :  { %v1621_v63 = vsel %vm1565_vm7, %v1537_v2, %v1593_v34  ;;  %v1622_v6 = vsel %vm1566_vm8, %v1538_v4, %v1594_v42  ;;  %v1623_v48 = vsel %vm1567_vm9, %v1539_v51, %v1595_v57 }
 0x2cd   :  { %v1624_v7 = vsel %vm1568_vm10, %v1540_v58, %v1596_v8  ;;  %v1625_v43 = vsel %vm1569_vm11, %v1541_v10, %v1597_v59  ;;  %v1626_v5 = vsel %vm1570_vm12, %v1542_v40, %v1598_v39  ;;  %v1645_v14 = vpack.c.bf16 %v1621_v63, %v1620_v44  ;;  %v1474_v12 = vpop.permute.xlu1 %1473 }
 0x2ce   :  { %v1646_v24 = vpack.c.bf16 %v1623_v48, %v1622_v6  ;;  %v1647_v55 = vpack.c.bf16 %v1625_v43, %v1624_v7  ;;  %v1648_v21 = vpack.c.bf16 %v1626_v5, %v1626_v5  ;;  %v1495_v31 = vmul.f32 %v1474_v12, %v3254_v52 }
 0x2cf   :  { %1662 = vst [vmem:[%s3570_s4 + $0x1c] sm:$0xff] %v1645_v14  ;;  %v1496_v36 = vmul.f32 %v1474_v12, %v3268_v16  ;;  %v1497_v41 = vmul.f32 %v1474_v12, %v3274_v28  ;;  %v1498_v49 = vmul.f32 %v1474_v12, %v3321_v11  ;;  %v1499_v61 = vmul.f32 %v1474_v12, %v3327_v13 }
 0x2d0   :  { %1663 = vst [vmem:[%s3570_s4 + $0x24] sm:$0xff] %v1646_v24  ;;  %v1500_v15 = vmul.f32 %v1474_v12, %v3332_v19  ;;  %v1501_v52 = vmul.f32 %v1474_v12, %v3336_v27  ;;  %v1543_v17 = vadd.f32 %v1522_v60, %v1495_v31 }
 0x2d1   :  { %1664 = vst [vmem:[%s3570_s4 + $0x2c] sm:$0xff] %v1647_v55  ;;  %v1544_v16 = vadd.f32 %v1522_v60, %v1496_v36  ;;  %v1545_v28 = vadd.f32 %v1522_v60, %v1497_v41  ;;  %v1546_v11 = vadd.f32 %v1522_v60, %v1498_v49  ;;  %v1547_v45 = vadd.f32 %v1522_v60, %v1499_v61 }
 0x2d2   :  { %1665 = vst.msk [vmem:[%s3570_s4 + $0x34] sm:$0xf] %vm1660_vm5, %v1648_v21  ;;  %v1548_v13 = vadd.f32 %v1522_v60, %v1500_v15  ;;  %v1549_v19 = vadd.f32 %v1522_v60, %v1501_v52  ;;  %vm1571_vm13 = vcmp.ge.f32.partialorder %v1543_v17, 0.0  ;;  %v1599_v27 = vmul.f32 0.01, %v1543_v17 }
 0x2d3   :  { %vm1572_vm14 = vcmp.ge.f32.partialorder %v1544_v16, 0.0  ;;  %vm1573_vm15 = vcmp.ge.f32.partialorder %v1545_v28, 0.0  ;;  %vm1574_vm0 = vcmp.ge.f32.partialorder %v1546_v11, 0.0  ;;  %vm1575_vm1 = vcmp.ge.f32.partialorder %v1547_v45, 0.0 }
 0x2d4   :  { %vm1576_vm2 = vcmp.ge.f32.partialorder %v1548_v13, 0.0  ;;  %vm1577_vm3 = vcmp.ge.f32.partialorder %v1549_v19, 0.0  ;;  %v1600_v56 = vmul.f32 0.01, %v1544_v16  ;;  %v1601_v25 = vmul.f32 0.01, %v1545_v28 }
 0x2d5   :  { %v1602_v26 = vmul.f32 0.01, %v1546_v11  ;;  %v1603_v62 = vmul.f32 0.01, %v1547_v45  ;;  %v1604_v3 = vmul.f32 0.01, %v1548_v13  ;;  %v1627_v30 = vsel %vm1571_vm13, %v1543_v17, %v1599_v27  ;;  %v1527_v22 = vpop.permute.xlu1 %1526 }
 0x2d6   :  { %v1605_v1 = vmul.f32 0.01, %v1549_v19  ;;  %v1628_v32 = vsel %vm1572_vm14, %v1544_v16, %v1600_v56  ;;  %v1629_v35 = vsel %vm1573_vm15, %v1545_v28, %v1601_v25  ;;  %v1550_v38 = vadd.f32 %v1527_v22, %v3487_v46 }
 0x2d7   :  { %v1630_v50 = vsel %vm1574_vm0, %v1546_v11, %v1602_v26  ;;  %v1631_v37 = vsel %vm1575_vm1, %v1547_v45, %v1603_v62  ;;  %v1632_v53 = vsel %vm1576_vm2, %v1548_v13, %v1604_v3  ;;  %v1649_v54 = vpack.c.bf16 %v1628_v32, %v1627_v30 }
 0x2d8   :  { %v1633_v23 = vsel %vm1577_vm3, %v1549_v19, %v1605_v1  ;;  %v1650_v2 = vpack.c.bf16 %v1630_v50, %v1629_v35  ;;  %v1651_v4 = vpack.c.bf16 %v1632_v53, %v1631_v37  ;;  %v1551_v51 = vadd.f32 %v1527_v22, %v3490_v47 }
 0x2d9   :  { %v1652_v58 = vpack.c.bf16 %v1633_v23, %v1633_v23  ;;  %1666 = vst [vmem:[%s3570_s4 + $0x38] sm:$0xff] %v1649_v54  ;;  %v1552_v10 = vadd.f32 %v1527_v22, %v3500_v0  ;;  %v1553_v40 = vadd.f32 %v1527_v22, %v3503_v20  ;;  %v1554_v46 = vadd.f32 %v1527_v22, %v3506_v9 }
 0x2da   :  { %1667 = vst [vmem:[%s3570_s4 + $0x40] sm:$0xff] %v1650_v2  ;;  %v1555_v33 = vadd.f32 %v1527_v22, %v1507_v29  ;;  %v1556_v34 = vadd.f32 %v1527_v22, %v1508_v18  ;;  %vm1578_vm4 = vcmp.ge.f32.partialorder %v1550_v38, 0.0  ;;  %vm1579_vm6 = vcmp.ge.f32.partialorder %v1551_v51, 0.0 }
 0x2db   :  { %1668 = vst [vmem:[%s3570_s4 + $0x48] sm:$0xff] %v1651_v4  ;;  %vm1580_vm7 = vcmp.ge.f32.partialorder %v1552_v10, 0.0  ;;  %vm1581_vm8 = vcmp.ge.f32.partialorder %v1553_v40, 0.0  ;;  %vm1582_vm9 = vcmp.ge.f32.partialorder %v1554_v46, 0.0  ;;  %v1606_v47 = vmul.f32 0.01, %v1550_v38 }
 0x2dc   :  { %1669 = vst.msk [vmem:[%s3570_s4 + $0x50] sm:$0xf] %vm1660_vm5, %v1652_v58  ;;  %vm1583_vm10 = vcmp.ge.f32.partialorder %v1555_v33, 0.0  ;;  %vm1584_vm11 = vcmp.ge.f32.partialorder %v1556_v34, 0.0  ;;  %v1607_v0 = vmul.f32 0.01, %v1551_v51 }
 0x2dd   :  { %v1608_v20 = vmul.f32 0.01, %v1552_v10  ;;  %v1609_v42 = vmul.f32 0.01, %v1553_v40  ;;  %v1610_v57 = vmul.f32 0.01, %v1554_v46  ;;  %v1634_v9 = vsel %vm1578_vm4, %v1550_v38, %v1606_v47 }
 0x2de   :  { %v1611_v8 = vmul.f32 0.01, %v1555_v33  ;;  %v1612_v59 = vmul.f32 0.01, %v1556_v34  ;;  %v1635_v39 = vsel %vm1579_vm6, %v1551_v51, %v1607_v0 }
 0x2df   :  { %v1636_v44 = vsel %vm1580_vm7, %v1552_v10, %v1608_v20  ;;  %v1637_v63 = vsel %vm1581_vm8, %v1553_v40, %v1609_v42  ;;  %v1638_v6 = vsel %vm1582_vm9, %v1554_v46, %v1610_v57  ;;  %v1653_v48 = vpack.c.bf16 %v1635_v39, %v1634_v9 }
 0x2e0   :  { %v1639_v29 = vsel %vm1583_vm10, %v1555_v33, %v1611_v8  ;;  %v1640_v7 = vsel %vm1584_vm11, %v1556_v34, %v1612_v59  ;;  %v1654_v43 = vpack.c.bf16 %v1637_v63, %v1636_v44 }
 0x2e1   :  { %v1655_v5 = vpack.c.bf16 %v1639_v29, %v1638_v6  ;;  %v1656_v14 = vpack.c.bf16 %v1640_v7, %v1640_v7  ;;  %1670 = vst [vmem:[%s3570_s4 + $0x54] sm:$0xff] %v1653_v48 }
 0x2e2   :  { %1671 = vst [vmem:[%s3570_s4 + $0x5c] sm:$0xff] %v1654_v43 }
 0x2e3   :  { %1672 = vst [vmem:[%s3570_s4 + $0x64] sm:$0xff] %v1655_v5 }
 0x2e4   :  { %1673 = vst.msk [vmem:[%s3570_s4 + $0x6c] sm:$0xf] %vm1660_vm5, %v1656_v14 }

// kernel: vae_forward.7
= control target key start
LH: loop header
LB: loop body
LE: loop exit
PB: predicated region body
PF: predicated region fallthrough
CT: control target
= control target key end

     0   :  { %vm310_vm0 = vcmask 261120   ;;  %vm497_vm1 = vcmask 277504   ;;  %s1822_s1 = inlined_call_operand.vmem [shape: bf16[288,162], index: 1, kind: input, shape index: {}]   ;;  %s1823_s0 = inlined_call_operand.vmem [shape: bf16[64,288], index: 0, kind: input, shape index: {}]   ;;  %s1824_s2 = inlined_call_operand.vmem [shape: f32[64,1], index: 2, kind: input, shape index: {}]   ;;  %s1825_s3 = inlined_call_operand.vmem [shape: f32[64,1], index: 3, kind: input, shape index: {}]   ;;  %s1826_s4 = inlined_call_operand.vmem [shape: bf16[64,162], index: 4, kind: output, shape index: {}]  }
   0x1   :  { %v1034_v0 = vld [vmem:[%s1822_s1 + $0x70] sm:$0xf]  ;;  %v1155_v1 = vld [vmem:[%s1822_s1 + $0x74] sm:$0xf0]  ;;  %v1026_v2 = vld [vmem:[%s1822_s1 + $0x60] sm:$0xf] }
   0x2   :  { %v1035_v3 = vor.u32 %v1155_v1, %v1034_v0  ;;  %v1153_v4 = vld [vmem:[%s1822_s1 + $0x64] sm:$0xf0]  ;;  %v1114_v5 = vld [vmem:[%s1822_s1 + $0x110] sm:$0xf]  ;;  %v1175_v6 = vld [vmem:[%s1822_s1 + $0x114] sm:$0xf0] }
   0x3   :  { %v1027_v7 = vor.u32 %v1153_v4, %v1026_v2  ;;  %v1115_v8 = vor.u32 %v1175_v6, %v1114_v5  ;;  %v1106_v9 = vld [vmem:[%s1822_s1 + $0x100] sm:$0xf]  ;;  %v1173_v10 = vld [vmem:[%s1822_s1 + $0x104] sm:$0xf0]  ;;  %v1018_v11 = vld [vmem:[%s1822_s1 + $0x50] sm:$0xf] }
   0x4   :  { %323 = vmatpush.bf16.msra.mxu0 %v1035_v3  ;;  %1176 = vmatpush.bf16.msra.mxu1 %v1035_v3  ;;  %v1151_v12 = vld [vmem:[%s1822_s1 + $0x54] sm:$0xf0]  ;;  %v938_v13 = vld [vmem:[%s1823_s0 + $0x8] sm:$0xf]  ;;  %v1107_v14 = vor.u32 %v1173_v10, %v1106_v9  ;;  %v1130_v15 = vld [vmem:[%s1823_s0 + $0x10] sm:$0xf0] }
   0x5   :  { %387 = vmatpush.bf16.msra.mxu2 %v1115_v8  ;;  %1184 = vmatpush.bf16.msra.mxu3 %v1115_v8  ;;  %v962_v16 = vld [vmem:[%s1823_s0 + $0x38] sm:$0xf]  ;;  %v1136_v17 = vld [vmem:[%s1823_s0 + $0x40] sm:$0xf0]  ;;  %v1154_v18 = vld [vmem:[%s1822_s1 + $0x74] sm:$0xf]  ;;  %v1019_v21 = vor.u32 %v1151_v12, %v1018_v11  ;;  %v1296_v26 = vor.u32 %v1130_v15, %v938_v13 }
   0x6   :  { %v1036_v19 = vld [vmem:[%s1822_s1 + $0x78] sm:$0xf0]  ;;  %v1170_v20 = vld [vmem:[%s1822_s1 + $0xf4] sm:$0xf]  ;;  %v1010_v22 = vld [vmem:[%s1822_s1 + $0x40] sm:$0xf]  ;;  %v1298_v27 = vor.u32 %v1136_v17, %v962_v16 }
   0x7   :  { %v1149_v23 = vld [vmem:[%s1822_s1 + $0x44] sm:$0xf0]  ;;  %v1039_v24 = vor.u32 %v1154_v18, %v1036_v19  ;;  %v1100_v25 = vld [vmem:[%s1822_s1 + $0xf8] sm:$0xf0]  ;;  %v1152_v29 = vld [vmem:[%s1822_s1 + $0x64] sm:$0xf] }
   0x8   :  { %324 = vmatpush.bf16.msra.mxu0 %v1027_v7  ;;  %1177 = vmatpush.bf16.msra.mxu1 %v1027_v7  ;;  %v1103_v28 = vor.u32 %v1170_v20, %v1100_v25  ;;  %v1028_v30 = vld [vmem:[%s1822_s1 + $0x68] sm:$0xf0]  ;;  %v1168_v31 = vld [vmem:[%s1822_s1 + $0xe4] sm:$0xf]  ;;  %v1150_v35 = vld [vmem:[%s1822_s1 + $0x54] sm:$0xf]  ;;  %v1011_v36 = vor.u32 %v1149_v23, %v1010_v22 }
   0x9   :  { %388 = vmatpush.bf16.msra.mxu2 %v1107_v14  ;;  %1185 = vmatpush.bf16.msra.mxu3 %v1107_v14  ;;  %v1092_v32 = vld [vmem:[%s1822_s1 + $0xe8] sm:$0xf0]  ;;  %v1031_v33 = vor.u32 %v1152_v29, %v1028_v30  ;;  %v1020_v37 = vld [vmem:[%s1822_s1 + $0x58] sm:$0xf0]  ;;  %v1166_v38 = vld [vmem:[%s1822_s1 + $0xd4] sm:$0xf] }
   0xa   :  { %v1095_v34 = vor.u32 %v1168_v31, %v1092_v32  ;;  %v1084_v39 = vld [vmem:[%s1822_s1 + $0xd8] sm:$0xf0]  ;;  %v1002_v40 = vld [vmem:[%s1822_s1 + $0x30] sm:$0xf]  ;;  %v1147_v41 = vld [vmem:[%s1822_s1 + $0x34] sm:$0xf0]  ;;  %v1023_v42 = vor.u32 %v1150_v35, %v1020_v37 }
   0xb   :  { %v1087_v43 = vor.u32 %v1166_v38, %v1084_v39  ;;  %v1148_v44 = vld [vmem:[%s1822_s1 + $0x44] sm:$0xf]  ;;  %v1003_v45 = vor.u32 %v1147_v41, %v1002_v40  ;;  %v1012_v46 = vld [vmem:[%s1822_s1 + $0x48] sm:$0xf0]  ;;  %v994_v49 = vld [vmem:[%s1822_s1 + $0x20] sm:$0xf] }
   0xc   :  { %325 = vmatpush.bf16.msra.mxu0 %v1019_v21  ;;  %1178 = vmatpush.bf16.msra.mxu1 %v1019_v21  ;;  %v1164_v47 = vld [vmem:[%s1822_s1 + $0xc4] sm:$0xf]  ;;  %v1076_v48 = vld [vmem:[%s1822_s1 + $0xc8] sm:$0xf0]  ;;  %v1145_v50 = vld [vmem:[%s1822_s1 + $0x24] sm:$0xf0]  ;;  %v1015_v51 = vor.u32 %v1148_v44, %v1012_v46 }
   0xd   :  { %410 = vmatpush.bf16.msrb.mxu3 %v1039_v24  ;;  %439 = vmatpush.bf16.msrb.mxu2 %v1103_v28  ;;  %v1079_v52 = vor.u32 %v1164_v47, %v1076_v48  ;;  %v1146_v53 = vld [vmem:[%s1822_s1 + $0x34] sm:$0xf]  ;;  %v995_v54 = vor.u32 %v1145_v50, %v994_v49  ;;  %v1004_v55 = vld [vmem:[%s1822_s1 + $0x38] sm:$0xf0]  ;;  %v986_v58 = vld [vmem:[%s1822_s1 + $0x10] sm:$0xf] }
   0xe   :  { %1120 = vmatmul.msk.bf16.vlgmr.msra.gmra.mxu2 %vm310_vm0, %v1296_v26  ;;  %1122 = vmatmul.msk.bf16.vlgmr.msra.gmra.mxu3 %vm310_vm0, %v1298_v27  ;;  %v1162_v56 = vld [vmem:[%s1822_s1 + $0xb4] sm:$0xf]  ;;  %v1068_v57 = vld [vmem:[%s1822_s1 + $0xb8] sm:$0xf0]  ;;  %v1143_v59 = vld [vmem:[%s1822_s1 + $0x14] sm:$0xf0]  ;;  %v1007_v0 = vor.u32 %v1146_v53, %v1004_v55 }
   0xf   :  { %v950_v60 = vld [vmem:[%s1823_s0 + $0x20] sm:$0xf]  ;;  %v1133_v61 = vld [vmem:[%s1823_s0 + $0x28] sm:$0xf0]  ;;  %v974_v62 = vld [vmem:[%s1823_s0 + $0x50] sm:$0xf]  ;;  %v1071_v1 = vor.u32 %v1162_v56, %v1068_v57  ;;  %v987_v3 = vor.u32 %v1143_v59, %v986_v58 }
  0x10   :  { %326 = vmatpush.bf16.msra.mxu0 %v1011_v36  ;;  %1179 = vmatpush.bf16.msra.mxu1 %v1011_v36  ;;  %v1139_v63 = vld [vmem:[%s1823_s0 + $0x58] sm:$0xf0]  ;;  %v1144_v2 = vld [vmem:[%s1822_s1 + $0x24] sm:$0xf]  ;;  %v996_v4 = vld [vmem:[%s1822_s1 + $0x28] sm:$0xf0]  ;;  %v1403_v10 = vor.u32 %v1133_v61, %v950_v60 }
  0x11   :  { %411 = vmatpush.bf16.msrb.mxu3 %v1031_v33  ;;  %440 = vmatpush.bf16.msrb.mxu2 %v1095_v34  ;;  %v1160_v5 = vld [vmem:[%s1822_s1 + $0xa4] sm:$0xf]  ;;  %v1060_v6 = vld [vmem:[%s1822_s1 + $0xa8] sm:$0xf0]  ;;  %v978_v7 = vld [vmem:[%s1822_s1] sm:$0xf]  ;;  %v1405_v11 = vor.u32 %v1139_v63, %v974_v62  ;;  %v999_v18 = vor.u32 %v1144_v2, %v996_v4 }
  0x12   :  { %v1141_v8 = vld [vmem:[%s1822_s1 + $0x4] sm:$0xf0]  ;;  %v1098_v9 = vld [vmem:[%s1822_s1 + $0xf0] sm:$0xf]  ;;  %v1171_v12 = vld [vmem:[%s1822_s1 + $0xf4] sm:$0xf0]  ;;  %v1063_v19 = vor.u32 %v1160_v5, %v1060_v6 }
  0x13   :  { %v1174_v13 = vld [vmem:[%s1822_s1 + $0x114] sm:$0xf]  ;;  %v1116_v14 = vld [vmem:[%s1822_s1 + $0x118] sm:$0xf0]  ;;  %v930_v15 = vld [vmem:[%s1823_s0] sm:$0xf]  ;;  %v979_v20 = vor.u32 %v1141_v8, %v978_v7  ;;  %v1099_v24 = vor.u32 %v1171_v12, %v1098_v9 }
  0x14   :  { %327 = vmatpush.bf16.msra.mxu0 %v1003_v45  ;;  %1180 = vmatpush.bf16.msra.mxu1 %v1003_v45  ;;  %v1129_v16 = vld [vmem:[%s1823_s0 + $0x8] sm:$0xf0]  ;;  %v954_v17 = vld [vmem:[%s1823_s0 + $0x30] sm:$0xf]  ;;  %v1135_v21 = vld [vmem:[%s1823_s0 + $0x38] sm:$0xf0]  ;;  %v1119_v25 = vor.u32 %v1174_v13, %v1116_v14 }
  0x15   :  { %412 = vmatpush.bf16.msrb.mxu3 %v1023_v42  ;;  %441 = vmatpush.bf16.msrb.mxu2 %v1087_v43  ;;  %v1090_v22 = vld [vmem:[%s1822_s1 + $0xe0] sm:$0xf]  ;;  %v1142_v23 = vld [vmem:[%s1822_s1 + $0x14] sm:$0xf]  ;;  %v988_v28 = vld [vmem:[%s1822_s1 + $0x18] sm:$0xf0]  ;;  %v931_v34 = vor.u32 %v1129_v16, %v930_v15  ;;  %v1456_v35 = vor.u32 %v1135_v21, %v954_v17 }
  0x16   :  { %v1158_v29 = vld [vmem:[%s1822_s1 + $0x94] sm:$0xf]  ;;  %v1052_v30 = vld [vmem:[%s1822_s1 + $0x98] sm:$0xf0]  ;;  %v1169_v31 = vld [vmem:[%s1822_s1 + $0xe4] sm:$0xf0]  ;;  %v991_v36 = vor.u32 %v1142_v23, %v988_v28 }
  0x17   :  { %v1172_v32 = vld [vmem:[%s1822_s1 + $0x104] sm:$0xf]  ;;  %v1108_v33 = vld [vmem:[%s1822_s1 + $0x108] sm:$0xf0]  ;;  %v1055_v37 = vor.u32 %v1158_v29, %v1052_v30  ;;  %v1091_v39 = vor.u32 %v1169_v31, %v1090_v22  ;;  %v1082_v44 = vld [vmem:[%s1822_s1 + $0xd0] sm:$0xf] }
  0x18   :  { %328 = vmatpush.bf16.msra.mxu0 %v995_v54  ;;  %1181 = vmatpush.bf16.msra.mxu1 %v995_v54  ;;  %v1140_v38 = vld [vmem:[%s1822_s1 + $0x4] sm:$0xf]  ;;  %v980_v40 = vld [vmem:[%s1822_s1 + $0x8] sm:$0xf0]  ;;  %v1111_v43 = vor.u32 %v1172_v32, %v1108_v33  ;;  %v1167_v45 = vld [vmem:[%s1822_s1 + $0xd4] sm:$0xf0] }
  0x19   :  { %413 = vmatpush.bf16.msrb.mxu3 %v1015_v51  ;;  %442 = vmatpush.bf16.msrb.mxu2 %v1079_v52  ;;  %v1156_v41 = vld [vmem:[%s1822_s1 + $0x84] sm:$0xf]  ;;  %v1044_v42 = vld [vmem:[%s1822_s1 + $0x88] sm:$0xf0]  ;;  %v983_v46 = vor.u32 %v1140_v38, %v980_v40  ;;  %v1083_v48 = vor.u32 %v1167_v45, %v1082_v44  ;;  %v1074_v49 = vld [vmem:[%s1822_s1 + $0xc0] sm:$0xf] }
  0x1a   :  { %v1047_v47 = vor.u32 %v1156_v41, %v1044_v42  ;;  %v1165_v50 = vld [vmem:[%s1822_s1 + $0xc4] sm:$0xf0]  ;;  %v1128_v51 = vld [vmem:[%s1823_s0 + $0x4] sm:$0xf]  ;;  %v932_v52 = vld [vmem:[%s1823_s0 + $0xc] sm:$0xf0] }
  0x1b   :  { %v1075_v53 = vor.u32 %v1165_v50, %v1074_v49  ;;  %v1066_v54 = vld [vmem:[%s1822_s1 + $0xb0] sm:$0xf]  ;;  %v1163_v55 = vld [vmem:[%s1822_s1 + $0xb4] sm:$0xf0]  ;;  %v935_v56 = vor.u32 %v1128_v51, %v932_v52  ;;  %v1132_v58 = vld [vmem:[%s1823_s0 + $0x20] sm:$0xf0] }
  0x1c   :  { %329 = vmatpush.bf16.msra.mxu0 %v987_v3  ;;  %1182 = vmatpush.bf16.msra.mxu1 %v987_v3  ;;  %v942_v57 = vld [vmem:[%s1823_s0 + $0x18] sm:$0xf]  ;;  %v966_v59 = vld [vmem:[%s1823_s0 + $0x48] sm:$0xf]  ;;  %v1138_v60 = vld [vmem:[%s1823_s0 + $0x50] sm:$0xf0]  ;;  %v1067_v61 = vor.u32 %v1163_v55, %v1066_v54 }
  0x1d   :  { %414 = vmatpush.bf16.msrb.mxu3 %v1007_v0  ;;  %443 = vmatpush.bf16.msrb.mxu2 %v1071_v1  ;;  %v1058_v62 = vld [vmem:[%s1822_s1 + $0xa0] sm:$0xf]  ;;  %v1161_v63 = vld [vmem:[%s1822_s1 + $0xa4] sm:$0xf0]  ;;  %v943_v0 = vor.u32 %v1132_v58, %v942_v57  ;;  %v967_v1 = vor.u32 %v1138_v60, %v966_v59  ;;  %v1050_v3 = vld [vmem:[%s1822_s1 + $0x90] sm:$0xf] }
  0x1e   :  { %1121 = vmatmul.msk.bf16.gmra.mxu2 %vm310_vm0, %v1403_v10  ;;  %1123 = vmatmul.msk.bf16.gmra.mxu3 %vm310_vm0, %v1405_v11  ;;  %v1059_v2 = vor.u32 %v1161_v63, %v1058_v62  ;;  %v1159_v4 = vld [vmem:[%s1822_s1 + $0x94] sm:$0xf0]  ;;  %v1042_v6 = vld [vmem:[%s1822_s1 + $0x80] sm:$0xf]  ;;  %v1157_v7 = vld [vmem:[%s1822_s1 + $0x84] sm:$0xf0] }
  0x1f   :  { %v1051_v5 = vor.u32 %v1159_v4, %v1050_v3  ;;  %v1131_v8 = vld [vmem:[%s1823_s0 + $0x1c] sm:$0xf]  ;;  %v944_v9 = vld [vmem:[%s1823_s0 + $0x24] sm:$0xf0]  ;;  %v1043_v12 = vor.u32 %v1157_v7, %v1042_v6  ;;  %v1134_v14 = vld [vmem:[%s1823_s0 + $0x34] sm:$0xf] }
  0x20   :  { %330 = vmatpush.bf16.msra.mxu0 %v979_v20  ;;  %1183 = vmatpush.bf16.msra.mxu1 %v979_v20  ;;  %v947_v13 = vor.u32 %v1131_v8, %v944_v9  ;;  %v956_v15 = vld [vmem:[%s1823_s0 + $0x3c] sm:$0xf0]  ;;  %v968_v17 = vld [vmem:[%s1823_s0 + $0x54] sm:$0xf0] }
  0x21   :  { %415 = vmatpush.bf16.msrb.mxu3 %v999_v18  ;;  %444 = vmatpush.bf16.msrb.mxu2 %v1063_v19  ;;  %v959_v16 = vor.u32 %v1134_v14, %v956_v15 }
  0x23   :  { %331 = vmatmul.bf16.vlgmr.msra.gmra.mxu0 %v931_v34  ;;  %341 = vmatmul.bf16.vlgmr.msra.gmra.mxu1 %v1456_v35 }
  0x24   :  { %352 = vmatpush.bf16.msrb.mxu1 %v1099_v24  ;;  %474 = vmatpush.bf16.msrb.mxu0 %v1119_v25 }
  0x25   :  { %416 = vmatpush.bf16.msrb.mxu3 %v991_v36  ;;  %445 = vmatpush.bf16.msrb.mxu2 %v1055_v37 }
  0x28   :  { %353 = vmatpush.bf16.msrb.mxu1 %v1091_v39  ;;  %475 = vmatpush.bf16.msrb.mxu0 %v1111_v43 }
  0x29   :  { %417 = vmatpush.bf16.msrb.mxu3 %v983_v46  ;;  %446 = vmatpush.bf16.msrb.mxu2 %v1047_v47 }
  0x2c   :  { %354 = vmatpush.bf16.msrb.mxu1 %v1083_v48 }
  0x2e   :  { %418 = vmatmul.bf16.vlgmr.msrb.gmra.mxu3 %v931_v34  ;;  %447 = vmatmul.bf16.vlgmr.msrb.gmra.mxu2 %v935_v56 }
  0x30   :  { %355 = vmatpush.bf16.msrb.mxu1 %v1075_v53 }
  0x33   :  { %336 = vmatmul.bf16.gmra.mxu0 %v943_v0  ;;  %346 = vmatmul.bf16.gmra.mxu1 %v967_v1 }
  0x34   :  { %356 = vmatpush.bf16.msrb.mxu1 %v1067_v61 }
  0x38   :  { %357 = vmatpush.bf16.msrb.mxu1 %v1059_v2 }
  0x3c   :  { %358 = vmatpush.bf16.msrb.mxu1 %v1051_v5 }
  0x3e   :  { %423 = vmatmul.bf16.gmra.mxu3 %v943_v0  ;;  %452 = vmatmul.bf16.gmra.mxu2 %v947_v13 }
  0x40   :  { %359 = vmatpush.bf16.msrb.mxu1 %v1043_v12 }
  0x43   :  { %360 = vmatmul.bf16.vlgmr.msrb.gmra.mxu1 %v935_v56  ;;  %1124 = vmatmul.msk.bf16.vlgmr.msrb.gmra.mxu0 %vm310_vm0, %v1296_v26  ;;  %v1137_v26 = vld [vmem:[%s1823_s0 + $0x4c] sm:$0xf] }
  0x44   :  { %v971_v18 = vor.u32 %v1137_v26, %v968_v17 }
  0x4e   :  { %428 = vmatmul.bf16.gmra.mxu3 %v1456_v35  ;;  %457 = vmatmul.bf16.gmra.mxu2 %v959_v16 }
  0x53   :  { %365 = vmatmul.bf16.gmra.mxu1 %v947_v13  ;;  %1125 = vmatmul.msk.bf16.gmra.mxu0 %vm310_vm0, %v1403_v10 }
  0x5e   :  { %433 = vmatmul.bf16.gmra.mxu3 %v967_v1  ;;  %462 = vmatmul.bf16.gmra.mxu2 %v971_v18 }
  0x63   :  { %370 = vmatmul.bf16.gmra.mxu1 %v959_v16  ;;  %1126 = vmatmul.msk.bf16.gmra.mxu0 %vm310_vm0, %v1298_v27 }
  0x73   :  { %375 = vmatmul.bf16.gmra.mxu1 %v971_v18  ;;  %1127 = vmatmul.msk.bf16.gmra.mxu0 %vm310_vm0, %v1405_v11 }
  0x91   :  { %v390_v10 = vpop.f32.mrf.mxu2  ;;  %v1552_v19 = vpop.f32.mrf.mxu3 }
  0x99   :  { %v392_v20 = vpop.f32.mrf.mxu2  ;;  %v1554_v21 = vpop.f32.mrf.mxu3 }
  0xa0   :  { %v332_v22 = vpop.f32.mrf.mxu0  ;;  %v1556_v23 = vpop.f32.mrf.mxu1 }
  0xa1   :  { %v395_v24 = vpop.f32.mrf.mxu2  ;;  %v1558_v25 = vpop.f32.mrf.mxu3 }
  0xa8   :  { %v334_v28 = vpop.f32.mrf.mxu0  ;;  %v1560_v29 = vpop.f32.mrf.mxu1 }
  0xa9   :  { %v397_v27 = vpop.f32.mrf.mxu2  ;;  %v1562_v30 = vpop.f32.mrf.mxu3 }
  0xb0   :  { %v337_v31 = vpop.f32.mrf.mxu0  ;;  %v1564_v11 = vpop.f32.mrf.mxu1 }
  0xb1   :  { %v419_v32 = vpop.f32.mrf.mxu3  ;;  %v448_v33 = vpop.f32.mrf.mxu2 }
  0xb2   :  { %v449_v38 = vadd.f32 %v448_v33, %v419_v32 }
  0xb8   :  { %v339_v34 = vpop.f32.mrf.mxu0  ;;  %v1566_v35 = vpop.f32.mrf.mxu1 }
  0xb9   :  { %v421_v36 = vpop.f32.mrf.mxu3  ;;  %v450_v37 = vpop.f32.mrf.mxu2 }
  0xba   :  { %v451_v48 = vadd.f32 %v450_v37, %v421_v36 }
  0xc0   :  { %v361_v39 = vpop.f32.mrf.mxu1  ;;  %v477_v40 = vpop.f32.mrf.mxu0 }
  0xc1   :  { %v362_v41 = vadd.f32 %v361_v39, %v332_v22  ;;  %v1568_v42 = vadd.f32 %v477_v40, %v449_v38  ;;  %v424_v43 = vpop.f32.mrf.mxu3  ;;  %v453_v44 = vpop.f32.mrf.mxu2 }
  0xc2   :  { %v454_v57 = vadd.f32 %v453_v44, %v424_v43 }
  0xc3   :  { %v1570_v45 = vadd.f32 %v390_v10, %v362_v41  ;;  %v498_v46 = vsel %vm497_vm1, %v1568_v42, 0.0 }
  0xc5   :  { %v499_v47 = vadd.f32 %v498_v46, %v1570_v45 }
  0xc7   :  { %500 = vadd.xlane.f32.xlu0 %v499_v47 }
  0xc8   :  { %v363_v49 = vpop.f32.mrf.mxu1  ;;  %v479_v50 = vpop.f32.mrf.mxu0 }
  0xc9   :  { %v364_v51 = vadd.f32 %v363_v49, %v334_v28  ;;  %v1575_v52 = vadd.f32 %v479_v50, %v451_v48  ;;  %v426_v54 = vpop.f32.mrf.mxu3  ;;  %v455_v55 = vpop.f32.mrf.mxu2 }
  0xca   :  { %v456_v4 = vadd.f32 %v455_v55, %v426_v54 }
  0xcb   :  { %v1577_v53 = vadd.f32 %v392_v20, %v364_v51  ;;  %v502_v56 = vsel %vm497_vm1, %v1575_v52, 0.0 }
  0xcd   :  { %v503_v58 = vadd.f32 %v502_v56, %v1577_v53  ;;  %v1209_v56 = vmov 162.0  }
  0xce   :  { %1191 = vrcp.f32 %v1209_v56 }
  0xcf   :  { %504 = vadd.xlane.f32.xlu0 %v503_v58 }
  0xd0   :  { %v366_v59 = vpop.f32.mrf.mxu1  ;;  %v482_v60 = vpop.f32.mrf.mxu0 }
  0xd1   :  { %v367_v61 = vadd.f32 %v366_v59, %v337_v31  ;;  %v1582_v62 = vadd.f32 %v482_v60, %v454_v57  ;;  %v429_v1 = vpop.f32.mrf.mxu3  ;;  %v458_v2 = vpop.f32.mrf.mxu2 }
  0xd2   :  { %v459_v13 = vadd.f32 %v458_v2, %v429_v1 }
  0xd3   :  { %v1584_v63 = vadd.f32 %v395_v24, %v367_v61  ;;  %v506_v0 = vsel %vm497_vm1, %v1582_v62, 0.0 }
  0xd4   :  { %v1192_v57 = vpop.eup %1191 }
  0xd5   :  { %v507_v3 = vadd.f32 %v506_v0, %v1584_v63  ;;  %v531_v58 = vmul.f32 162.0, %v1192_v57  ;;  %vm535_vm2 = vweird.f32 %v1192_v57 }
  0xd7   :  { %508 = vadd.xlane.f32.xlu1 %v507_v3  ;;  %v532_v59 = vsub.f32 1.0, %v531_v58 }
  0xd8   :  { %v368_v5 = vpop.f32.mrf.mxu1  ;;  %v484_v6 = vpop.f32.mrf.mxu0 }
  0xd9   :  { %v369_v7 = vadd.f32 %v368_v5, %v339_v34  ;;  %v1589_v8 = vadd.f32 %v484_v6, %v456_v4  ;;  %v431_v15 = vpop.f32.mrf.mxu3  ;;  %v460_v16 = vpop.f32.mrf.mxu2  ;;  %v533_v60 = vmul.f32 %v1192_v57, %v532_v59 }
  0xda   :  { %v461_v28 = vadd.f32 %v460_v16, %v431_v15 }
  0xdb   :  { %v1591_v9 = vadd.f32 %v397_v27, %v369_v7  ;;  %v510_v12 = vsel %vm497_vm1, %v1589_v8, 0.0  ;;  %v534_v61 = vadd.f32 %v1192_v57, %v533_v60 }
  0xdd   :  { %v511_v14 = vadd.f32 %v510_v12, %v1591_v9 }
  0xdf   :  { %512 = vadd.xlane.f32.xlu1 %v511_v14 }
  0xe0   :  { %v371_v26 = vpop.f32.mrf.mxu1  ;;  %v487_v17 = vpop.f32.mrf.mxu0 }
  0xe1   :  { %v372_v18 = vadd.f32 %v371_v26, %v1556_v23  ;;  %v1597_v10 = vadd.f32 %v487_v17, %v459_v13  ;;  %v434_v34 = vpop.f32.mrf.mxu3  ;;  %v463_v23 = vpop.f32.mrf.mxu2 }
  0xe2   :  { %v464_v37 = vadd.f32 %v463_v23, %v434_v34 }
  0xe3   :  { %v1600_v20 = vadd.f32 %v1552_v19, %v372_v18  ;;  %v514_v22 = vsel %vm497_vm1, %v1597_v10, 0.0 }
  0xe5   :  { %v515_v24 = vadd.f32 %v514_v22, %v1600_v20 }
  0xe7   :  { %516 = vadd.xlane.f32.xlu2 %v515_v24 }
  0xe8   :  { %v373_v27 = vpop.f32.mrf.mxu1  ;;  %v489_v31 = vpop.f32.mrf.mxu0 }
  0xe9   :  { %v374_v32 = vadd.f32 %v373_v27, %v1560_v29  ;;  %v1606_v33 = vadd.f32 %v489_v31, %v461_v28  ;;  %v436_v44 = vpop.f32.mrf.mxu3  ;;  %v465_v46 = vpop.f32.mrf.mxu2 }
  0xea   :  { %v466_v48 = vadd.f32 %v465_v46, %v436_v44 }
  0xeb   :  { %v1609_v36 = vadd.f32 %v1554_v21, %v374_v32  ;;  %v518_v19 = vsel %vm497_vm1, %v1606_v33, 0.0 }
  0xed   :  { %v519_v38 = vadd.f32 %v518_v19, %v1609_v36 }
  0xef   :  { %520 = vadd.xlane.f32.xlu2 %v519_v38 }
  0xf0   :  { %v376_v39 = vpop.f32.mrf.mxu1  ;;  %v492_v40 = vpop.f32.mrf.mxu0 }
  0xf1   :  { %v377_v41 = vadd.f32 %v376_v39, %v1564_v11  ;;  %v1615_v43 = vadd.f32 %v492_v40, %v464_v37 }
  0xf3   :  { %v1618_v29 = vadd.f32 %v1558_v25, %v377_v41  ;;  %v522_v21 = vsel %vm497_vm1, %v1615_v43, 0.0 }
  0xf5   :  { %v523_v47 = vadd.f32 %v522_v21, %v1618_v29 }
  0xf7   :  { %524 = vadd.xlane.f32.xlu0 %v523_v47 }
  0xf8   :  { %v378_v49 = vpop.f32.mrf.mxu1  ;;  %v494_v50 = vpop.f32.mrf.mxu0 }
  0xf9   :  { %v379_v51 = vadd.f32 %v378_v49, %v1566_v35  ;;  %v1624_v54 = vadd.f32 %v494_v50, %v466_v48  ;;  %v1632_v35 = vsel %vm535_vm2, %v1192_v57, %v534_v61 }
  0xfb   :  { %v1627_v11 = vadd.f32 %v1562_v30, %v379_v51  ;;  %v526_v25 = vsel %vm497_vm1, %v1624_v54, 0.0 }
  0xfd   :  { %v527_v55 = vadd.f32 %v526_v25, %v1627_v11 }
  0xff   :  { %528 = vadd.xlane.f32.xlu1 %v527_v55 }
 0x13a   :  { %v501_v0 = vpop.xlane.xlu0 %500 }
 0x13b   :  { %v1635_v30 = vmul.f32 %v1632_v35, %v501_v0 }
 0x13d   :  { %v545_v1 = vsub.f32 %v1570_v45, %v1635_v30  ;;  %v546_v2 = vsub.f32 %v1568_v42, %v1635_v30 }
 0x13f   :  { %v561_v3 = vmul.f32 %v545_v1, %v545_v1  ;;  %v562_v4 = vmul.f32 %v546_v2, %v546_v2 }
 0x141   :  { %v577_v5 = vsel %vm497_vm1, %v562_v4, 0.0 }
 0x142   :  { %v505_v6 = vpop.xlane.xlu0 %504  ;;  %v578_v7 = vadd.f32 %v577_v5, %v561_v3 }
 0x143   :  { %v1643_v12 = vmul.f32 %v1632_v35, %v505_v6 }
 0x144   :  { %579 = vadd.xlane.f32.xlu2 %v578_v7 }
 0x145   :  { %v547_v13 = vsub.f32 %v1577_v53, %v1643_v12  ;;  %v548_v14 = vsub.f32 %v1575_v52, %v1643_v12 }
 0x147   :  { %v563_v15 = vmul.f32 %v547_v13, %v547_v13  ;;  %v564_v16 = vmul.f32 %v548_v14, %v548_v14 }
 0x149   :  { %v581_v26 = vsel %vm497_vm1, %v564_v16, 0.0 }
 0x14a   :  { %v509_v17 = vpop.xlane.xlu1 %508  ;;  %v582_v18 = vadd.f32 %v581_v26, %v563_v15 }
 0x14b   :  { %v1651_v22 = vmul.f32 %v1632_v35, %v509_v17 }
 0x14c   :  { %583 = vadd.xlane.f32.xlu0 %v582_v18 }
 0x14d   :  { %v549_v24 = vsub.f32 %v1584_v63, %v1651_v22  ;;  %v550_v28 = vsub.f32 %v1582_v62, %v1651_v22 }
 0x14f   :  { %v565_v27 = vmul.f32 %v549_v24, %v549_v24  ;;  %v566_v31 = vmul.f32 %v550_v28, %v550_v28 }
 0x151   :  { %v585_v32 = vsel %vm497_vm1, %v566_v31, 0.0 }
 0x152   :  { %v513_v34 = vpop.xlane.xlu1 %512  ;;  %v586_v23 = vadd.f32 %v585_v32, %v565_v27  ;;  %v1210_v27 = vmov 0  }
 0x153   :  { %v1659_v19 = vmul.f32 %v1632_v35, %v513_v34  ;;  %1188 = vset.pattern.permute.xlu1 %v1210_v27  ;;  %1189 = vset.pattern.permute.xlu2 %v1210_v27 }
 0x154   :  { %587 = vadd.xlane.f32.xlu1 %v586_v23  ;;  %1190 = vset.pattern.permute.xlu0 %v1210_v27 }
 0x155   :  { %v551_v37 = vsub.f32 %v1591_v9, %v1659_v19  ;;  %v552_v38 = vsub.f32 %v1589_v8, %v1659_v19 }
 0x157   :  { %v567_v39 = vmul.f32 %v551_v37, %v551_v37  ;;  %v568_v40 = vmul.f32 %v552_v38, %v552_v38 }
 0x159   :  { %v589_v41 = vsel %vm497_vm1, %v568_v40, 0.0 }
 0x15a   :  { %v517_v21 = vpop.xlane.xlu2 %516  ;;  %v590_v44 = vadd.f32 %v589_v41, %v567_v39 }
 0x15b   :  { %v1667_v46 = vmul.f32 %v1632_v35, %v517_v21 }
 0x15c   :  { %591 = vadd.xlane.f32.xlu2 %v590_v44 }
 0x15d   :  { %v553_v47 = vsub.f32 %v1600_v20, %v1667_v46  ;;  %v554_v48 = vsub.f32 %v1597_v10, %v1667_v46 }
 0x15f   :  { %v569_v49 = vmul.f32 %v553_v47, %v553_v47  ;;  %v570_v50 = vmul.f32 %v554_v48, %v554_v48 }
 0x161   :  { %v593_v51 = vsel %vm497_vm1, %v570_v50, 0.0 }
 0x162   :  { %v521_v25 = vpop.xlane.xlu2 %520  ;;  %v594_v55 = vadd.f32 %v593_v51, %v569_v49 }
 0x163   :  { %v1675_v56 = vmul.f32 %v1632_v35, %v521_v25  ;;  %v617_v25 = vld [vmem:[%s1824_s2] sm:$0xff] }
 0x164   :  { %595 = vadd.xlane.f32.xlu0 %v594_v55 }
 0x165   :  { %v555_v57 = vsub.f32 %v1609_v36, %v1675_v56  ;;  %v556_v58 = vsub.f32 %v1606_v33, %v1675_v56 }
 0x167   :  { %v571_v59 = vmul.f32 %v555_v57, %v555_v57  ;;  %v572_v60 = vmul.f32 %v556_v58, %v556_v58 }
 0x169   :  { %v597_v61 = vsel %vm497_vm1, %v572_v60, 0.0 }
 0x16a   :  { %v525_v0 = vpop.xlane.xlu0 %524  ;;  %v598_v1 = vadd.f32 %v597_v61, %v571_v59 }
 0x16b   :  { %v1683_v2 = vmul.f32 %v1632_v35, %v525_v0 }
 0x16c   :  { %599 = vadd.xlane.f32.xlu1 %v598_v1 }
 0x16d   :  { %v557_v3 = vsub.f32 %v1618_v29, %v1683_v2  ;;  %v558_v4 = vsub.f32 %v1615_v43, %v1683_v2 }
 0x16f   :  { %v573_v5 = vmul.f32 %v557_v3, %v557_v3  ;;  %v574_v6 = vmul.f32 %v558_v4, %v558_v4 }
 0x171   :  { %v601_v7 = vsel %vm497_vm1, %v574_v6, 0.0 }
 0x172   :  { %v529_v13 = vpop.xlane.xlu1 %528  ;;  %v602_v14 = vadd.f32 %v601_v7, %v573_v5  ;;  %v721_v7 = vld [vmem:[%s1825_s3] sm:$0xff] }
 0x173   :  { %v1691_v15 = vmul.f32 %v1632_v35, %v529_v13  ;;  %v618_v13 = vld [vmem:[%s1824_s2 + $0x8] sm:$0xff] }
 0x174   :  { %603 = vadd.xlane.f32.xlu2 %v602_v14 }
 0x175   :  { %v559_v16 = vsub.f32 %v1627_v11, %v1691_v15  ;;  %v560_v26 = vsub.f32 %v1624_v54, %v1691_v15 }
 0x177   :  { %v575_v17 = vmul.f32 %v559_v16, %v559_v16  ;;  %v576_v18 = vmul.f32 %v560_v26, %v560_v26 }
 0x179   :  { %v605_v24 = vsel %vm497_vm1, %v576_v18, 0.0 }
 0x17a   :  { %v606_v28 = vadd.f32 %v605_v24, %v575_v17 }
 0x17c   :  { %607 = vadd.xlane.f32.xlu0 %v606_v28 }
 0x1b7   :  { %v580_v31 = vpop.xlane.xlu2 %579 }
 0x1b8   :  { %v609_v32 = vmul.f32 %v580_v31, %v1632_v35 }
 0x1ba   :  { %v625_v34 = vadd.f32 1e-05, %v609_v32 }
 0x1bc   :  { %1193 = vrsqrt.f32 %v625_v34  ;;  %vm639_vm4 = vweird.f32 %v625_v34 }
 0x1bf   :  { %v584_v23 = vpop.xlane.xlu0 %583 }
 0x1c0   :  { %v610_v37 = vmul.f32 %v584_v23, %v1632_v35 }
 0x1c2   :  { %v1194_v38 = vpop.eup %1193  ;;  %v626_v39 = vadd.f32 1e-05, %v610_v37 }
 0x1c3   :  { %v634_v40 = vmul.f32 %v1194_v38, %v625_v34  ;;  %vm640_vm3 = vweird.f32 %v1194_v38 }
 0x1c4   :  { %1195 = vrsqrt.f32 %v626_v39  ;;  %vm641_vm5 = vmor %vm639_vm4, %vm640_vm3  ;;  %vm649_vm7 = vweird.f32 %v626_v39 }
 0x1c5   :  { %v635_v41 = vmul.f32 %v1194_v38, %v634_v40  ;;  %v619_v40 = vld [vmem:[%s1824_s2 + $0x10] sm:$0xff] }
 0x1c7   :  { %v636_v21 = vmul.f32 0.5, %v635_v41  ;;  %v588_v44 = vpop.xlane.xlu1 %587 }
 0x1c8   :  { %v611_v47 = vmul.f32 %v588_v44, %v1632_v35 }
 0x1c9   :  { %v637_v48 = vsub.f32 1.5, %v636_v21 }
 0x1ca   :  { %v1196_v49 = vpop.eup %1195  ;;  %v627_v50 = vadd.f32 1e-05, %v611_v47 }
 0x1cb   :  { %v644_v51 = vmul.f32 %v1196_v49, %v626_v39  ;;  %v638_v55 = vmul.f32 %v1194_v38, %v637_v48  ;;  %vm650_vm6 = vweird.f32 %v1196_v49  ;;  %v723_v48 = vld [vmem:[%s1825_s3 + $0x10] sm:$0xff] }
 0x1cc   :  { %1197 = vrsqrt.f32 %v627_v50  ;;  %vm651_vm8 = vmor %vm649_vm7, %vm650_vm6  ;;  %vm659_vm10 = vweird.f32 %v627_v50 }
 0x1cd   :  { %v645_v57 = vmul.f32 %v1196_v49, %v644_v51  ;;  %v642_v58 = vsel %vm641_vm5, %v1194_v38, %v638_v55 }
 0x1ce   :  { %v713_v59 = vmul.f32 %v642_v58, %v617_v25 }
 0x1cf   :  { %v646_v60 = vmul.f32 0.5, %v645_v57  ;;  %v592_v61 = vpop.xlane.xlu2 %591 }
 0x1d0   :  { %v612_v0 = vmul.f32 %v592_v61, %v1632_v35  ;;  %747 = vperm.xlu1 %1188, %v713_v59   ;;  %v729_v5 = vmul.f32 %v713_v59, %v1635_v30  ;;  %v722_v30 = vld [vmem:[%s1825_s3 + $0x8] sm:$0xff] }
 0x1d1   :  { %v647_v1 = vsub.f32 1.5, %v646_v60  ;;  %v620_v60 = vld [vmem:[%s1824_s2 + $0x18] sm:$0xff] }
 0x1d2   :  { %v1198_v3 = vpop.eup %1197  ;;  %v628_v4 = vadd.f32 1e-05, %v612_v0  ;;  %v737_v17 = vsub.f32 %v721_v7, %v729_v5  ;;  %v724_v5 = vld [vmem:[%s1825_s3 + $0x18] sm:$0xff] }
 0x1d3   :  { %v654_v6 = vmul.f32 %v1198_v3, %v627_v50  ;;  %v648_v14 = vmul.f32 %v1196_v49, %v647_v1  ;;  %vm660_vm9 = vweird.f32 %v1198_v3 }
 0x1d4   :  { %1199 = vrsqrt.f32 %v628_v4  ;;  %vm661_vm11 = vmor %vm659_vm10, %vm660_vm9  ;;  %vm669_vm13 = vweird.f32 %v628_v4 }
 0x1d5   :  { %v655_v16 = vmul.f32 %v1198_v3, %v654_v6  ;;  %v652_v26 = vsel %vm651_vm8, %v1196_v49, %v648_v14 }
 0x1d6   :  { %v714_v18 = vmul.f32 %v652_v26, %v618_v13 }
 0x1d7   :  { %v656_v24 = vmul.f32 0.5, %v655_v16  ;;  %v596_v28 = vpop.xlane.xlu0 %595 }
 0x1d8   :  { %v613_v27 = vmul.f32 %v596_v28, %v1632_v35  ;;  %803 = vperm.xlu1 %1188, %v737_v17   ;;  %752 = vperm.xlu2 %1189, %v714_v18   ;;  %v730_v31 = vmul.f32 %v714_v18, %v1643_v12  ;;  %v621_v17 = vld [vmem:[%s1824_s2 + $0x20] sm:$0xff] }
 0x1d9   :  { %v657_v32 = vsub.f32 1.5, %v656_v24 }
 0x1da   :  { %v1200_v34 = vpop.eup %1199  ;;  %v629_v23 = vadd.f32 1e-05, %v613_v27  ;;  %v738_v37 = vsub.f32 %v722_v30, %v730_v31  ;;  %v725_v31 = vld [vmem:[%s1825_s3 + $0x20] sm:$0xff] }
 0x1db   :  { %v658_v38 = vmul.f32 %v1198_v3, %v657_v32  ;;  %v664_v39 = vmul.f32 %v1200_v34, %v628_v4  ;;  %vm670_vm12 = vweird.f32 %v1200_v34 }
 0x1dc   :  { %1201 = vrsqrt.f32 %v629_v23  ;;  %808 = vperm.xlu0 %1190, %v738_v37   ;;  %vm671_vm14 = vmor %vm669_vm13, %vm670_vm12  ;;  %vm679_vm0 = vweird.f32 %v629_v23  ;;  %vm914_vm12 = vcmask 277508  }
 0x1dd   :  { %v662_v41 = vsel %vm661_vm11, %v1198_v3, %v658_v38  ;;  %v665_v21 = vmul.f32 %v1200_v34, %v664_v39  ;;  %vm913_vm11 = vcmask 1043456  }
 0x1de   :  { %v715_v44 = vmul.f32 %v662_v41, %v619_v40  ;;  %v622_v41 = vld [vmem:[%s1824_s2 + $0x28] sm:$0xff] }
 0x1df   :  { %v666_v47 = vmul.f32 0.5, %v665_v21  ;;  %v600_v12 = vpop.xlane.xlu1 %599 }
 0x1e0   :  { %v614_v49 = vmul.f32 %v600_v12, %v1632_v35  ;;  %v731_v50 = vmul.f32 %v715_v44, %v1651_v22 }
 0x1e1   :  { %v667_v51 = vsub.f32 1.5, %v666_v47 }
 0x1e2   :  { %v1202_v25 = vpop.eup %1201  ;;  %v630_v55 = vadd.f32 1e-05, %v614_v49  ;;  %v739_v57 = vsub.f32 %v723_v48, %v731_v50  ;;  %v623_v50 = vld [vmem:[%s1824_s2 + $0x30] sm:$0xff] }
 0x1e3   :  { %v668_v58 = vmul.f32 %v1200_v34, %v667_v51  ;;  %v674_v59 = vmul.f32 %v1202_v25, %v629_v23  ;;  %vm680_vm15 = vweird.f32 %v1202_v25 }
 0x1e4   :  { %1203 = vrsqrt.f32 %v630_v55  ;;  %813 = vperm.xlu2 %1189, %v739_v57   ;;  %757 = vperm.xlu0 %1190, %v715_v44   ;;  %vm681_vm1 = vmor %vm679_vm0, %vm680_vm15  ;;  %vm689_vm3 = vweird.f32 %v630_v55 }
 0x1e5   :  { %v672_v61 = vsel %vm671_vm14, %v1200_v34, %v668_v58  ;;  %v675_v0 = vmul.f32 %v1202_v25, %v674_v59  ;;  %vm1766_vm15 = vmor %vm914_vm12, %vm913_vm11 }
 0x1e6   :  { %v716_v1 = vmul.f32 %v672_v61, %v620_v60  ;;  %v727_v61 = vld [vmem:[%s1825_s3 + $0x30] sm:$0xff] }
 0x1e7   :  { %v676_v22 = vmul.f32 0.5, %v675_v0  ;;  %v604_v3 = vpop.xlane.xlu2 %603  ;;  %v624_v0 = vld [vmem:[%s1824_s2 + $0x38] sm:$0xff] }
 0x1e8   :  { %v615_v4 = vmul.f32 %v604_v3, %v1632_v35  ;;  %v732_v6 = vmul.f32 %v716_v1, %v1659_v19 }
 0x1e9   :  { %v677_v7 = vsub.f32 1.5, %v676_v22 }
 0x1ea   :  { %v1204_v13 = vpop.eup %1203  ;;  %v631_v14 = vadd.f32 1e-05, %v615_v4  ;;  %v740_v16 = vsub.f32 %v724_v5, %v732_v6  ;;  %v728_v4 = vld [vmem:[%s1825_s3 + $0x38] sm:$0xff] }
 0x1eb   :  { %v684_v26 = vmul.f32 %v1204_v13, %v630_v55  ;;  %v678_v18 = vmul.f32 %v1202_v25, %v677_v7  ;;  %vm690_vm2 = vweird.f32 %v1204_v13 }
 0x1ec   :  { %1205 = vrsqrt.f32 %v631_v14  ;;  %818 = vperm.xlu1 %1188, %v740_v16   ;;  %762 = vperm.xlu2 %1189, %v716_v1   ;;  %vm691_vm4 = vmor %vm689_vm3, %vm690_vm2  ;;  %vm699_vm6 = vweird.f32 %v631_v14 }
 0x1ed   :  { %v685_v24 = vmul.f32 %v1204_v13, %v684_v26  ;;  %v682_v28 = vsel %vm681_vm1, %v1202_v25, %v678_v18 }
 0x1ee   :  { %v717_v30 = vmul.f32 %v682_v28, %v621_v17 }
 0x1ef   :  { %v686_v19 = vmul.f32 0.5, %v685_v24  ;;  %v608_v27 = vpop.xlane.xlu0 %607 }
 0x1f0   :  { %v616_v32 = vmul.f32 %v608_v27, %v1632_v35  ;;  %v733_v34 = vmul.f32 %v717_v30, %v1667_v46 }
 0x1f1   :  { %v687_v23 = vsub.f32 1.5, %v686_v19 }
 0x1f2   :  { %v1206_v37 = vpop.eup %1205  ;;  %v632_v38 = vadd.f32 1e-05, %v616_v32  ;;  %v741_v39 = vsub.f32 %v725_v31, %v733_v34 }
 0x1f3   :  { %v694_v40 = vmul.f32 %v1206_v37, %v631_v14  ;;  %v688_v21 = vmul.f32 %v1204_v13, %v687_v23  ;;  %vm700_vm5 = vweird.f32 %v1206_v37 }
 0x1f4   :  { %1207 = vrsqrt.f32 %v632_v38  ;;  %767 = vperm.xlu1 %1188, %v717_v30   ;;  %823 = vperm.xlu0 %1190, %v741_v39   ;;  %vm701_vm7 = vmor %vm699_vm6, %vm700_vm5  ;;  %vm709_vm9 = vweird.f32 %v632_v38 }
 0x1f5   :  { %v695_v44 = vmul.f32 %v1206_v37, %v694_v40  ;;  %v692_v35 = vsel %vm691_vm4, %v1204_v13, %v688_v21  ;;  %v726_v13 = vld [vmem:[%s1825_s3 + $0x28] sm:$0xff] }
 0x1f6   :  { %v718_v47 = vmul.f32 %v692_v35, %v622_v41 }
 0x1f7   :  { %v696_v46 = vmul.f32 0.5, %v695_v44 }
 0x1f8   :  { %772 = vperm.xlu2 %1189, %v718_v47   ;;  %v734_v7 = vmul.f32 %v718_v47, %v1675_v56 }
 0x1f9   :  { %v697_v12 = vsub.f32 1.5, %v696_v46 }
 0x1fa   :  { %v1208_v48 = vpop.eup %1207  ;;  %v742_v14 = vsub.f32 %v726_v13, %v734_v7 }
 0x1fb   :  { %v704_v49 = vmul.f32 %v1208_v48, %v632_v38  ;;  %v698_v51 = vmul.f32 %v1206_v37, %v697_v12  ;;  %vm710_vm8 = vweird.f32 %v1208_v48 }
 0x1fc   :  { %vm711_vm10 = vmor %vm709_vm9, %vm710_vm8 }
 0x1fd   :  { %v705_v25 = vmul.f32 %v1208_v48, %v704_v49  ;;  %v702_v55 = vsel %vm701_vm7, %v1206_v37, %v698_v51 }
 0x1fe   :  { %v719_v57 = vmul.f32 %v702_v55, %v623_v50 }
 0x1ff   :  { %v706_v58 = vmul.f32 0.5, %v705_v25 }
 0x200   :  { %777 = vperm.xlu1 %1188, %v719_v57   ;;  %v735_v60 = vmul.f32 %v719_v57, %v1683_v2 }
 0x201   :  { %v707_v59 = vsub.f32 1.5, %v706_v58 }
 0x202   :  { %v743_v3 = vsub.f32 %v727_v61, %v735_v60 }
 0x203   :  { %v708_v1 = vmul.f32 %v1208_v48, %v707_v59 }
 0x205   :  { %v712_v22 = vsel %vm711_vm10, %v1208_v48, %v708_v1 }
 0x206   :  { %v720_v5 = vmul.f32 %v712_v22, %v624_v0 }
 0x208   :  { %833 = vperm.xlu1 %1188, %v743_v3   ;;  %782 = vperm.xlu2 %1189, %v720_v5   ;;  %v736_v2 = vmul.f32 %v720_v5, %v1691_v15 }
 0x20a   :  { %v744_v6 = vsub.f32 %v728_v4, %v736_v2 }
 0x20c   :  { %838 = vperm.xlu0 %1190, %v744_v6  }
 0x210   :  { %828 = vperm.xlu2 %1189, %v742_v14  }
 0x232   :  { %v753_v16 = vpop.permute.xlu2 %752 }
 0x233   :  { %v787_v19 = vmul.f32 %v753_v16, %v1577_v53  ;;  %v788_v56 = vmul.f32 %v753_v16, %v1575_v52 }
 0x23e   :  { %v814_v17 = vpop.permute.xlu2 %813 }
 0x242   :  { %v748_v26 = vpop.permute.xlu1 %747 }
 0x243   :  { %v785_v18 = vmul.f32 %v748_v26, %v1570_v45  ;;  %v786_v24 = vmul.f32 %v748_v26, %v1568_v42 }
 0x246   :  { %v763_v39 = vpop.permute.xlu2 %762 }
 0x247   :  { %v791_v51 = vmul.f32 %v763_v39, %v1591_v9  ;;  %v792_v25 = vmul.f32 %v763_v39, %v1589_v8 }
 0x24a   :  { %v804_v28 = vpop.permute.xlu1 %803 }
 0x24b   :  { %v841_v30 = vadd.f32 %v804_v28, %v785_v18  ;;  %v842_v15 = vadd.f32 %v804_v28, %v786_v24 }
 0x24d   :  { %vm857_vm13 = vcmp.ge.f32.partialorder %v841_v30, 0.0  ;;  %vm858_vm14 = vcmp.ge.f32.partialorder %v842_v15, 0.0  ;;  %v873_v27 = vmul.f32 0.01, %v841_v30  ;;  %v874_v31 = vmul.f32 0.01, %v842_v15 }
 0x24e   :  { %v809_v32 = vpop.permute.xlu0 %808 }
 0x24f   :  { %v889_v45 = vsel %vm857_vm13, %v841_v30, %v873_v27  ;;  %v890_v42 = vsel %vm858_vm14, %v842_v15, %v874_v31  ;;  %v843_v23 = vadd.f32 %v809_v32, %v787_v19  ;;  %v844_v37 = vadd.f32 %v809_v32, %v788_v56 }
 0x250   :  { %v905_v38 = vpack.c.bf16 %v890_v42, %v889_v45 }
 0x251   :  { %vm859_vm0 = vcmp.ge.f32.partialorder %v843_v23, 0.0  ;;  %vm860_vm1 = vcmp.ge.f32.partialorder %v844_v37, 0.0  ;;  %v875_v53 = vmul.f32 0.01, %v843_v23  ;;  %v876_v52 = vmul.f32 0.01, %v844_v37 }
 0x252   :  { %916 = vst.msk [vmem:[%s1826_s4] sm:$0xff] %vm1766_vm15, %v905_v38  ;;  %v773_v48 = vpop.permute.xlu2 %772 }
 0x253   :  { %v891_v40 = vsel %vm859_vm0, %v843_v23, %v875_v53  ;;  %v892_v41 = vsel %vm860_vm1, %v844_v37, %v876_v52  ;;  %v795_v7 = vmul.f32 %v773_v48, %v1609_v36  ;;  %v796_v13 = vmul.f32 %v773_v48, %v1606_v33 }
 0x254   :  { %v906_v21 = vpack.c.bf16 %v892_v41, %v891_v40 }
 0x256   :  { %917 = vst.msk [vmem:[%s1826_s4 + $0x8] sm:$0xff] %vm1766_vm15, %v906_v21  ;;  %v758_v44 = vpop.permute.xlu0 %757 }
 0x257   :  { %v789_v35 = vmul.f32 %v758_v44, %v1584_v63  ;;  %v790_v47 = vmul.f32 %v758_v44, %v1582_v62 }
 0x259   :  { %v845_v46 = vadd.f32 %v814_v17, %v789_v35  ;;  %v846_v12 = vadd.f32 %v814_v17, %v790_v47 }
 0x25b   :  { %vm861_vm2 = vcmp.ge.f32.partialorder %v845_v46, 0.0  ;;  %vm862_vm3 = vcmp.ge.f32.partialorder %v846_v12, 0.0  ;;  %v877_v49 = vmul.f32 0.01, %v845_v46  ;;  %v878_v50 = vmul.f32 0.01, %v846_v12 }
 0x25d   :  { %v893_v55 = vsel %vm861_vm2, %v845_v46, %v877_v49  ;;  %v894_v57 = vsel %vm862_vm3, %v846_v12, %v878_v50 }
 0x25e   :  { %v907_v58 = vpack.c.bf16 %v894_v57, %v893_v55  ;;  %v819_v59 = vpop.permute.xlu1 %818 }
 0x25f   :  { %v847_v60 = vadd.f32 %v819_v59, %v791_v51  ;;  %v848_v61 = vadd.f32 %v819_v59, %v792_v25 }
 0x260   :  { %918 = vst.msk [vmem:[%s1826_s4 + $0x10] sm:$0xff] %vm1766_vm15, %v907_v58 }
 0x261   :  { %vm863_vm4 = vcmp.ge.f32.partialorder %v847_v60, 0.0  ;;  %vm864_vm5 = vcmp.ge.f32.partialorder %v848_v61, 0.0  ;;  %v879_v62 = vmul.f32 0.01, %v847_v60  ;;  %v880_v63 = vmul.f32 0.01, %v848_v61 }
 0x262   :  { %v783_v0 = vpop.permute.xlu2 %782 }
 0x263   :  { %v895_v9 = vsel %vm863_vm4, %v847_v60, %v879_v62  ;;  %v896_v1 = vsel %vm864_vm5, %v848_v61, %v880_v63  ;;  %v799_v42 = vmul.f32 %v783_v0, %v1627_v11  ;;  %v800_v23 = vmul.f32 %v783_v0, %v1624_v54 }
 0x264   :  { %v908_v8 = vpack.c.bf16 %v896_v1, %v895_v9 }
 0x266   :  { %919 = vst.msk [vmem:[%s1826_s4 + $0x18] sm:$0xff] %vm1766_vm15, %v908_v8  ;;  %v768_v22 = vpop.permute.xlu1 %767  ;;  %v824_v4 = vpop.permute.xlu0 %823 }
 0x267   :  { %v793_v3 = vmul.f32 %v768_v22, %v1600_v20  ;;  %v794_v5 = vmul.f32 %v768_v22, %v1597_v10 }
 0x269   :  { %v849_v2 = vadd.f32 %v824_v4, %v793_v3  ;;  %v850_v6 = vadd.f32 %v824_v4, %v794_v5 }
 0x26a   :  { %v829_v14 = vpop.permute.xlu2 %828 }
 0x26b   :  { %vm865_vm6 = vcmp.ge.f32.partialorder %v849_v2, 0.0  ;;  %vm866_vm7 = vcmp.ge.f32.partialorder %v850_v6, 0.0  ;;  %v881_v16 = vmul.f32 0.01, %v849_v2  ;;  %v882_v26 = vmul.f32 0.01, %v850_v6 }
 0x26c   :  { %v851_v17 = vadd.f32 %v829_v14, %v795_v7  ;;  %v852_v18 = vadd.f32 %v829_v14, %v796_v13 }
 0x26d   :  { %v897_v24 = vsel %vm865_vm6, %v849_v2, %v881_v16  ;;  %v898_v28 = vsel %vm866_vm7, %v850_v6, %v882_v26 }
 0x26e   :  { %v909_v30 = vpack.c.bf16 %v898_v28, %v897_v24  ;;  %vm867_vm8 = vcmp.ge.f32.partialorder %v851_v17, 0.0  ;;  %vm868_vm9 = vcmp.ge.f32.partialorder %v852_v18, 0.0  ;;  %v883_v10 = vmul.f32 0.01, %v851_v17 }
 0x26f   :  { %v884_v20 = vmul.f32 0.01, %v852_v18 }
 0x270   :  { %920 = vst.msk [vmem:[%s1826_s4 + $0x20] sm:$0xff] %vm1766_vm15, %v909_v30  ;;  %v899_v33 = vsel %vm867_vm8, %v851_v17, %v883_v10 }
 0x271   :  { %v900_v36 = vsel %vm868_vm9, %v852_v18, %v884_v20 }
 0x272   :  { %v910_v15 = vpack.c.bf16 %v900_v36, %v899_v33  ;;  %v778_v19 = vpop.permute.xlu1 %777 }
 0x273   :  { %v797_v56 = vmul.f32 %v778_v19, %v1618_v29  ;;  %v798_v27 = vmul.f32 %v778_v19, %v1615_v43 }
 0x274   :  { %921 = vst.msk [vmem:[%s1826_s4 + $0x28] sm:$0xff] %vm1766_vm15, %v910_v15 }
 0x27a   :  { %v834_v31 = vpop.permute.xlu1 %833 }
 0x27b   :  { %v853_v32 = vadd.f32 %v834_v31, %v797_v56  ;;  %v854_v45 = vadd.f32 %v834_v31, %v798_v27 }
 0x27d   :  { %vm869_vm10 = vcmp.ge.f32.partialorder %v853_v32, 0.0  ;;  %vm870_vm11 = vcmp.ge.f32.partialorder %v854_v45, 0.0  ;;  %v885_v37 = vmul.f32 0.01, %v853_v32  ;;  %v886_v38 = vmul.f32 0.01, %v854_v45 }
 0x27e   :  { %v839_v53 = vpop.permute.xlu0 %838 }
 0x27f   :  { %v901_v52 = vsel %vm869_vm10, %v853_v32, %v885_v37  ;;  %v902_v39 = vsel %vm870_vm11, %v854_v45, %v886_v38  ;;  %v855_v40 = vadd.f32 %v839_v53, %v799_v42  ;;  %v856_v41 = vadd.f32 %v839_v53, %v800_v23 }
 0x280   :  { %v911_v21 = vpack.c.bf16 %v902_v39, %v901_v52 }
 0x281   :  { %vm871_vm12 = vcmp.ge.f32.partialorder %v855_v40, 0.0  ;;  %vm872_vm13 = vcmp.ge.f32.partialorder %v856_v41, 0.0  ;;  %v887_v43 = vmul.f32 0.01, %v855_v40  ;;  %v888_v29 = vmul.f32 0.01, %v856_v41 }
 0x282   :  { %922 = vst.msk [vmem:[%s1826_s4 + $0x30] sm:$0xff] %vm1766_vm15, %v911_v21 }
 0x283   :  { %v903_v54 = vsel %vm871_vm12, %v855_v40, %v887_v43  ;;  %v904_v11 = vsel %vm872_vm13, %v856_v41, %v888_v29 }
 0x284   :  { %v912_v44 = vpack.c.bf16 %v904_v11, %v903_v54 }
 0x286   :  { %923 = vst.msk [vmem:[%s1826_s4 + $0x38] sm:$0xff] %vm1766_vm15, %v912_v44 }

// kernel: vae_forward.8
= control target key start
LH: loop header
LB: loop body
LE: loop exit
PB: predicated region body
PF: predicated region fallthrough
CT: control target
= control target key end

     0   :  { %v950_v6 = vmov 0   ;;  %vm475_vm0 = vcmask 523264   ;;  %vm633_vm1 = vcmask 261120   ;;  %s1265_s1 = inlined_call_operand.vmem [shape: bf16[576,32], index: 1, kind: input, shape index: {}]   ;;  %s1266_s2 = inlined_call_operand.vmem [shape: f32[64,1], index: 2, kind: input, shape index: {}]   ;;  %s1267_s0 = inlined_call_operand.vmem [shape: bf16[64,576], index: 0, kind: input, shape index: {}]   ;;  %s1268_s3 = inlined_call_operand.vmem [shape: f32[64,32], index: 3, kind: output, shape index: {}]  }
   0x1   :  { %v901_v0 = vld [vmem:[%s1265_s1 + $0x38] sm:$0xff]  ;;  %v900_v1 = vld [vmem:[%s1265_s1 + $0x30] sm:$0xff]  ;;  %v899_v4 = vld [vmem:[%s1265_s1 + $0x28] sm:$0xff]  ;;  %948 = vset.pattern.permute.xlu1 %v950_v6  ;;  %947 = vset.pattern.permute.xlu0 %v950_v6 }
   0x2   :  { %930 = vmatpush.bf16.msra.mxu1 %v901_v0  ;;  %931 = vmatpush.bf16.msra.mxu2 %v901_v0  ;;  %v925_v2 = vld [vmem:[%s1265_s1 + $0xf8] sm:$0xff]  ;;  %v924_v3 = vld [vmem:[%s1265_s1 + $0xf0] sm:$0xff]  ;;  %v923_v5 = vld [vmem:[%s1265_s1 + $0xe8] sm:$0xff] }
   0x3   :  { %488 = vmatpush.bf16.msra.mxu0 %v901_v0  ;;  %575 = vmatpush.bf16.msra.mxu3 %v925_v2  ;;  %v898_v7 = vld [vmem:[%s1265_s1 + $0x20] sm:$0xff]  ;;  %v113_v8 = vld [vmem:[%s1266_s2 + $0x10] sm:$0xff]  ;;  %v897_v11 = vld [vmem:[%s1265_s1 + $0x18] sm:$0xff] }
   0x4   :  { %949 = vset.pattern.permute.xlu2 %v950_v6  ;;  %v922_v9 = vld [vmem:[%s1265_s1 + $0xe0] sm:$0xff]  ;;  %131 = vperm.xlu1 %948, %v113_v8   ;;  %v921_v12 = vld [vmem:[%s1265_s1 + $0xd8] sm:$0xff]  ;;  %v896_v13 = vld [vmem:[%s1265_s1 + $0x10] sm:$0xff] }
   0x5   :  { %v111_v10 = vld [vmem:[%s1266_s2] sm:$0xff]  ;;  %v114_v14 = vld [vmem:[%s1266_s2 + $0x18] sm:$0xff]  ;;  %v920_v15 = vld [vmem:[%s1265_s1 + $0xd0] sm:$0xff] }
   0x6   :  { %932 = vmatpush.bf16.msra.mxu1 %v900_v1  ;;  %933 = vmatpush.bf16.msra.mxu2 %v900_v1  ;;  %v112_v16 = vld [vmem:[%s1266_s2 + $0x8] sm:$0xff]  ;;  %v894_v19 = vld [vmem:[%s1265_s1] sm:$0xff]  ;;  %v881_v21 = vld [vmem:[%s1267_s0 + $0x38] sm:$0xf0] }
   0x7   :  { %489 = vmatpush.bf16.msra.mxu0 %v900_v1  ;;  %576 = vmatpush.bf16.msra.mxu3 %v924_v3  ;;  %v895_v17 = vld [vmem:[%s1265_s1 + $0x8] sm:$0xff]  ;;  %v708_v22 = vld [vmem:[%s1267_s0 + $0x78] sm:$0xf]  ;;  %v648_v26 = vld [vmem:[%s1267_s0] sm:$0xf] }
   0x8   :  { %121 = vperm.xlu0 %947, %v111_v10   ;;  %v919_v18 = vld [vmem:[%s1265_s1 + $0xc8] sm:$0xff]  ;;  %v917_v24 = vld [vmem:[%s1265_s1 + $0xb8] sm:$0xff]  ;;  %v918_v27 = vld [vmem:[%s1265_s1 + $0xc0] sm:$0xff] }
   0x9   :  { %v668_v20 = vld [vmem:[%s1267_s0 + $0x28] sm:$0xf]  ;;  %v891_v23 = vld [vmem:[%s1267_s0 + $0x88] sm:$0xf0]  ;;  %v909_v25 = vld [vmem:[%s1265_s1 + $0x78] sm:$0xff] }
   0xa   :  { %934 = vmatpush.bf16.msra.mxu1 %v899_v4  ;;  %935 = vmatpush.bf16.msra.mxu2 %v899_v4  ;;  %v669_v28 = vor.u32 %v881_v21, %v668_v20  ;;  %v709_v29 = vor.u32 %v891_v23, %v708_v22  ;;  %v876_v30 = vld [vmem:[%s1267_s0 + $0x10] sm:$0xf0]  ;;  %v875_v31 = vld [vmem:[%s1267_s0 + $0xc] sm:$0xf]  ;;  %v658_v32 = vld [vmem:[%s1267_s0 + $0x1c] sm:$0xf0] }
   0xb   :  { %490 = vmatpush.bf16.msra.mxu0 %v899_v4  ;;  %577 = vmatpush.bf16.msra.mxu3 %v923_v5  ;;  %v929_v33 = vld [vmem:[%s1265_s1 + $0x118] sm:$0xff]  ;;  %v916_v34 = vld [vmem:[%s1265_s1 + $0xb0] sm:$0xff]  ;;  %v649_v37 = vor.u32 %v876_v30, %v648_v26  ;;  %v661_v38 = vor.u32 %v875_v31, %v658_v32  ;;  %v915_v41 = vld [vmem:[%s1265_s1 + $0xa8] sm:$0xff] }
   0xc   :  { %136 = vperm.xlu1 %948, %v114_v14   ;;  %v908_v35 = vld [vmem:[%s1265_s1 + $0x70] sm:$0xff]  ;;  %v118_v36 = vld [vmem:[%s1266_s2 + $0x38] sm:$0xff]  ;;  %v907_v42 = vld [vmem:[%s1265_s1 + $0x68] sm:$0xff] }
   0xd   :  { %v928_v39 = vld [vmem:[%s1265_s1 + $0x110] sm:$0xff]  ;;  %v927_v43 = vld [vmem:[%s1265_s1 + $0x108] sm:$0xff]  ;;  %v914_v44 = vld [vmem:[%s1265_s1 + $0xa0] sm:$0xff] }
   0xe   :  { %936 = vmatpush.bf16.msra.mxu1 %v898_v7  ;;  %937 = vmatpush.bf16.msra.mxu2 %v898_v7  ;;  %v117_v40 = vld [vmem:[%s1266_s2 + $0x30] sm:$0xff]  ;;  %v906_v45 = vld [vmem:[%s1265_s1 + $0x60] sm:$0xff]  ;;  %v913_v49 = vld [vmem:[%s1265_s1 + $0x98] sm:$0xff] }
   0xf   :  { %491 = vmatpush.bf16.msra.mxu0 %v898_v7  ;;  %578 = vmatpush.bf16.msra.mxu3 %v922_v9  ;;  %v688_v46 = vld [vmem:[%s1267_s0 + $0x50] sm:$0xf]  ;;  %v886_v47 = vld [vmem:[%s1267_s0 + $0x60] sm:$0xf0]  ;;  %v905_v50 = vld [vmem:[%s1265_s1 + $0x58] sm:$0xff] }
  0x10   :  { %126 = vperm.xlu0 %947, %v112_v16   ;;  %v926_v48 = vld [vmem:[%s1265_s1 + $0x100] sm:$0xff]  ;;  %v664_v51 = vld [vmem:[%s1267_s0 + $0x10] sm:$0xf]  ;;  %v689_v52 = vor.u32 %v886_v47, %v688_v46  ;;  %v880_v54 = vld [vmem:[%s1267_s0 + $0x34] sm:$0xf] }
  0x11   :  { %v878_v53 = vld [vmem:[%s1267_s0 + $0x20] sm:$0xf0]  ;;  %v678_v55 = vld [vmem:[%s1267_s0 + $0x44] sm:$0xf0]  ;;  %v912_v56 = vld [vmem:[%s1265_s1 + $0x90] sm:$0xff] }
  0x12   :  { %938 = vmatpush.bf16.msra.mxu1 %v897_v11  ;;  %939 = vmatpush.bf16.msra.mxu2 %v897_v11  ;;  %v904_v57 = vld [vmem:[%s1265_s1 + $0x50] sm:$0xff]  ;;  %v665_v58 = vor.u32 %v878_v53, %v664_v51  ;;  %v681_v59 = vor.u32 %v880_v54, %v678_v55  ;;  %v115_v60 = vld [vmem:[%s1266_s2 + $0x20] sm:$0xff]  ;;  %v911_v61 = vld [vmem:[%s1265_s1 + $0x88] sm:$0xff] }
  0x13   :  { %492 = vmatpush.bf16.msra.mxu0 %v897_v11  ;;  %579 = vmatpush.bf16.msra.mxu3 %v921_v12  ;;  %v903_v62 = vld [vmem:[%s1265_s1 + $0x48] sm:$0xff]  ;;  %v910_v63 = vld [vmem:[%s1265_s1 + $0x80] sm:$0xff]  ;;  %v877_v2 = vld [vmem:[%s1267_s0 + $0x18] sm:$0xf0] }
  0x14   :  { %156 = vperm.xlu1 %948, %v118_v36   ;;  %141 = vperm.xlu2 %949, %v115_v60   ;;  %v902_v0 = vld [vmem:[%s1265_s1 + $0x40] sm:$0xff]  ;;  %v656_v1 = vld [vmem:[%s1267_s0 + $0x8] sm:$0xf]  ;;  %v650_v6 = vld [vmem:[%s1267_s0 + $0x14] sm:$0xf0] }
  0x15   :  { %v116_v3 = vld [vmem:[%s1266_s2 + $0x28] sm:$0xff]  ;;  %v657_v4 = vor.u32 %v877_v2, %v656_v1  ;;  %v874_v5 = vld [vmem:[%s1267_s0 + $0x4] sm:$0xf]  ;;  %v684_v7 = vld [vmem:[%s1267_s0 + $0x38] sm:$0xf] }
  0x16   :  { %940 = vmatpush.bf16.msra.mxu1 %v896_v13  ;;  %941 = vmatpush.bf16.msra.mxu2 %v896_v13  ;;  %v653_v8 = vor.u32 %v874_v5, %v650_v6  ;;  %v883_v9 = vld [vmem:[%s1267_s0 + $0x48] sm:$0xf0]  ;;  %v885_v10 = vld [vmem:[%s1267_s0 + $0x5c] sm:$0xf]  ;;  %v698_v11 = vld [vmem:[%s1267_s0 + $0x6c] sm:$0xf0] }
  0x17   :  { %493 = vmatpush.bf16.msra.mxu0 %v896_v13  ;;  %580 = vmatpush.bf16.msra.mxu3 %v920_v15  ;;  %v685_v12 = vor.u32 %v883_v9, %v684_v7  ;;  %v701_v13 = vor.u32 %v885_v10, %v698_v11  ;;  %v676_v14 = vld [vmem:[%s1267_s0 + $0x30] sm:$0xf]  ;;  %v882_v15 = vld [vmem:[%s1267_s0 + $0x40] sm:$0xf0]  ;;  %v888_v21 = vld [vmem:[%s1267_s0 + $0x70] sm:$0xf0] }
  0x18   :  { %151 = vperm.xlu0 %947, %v117_v40   ;;  %v677_v16 = vor.u32 %v882_v15, %v676_v14  ;;  %v890_v22 = vld [vmem:[%s1267_s0 + $0x84] sm:$0xf]  ;;  %v718_v23 = vld [vmem:[%s1267_s0 + $0x94] sm:$0xf0]  ;;  %v690_v30 = vld [vmem:[%s1267_s0 + $0x64] sm:$0xf0] }
  0x19   :  { %v696_v26 = vld [vmem:[%s1267_s0 + $0x58] sm:$0xf]  ;;  %v724_v32 = vld [vmem:[%s1267_s0 + $0x88] sm:$0xf]  ;;  %v892_v36 = vld [vmem:[%s1267_s0 + $0x90] sm:$0xf0] }
  0x1a   :  { %942 = vmatpush.bf16.msra.mxu1 %v895_v17  ;;  %943 = vmatpush.bf16.msra.mxu2 %v895_v17 }
  0x1b   :  { %494 = vmatpush.bf16.msra.mxu0 %v895_v17  ;;  %581 = vmatpush.bf16.msra.mxu3 %v919_v18  ;;  %v879_v17 = vld [vmem:[%s1267_s0 + $0x2c] sm:$0xf]  ;;  %v670_v18 = vld [vmem:[%s1267_s0 + $0x3c] sm:$0xf0] }
  0x1c   :  { %146 = vperm.xlu2 %949, %v116_v3   ;;  %v673_v20 = vor.u32 %v879_v17, %v670_v18 }
  0x1e   :  { %944 = vmatpush.bf16.msra.mxu1 %v894_v19  ;;  %945 = vmatpush.bf16.msra.mxu2 %v894_v19 }
  0x1f   :  { %495 = vmatpush.bf16.msra.mxu0 %v894_v19  ;;  %582 = vmatpush.bf16.msra.mxu3 %v918_v27  ;;  %v704_v19 = vld [vmem:[%s1267_s0 + $0x60] sm:$0xf]  ;;  %v887_v27 = vld [vmem:[%s1267_s0 + $0x68] sm:$0xf0] }
  0x21   :  { %501 = vmatmul.bf16.vlgmr.msra.gmra.mxu1 %v669_v28  ;;  %511 = vmatmul.bf16.vlgmr.msra.gmra.mxu2 %v709_v29  ;;  %v697_v28 = vor.u32 %v887_v27, %v696_v26  ;;  %v884_v29 = vld [vmem:[%s1267_s0 + $0x54] sm:$0xf] }
  0x22   :  { %546 = vmatpush.bf16.msrb.mxu2 %v917_v24  ;;  %517 = vmatpush.bf16.msrb.mxu1 %v909_v25  ;;  %v705_v24 = vor.u32 %v888_v21, %v704_v19  ;;  %v721_v25 = vor.u32 %v890_v22, %v718_v23  ;;  %v693_v31 = vor.u32 %v884_v29, %v690_v30 }
  0x23   :  { %608 = vmatpush.bf16.msrb.mxu0 %v929_v33  ;;  %583 = vmatmul.bf16.vlgmr.msra.gmra.mxu3 %v661_v38  ;;  %v893_v33 = vld [vmem:[%s1267_s0 + $0x98] sm:$0xf0] }
  0x24   :  { %496 = vmatmul.bf16.vlgmr.msra.gmra.mxu0 %v649_v37  ;;  %v889_v38 = vld [vmem:[%s1267_s0 + $0x7c] sm:$0xf] }
  0x26   :  { %547 = vmatpush.bf16.msrb.mxu2 %v916_v34  ;;  %518 = vmatpush.bf16.msrb.mxu1 %v908_v35  ;;  %v725_v34 = vor.u32 %v893_v33, %v724_v32  ;;  %v716_v35 = vld [vmem:[%s1267_s0 + $0x80] sm:$0xf] }
  0x27   :  { %609 = vmatpush.bf16.msrb.mxu0 %v928_v39  ;;  %v717_v37 = vor.u32 %v892_v36, %v716_v35  ;;  %v710_v39 = vld [vmem:[%s1267_s0 + $0x8c] sm:$0xf0] }
  0x28   :  { %v713_v40 = vor.u32 %v889_v38, %v710_v39 }
  0x2a   :  { %548 = vmatpush.bf16.msrb.mxu2 %v915_v41  ;;  %519 = vmatpush.bf16.msrb.mxu1 %v907_v42 }
  0x2b   :  { %610 = vmatpush.bf16.msrb.mxu0 %v927_v43 }
  0x2e   :  { %549 = vmatpush.bf16.msrb.mxu2 %v914_v44  ;;  %520 = vmatpush.bf16.msrb.mxu1 %v906_v45 }
  0x2f   :  { %611 = vmatpush.bf16.msrb.mxu0 %v926_v48 }
  0x31   :  { %506 = vmatmul.bf16.gmra.mxu1 %v689_v52 }
  0x32   :  { %550 = vmatpush.bf16.msrb.mxu2 %v913_v49  ;;  %521 = vmatpush.bf16.msrb.mxu1 %v905_v50 }
  0x33   :  { %588 = vmatmul.bf16.gmra.mxu3 %v681_v59 }
  0x34   :  { %870 = vmatmul.msk.bf16.vlgmr.msrb.gmra.mxu0 %vm475_vm0, %v665_v58 }
  0x36   :  { %551 = vmatpush.bf16.msrb.mxu2 %v912_v56  ;;  %522 = vmatpush.bf16.msrb.mxu1 %v904_v57 }
  0x3a   :  { %552 = vmatpush.bf16.msrb.mxu2 %v911_v61  ;;  %523 = vmatpush.bf16.msrb.mxu1 %v903_v62 }
  0x3e   :  { %553 = vmatpush.bf16.msrb.mxu2 %v910_v63  ;;  %524 = vmatpush.bf16.msrb.mxu1 %v902_v0 }
  0x41   :  { %554 = vmatmul.bf16.vlgmr.msrb.gmra.mxu2 %v657_v4  ;;  %525 = vmatmul.bf16.vlgmr.msrb.gmra.mxu1 %v653_v8 }
  0x43   :  { %593 = vmatmul.bf16.gmra.mxu3 %v701_v13 }
  0x44   :  { %871 = vmatmul.msk.bf16.gmra.mxu0 %vm475_vm0, %v685_v12 }
  0x51   :  { %559 = vmatmul.bf16.gmra.mxu2 %v677_v16  ;;  %530 = vmatmul.bf16.gmra.mxu1 %v673_v20 }
  0x53   :  { %598 = vmatmul.bf16.gmra.mxu3 %v721_v25 }
  0x54   :  { %872 = vmatmul.msk.bf16.gmra.mxu0 %vm475_vm0, %v705_v24 }
  0x61   :  { %564 = vmatmul.bf16.gmra.mxu2 %v697_v28  ;;  %535 = vmatmul.bf16.gmra.mxu1 %v693_v31 }
  0x64   :  { %873 = vmatmul.msk.bf16.gmra.mxu0 %vm475_vm0, %v725_v34 }
  0x6e   :  { %v142_v21 = vpop.permute.xlu2 %141 }
  0x71   :  { %569 = vmatmul.bf16.gmra.mxu2 %v717_v37  ;;  %540 = vmatmul.bf16.gmra.mxu1 %v713_v40 }
  0x76   :  { %v132_v1 = vpop.permute.xlu1 %131  ;;  %v147_v32 = vpop.permute.xlu2 %146 }
  0x7a   :  { %v122_v51 = vpop.permute.xlu0 %121 }
  0x7e   :  { %v137_v12 = vpop.permute.xlu1 %136 }
  0x82   :  { %v127_v59 = vpop.permute.xlu0 %126 }
  0x9e   :  { %v502_v41 = vpop.f32.mrf.mxu1 }
  0x9f   :  { %v503_v7 = vadd.f32 %v502_v41, %v132_v1 }
  0xa1   :  { %v497_v42 = vpop.f32.mrf.mxu0 }
  0xa2   :  { %v498_v52 = vadd.f32 %v497_v42, %v122_v51  ;;  %v152_v42 = vpop.permute.xlu0 %151 }
  0xa4   :  { %v1227_v46 = vpop.f32.mrf.mxu2 }
  0xa6   :  { %v504_v43 = vpop.f32.mrf.mxu1  ;;  %v584_v47 = vpop.f32.mrf.mxu3 }
  0xa7   :  { %v505_v16 = vadd.f32 %v504_v43, %v137_v12 }
  0xa9   :  { %v499_v44 = vpop.f32.mrf.mxu0 }
  0xaa   :  { %v500_v61 = vadd.f32 %v499_v44, %v127_v59 }
  0xac   :  { %v1229_v50 = vpop.f32.mrf.mxu2 }
  0xae   :  { %v507_v45 = vpop.f32.mrf.mxu1  ;;  %v586_v55 = vpop.f32.mrf.mxu3 }
  0xaf   :  { %v508_v25 = vadd.f32 %v507_v45, %v142_v21  ;;  %v513_v45 = vadd.f32 %v1227_v46, %v152_v42 }
  0xb1   :  { %v613_v49 = vpop.f32.mrf.mxu0 }
  0xb6   :  { %v509_v48 = vpop.f32.mrf.mxu1  ;;  %v589_v3 = vpop.f32.mrf.mxu3 }
  0xb7   :  { %v510_v35 = vadd.f32 %v509_v48, %v147_v32 }
  0xb9   :  { %v615_v57 = vpop.f32.mrf.mxu0 }
  0xbe   :  { %v526_v53 = vpop.f32.mrf.mxu1  ;;  %v591_v14 = vpop.f32.mrf.mxu3 }
  0xbf   :  { %v527_v54 = vadd.f32 %v526_v53, %v498_v52  ;;  %v157_v53 = vpop.permute.xlu1 %156 }
  0xc1   :  { %v618_v5 = vpop.f32.mrf.mxu0 }
  0xc4   :  { %v555_v56 = vpop.f32.mrf.mxu2 }
  0xc5   :  { %v556_v58 = vadd.f32 %v555_v56, %v527_v54 }
  0xc6   :  { %v528_v63 = vpop.f32.mrf.mxu1  ;;  %v594_v26 = vpop.f32.mrf.mxu3 }
  0xc7   :  { %v585_v60 = vadd.f32 %v584_v47, %v556_v58  ;;  %v529_v0 = vadd.f32 %v528_v63, %v500_v61 }
  0xc9   :  { %v614_v62 = vadd.f32 %v613_v49, %v585_v60  ;;  %v620_v17 = vpop.f32.mrf.mxu0 }
  0xcb   :  { %634 = vst.msk [vmem:[%s1268_s3] sm:$0xff] %vm633_vm1, %v614_v62 }
  0xcc   :  { %v557_v2 = vpop.f32.mrf.mxu2 }
  0xcd   :  { %v558_v4 = vadd.f32 %v557_v2, %v529_v0 }
  0xce   :  { %v531_v9 = vpop.f32.mrf.mxu1  ;;  %v596_v38 = vpop.f32.mrf.mxu3 }
  0xcf   :  { %v587_v6 = vadd.f32 %v586_v55, %v558_v4  ;;  %v532_v10 = vadd.f32 %v531_v9, %v503_v7 }
  0xd1   :  { %v616_v8 = vadd.f32 %v615_v57, %v587_v6  ;;  %v623_v29 = vpop.f32.mrf.mxu0  ;;  %v515_v57 = vadd.f32 %v1229_v50, %v157_v53 }
  0xd3   :  { %635 = vst.msk [vmem:[%s1268_s3 + $0x8] sm:$0xff] %vm633_vm1, %v616_v8 }
  0xd4   :  { %v560_v11 = vpop.f32.mrf.mxu2 }
  0xd5   :  { %v561_v13 = vadd.f32 %v560_v11, %v532_v10 }
  0xd6   :  { %v533_v19 = vpop.f32.mrf.mxu1  ;;  %v599_v48 = vpop.f32.mrf.mxu3 }
  0xd7   :  { %v590_v15 = vadd.f32 %v589_v3, %v561_v13  ;;  %v534_v20 = vadd.f32 %v533_v19, %v505_v16 }
  0xd9   :  { %v619_v18 = vadd.f32 %v618_v5, %v590_v15  ;;  %v625_v40 = vpop.f32.mrf.mxu0 }
  0xdb   :  { %636 = vst.msk [vmem:[%s1268_s3 + $0x10] sm:$0xff] %vm633_vm1, %v619_v18 }
  0xdc   :  { %v562_v22 = vpop.f32.mrf.mxu2 }
  0xdd   :  { %v563_v23 = vadd.f32 %v562_v22, %v534_v20 }
  0xde   :  { %v536_v28 = vpop.f32.mrf.mxu1  ;;  %v601_v62 = vpop.f32.mrf.mxu3 }
  0xdf   :  { %v592_v24 = vadd.f32 %v591_v14, %v563_v23  ;;  %v537_v30 = vadd.f32 %v536_v28, %v508_v25 }
  0xe1   :  { %v621_v27 = vadd.f32 %v620_v17, %v592_v24  ;;  %v628_v55 = vpop.f32.mrf.mxu0 }
  0xe3   :  { %637 = vst.msk [vmem:[%s1268_s3 + $0x18] sm:$0xff] %vm633_vm1, %v621_v27 }
  0xe4   :  { %v565_v31 = vpop.f32.mrf.mxu2 }
  0xe5   :  { %v566_v33 = vadd.f32 %v565_v31, %v537_v30 }
  0xe6   :  { %v538_v37 = vpop.f32.mrf.mxu1 }
  0xe7   :  { %v595_v34 = vadd.f32 %v594_v26, %v566_v33  ;;  %v539_v39 = vadd.f32 %v538_v37, %v510_v35 }
  0xe9   :  { %v624_v36 = vadd.f32 %v623_v29, %v595_v34  ;;  %v630_v0 = vpop.f32.mrf.mxu0 }
  0xeb   :  { %638 = vst.msk [vmem:[%s1268_s3 + $0x20] sm:$0xff] %vm633_vm1, %v624_v36 }
  0xec   :  { %v567_v41 = vpop.f32.mrf.mxu2 }
  0xed   :  { %v568_v43 = vadd.f32 %v567_v41, %v539_v39 }
  0xee   :  { %v541_v49 = vpop.f32.mrf.mxu1 }
  0xef   :  { %v597_v44 = vadd.f32 %v596_v38, %v568_v43  ;;  %v542_v51 = vadd.f32 %v541_v49, %v513_v45 }
  0xf1   :  { %v626_v47 = vadd.f32 %v625_v40, %v597_v44 }
  0xf3   :  { %639 = vst.msk [vmem:[%s1268_s3 + $0x28] sm:$0xff] %vm633_vm1, %v626_v47 }
  0xf4   :  { %v570_v52 = vpop.f32.mrf.mxu2 }
  0xf5   :  { %v571_v54 = vadd.f32 %v570_v52, %v542_v51 }
  0xf6   :  { %v543_v59 = vpop.f32.mrf.mxu1 }
  0xf7   :  { %v600_v56 = vadd.f32 %v599_v48, %v571_v54  ;;  %v544_v60 = vadd.f32 %v543_v59, %v515_v57 }
  0xf9   :  { %v629_v58 = vadd.f32 %v628_v55, %v600_v56 }
  0xfb   :  { %640 = vst.msk [vmem:[%s1268_s3 + $0x30] sm:$0xff] %vm633_vm1, %v629_v58 }
  0xfc   :  { %v572_v46 = vpop.f32.mrf.mxu2 }
  0xfd   :  { %v573_v61 = vadd.f32 %v572_v46, %v544_v60 }
  0xff   :  { %v602_v63 = vadd.f32 %v601_v62, %v573_v61 }
 0x101   :  { %v631_v1 = vadd.f32 %v630_v0, %v602_v63 }
 0x103   :  { %641 = vst.msk [vmem:[%s1268_s3 + $0x38] sm:$0xff] %vm633_vm1, %v631_v1 }

// kernel: vae_forward.9
= control target key start
LH: loop header
LB: loop body
LE: loop exit
PB: predicated region body
PF: predicated region fallthrough
CT: control target
= control target key end

     0   :  { %12 = vsyncpa [#allocation3], 0  ;;  %s932_s0 = inlined_call_operand.vmem [shape: f32[2,1024], index: 0, kind: input, shape index: {}]   ;;  %s933_s1 = inlined_call_operand.vmem [shape: f32[1024,128], index: 1, kind: input, shape index: {}]   ;;  %s934_s2 = inlined_call_operand.vmem [shape: f32[1,128], index: 2, kind: input, shape index: {}]   ;;  %s935_s3 = inlined_call_operand.vmem [shape: f32[2,64], index: 3, kind: input, shape index: {}]   ;;  %s936_s4 = inlined_call_operand.hbm [shape: f32[2,64], index: 4, kind: output, shape index: {0}]   ;;  %s937_s5 = inlined_call_operand.hbm [shape: f32[2,64], index: 5, kind: output, shape index: {1}]   ;;  %s938_s6 = inlined_call_operand.hbm [shape: f32[2,64], index: 6, kind: output, shape index: {2}]  }
   0x1   :  { %v71_v0 = vld [vmem:[%s933_s1 + $0x178] sm:$0xff]  ;;  %v70_v2 = vld [vmem:[%s933_s1 + $0x170] sm:$0xff]  ;;  %v69_v6 = vld [vmem:[%s933_s1 + $0x168] sm:$0xff] }
   0x2   :  { %v39_v1 = vld [vmem:[%s933_s1 + $0x78] sm:$0xff]  ;;  %217 = vmatpush.msra.mxu2 %v71_v0  ;;  %v38_v4 = vld [vmem:[%s933_s1 + $0x70] sm:$0xff]  ;;  %v37_v8 = vld [vmem:[%s933_s1 + $0x68] sm:$0xff] }
   0x3   :  { %177 = vmatpush.msra.mxu0 %v39_v1  ;;  %v87_v3 = vld [vmem:[%s933_s1 + $0x1f8] sm:$0xff]  ;;  %v86_v7 = vld [vmem:[%s933_s1 + $0x1f0] sm:$0xff]  ;;  %v85_v10 = vld [vmem:[%s933_s1 + $0x1e8] sm:$0xff] }
   0x4   :  { %v55_v5 = vld [vmem:[%s933_s1 + $0xf8] sm:$0xff]  ;;  %237 = vmatpush.msra.mxu3 %v87_v3  ;;  %218 = vmatpush.msra.mxu2 %v70_v2  ;;  %v54_v9 = vld [vmem:[%s933_s1 + $0xf0] sm:$0xff]  ;;  %v68_v11 = vld [vmem:[%s933_s1 + $0x160] sm:$0xff] }
   0x5   :  { %197 = vmatpush.msra.mxu1 %v55_v5  ;;  %178 = vmatpush.msra.mxu0 %v38_v4  ;;  %v36_v12 = vld [vmem:[%s933_s1 + $0x60] sm:$0xff]  ;;  %v53_v13 = vld [vmem:[%s933_s1 + $0xe8] sm:$0xff]  ;;  %v67_v16 = vld [vmem:[%s933_s1 + $0x158] sm:$0xff] }
   0x6   :  { %238 = vmatpush.msra.mxu3 %v86_v7  ;;  %219 = vmatpush.msra.mxu2 %v69_v6  ;;  %v84_v14 = vld [vmem:[%s933_s1 + $0x1e0] sm:$0xff]  ;;  %v35_v17 = vld [vmem:[%s933_s1 + $0x58] sm:$0xff]  ;;  %v66_v20 = vld [vmem:[%s933_s1 + $0x150] sm:$0xff] }
   0x7   :  { %198 = vmatpush.msra.mxu1 %v54_v9  ;;  %179 = vmatpush.msra.mxu0 %v37_v8  ;;  %v52_v15 = vld [vmem:[%s933_s1 + $0xe0] sm:$0xff]  ;;  %v83_v18 = vld [vmem:[%s933_s1 + $0x1d8] sm:$0xff]  ;;  %v34_v21 = vld [vmem:[%s933_s1 + $0x50] sm:$0xff] }
   0x8   :  { %239 = vmatpush.msra.mxu3 %v85_v10  ;;  %220 = vmatpush.msra.mxu2 %v68_v11  ;;  %v51_v19 = vld [vmem:[%s933_s1 + $0xd8] sm:$0xff]  ;;  %v82_v22 = vld [vmem:[%s933_s1 + $0x1d0] sm:$0xff]  ;;  %v65_v24 = vld [vmem:[%s933_s1 + $0x148] sm:$0xff] }
   0x9   :  { %199 = vmatpush.msra.mxu1 %v53_v13  ;;  %180 = vmatpush.msra.mxu0 %v36_v12  ;;  %v50_v23 = vld [vmem:[%s933_s1 + $0xd0] sm:$0xff]  ;;  %v33_v25 = vld [vmem:[%s933_s1 + $0x48] sm:$0xff]  ;;  %v64_v28 = vld [vmem:[%s933_s1 + $0x140] sm:$0xff] }
   0xa   :  { %240 = vmatpush.msra.mxu3 %v84_v14  ;;  %221 = vmatpush.msra.mxu2 %v67_v16  ;;  %v81_v26 = vld [vmem:[%s933_s1 + $0x1c8] sm:$0xff]  ;;  %v32_v29 = vld [vmem:[%s933_s1 + $0x40] sm:$0xff]  ;;  %v63_v32 = vld [vmem:[%s933_s1 + $0x138] sm:$0xff] }
   0xb   :  { %200 = vmatpush.msra.mxu1 %v52_v15  ;;  %181 = vmatpush.msra.mxu0 %v35_v17  ;;  %v49_v27 = vld [vmem:[%s933_s1 + $0xc8] sm:$0xff]  ;;  %v80_v30 = vld [vmem:[%s933_s1 + $0x1c0] sm:$0xff]  ;;  %v31_v33 = vld [vmem:[%s933_s1 + $0x38] sm:$0xff] }
   0xc   :  { %241 = vmatpush.msra.mxu3 %v83_v18  ;;  %222 = vmatpush.msra.mxu2 %v66_v20  ;;  %v48_v31 = vld [vmem:[%s933_s1 + $0xc0] sm:$0xff]  ;;  %v79_v34 = vld [vmem:[%s933_s1 + $0x1b8] sm:$0xff]  ;;  %v62_v36 = vld [vmem:[%s933_s1 + $0x130] sm:$0xff] }
   0xd   :  { %201 = vmatpush.msra.mxu1 %v51_v19  ;;  %182 = vmatpush.msra.mxu0 %v34_v21  ;;  %v47_v35 = vld [vmem:[%s933_s1 + $0xb8] sm:$0xff]  ;;  %v30_v37 = vld [vmem:[%s933_s1 + $0x30] sm:$0xff]  ;;  %v61_v40 = vld [vmem:[%s933_s1 + $0x128] sm:$0xff] }
   0xe   :  { %242 = vmatpush.msra.mxu3 %v82_v22  ;;  %223 = vmatpush.msra.mxu2 %v65_v24  ;;  %v78_v38 = vld [vmem:[%s933_s1 + $0x1b0] sm:$0xff]  ;;  %v29_v41 = vld [vmem:[%s933_s1 + $0x28] sm:$0xff]  ;;  %v60_v44 = vld [vmem:[%s933_s1 + $0x120] sm:$0xff] }
   0xf   :  { %202 = vmatpush.msra.mxu1 %v50_v23  ;;  %183 = vmatpush.msra.mxu0 %v33_v25  ;;  %v46_v39 = vld [vmem:[%s933_s1 + $0xb0] sm:$0xff]  ;;  %v77_v42 = vld [vmem:[%s933_s1 + $0x1a8] sm:$0xff]  ;;  %v28_v45 = vld [vmem:[%s933_s1 + $0x20] sm:$0xff] }
  0x10   :  { %243 = vmatpush.msra.mxu3 %v81_v26  ;;  %224 = vmatpush.msra.mxu2 %v64_v28  ;;  %v45_v43 = vld [vmem:[%s933_s1 + $0xa8] sm:$0xff]  ;;  %v76_v46 = vld [vmem:[%s933_s1 + $0x1a0] sm:$0xff]  ;;  %v59_v48 = vld [vmem:[%s933_s1 + $0x118] sm:$0xff] }
  0x11   :  { %203 = vmatpush.msra.mxu1 %v49_v27  ;;  %184 = vmatpush.msra.mxu0 %v32_v29  ;;  %v44_v47 = vld [vmem:[%s933_s1 + $0xa0] sm:$0xff]  ;;  %v27_v49 = vld [vmem:[%s933_s1 + $0x18] sm:$0xff]  ;;  %v58_v52 = vld [vmem:[%s933_s1 + $0x110] sm:$0xff] }
  0x12   :  { %244 = vmatpush.msra.mxu3 %v80_v30  ;;  %225 = vmatpush.msra.mxu2 %v63_v32  ;;  %v75_v50 = vld [vmem:[%s933_s1 + $0x198] sm:$0xff]  ;;  %v26_v53 = vld [vmem:[%s933_s1 + $0x10] sm:$0xff]  ;;  %v57_v56 = vld [vmem:[%s933_s1 + $0x108] sm:$0xff] }
  0x13   :  { %204 = vmatpush.msra.mxu1 %v48_v31  ;;  %185 = vmatpush.msra.mxu0 %v31_v33  ;;  %v43_v51 = vld [vmem:[%s933_s1 + $0x98] sm:$0xff]  ;;  %v74_v54 = vld [vmem:[%s933_s1 + $0x190] sm:$0xff]  ;;  %v25_v57 = vld [vmem:[%s933_s1 + $0x8] sm:$0xff] }
  0x14   :  { %245 = vmatpush.msra.mxu3 %v79_v34  ;;  %226 = vmatpush.msra.mxu2 %v62_v36  ;;  %v42_v55 = vld [vmem:[%s933_s1 + $0x90] sm:$0xff]  ;;  %v73_v58 = vld [vmem:[%s933_s1 + $0x188] sm:$0xff]  ;;  %v56_v60 = vld [vmem:[%s933_s1 + $0x100] sm:$0xff] }
  0x15   :  { %205 = vmatpush.msra.mxu1 %v47_v35  ;;  %186 = vmatpush.msra.mxu0 %v30_v37  ;;  %v41_v59 = vld [vmem:[%s933_s1 + $0x88] sm:$0xff]  ;;  %v24_v61 = vld [vmem:[%s933_s1] sm:$0xff]  ;;  %v135_v62 = vld [vmem:[%s933_s1 + $0x378] sm:$0xff] }
  0x16   :  { %246 = vmatpush.msra.mxu3 %v78_v38  ;;  %227 = vmatpush.msra.mxu2 %v61_v40  ;;  %v72_v63 = vld [vmem:[%s933_s1 + $0x180] sm:$0xff]  ;;  %v103_v0 = vld [vmem:[%s933_s1 + $0x278] sm:$0xff]  ;;  %v134_v2 = vld [vmem:[%s933_s1 + $0x370] sm:$0xff] }
  0x17   :  { %206 = vmatpush.msra.mxu1 %v46_v39  ;;  %187 = vmatpush.msra.mxu0 %v29_v41  ;;  %v151_v1 = vld [vmem:[%s933_s1 + $0x3f8] sm:$0xff]  ;;  %v40_v3 = vld [vmem:[%s933_s1 + $0x80] sm:$0xff]  ;;  %v102_v4 = vld [vmem:[%s933_s1 + $0x270] sm:$0xff] }
  0x18   :  { %247 = vmatpush.msra.mxu3 %v77_v42  ;;  %228 = vmatpush.msra.mxu2 %v60_v44  ;;  %v119_v5 = vld [vmem:[%s933_s1 + $0x2f8] sm:$0xff]  ;;  %v133_v6 = vld [vmem:[%s933_s1 + $0x368] sm:$0xff]  ;;  %v150_v7 = vld [vmem:[%s933_s1 + $0x3f0] sm:$0xff] }
  0x19   :  { %207 = vmatpush.msra.mxu1 %v45_v43  ;;  %188 = vmatpush.msra.mxu0 %v28_v45  ;;  %v101_v8 = vld [vmem:[%s933_s1 + $0x268] sm:$0xff]  ;;  %v118_v9 = vld [vmem:[%s933_s1 + $0x2f0] sm:$0xff]  ;;  %v132_v10 = vld [vmem:[%s933_s1 + $0x360] sm:$0xff] }
  0x1a   :  { %248 = vmatpush.msra.mxu3 %v76_v46  ;;  %229 = vmatpush.msra.mxu2 %v59_v48  ;;  %v149_v11 = vld [vmem:[%s933_s1 + $0x3e8] sm:$0xff]  ;;  %v100_v12 = vld [vmem:[%s933_s1 + $0x260] sm:$0xff]  ;;  %v131_v15 = vld [vmem:[%s933_s1 + $0x358] sm:$0xff] }
  0x1b   :  { %208 = vmatpush.msra.mxu1 %v44_v47  ;;  %189 = vmatpush.msra.mxu0 %v27_v49  ;;  %v117_v13 = vld [vmem:[%s933_s1 + $0x2e8] sm:$0xff]  ;;  %v22_v14 = vld [vmem:[%s932_s0] sm:$0xff]  ;;  %v99_v17 = vld [vmem:[%s933_s1 + $0x258] sm:$0xff] }
  0x1c   :  { %249 = vmatpush.msra.mxu3 %v75_v50  ;;  %230 = vmatpush.msra.mxu2 %v58_v52  ;;  %v148_v16 = vld [vmem:[%s933_s1 + $0x3e0] sm:$0xff]  ;;  %158 = vst [vmem:[#allocation1] ss:$4 sm:$0xff] %v22_v14  ;;  %v130_v19 = vld [vmem:[%s933_s1 + $0x350] sm:$0xff]  ;;  %v147_v20 = vld [vmem:[%s933_s1 + $0x3d8] sm:$0xff] }
  0x1d   :  { %209 = vmatpush.msra.mxu1 %v43_v51  ;;  %190 = vmatpush.msra.mxu0 %v26_v53  ;;  %v116_v18 = vld [vmem:[%s933_s1 + $0x2e0] sm:$0xff]  ;;  %v98_v21 = vld [vmem:[%s933_s1 + $0x250] sm:$0xff]  ;;  %v115_v22 = vld [vmem:[%s933_s1 + $0x2d8] sm:$0xff] }
  0x1e   :  { %250 = vmatpush.msra.mxu3 %v74_v54  ;;  %231 = vmatpush.msra.mxu2 %v57_v56  ;;  %v129_v23 = vld [vmem:[%s933_s1 + $0x348] sm:$0xff]  ;;  %v146_v24 = vld [vmem:[%s933_s1 + $0x3d0] sm:$0xff]  ;;  %v128_v28 = vld [vmem:[%s933_s1 + $0x340] sm:$0xff] }
  0x1f   :  { %210 = vmatpush.msra.mxu1 %v42_v55  ;;  %191 = vmatpush.msra.mxu0 %v25_v57  ;;  %v23_v25 = vld [vmem:[%s932_s0 + $0x8] sm:$0xff]  ;;  %v114_v27 = vld [vmem:[%s933_s1 + $0x2d0] sm:$0xff]  ;;  %v96_v30 = vld [vmem:[%s933_s1 + $0x240] sm:$0xff] }
  0x20   :  { %251 = vmatpush.msra.mxu3 %v73_v58  ;;  %232 = vmatpush.msra.mxu2 %v56_v60  ;;  %v97_v26 = vld [vmem:[%s933_s1 + $0x248] sm:$0xff]  ;;  %160 = vst [vmem:[#allocation1 + $0x20] ss:$4 sm:$0xff] %v23_v25  ;;  %v127_v32 = vld [vmem:[%s933_s1 + $0x338] sm:$0xff]  ;;  %v144_v33 = vld [vmem:[%s933_s1 + $0x3c0] sm:$0xff] }
  0x21   :  { %211 = vmatpush.msra.mxu1 %v41_v59  ;;  %192 = vmatpush.msra.mxu0 %v24_v61  ;;  %v145_v29 = vld [vmem:[%s933_s1 + $0x3c8] sm:$0xff]  ;;  %v95_v34 = vld [vmem:[%s933_s1 + $0x238] sm:$0xff]  ;;  %v112_v35 = vld [vmem:[%s933_s1 + $0x2c0] sm:$0xff] }
  0x22   :  { %297 = vmatpush.msrb.mxu2 %v135_v62  ;;  %252 = vmatpush.msra.mxu3 %v72_v63  ;;  %v113_v31 = vld [vmem:[%s933_s1 + $0x2c8] sm:$0xff] }
  0x23   :  { %257 = vmatpush.msrb.mxu0 %v103_v0  ;;  %212 = vmatpush.msra.mxu1 %v40_v3 }
  0x24   :  { %317 = vmatpush.msrb.mxu3 %v151_v1  ;;  %298 = vmatpush.msrb.mxu2 %v134_v2 }
  0x25   :  { %258 = vmatpush.msrb.mxu0 %v102_v4  ;;  %277 = vmatpush.msrb.mxu1 %v119_v5 }
  0x26   :  { %299 = vmatpush.msrb.mxu2 %v133_v6  ;;  %318 = vmatpush.msrb.mxu3 %v150_v7 }
  0x27   :  { %259 = vmatpush.msrb.mxu0 %v101_v8  ;;  %278 = vmatpush.msrb.mxu1 %v118_v9 }
  0x28   :  { %300 = vmatpush.msrb.mxu2 %v132_v10  ;;  %319 = vmatpush.msrb.mxu3 %v149_v11 }
  0x29   :  { %260 = vmatpush.msrb.mxu0 %v100_v12  ;;  %279 = vmatpush.msrb.mxu1 %v117_v13 }
  0x2a   :  { %301 = vmatpush.msrb.mxu2 %v131_v15  ;;  %320 = vmatpush.msrb.mxu3 %v148_v16 }
  0x2b   :  { %261 = vmatpush.msrb.mxu0 %v99_v17  ;;  %280 = vmatpush.msrb.mxu1 %v116_v18 }
  0x2c   :  { %302 = vmatpush.msrb.mxu2 %v130_v19  ;;  %321 = vmatpush.msrb.mxu3 %v147_v20 }
  0x2d   :  { %262 = vmatpush.msrb.mxu0 %v98_v21  ;;  %281 = vmatpush.msrb.mxu1 %v115_v22 }
  0x2e   :  { %303 = vmatpush.msrb.mxu2 %v129_v23  ;;  %322 = vmatpush.msrb.mxu3 %v146_v24 }
  0x2f   :  { %263 = vmatpush.msrb.mxu0 %v97_v26  ;;  %282 = vmatpush.msrb.mxu1 %v114_v27 }
  0x30   :  { %304 = vmatpush.msrb.mxu2 %v128_v28  ;;  %323 = vmatpush.msrb.mxu3 %v145_v29 }
  0x31   :  { %13 = vsyncpa [#allocation5], 0  ;;  %264 = vmatpush.msrb.mxu0 %v96_v30  ;;  %283 = vmatpush.msrb.mxu1 %v113_v31  ;;  %v126_v36 = vld [vmem:[%s933_s1 + $0x330] sm:$0xff]  ;;  %v143_v37 = vld [vmem:[%s933_s1 + $0x3b8] sm:$0xff]  ;;  %vm337_vm0 = vcmask 517120   ;;  %s373_s17 = sshll.u32 %s937_s5, 4  ;;  %s374_s17 = int_to_ptr.hbm [resolvable:$true] %s373_s17 }
  0x32   :  { %305 = vmatpush.msrb.mxu2 %v127_v32  ;;  %324 = vmatpush.msrb.mxu3 %v144_v33  ;;  %v94_v38 = vld [vmem:[%s933_s1 + $0x230] sm:$0xff]  ;;  %v111_v39 = vld [vmem:[%s933_s1 + $0x2b8] sm:$0xff]  ;;  %v125_v40 = vld [vmem:[%s933_s1 + $0x328] sm:$0xff]  ;;  %s486_s18 = smov 64   ;;  %s487_s21 = smov [#allocation2]  }
  0x33   :  { %265 = vmatpush.msrb.mxu0 %v95_v34  ;;  %284 = vmatpush.msrb.mxu1 %v112_v35  ;;  %v142_v41 = vld [vmem:[%s933_s1 + $0x3b0] sm:$0xff]  ;;  %v93_v42 = vld [vmem:[%s933_s1 + $0x228] sm:$0xff]  ;;  %v124_v44 = vld [vmem:[%s933_s1 + $0x320] sm:$0xff]  ;;  %s360_s22 = sshll.u32 %s487_s21, 4  ;;  %s362_s25 = sshll.u32 %s936_s4, 4  ;;  %s361_s22 = int_to_ptr.vmem [resolvable:$true] %s360_s22  ;;  %s363_s25 = int_to_ptr.hbm [resolvable:$true] %s362_s25 }
  0x34   :  { %306 = vmatpush.msrb.mxu2 %v126_v36  ;;  %325 = vmatpush.msrb.mxu3 %v143_v37  ;;  %v110_v43 = vld [vmem:[%s933_s1 + $0x2b0] sm:$0xff]  ;;  %v141_v45 = vld [vmem:[%s933_s1 + $0x3a8] sm:$0xff]  ;;  %v92_v47 = vld [vmem:[%s933_s1 + $0x220] sm:$0xff]  ;;  %s488_s5 = smov [#allocation6]   ;;  %s384_s29 = sshll.u32 %s938_s6, 4  ;;  %s385_s29 = int_to_ptr.hbm [resolvable:$true] %s384_s29 }
  0x35   :  { %266 = vmatpush.msrb.mxu0 %v94_v38  ;;  %285 = vmatpush.msrb.mxu1 %v111_v39  ;;  %v163_v46 = vld.sshfl [vmem:[#allocation1 + $0x10] sm:$0xff pattern:$0x73625140]  ;;  %v109_v48 = vld [vmem:[%s933_s1 + $0x2a8] sm:$0xff]  ;;  %v123_v49 = vld [vmem:[%s933_s1 + $0x318] sm:$0xff]  ;;  %s382_s26 = sshll.u32 %s488_s5, 4  ;;  %s383_s26 = int_to_ptr.vmem [resolvable:$true] %s382_s26 }
  0x36   :  { %307 = vmatpush.msrb.mxu2 %v125_v40  ;;  %326 = vmatpush.msrb.mxu3 %v142_v41  ;;  %v140_v50 = vld [vmem:[%s933_s1 + $0x3a0] sm:$0xff]  ;;  %v164_v52 = vld.sshfl [vmem:[#allocation1 + $0x18] sm:$0xff pattern:$0x73625140]  ;;  %v122_v55 = vld [vmem:[%s933_s1 + $0x310] sm:$0xff] }
  0x37   :  { %267 = vmatpush.msrb.mxu0 %v93_v42  ;;  %286 = vmatpush.msrb.mxu1 %v110_v43  ;;  %v161_v51 = vld.sshfl [vmem:[#allocation1] sm:$0xff pattern:$0x73625140]  ;;  %v91_v53 = vld [vmem:[%s933_s1 + $0x218] sm:$0xff]  ;;  %v90_v58 = vld [vmem:[%s933_s1 + $0x210] sm:$0xff] }
  0x38   :  { %308 = vmatpush.msrb.mxu2 %v124_v44  ;;  %327 = vmatpush.msrb.mxu3 %v141_v45  ;;  %v108_v54 = vld [vmem:[%s933_s1 + $0x2a0] sm:$0xff]  ;;  %v139_v56 = vld [vmem:[%s933_s1 + $0x398] sm:$0xff]  ;;  %v162_v57 = vld.sshfl [vmem:[#allocation1 + $0x8] sm:$0xff pattern:$0x73625140] }
  0x39   :  { %233 = vmatmul.f32.vlgmr.msra.gmra.mxu2 %v163_v46  ;;  %268 = vmatpush.msrb.mxu0 %v92_v47  ;;  %v107_v59 = vld [vmem:[%s933_s1 + $0x298] sm:$0xff]  ;;  %v121_v60 = vld [vmem:[%s933_s1 + $0x308] sm:$0xff]  ;;  %v138_v61 = vld [vmem:[%s933_s1 + $0x390] sm:$0xff] }
  0x3a   :  { %287 = vmatpush.msrb.mxu1 %v109_v48  ;;  %309 = vmatpush.msrb.mxu2 %v123_v49  ;;  %v89_v62 = vld [vmem:[%s933_s1 + $0x208] sm:$0xff]  ;;  %v106_v63 = vld [vmem:[%s933_s1 + $0x290] sm:$0xff]  ;;  %v120_v0 = vld [vmem:[%s933_s1 + $0x300] sm:$0xff] }
  0x3b   :  { %328 = vmatpush.msrb.mxu3 %v140_v50  ;;  %193 = vmatmul.f32.vlgmr.msra.gmra.mxu0 %v161_v51  ;;  %v137_v1 = vld [vmem:[%s933_s1 + $0x388] sm:$0xff]  ;;  %v167_v2 = vld.sshfl [vmem:[#allocation1 + $0x30] sm:$0xff pattern:$0x73625140]  ;;  %v88_v3 = vld [vmem:[%s933_s1 + $0x200] sm:$0xff] }
  0x3c   :  { %253 = vmatmul.f32.vlgmr.msra.gmra.mxu3 %v164_v52  ;;  %269 = vmatpush.msrb.mxu0 %v91_v53  ;;  %v105_v4 = vld [vmem:[%s933_s1 + $0x288] sm:$0xff]  ;;  %v136_v5 = vld [vmem:[%s933_s1 + $0x380] sm:$0xff]  ;;  %v168_v7 = vld.sshfl [vmem:[#allocation1 + $0x38] sm:$0xff pattern:$0x73625140] }
  0x3d   :  { %288 = vmatpush.msrb.mxu1 %v108_v54  ;;  %310 = vmatpush.msrb.mxu2 %v122_v55  ;;  %v165_v6 = vld.sshfl [vmem:[#allocation1 + $0x20] sm:$0xff pattern:$0x73625140]  ;;  %v166_v9 = vld.sshfl [vmem:[#allocation1 + $0x28] sm:$0xff pattern:$0x73625140] }
  0x3e   :  { %329 = vmatpush.msrb.mxu3 %v139_v56  ;;  %213 = vmatmul.f32.vlgmr.msra.gmra.mxu1 %v162_v57  ;;  %v104_v8 = vld [vmem:[%s933_s1 + $0x280] sm:$0xff]  ;;  %s485_s1 = smov [#allocation4]  }
  0x3f   :  { %270 = vmatpush.msrb.mxu0 %v90_v58  ;;  %289 = vmatpush.msrb.mxu1 %v107_v59  ;;  %v406_v10 = vld [vmem:[%s934_s2] ss:$0 sm:$0xff]  ;;  %s371_s2 = sshll.u32 %s485_s1, 4  ;;  %s372_s2 = int_to_ptr.vmem [resolvable:$true] %s371_s2 }
  0x40   :  { %311 = vmatpush.msrb.mxu2 %v121_v60  ;;  %330 = vmatpush.msrb.mxu3 %v138_v61  ;;  %v344_v30 = vld [vmem:[%s935_s3] sm:$0x3] }
  0x41   :  { %271 = vmatpush.msrb.mxu0 %v89_v62  ;;  %290 = vmatpush.msrb.mxu1 %v106_v63 }
  0x42   :  { %312 = vmatpush.msrb.mxu2 %v120_v0  ;;  %331 = vmatpush.msrb.mxu3 %v137_v1 }
  0x43   :  { %313 = vmatmul.f32.vlgmr.msrb.gmra.mxu2 %v167_v2  ;;  %272 = vmatpush.msrb.mxu0 %v88_v3 }
  0x44   :  { %291 = vmatpush.msrb.mxu1 %v105_v4  ;;  %332 = vmatpush.msrb.mxu3 %v136_v5 }
  0x45   :  { %273 = vmatmul.f32.vlgmr.msrb.gmra.mxu0 %v165_v6  ;;  %333 = vmatmul.f32.vlgmr.msrb.gmra.mxu3 %v168_v7 }
  0x46   :  { %292 = vmatpush.msrb.mxu1 %v104_v8 }
  0x47   :  { %293 = vmatmul.f32.vlgmr.msrb.gmra.mxu1 %v166_v9 }
  0xb8   :  { %v194_v11 = vpop.f32.mrf.mxu0 }
  0xb9   :  { %v195_v12 = vadd.f32 %v406_v10, %v194_v11 }
  0xbb   :  { %v214_v13 = vpop.f32.mrf.mxu1 }
  0xbc   :  { %v215_v14 = vadd.f32 %v214_v13, %v195_v12  ;;  %v234_v15 = vpop.f32.mrf.mxu2 }
  0xbe   :  { %v235_v16 = vadd.f32 %v234_v15, %v215_v14 }
  0xbf   :  { %v254_v17 = vpop.f32.mrf.mxu3 }
  0xc0   :  { %v255_v18 = vadd.f32 %v254_v17, %v235_v16 }
  0xc2   :  { %v274_v19 = vpop.f32.mrf.mxu0 }
  0xc3   :  { %v275_v20 = vadd.f32 %v274_v19, %v255_v18 }
  0xc4   :  { %v294_v21 = vpop.f32.mrf.mxu1 }
  0xc5   :  { %v295_v22 = vadd.f32 %v294_v21, %v275_v20 }
  0xc6   :  { %v314_v23 = vpop.f32.mrf.mxu2 }
  0xc7   :  { %v315_v24 = vadd.f32 %v314_v23, %v295_v22 }
  0xc8   :  { %v334_v25 = vpop.f32.mrf.mxu3 }
  0xc9   :  { %v335_v26 = vadd.f32 %v334_v25, %v315_v24 }
  0xcb   :  { %v345_v27 = vmul.f32 0.5, %v335_v26  ;;  %338 = vst.msk [vmem:[#allocation4] sm:$0x3] %vm337_vm0, %v335_v26 }
  0xcc   :  { %376 = dma.vmem_to_hbm [thread:$0]  %s372_s2, 32, %s374_s17, [#allocation5]  }
  0xcd   :  { %v346_v28 = vmul.f32 1.442695, %v345_v27 }
  0xcf   :  { %407 = vpow2.f32 %v346_v28 }
  0xd5   :  { %v408_v29 = vpop.eup %407 }
  0xd6   :  { %349 = vrot.lane.b32.xlu0 %v408_v29, %s486_s18 }
  0xde   :  { %340 = vrot.lane.b32.xlu0 %v335_v26, %s486_s18 }
 0x148   :  { %v350_v31 = vpop.permute.xlu0 %349 }
 0x149   :  { %v352_v32 = vmul.f32 %v350_v31, %v344_v30 }
 0x14b   :  { %v353_v33 = vadd.f32 %v352_v32, %v335_v26 }
 0x14d   :  { %354 = vst.msk [vmem:[#allocation2] sm:$0x3] %vm337_vm0, %v353_v33 }
 0x14e   :  { %365 = dma.vmem_to_hbm [thread:$0]  %s361_s22, 32, %s363_s25, [#allocation3]  }
 0x150   :  { %v341_v34 = vpop.permute.xlu0 %340 }
 0x151   :  { %343 = vst.msk [vmem:[#allocation6] sm:$0x3] %vm337_vm0, %v341_v34 }
 0x152   :  { %387 = dma.vmem_to_hbm [thread:$0]  %s383_s26, 32, %s385_s29, [#allocation5]  }
 0x153   :  { %481 = dma.done.wait [#allocation3], 32  }
 0x154   :  { %482 = vsyncadd [#allocation3], 4294967264 }
 0x155   :  { %483 = dma.done.wait [#allocation5], 64  }
 0x156   :  { %484 = vsyncadd [#allocation5], 4294967232 }
 0x157   :  { %400 = vsyncpa [#allocation3], 1 }
 0x158   :  { %401 = vsyncpa [#allocation5], 1 }

</bundles_post_ra>
